<compile_context>
chip_gen: v6e
topology: v6e:2x2x1
jax: 0.10.0
libtpu: 0.0.40
codegen_flags: <defaults>
</compile_context>

<pallas_src>
import functools

import jax
import jax.numpy as jnp
from jax.experimental import pallas as pl
from jax.experimental.pallas import tpu as pltpu


# --------------------------------------------------------------------------- #
#                                   kernel                                    #
# --------------------------------------------------------------------------- #
def _gru_region_kernel(x_ref, wih0_ref, wihd_ref, whh_ref, bih_ref, bhh_ref,
                       w1_ref, b1_ref, w2_ref, b2_ref, o_ref, *,
                       layers, hidden, seq_len, neg_slope):
    """Stacked bi-GRU + MLP head for one row tile (rows on the lane axis)."""
    H = hidden
    T = seq_len
    rt = x_ref.shape[-1]                      # rows in this tile (lane axis)
    H2, H4, G = 2 * H, 4 * H, 6 * H
    f32 = jnp.float32

    def fused_scan(pair_fn, w_ih, l):
        # Combined biases, lane-broadcast once per layer (hoisted out of the loop).
        bih = jnp.broadcast_to(bih_ref[l], (G, rt))
        bhh = jnp.broadcast_to(bhh_ref[l], (G, rt))
        whh = whh_ref[l]                                  # (6H, 2H) block-diagonal
        h = jnp.zeros((H2, rt), f32)                      # [h_fwd(s); h_rev(T-1-s)]
        hs = [None] * T
        for s in range(T):
            # Input projection: independent of h, so the scheduler overlaps it
            # with the previous step's gate math.
            gx = jnp.dot(w_ih, pair_fn(s), preferred_element_type=f32) + bih
            gh = jnp.dot(whh, h, preferred_element_type=f32) + bhh
            # Gate-interleaved rows: [r_f, r_r, z_f, z_r, n_f, n_r]
            r = jax.nn.sigmoid(gx[:H2] + gh[:H2])
            z = jax.nn.sigmoid(gx[H2:H4] + gh[H2:H4])
            n = jnp.tanh(gx[H4:] + r * gh[H4:])
            h = (1.0 - z) * n + z * h
            hs[s] = h
        return hs

    # -------- layer 0: pair(s) = [x(s); x(T-1-s)]  -> (2H, rt) --------------
    hs = fused_scan(
        lambda s: jnp.concatenate([x_ref[s], x_ref[T - 1 - s]], axis=0),
        wih0_ref[...], 0)

    # -------- layers 1..L-1: pair(s) = [h_prev(s); h_prev(T-1-s)] -> (4H, rt)
    # h_prev(s) already holds [fwd(s); rev(T-1-s)]; the column-permuted combined
    # input weight (built in the wrapper) picks the right halves per direction.
    for l in range(1, layers):
        prev = hs
        hs = fused_scan(
            lambda s, prev=prev: jnp.concatenate(
                [prev[s], prev[T - 1 - s]], axis=0),
            wihd_ref[l - 1], l)

    # GRU output at the last timestep: [fwd(T-1); rev(T-1)].
    # fwd(T-1) = hs[T-1][:H]; rev(T-1) is the FIRST reverse step -> hs[0][H:].
    last = jnp.concatenate([hs[T - 1][:H], hs[0][H:]], axis=0)        # (2H, rt)

    # -------- MLP head: Linear(2H->H) + LeakyReLU(0.2) + Linear(H->out) -----
    h1 = jnp.dot(w1_ref[...], last, preferred_element_type=f32) + b1_ref[...]
    h1 = jnp.where(h1 >= 0.0, h1, neg_slope * h1)
    out = jnp.dot(w2_ref[...], h1, preferred_element_type=f32) + b2_ref[...]
    o_ref[...] = out.astype(o_ref.dtype)


# --------------------------------------------------------------------------- #
#                        weight packing (host / wrapper)                       #
# --------------------------------------------------------------------------- #
def _prepare_params(gru_params, lin_params, layers, H):
    """Pack torch-layout GRU/Linear params into combined, gate-interleaved
    weights for the fused bidirectional scan (transposed y = W @ x layout)."""
    G3, G6 = 3 * H, 6 * H

    def gate(mat, g):                       # rows of gate g (0=r, 1=z, 2=n)
        return mat[g * H:(g + 1) * H]

    def combine_bias(b_f, b_r):
        parts = []
        for g in range(3):
            parts += [gate(b_f.reshape(G3, 1), g), gate(b_r.reshape(G3, 1), g)]
        return jnp.concatenate(parts, axis=0)            # (6H, 1)

    def combine_square(w_f, w_r):
        # (3H, H) x 2 -> (6H, 2H); fwd rows use cols 0:H, rev rows use cols H:2H.
        out = jnp.zeros((G6, 2 * H), jnp.float32)
        for g in range(3):
            out = out.at[2 * g * H:(2 * g + 1) * H, 0:H].set(gate(w_f, g))
            out = out.at[(2 * g + 1) * H:(2 * g + 2) * H, H:2 * H].set(gate(w_r, g))
        return out

    def combine_ih_deep(w_f, w_r):
        # (3H, 2H) x 2 -> (6H, 4H), column-permuted for the pair layout
        # [fwd_prev(s); rev_prev(T-1-s); fwd_prev(T-1-s); rev_prev(s)].
        out = jnp.zeros((G6, 4 * H), jnp.float32)
        for g in range(3):
            rf = slice(2 * g * H, (2 * g + 1) * H)
            rr = slice((2 * g + 1) * H, (2 * g + 2) * H)
            wf, wr = gate(w_f, g), gate(w_r, g)
            out = out.at[rf, 0:H].set(wf[:, 0:H])                 # fwd_prev(s)
            out = out.at[rf, 3 * H:4 * H].set(wf[:, H:2 * H])     # rev_prev(s)
            out = out.at[rr, 2 * H:3 * H].set(wr[:, 0:H])         # fwd_prev(T-1-s)
            out = out.at[rr, H:2 * H].set(wr[:, H:2 * H])         # rev_prev(T-1-s)
        return out

    wih0 = None
    wih_deep, whh, bih, bhh = [], [], [], []
    for l in range(layers):
        wf_ih, wf_hh, bf_ih, bf_hh = [jnp.asarray(p, jnp.float32)
                                      for p in gru_params[(l, 0)]]
        wr_ih, wr_hh, br_ih, br_hh = [jnp.asarray(p, jnp.float32)
                                      for p in gru_params[(l, 1)]]
        if l == 0:
            wih0 = combine_square(wf_ih, wr_ih)                   # (6H, 2H)
        else:
            wih_deep.append(combine_ih_deep(wf_ih, wr_ih))        # (6H, 4H)
        whh.append(combine_square(wf_hh, wr_hh))                  # (6H, 2H)
        bih.append(combine_bias(bf_ih, br_ih))
        bhh.append(combine_bias(bf_hh, br_hh))

    wih_deep = (jnp.stack(wih_deep) if wih_deep
                else jnp.zeros((1, G6, 4 * H), jnp.float32))      # unused if layers==1

    w1, b1, w2, b2 = [jnp.asarray(p, jnp.float32) for p in lin_params]
    return (wih0, wih_deep, jnp.stack(whh), jnp.stack(bih), jnp.stack(bhh),
            w1, b1.reshape(-1, 1), w2, b2.reshape(-1, 1))


def _choose_row_tiling(rows):
    """Lane-dense row tiles (multiple of 128), padded row count, >= 2 grid steps
    so v7x's two TensorCores both get work; larger tiles for big R (v5e/v6e)."""
    if rows >= 1024:
        tile = 512
    elif rows >= 256:
        tile = 256
    else:
        tile = 128
    padded = max(2 * tile, -(-rows // tile) * tile)
    return tile, padded


# --------------------------------------------------------------------------- #
#                                   wrapper                                   #
# --------------------------------------------------------------------------- #
def gru_k_region_forward(bold, gru_params, lin_params, *,
                         kernel_size=8, layers=4, out_size=8, row_tile=None):
    """bold: (b, n, T*kernel_size) float32 -> (b, n, out_size) float32."""
    b, n, total = bold.shape
    H = kernel_size
    assert total % H == 0, "last dim must be divisible by kernel_size"
    T = total // H
    R = b * n

    # Transposed, lane-dense layout: (T, H, R) with rows on the lane axis.
    x = jnp.asarray(bold, jnp.float32).reshape(R, T, H).transpose(1, 2, 0)

    if row_tile is None:
        row_tile, R_pad = _choose_row_tiling(R)
    else:
        row_tile = max(128, -(-row_tile // 128) * 128)
        R_pad = max(row_tile, -(-R // row_tile) * row_tile)
    if R_pad > R:
        x = jnp.pad(x, ((0, 0), (0, 0), (0, R_pad - R)))
    grid = (R_pad // row_tile,)

    (wih0, wihd, whh, bih, bhh, w1, b1, w2, b2) = _prepare_params(
        gru_params, lin_params, layers, H)

    kernel = functools.partial(_gru_region_kernel, layers=layers, hidden=H,
                               seq_len=T, neg_slope=0.2)
    c2 = lambda i: (0, 0)
    c3 = lambda i: (0, 0, 0)

    out = pl.pallas_call(
        kernel,
        out_shape=jax.ShapeDtypeStruct((out_size, R_pad), jnp.float32),
        grid_spec=pltpu.PrefetchScalarGridSpec(
            num_scalar_prefetch=0,
            grid=grid,
            in_specs=[
                pl.BlockSpec((T, H, row_tile), lambda i: (0, 0, i)),      # x rows tile
                pl.BlockSpec((6 * H, 2 * H), c2),                         # W_ih layer 0
                pl.BlockSpec((wihd.shape[0], 6 * H, 4 * H), c3),          # W_ih layers>=1
                pl.BlockSpec((layers, 6 * H, 2 * H), c3),                 # W_hh (blockdiag)
                pl.BlockSpec((layers, 6 * H, 1), c3),                     # b_ih
                pl.BlockSpec((layers, 6 * H, 1), c3),                     # b_hh
                pl.BlockSpec((H, 2 * H), c2),                             # W1
                pl.BlockSpec((H, 1), c2),                                 # b1
                pl.BlockSpec((out_size, H), c2),                          # W2
                pl.BlockSpec((out_size, 1), c2),                          # b2
            ],
            out_specs=pl.BlockSpec((out_size, row_tile), lambda i: (0, i)),
        ),
        compiler_params=pltpu.CompilerParams(
            dimension_semantics=("parallel",)),
    )(x, wih0, wihd, whh, bih, bhh, w1, b1, w2, b2)

    return out[:, :R].T.reshape(b, n, out_size)


# --------------------------------------------------------------------------- #
#                             pure-JAX reference                              #
# --------------------------------------------------------------------------- #
def reference_forward(bold, gru_params, lin_params, *,
                      kernel_size=8, layers=4, out_size=8):
    """Pure-JAX reference mirroring the PyTorch forward (eval mode)."""
    b, n, total = bold.shape
    H = kernel_size
    T = total // H
    x = jnp.asarray(bold, jnp.float32).reshape(b * n, T, H)

    def run_dir(inp, w_ih, w_hh, b_ih, b_hh, reverse):
        R = inp.shape[0]
        h = jnp.zeros((R, H), jnp.float32)
        outs = [None] * T
        order = range(T - 1, -1, -1) if reverse else range(T)
        for t in order:
            gi = inp[:, t, :] @ w_ih.T + b_ih
            gh = h @ w_hh.T + b_hh
            r = jax.nn.sigmoid(gi[:, :H] + gh[:, :H])
            z = jax.nn.sigmoid(gi[:, H:2 * H] + gh[:, H:2 * H])
            nn_ = jnp.tanh(gi[:, 2 * H:] + r * gh[:, 2 * H:])
            h = (1.0 - z) * nn_ + z * h
            outs[t] = h
        return jnp.stack(outs, axis=1)

    seq = x
    for l in range(layers):
        out_f = run_dir(seq, *gru_params[(l, 0)], reverse=False)
        out_r = run_dir(seq, *gru_params[(l, 1)], reverse=True)
        seq = jnp.concatenate([out_f, out_r], axis=-1)
    last = seq[:, -1, :]                                  # (R, 2H)

    w1, b1, w2, b2 = lin_params
    h1 = last @ jnp.asarray(w1).T + jnp.asarray(b1)
    h1 = jnp.where(h1 >= 0.0, h1, 0.2 * h1)
    out = h1 @ jnp.asarray(w2).T + jnp.asarray(b2)
    return out.reshape(b, n, out_size)


if __name__ == "__main__":
    # Small shapes consistent with the module: batch=2, regions=8,
    # kernel_size(hidden)=8, layers=4, out_size=8, seq_len=8.
    B, N, K, L, OUT, SEQ = 2, 8, 8, 4, 8, 8

    key = jax.random.PRNGKey(0)
    keys = jax.random.split(key, 64)
    ki = iter(keys)

    bold = jax.random.normal(next(ki), (B, N, SEQ * K), dtype=jnp.float32)

    scale = 1.0 / float(K) ** 0.5
    gru_params = {}
    for l in range(L):
        in_l = K if l == 0 else 2 * K
        for d in range(2):
            w_ih = jax.random.normal(next(ki), (3 * K, in_l), jnp.float32) * scale
            w_hh = jax.random.normal(next(ki), (3 * K, K), jnp.float32) * scale
            b_ih = jax.random.normal(next(ki), (3 * K,), jnp.float32) * scale
            b_hh = jax.random.normal(next(ki), (3 * K,), jnp.float32) * scale
            gru_params[(l, d)] = (w_ih, w_hh, b_ih, b_hh)

    w1 = jax.random.normal(next(ki), (K, 2 * K), jnp.float32) * scale
    b1 = jax.random.normal(next(ki), (K,), jnp.float32) * scale
    w2 = jax.random.normal(next(ki), (OUT, K), jnp.float32) * scale
    b2 = jax.random.normal(next(ki), (OUT,), jnp.float32) * scale
    lin_params = (w1, b1, w2, b2)

    out = gru_k_region_forward(bold, gru_params, lin_params,
                               kernel_size=K, layers=L, out_size=OUT)
    out = jax.block_until_ready(out)

    ref = reference_forward(bold, gru_params, lin_params,
                            kernel_size=K, layers=L, out_size=OUT)
    assert out.shape == (B, N, OUT), out.shape
    assert jnp.allclose(out, ref, atol=1e-4, rtol=1e-4), (
        "mismatch vs reference, max abs err "
        f"{float(jnp.max(jnp.abs(out - ref)))}")

    print("KERNEL_OK")
</pallas_src>

<mosaic_0001>
module attributes {stable_mosaic.version = 11 : i64} {
  func.func @_gru_region_kernel(%arg0: i32, %arg1: memref<8x8x128xf32, #tpu.memory_space<vmem>>, %arg2: memref<48x16xf32, #tpu.memory_space<vmem>>, %arg3: memref<3x48x32xf32, #tpu.memory_space<vmem>>, %arg4: memref<4x48x16xf32, #tpu.memory_space<vmem>>, %arg5: memref<4x48x1xf32, #tpu.memory_space<vmem>>, %arg6: memref<4x48x1xf32, #tpu.memory_space<vmem>>, %arg7: memref<8x16xf32, #tpu.memory_space<vmem>>, %arg8: memref<8x1xf32, #tpu.memory_space<vmem>>, %arg9: memref<8x8xf32, #tpu.memory_space<vmem>>, %arg10: memref<8x1xf32, #tpu.memory_space<vmem>>, %arg11: memref<8x128xf32, #tpu.memory_space<vmem>>) attributes {dimension_semantics = [#tpu.dimension_semantics<parallel>], iteration_bounds = array<i64: 2>, scalar_prefetch = 0 : i64, scratch_operands = 0 : i64, tpu.core_type = #tpu.core_type<tc>, window_params = [{transform_indices = @transform_0, window_bounds = array<i64: 8, 8, 128>}, {pipeline_mode = #tpu.pipeline_mode<synchronous>, transform_indices = @transform_1, window_bounds = array<i64: 48, 16>}, {pipeline_mode = #tpu.pipeline_mode<synchronous>, transform_indices = @transform_2, window_bounds = array<i64: 3, 48, 32>}, {pipeline_mode = #tpu.pipeline_mode<synchronous>, transform_indices = @transform_3, window_bounds = array<i64: 4, 48, 16>}, {pipeline_mode = #tpu.pipeline_mode<synchronous>, transform_indices = @transform_4, window_bounds = array<i64: 4, 48, 1>}, {pipeline_mode = #tpu.pipeline_mode<synchronous>, transform_indices = @transform_5, window_bounds = array<i64: 4, 48, 1>}, {pipeline_mode = #tpu.pipeline_mode<synchronous>, transform_indices = @transform_6, window_bounds = array<i64: 8, 16>}, {pipeline_mode = #tpu.pipeline_mode<synchronous>, transform_indices = @transform_7, window_bounds = array<i64: 8, 1>}, {pipeline_mode = #tpu.pipeline_mode<synchronous>, transform_indices = @transform_8, window_bounds = array<i64: 8, 8>}, {pipeline_mode = #tpu.pipeline_mode<synchronous>, transform_indices = @transform_9, window_bounds = array<i64: 8, 1>}, {transform_indices = @transform_10, window_bounds = array<i64: 8, 128>}]} {
    %c0 = arith.constant 0 : index
    %c0_0 = arith.constant 0 : index
    %0 = vector.load %arg2[%c0, %c0_0] : memref<48x16xf32, #tpu.memory_space<vmem>>, vector<48x16xf32>
    %c0_1 = arith.constant 0 : index
    %c0_2 = arith.constant 0 : index
    %c0_3 = arith.constant 0 : index
    %1 = vector.load %arg5[%c0_1, %c0_2, %c0_3] : memref<4x48x1xf32, #tpu.memory_space<vmem>>, vector<1x48x1xf32>
    %2 = vector.shape_cast %1 : vector<1x48x1xf32> to vector<48x1xf32>
    %3 = vector.shape_cast %2 : vector<48x1xf32> to vector<48x1xf32>
    %4 = vector.broadcast %3 : vector<48x1xf32> to vector<48x128xf32>
    %c0_4 = arith.constant 0 : index
    %c0_5 = arith.constant 0 : index
    %c0_6 = arith.constant 0 : index
    %5 = vector.load %arg6[%c0_4, %c0_5, %c0_6] : memref<4x48x1xf32, #tpu.memory_space<vmem>>, vector<1x48x1xf32>
    %6 = vector.shape_cast %5 : vector<1x48x1xf32> to vector<48x1xf32>
    %7 = vector.shape_cast %6 : vector<48x1xf32> to vector<48x1xf32>
    %8 = vector.broadcast %7 : vector<48x1xf32> to vector<48x128xf32>
    %c0_7 = arith.constant 0 : index
    %c0_8 = arith.constant 0 : index
    %c0_9 = arith.constant 0 : index
    %9 = vector.load %arg4[%c0_7, %c0_8, %c0_9] : memref<4x48x16xf32, #tpu.memory_space<vmem>>, vector<1x48x16xf32>
    %10 = vector.shape_cast %9 : vector<1x48x16xf32> to vector<48x16xf32>
    %cst = arith.constant 0.000000e+00 : f32
    %11 = vector.broadcast %cst : f32 to vector<16x128xf32>
    %c0_10 = arith.constant 0 : index
    %c0_11 = arith.constant 0 : index
    %c0_12 = arith.constant 0 : index
    %12 = vector.load %arg1[%c0_10, %c0_11, %c0_12] : memref<8x8x128xf32, #tpu.memory_space<vmem>>, vector<1x8x128xf32>
    %13 = vector.shape_cast %12 : vector<1x8x128xf32> to vector<8x128xf32>
    %c7 = arith.constant 7 : index
    %c0_13 = arith.constant 0 : index
    %c0_14 = arith.constant 0 : index
    %14 = vector.load %arg1[%c7, %c0_13, %c0_14] : memref<8x8x128xf32, #tpu.memory_space<vmem>>, vector<1x8x128xf32>
    %15 = vector.shape_cast %14 : vector<1x8x128xf32> to vector<8x128xf32>
    %16 = tpu.concatenate %13, %15 in 0 : vector<8x128xf32>, vector<8x128xf32> -> vector<16x128xf32>
    %cst_15 = arith.constant dense<0.000000e+00> : vector<48x128xf32>
    %17 = tpu.matmul %0, %16, %cst_15 {dimension_numbers = #tpu.dot_dimension_numbers<[1], [0], [0], [1], [0, 0, 1, 1], [], []>} : vector<48x16xf32>, vector<16x128xf32>, vector<48x128xf32> -> vector<48x128xf32>
    %18 = arith.addf %17, %4 : vector<48x128xf32>
    %cst_16 = arith.constant dense<0.000000e+00> : vector<48x128xf32>
    %19 = tpu.matmul %10, %11, %cst_16 {dimension_numbers = #tpu.dot_dimension_numbers<[1], [0], [0], [1], [0, 0, 1, 1], [], []>} : vector<48x16xf32>, vector<16x128xf32>, vector<48x128xf32> -> vector<48x128xf32>
    %20 = arith.addf %19, %8 : vector<48x128xf32>
    %21 = vector.extract_strided_slice %18 {offsets = [0, 0], sizes = [16, 128], strides = [1, 1]} : vector<48x128xf32> to vector<16x128xf32>
    %22 = vector.extract_strided_slice %20 {offsets = [0, 0], sizes = [16, 128], strides = [1, 1]} : vector<48x128xf32> to vector<16x128xf32>
    %23 = arith.addf %21, %22 : vector<16x128xf32>
    %24 = arith.negf %23 : vector<16x128xf32>
    %25 = math.exp %24 : vector<16x128xf32>
    %cst_17 = arith.constant 1.000000e+00 : f32
    %26 = vector.broadcast %cst_17 : f32 to vector<16x128xf32>
    %27 = arith.addf %26, %25 : vector<16x128xf32>
    %28 = arith.divf %26, %27 : vector<16x128xf32>
    %29 = vector.extract_strided_slice %18 {offsets = [16, 0], sizes = [16, 128], strides = [1, 1]} : vector<48x128xf32> to vector<16x128xf32>
    %30 = vector.extract_strided_slice %20 {offsets = [16, 0], sizes = [16, 128], strides = [1, 1]} : vector<48x128xf32> to vector<16x128xf32>
    %31 = arith.addf %29, %30 : vector<16x128xf32>
    %32 = arith.negf %31 : vector<16x128xf32>
    %33 = math.exp %32 : vector<16x128xf32>
    %cst_18 = arith.constant 1.000000e+00 : f32
    %34 = vector.broadcast %cst_18 : f32 to vector<16x128xf32>
    %35 = arith.addf %34, %33 : vector<16x128xf32>
    %36 = arith.divf %34, %35 : vector<16x128xf32>
    %37 = vector.extract_strided_slice %18 {offsets = [32, 0], sizes = [16, 128], strides = [1, 1]} : vector<48x128xf32> to vector<16x128xf32>
    %38 = vector.extract_strided_slice %20 {offsets = [32, 0], sizes = [16, 128], strides = [1, 1]} : vector<48x128xf32> to vector<16x128xf32>
    %39 = arith.mulf %28, %38 : vector<16x128xf32>
    %40 = arith.addf %37, %39 : vector<16x128xf32>
    %41 = math.tanh %40 : vector<16x128xf32>
    %cst_19 = arith.constant 1.000000e+00 : f32
    %42 = vector.broadcast %cst_19 : f32 to vector<16x128xf32>
    %43 = arith.subf %42, %36 : vector<16x128xf32>
    %44 = arith.mulf %43, %41 : vector<16x128xf32>
    %45 = arith.mulf %36, %11 : vector<16x128xf32>
    %46 = arith.addf %44, %45 : vector<16x128xf32>
    %c1 = arith.constant 1 : index
    %c0_20 = arith.constant 0 : index
    %c0_21 = arith.constant 0 : index
    %47 = vector.load %arg1[%c1, %c0_20, %c0_21] : memref<8x8x128xf32, #tpu.memory_space<vmem>>, vector<1x8x128xf32>
    %48 = vector.shape_cast %47 : vector<1x8x128xf32> to vector<8x128xf32>
    %c6 = arith.constant 6 : index
    %c0_22 = arith.constant 0 : index
    %c0_23 = arith.constant 0 : index
    %49 = vector.load %arg1[%c6, %c0_22, %c0_23] : memref<8x8x128xf32, #tpu.memory_space<vmem>>, vector<1x8x128xf32>
    %50 = vector.shape_cast %49 : vector<1x8x128xf32> to vector<8x128xf32>
    %51 = tpu.concatenate %48, %50 in 0 : vector<8x128xf32>, vector<8x128xf32> -> vector<16x128xf32>
    %cst_24 = arith.constant dense<0.000000e+00> : vector<48x128xf32>
    %52 = tpu.matmul %0, %51, %cst_24 {dimension_numbers = #tpu.dot_dimension_numbers<[1], [0], [0], [1], [0, 0, 1, 1], [], []>} : vector<48x16xf32>, vector<16x128xf32>, vector<48x128xf32> -> vector<48x128xf32>
    %53 = arith.addf %52, %4 : vector<48x128xf32>
    %cst_25 = arith.constant dense<0.000000e+00> : vector<48x128xf32>
    %54 = tpu.matmul %10, %46, %cst_25 {dimension_numbers = #tpu.dot_dimension_numbers<[1], [0], [0], [1], [0, 0, 1, 1], [], []>} : vector<48x16xf32>, vector<16x128xf32>, vector<48x128xf32> -> vector<48x128xf32>
    %55 = arith.addf %54, %8 : vector<48x128xf32>
    %56 = vector.extract_strided_slice %53 {offsets = [0, 0], sizes = [16, 128], strides = [1, 1]} : vector<48x128xf32> to vector<16x128xf32>
    %57 = vector.extract_strided_slice %55 {offsets = [0, 0], sizes = [16, 128], strides = [1, 1]} : vector<48x128xf32> to vector<16x128xf32>
    %58 = arith.addf %56, %57 : vector<16x128xf32>
    %59 = arith.negf %58 : vector<16x128xf32>
    %60 = math.exp %59 : vector<16x128xf32>
    %cst_26 = arith.constant 1.000000e+00 : f32
    %61 = vector.broadcast %cst_26 : f32 to vector<16x128xf32>
    %62 = arith.addf %61, %60 : vector<16x128xf32>
    %63 = arith.divf %61, %62 : vector<16x128xf32>
    %64 = vector.extract_strided_slice %53 {offsets = [16, 0], sizes = [16, 128], strides = [1, 1]} : vector<48x128xf32> to vector<16x128xf32>
    %65 = vector.extract_strided_slice %55 {offsets = [16, 0], sizes = [16, 128], strides = [1, 1]} : vector<48x128xf32> to vector<16x128xf32>
    %66 = arith.addf %64, %65 : vector<16x128xf32>
    %67 = arith.negf %66 : vector<16x128xf32>
    %68 = math.exp %67 : vector<16x128xf32>
    %cst_27 = arith.constant 1.000000e+00 : f32
    %69 = vector.broadcast %cst_27 : f32 to vector<16x128xf32>
    %70 = arith.addf %69, %68 : vector<16x128xf32>
    %71 = arith.divf %69, %70 : vector<16x128xf32>
    %72 = vector.extract_strided_slice %53 {offsets = [32, 0], sizes = [16, 128], strides = [1, 1]} : vector<48x128xf32> to vector<16x128xf32>
    %73 = vector.extract_strided_slice %55 {offsets = [32, 0], sizes = [16, 128], strides = [1, 1]} : vector<48x128xf32> to vector<16x128xf32>
    %74 = arith.mulf %63, %73 : vector<16x128xf32>
    %75 = arith.addf %72, %74 : vector<16x128xf32>
    %76 = math.tanh %75 : vector<16x128xf32>
    %cst_28 = arith.constant 1.000000e+00 : f32
    %77 = vector.broadcast %cst_28 : f32 to vector<16x128xf32>
    %78 = arith.subf %77, %71 : vector<16x128xf32>
    %79 = arith.mulf %78, %76 : vector<16x128xf32>
    %80 = arith.mulf %71, %46 : vector<16x128xf32>
    %81 = arith.addf %79, %80 : vector<16x128xf32>
    %c2 = arith.constant 2 : index
    %c0_29 = arith.constant 0 : index
    %c0_30 = arith.constant 0 : index
    %82 = vector.load %arg1[%c2, %c0_29, %c0_30] : memref<8x8x128xf32, #tpu.memory_space<vmem>>, vector<1x8x128xf32>
    %83 = vector.shape_cast %82 : vector<1x8x128xf32> to vector<8x128xf32>
    %c5 = arith.constant 5 : index
    %c0_31 = arith.constant 0 : index
    %c0_32 = arith.constant 0 : index
    %84 = vector.load %arg1[%c5, %c0_31, %c0_32] : memref<8x8x128xf32, #tpu.memory_space<vmem>>, vector<1x8x128xf32>
    %85 = vector.shape_cast %84 : vector<1x8x128xf32> to vector<8x128xf32>
    %86 = tpu.concatenate %83, %85 in 0 : vector<8x128xf32>, vector<8x128xf32> -> vector<16x128xf32>
    %cst_33 = arith.constant dense<0.000000e+00> : vector<48x128xf32>
    %87 = tpu.matmul %0, %86, %cst_33 {dimension_numbers = #tpu.dot_dimension_numbers<[1], [0], [0], [1], [0, 0, 1, 1], [], []>} : vector<48x16xf32>, vector<16x128xf32>, vector<48x128xf32> -> vector<48x128xf32>
    %88 = arith.addf %87, %4 : vector<48x128xf32>
    %cst_34 = arith.constant dense<0.000000e+00> : vector<48x128xf32>
    %89 = tpu.matmul %10, %81, %cst_34 {dimension_numbers = #tpu.dot_dimension_numbers<[1], [0], [0], [1], [0, 0, 1, 1], [], []>} : vector<48x16xf32>, vector<16x128xf32>, vector<48x128xf32> -> vector<48x128xf32>
    %90 = arith.addf %89, %8 : vector<48x128xf32>
    %91 = vector.extract_strided_slice %88 {offsets = [0, 0], sizes = [16, 128], strides = [1, 1]} : vector<48x128xf32> to vector<16x128xf32>
    %92 = vector.extract_strided_slice %90 {offsets = [0, 0], sizes = [16, 128], strides = [1, 1]} : vector<48x128xf32> to vector<16x128xf32>
    %93 = arith.addf %91, %92 : vector<16x128xf32>
    %94 = arith.negf %93 : vector<16x128xf32>
    %95 = math.exp %94 : vector<16x128xf32>
    %cst_35 = arith.constant 1.000000e+00 : f32
    %96 = vector.broadcast %cst_35 : f32 to vector<16x128xf32>
    %97 = arith.addf %96, %95 : vector<16x128xf32>
    %98 = arith.divf %96, %97 : vector<16x128xf32>
    %99 = vector.extract_strided_slice %88 {offsets = [16, 0], sizes = [16, 128], strides = [1, 1]} : vector<48x128xf32> to vector<16x128xf32>
    %100 = vector.extract_strided_slice %90 {offsets = [16, 0], sizes = [16, 128], strides = [1, 1]} : vector<48x128xf32> to vector<16x128xf32>
    %101 = arith.addf %99, %100 : vector<16x128xf32>
    %102 = arith.negf %101 : vector<16x128xf32>
    %103 = math.exp %102 : vector<16x128xf32>
    %cst_36 = arith.constant 1.000000e+00 : f32
    %104 = vector.broadcast %cst_36 : f32 to vector<16x128xf32>
    %105 = arith.addf %104, %103 : vector<16x128xf32>
    %106 = arith.divf %104, %105 : vector<16x128xf32>
    %107 = vector.extract_strided_slice %88 {offsets = [32, 0], sizes = [16, 128], strides = [1, 1]} : vector<48x128xf32> to vector<16x128xf32>
    %108 = vector.extract_strided_slice %90 {offsets = [32, 0], sizes = [16, 128], strides = [1, 1]} : vector<48x128xf32> to vector<16x128xf32>
    %109 = arith.mulf %98, %108 : vector<16x128xf32>
    %110 = arith.addf %107, %109 : vector<16x128xf32>
    %111 = math.tanh %110 : vector<16x128xf32>
    %cst_37 = arith.constant 1.000000e+00 : f32
    %112 = vector.broadcast %cst_37 : f32 to vector<16x128xf32>
    %113 = arith.subf %112, %106 : vector<16x128xf32>
    %114 = arith.mulf %113, %111 : vector<16x128xf32>
    %115 = arith.mulf %106, %81 : vector<16x128xf32>
    %116 = arith.addf %114, %115 : vector<16x128xf32>
    %c3 = arith.constant 3 : index
    %c0_38 = arith.constant 0 : index
    %c0_39 = arith.constant 0 : index
    %117 = vector.load %arg1[%c3, %c0_38, %c0_39] : memref<8x8x128xf32, #tpu.memory_space<vmem>>, vector<1x8x128xf32>
    %118 = vector.shape_cast %117 : vector<1x8x128xf32> to vector<8x128xf32>
    %c4 = arith.constant 4 : index
    %c0_40 = arith.constant 0 : index
    %c0_41 = arith.constant 0 : index
    %119 = vector.load %arg1[%c4, %c0_40, %c0_41] : memref<8x8x128xf32, #tpu.memory_space<vmem>>, vector<1x8x128xf32>
    %120 = vector.shape_cast %119 : vector<1x8x128xf32> to vector<8x128xf32>
    %121 = tpu.concatenate %118, %120 in 0 : vector<8x128xf32>, vector<8x128xf32> -> vector<16x128xf32>
    %cst_42 = arith.constant dense<0.000000e+00> : vector<48x128xf32>
    %122 = tpu.matmul %0, %121, %cst_42 {dimension_numbers = #tpu.dot_dimension_numbers<[1], [0], [0], [1], [0, 0, 1, 1], [], []>} : vector<48x16xf32>, vector<16x128xf32>, vector<48x128xf32> -> vector<48x128xf32>
    %123 = arith.addf %122, %4 : vector<48x128xf32>
    %cst_43 = arith.constant dense<0.000000e+00> : vector<48x128xf32>
    %124 = tpu.matmul %10, %116, %cst_43 {dimension_numbers = #tpu.dot_dimension_numbers<[1], [0], [0], [1], [0, 0, 1, 1], [], []>} : vector<48x16xf32>, vector<16x128xf32>, vector<48x128xf32> -> vector<48x128xf32>
    %125 = arith.addf %124, %8 : vector<48x128xf32>
    %126 = vector.extract_strided_slice %123 {offsets = [0, 0], sizes = [16, 128], strides = [1, 1]} : vector<48x128xf32> to vector<16x128xf32>
    %127 = vector.extract_strided_slice %125 {offsets = [0, 0], sizes = [16, 128], strides = [1, 1]} : vector<48x128xf32> to vector<16x128xf32>
    %128 = arith.addf %126, %127 : vector<16x128xf32>
    %129 = arith.negf %128 : vector<16x128xf32>
    %130 = math.exp %129 : vector<16x128xf32>
    %cst_44 = arith.constant 1.000000e+00 : f32
    %131 = vector.broadcast %cst_44 : f32 to vector<16x128xf32>
    %132 = arith.addf %131, %130 : vector<16x128xf32>
    %133 = arith.divf %131, %132 : vector<16x128xf32>
    %134 = vector.extract_strided_slice %123 {offsets = [16, 0], sizes = [16, 128], strides = [1, 1]} : vector<48x128xf32> to vector<16x128xf32>
    %135 = vector.extract_strided_slice %125 {offsets = [16, 0], sizes = [16, 128], strides = [1, 1]} : vector<48x128xf32> to vector<16x128xf32>
    %136 = arith.addf %134, %135 : vector<16x128xf32>
    %137 = arith.negf %136 : vector<16x128xf32>
    %138 = math.exp %137 : vector<16x128xf32>
    %cst_45 = arith.constant 1.000000e+00 : f32
    %139 = vector.broadcast %cst_45 : f32 to vector<16x128xf32>
    %140 = arith.addf %139, %138 : vector<16x128xf32>
    %141 = arith.divf %139, %140 : vector<16x128xf32>
    %142 = vector.extract_strided_slice %123 {offsets = [32, 0], sizes = [16, 128], strides = [1, 1]} : vector<48x128xf32> to vector<16x128xf32>
    %143 = vector.extract_strided_slice %125 {offsets = [32, 0], sizes = [16, 128], strides = [1, 1]} : vector<48x128xf32> to vector<16x128xf32>
    %144 = arith.mulf %133, %143 : vector<16x128xf32>
    %145 = arith.addf %142, %144 : vector<16x128xf32>
    %146 = math.tanh %145 : vector<16x128xf32>
    %cst_46 = arith.constant 1.000000e+00 : f32
    %147 = vector.broadcast %cst_46 : f32 to vector<16x128xf32>
    %148 = arith.subf %147, %141 : vector<16x128xf32>
    %149 = arith.mulf %148, %146 : vector<16x128xf32>
    %150 = arith.mulf %141, %116 : vector<16x128xf32>
    %151 = arith.addf %149, %150 : vector<16x128xf32>
    %c4_47 = arith.constant 4 : index
    %c0_48 = arith.constant 0 : index
    %c0_49 = arith.constant 0 : index
    %152 = vector.load %arg1[%c4_47, %c0_48, %c0_49] : memref<8x8x128xf32, #tpu.memory_space<vmem>>, vector<1x8x128xf32>
    %153 = vector.shape_cast %152 : vector<1x8x128xf32> to vector<8x128xf32>
    %c3_50 = arith.constant 3 : index
    %c0_51 = arith.constant 0 : index
    %c0_52 = arith.constant 0 : index
    %154 = vector.load %arg1[%c3_50, %c0_51, %c0_52] : memref<8x8x128xf32, #tpu.memory_space<vmem>>, vector<1x8x128xf32>
    %155 = vector.shape_cast %154 : vector<1x8x128xf32> to vector<8x128xf32>
    %156 = tpu.concatenate %153, %155 in 0 : vector<8x128xf32>, vector<8x128xf32> -> vector<16x128xf32>
    %cst_53 = arith.constant dense<0.000000e+00> : vector<48x128xf32>
    %157 = tpu.matmul %0, %156, %cst_53 {dimension_numbers = #tpu.dot_dimension_numbers<[1], [0], [0], [1], [0, 0, 1, 1], [], []>} : vector<48x16xf32>, vector<16x128xf32>, vector<48x128xf32> -> vector<48x128xf32>
    %158 = arith.addf %157, %4 : vector<48x128xf32>
    %cst_54 = arith.constant dense<0.000000e+00> : vector<48x128xf32>
    %159 = tpu.matmul %10, %151, %cst_54 {dimension_numbers = #tpu.dot_dimension_numbers<[1], [0], [0], [1], [0, 0, 1, 1], [], []>} : vector<48x16xf32>, vector<16x128xf32>, vector<48x128xf32> -> vector<48x128xf32>
    %160 = arith.addf %159, %8 : vector<48x128xf32>
    %161 = vector.extract_strided_slice %158 {offsets = [0, 0], sizes = [16, 128], strides = [1, 1]} : vector<48x128xf32> to vector<16x128xf32>
    %162 = vector.extract_strided_slice %160 {offsets = [0, 0], sizes = [16, 128], strides = [1, 1]} : vector<48x128xf32> to vector<16x128xf32>
    %163 = arith.addf %161, %162 : vector<16x128xf32>
    %164 = arith.negf %163 : vector<16x128xf32>
    %165 = math.exp %164 : vector<16x128xf32>
    %cst_55 = arith.constant 1.000000e+00 : f32
    %166 = vector.broadcast %cst_55 : f32 to vector<16x128xf32>
    %167 = arith.addf %166, %165 : vector<16x128xf32>
    %168 = arith.divf %166, %167 : vector<16x128xf32>
    %169 = vector.extract_strided_slice %158 {offsets = [16, 0], sizes = [16, 128], strides = [1, 1]} : vector<48x128xf32> to vector<16x128xf32>
    %170 = vector.extract_strided_slice %160 {offsets = [16, 0], sizes = [16, 128], strides = [1, 1]} : vector<48x128xf32> to vector<16x128xf32>
    %171 = arith.addf %169, %170 : vector<16x128xf32>
    %172 = arith.negf %171 : vector<16x128xf32>
    %173 = math.exp %172 : vector<16x128xf32>
    %cst_56 = arith.constant 1.000000e+00 : f32
    %174 = vector.broadcast %cst_56 : f32 to vector<16x128xf32>
    %175 = arith.addf %174, %173 : vector<16x128xf32>
    %176 = arith.divf %174, %175 : vector<16x128xf32>
    %177 = vector.extract_strided_slice %158 {offsets = [32, 0], sizes = [16, 128], strides = [1, 1]} : vector<48x128xf32> to vector<16x128xf32>
    %178 = vector.extract_strided_slice %160 {offsets = [32, 0], sizes = [16, 128], strides = [1, 1]} : vector<48x128xf32> to vector<16x128xf32>
    %179 = arith.mulf %168, %178 : vector<16x128xf32>
    %180 = arith.addf %177, %179 : vector<16x128xf32>
    %181 = math.tanh %180 : vector<16x128xf32>
    %cst_57 = arith.constant 1.000000e+00 : f32
    %182 = vector.broadcast %cst_57 : f32 to vector<16x128xf32>
    %183 = arith.subf %182, %176 : vector<16x128xf32>
    %184 = arith.mulf %183, %181 : vector<16x128xf32>
    %185 = arith.mulf %176, %151 : vector<16x128xf32>
    %186 = arith.addf %184, %185 : vector<16x128xf32>
    %c5_58 = arith.constant 5 : index
    %c0_59 = arith.constant 0 : index
    %c0_60 = arith.constant 0 : index
    %187 = vector.load %arg1[%c5_58, %c0_59, %c0_60] : memref<8x8x128xf32, #tpu.memory_space<vmem>>, vector<1x8x128xf32>
    %188 = vector.shape_cast %187 : vector<1x8x128xf32> to vector<8x128xf32>
    %c2_61 = arith.constant 2 : index
    %c0_62 = arith.constant 0 : index
    %c0_63 = arith.constant 0 : index
    %189 = vector.load %arg1[%c2_61, %c0_62, %c0_63] : memref<8x8x128xf32, #tpu.memory_space<vmem>>, vector<1x8x128xf32>
    %190 = vector.shape_cast %189 : vector<1x8x128xf32> to vector<8x128xf32>
    %191 = tpu.concatenate %188, %190 in 0 : vector<8x128xf32>, vector<8x128xf32> -> vector<16x128xf32>
    %cst_64 = arith.constant dense<0.000000e+00> : vector<48x128xf32>
    %192 = tpu.matmul %0, %191, %cst_64 {dimension_numbers = #tpu.dot_dimension_numbers<[1], [0], [0], [1], [0, 0, 1, 1], [], []>} : vector<48x16xf32>, vector<16x128xf32>, vector<48x128xf32> -> vector<48x128xf32>
    %193 = arith.addf %192, %4 : vector<48x128xf32>
    %cst_65 = arith.constant dense<0.000000e+00> : vector<48x128xf32>
    %194 = tpu.matmul %10, %186, %cst_65 {dimension_numbers = #tpu.dot_dimension_numbers<[1], [0], [0], [1], [0, 0, 1, 1], [], []>} : vector<48x16xf32>, vector<16x128xf32>, vector<48x128xf32> -> vector<48x128xf32>
    %195 = arith.addf %194, %8 : vector<48x128xf32>
    %196 = vector.extract_strided_slice %193 {offsets = [0, 0], sizes = [16, 128], strides = [1, 1]} : vector<48x128xf32> to vector<16x128xf32>
    %197 = vector.extract_strided_slice %195 {offsets = [0, 0], sizes = [16, 128], strides = [1, 1]} : vector<48x128xf32> to vector<16x128xf32>
    %198 = arith.addf %196, %197 : vector<16x128xf32>
    %199 = arith.negf %198 : vector<16x128xf32>
    %200 = math.exp %199 : vector<16x128xf32>
    %cst_66 = arith.constant 1.000000e+00 : f32
    %201 = vector.broadcast %cst_66 : f32 to vector<16x128xf32>
    %202 = arith.addf %201, %200 : vector<16x128xf32>
    %203 = arith.divf %201, %202 : vector<16x128xf32>
    %204 = vector.extract_strided_slice %193 {offsets = [16, 0], sizes = [16, 128], strides = [1, 1]} : vector<48x128xf32> to vector<16x128xf32>
    %205 = vector.extract_strided_slice %195 {offsets = [16, 0], sizes = [16, 128], strides = [1, 1]} : vector<48x128xf32> to vector<16x128xf32>
    %206 = arith.addf %204, %205 : vector<16x128xf32>
    %207 = arith.negf %206 : vector<16x128xf32>
    %208 = math.exp %207 : vector<16x128xf32>
    %cst_67 = arith.constant 1.000000e+00 : f32
    %209 = vector.broadcast %cst_67 : f32 to vector<16x128xf32>
    %210 = arith.addf %209, %208 : vector<16x128xf32>
    %211 = arith.divf %209, %210 : vector<16x128xf32>
    %212 = vector.extract_strided_slice %193 {offsets = [32, 0], sizes = [16, 128], strides = [1, 1]} : vector<48x128xf32> to vector<16x128xf32>
    %213 = vector.extract_strided_slice %195 {offsets = [32, 0], sizes = [16, 128], strides = [1, 1]} : vector<48x128xf32> to vector<16x128xf32>
    %214 = arith.mulf %203, %213 : vector<16x128xf32>
    %215 = arith.addf %212, %214 : vector<16x128xf32>
    %216 = math.tanh %215 : vector<16x128xf32>
    %cst_68 = arith.constant 1.000000e+00 : f32
    %217 = vector.broadcast %cst_68 : f32 to vector<16x128xf32>
    %218 = arith.subf %217, %211 : vector<16x128xf32>
    %219 = arith.mulf %218, %216 : vector<16x128xf32>
    %220 = arith.mulf %211, %186 : vector<16x128xf32>
    %221 = arith.addf %219, %220 : vector<16x128xf32>
    %c6_69 = arith.constant 6 : index
    %c0_70 = arith.constant 0 : index
    %c0_71 = arith.constant 0 : index
    %222 = vector.load %arg1[%c6_69, %c0_70, %c0_71] : memref<8x8x128xf32, #tpu.memory_space<vmem>>, vector<1x8x128xf32>
    %223 = vector.shape_cast %222 : vector<1x8x128xf32> to vector<8x128xf32>
    %c1_72 = arith.constant 1 : index
    %c0_73 = arith.constant 0 : index
    %c0_74 = arith.constant 0 : index
    %224 = vector.load %arg1[%c1_72, %c0_73, %c0_74] : memref<8x8x128xf32, #tpu.memory_space<vmem>>, vector<1x8x128xf32>
    %225 = vector.shape_cast %224 : vector<1x8x128xf32> to vector<8x128xf32>
    %226 = tpu.concatenate %223, %225 in 0 : vector<8x128xf32>, vector<8x128xf32> -> vector<16x128xf32>
    %cst_75 = arith.constant dense<0.000000e+00> : vector<48x128xf32>
    %227 = tpu.matmul %0, %226, %cst_75 {dimension_numbers = #tpu.dot_dimension_numbers<[1], [0], [0], [1], [0, 0, 1, 1], [], []>} : vector<48x16xf32>, vector<16x128xf32>, vector<48x128xf32> -> vector<48x128xf32>
    %228 = arith.addf %227, %4 : vector<48x128xf32>
    %cst_76 = arith.constant dense<0.000000e+00> : vector<48x128xf32>
    %229 = tpu.matmul %10, %221, %cst_76 {dimension_numbers = #tpu.dot_dimension_numbers<[1], [0], [0], [1], [0, 0, 1, 1], [], []>} : vector<48x16xf32>, vector<16x128xf32>, vector<48x128xf32> -> vector<48x128xf32>
    %230 = arith.addf %229, %8 : vector<48x128xf32>
    %231 = vector.extract_strided_slice %228 {offsets = [0, 0], sizes = [16, 128], strides = [1, 1]} : vector<48x128xf32> to vector<16x128xf32>
    %232 = vector.extract_strided_slice %230 {offsets = [0, 0], sizes = [16, 128], strides = [1, 1]} : vector<48x128xf32> to vector<16x128xf32>
    %233 = arith.addf %231, %232 : vector<16x128xf32>
    %234 = arith.negf %233 : vector<16x128xf32>
    %235 = math.exp %234 : vector<16x128xf32>
    %cst_77 = arith.constant 1.000000e+00 : f32
    %236 = vector.broadcast %cst_77 : f32 to vector<16x128xf32>
    %237 = arith.addf %236, %235 : vector<16x128xf32>
    %238 = arith.divf %236, %237 : vector<16x128xf32>
    %239 = vector.extract_strided_slice %228 {offsets = [16, 0], sizes = [16, 128], strides = [1, 1]} : vector<48x128xf32> to vector<16x128xf32>
    %240 = vector.extract_strided_slice %230 {offsets = [16, 0], sizes = [16, 128], strides = [1, 1]} : vector<48x128xf32> to vector<16x128xf32>
    %241 = arith.addf %239, %240 : vector<16x128xf32>
    %242 = arith.negf %241 : vector<16x128xf32>
    %243 = math.exp %242 : vector<16x128xf32>
    %cst_78 = arith.constant 1.000000e+00 : f32
    %244 = vector.broadcast %cst_78 : f32 to vector<16x128xf32>
    %245 = arith.addf %244, %243 : vector<16x128xf32>
    %246 = arith.divf %244, %245 : vector<16x128xf32>
    %247 = vector.extract_strided_slice %228 {offsets = [32, 0], sizes = [16, 128], strides = [1, 1]} : vector<48x128xf32> to vector<16x128xf32>
    %248 = vector.extract_strided_slice %230 {offsets = [32, 0], sizes = [16, 128], strides = [1, 1]} : vector<48x128xf32> to vector<16x128xf32>
    %249 = arith.mulf %238, %248 : vector<16x128xf32>
    %250 = arith.addf %247, %249 : vector<16x128xf32>
    %251 = math.tanh %250 : vector<16x128xf32>
    %cst_79 = arith.constant 1.000000e+00 : f32
    %252 = vector.broadcast %cst_79 : f32 to vector<16x128xf32>
    %253 = arith.subf %252, %246 : vector<16x128xf32>
    %254 = arith.mulf %253, %251 : vector<16x128xf32>
    %255 = arith.mulf %246, %221 : vector<16x128xf32>
    %256 = arith.addf %254, %255 : vector<16x128xf32>
    %c7_80 = arith.constant 7 : index
    %c0_81 = arith.constant 0 : index
    %c0_82 = arith.constant 0 : index
    %257 = vector.load %arg1[%c7_80, %c0_81, %c0_82] : memref<8x8x128xf32, #tpu.memory_space<vmem>>, vector<1x8x128xf32>
    %258 = vector.shape_cast %257 : vector<1x8x128xf32> to vector<8x128xf32>
    %c0_83 = arith.constant 0 : index
    %c0_84 = arith.constant 0 : index
    %c0_85 = arith.constant 0 : index
    %259 = vector.load %arg1[%c0_83, %c0_84, %c0_85] : memref<8x8x128xf32, #tpu.memory_space<vmem>>, vector<1x8x128xf32>
    %260 = vector.shape_cast %259 : vector<1x8x128xf32> to vector<8x128xf32>
    %261 = tpu.concatenate %258, %260 in 0 : vector<8x128xf32>, vector<8x128xf32> -> vector<16x128xf32>
    %cst_86 = arith.constant dense<0.000000e+00> : vector<48x128xf32>
    %262 = tpu.matmul %0, %261, %cst_86 {dimension_numbers = #tpu.dot_dimension_numbers<[1], [0], [0], [1], [0, 0, 1, 1], [], []>} : vector<48x16xf32>, vector<16x128xf32>, vector<48x128xf32> -> vector<48x128xf32>
    %263 = arith.addf %262, %4 : vector<48x128xf32>
    %cst_87 = arith.constant dense<0.000000e+00> : vector<48x128xf32>
    %264 = tpu.matmul %10, %256, %cst_87 {dimension_numbers = #tpu.dot_dimension_numbers<[1], [0], [0], [1], [0, 0, 1, 1], [], []>} : vector<48x16xf32>, vector<16x128xf32>, vector<48x128xf32> -> vector<48x128xf32>
    %265 = arith.addf %264, %8 : vector<48x128xf32>
    %266 = vector.extract_strided_slice %263 {offsets = [0, 0], sizes = [16, 128], strides = [1, 1]} : vector<48x128xf32> to vector<16x128xf32>
    %267 = vector.extract_strided_slice %265 {offsets = [0, 0], sizes = [16, 128], strides = [1, 1]} : vector<48x128xf32> to vector<16x128xf32>
    %268 = arith.addf %266, %267 : vector<16x128xf32>
    %269 = arith.negf %268 : vector<16x128xf32>
    %270 = math.exp %269 : vector<16x128xf32>
    %cst_88 = arith.constant 1.000000e+00 : f32
    %271 = vector.broadcast %cst_88 : f32 to vector<16x128xf32>
    %272 = arith.addf %271, %270 : vector<16x128xf32>
    %273 = arith.divf %271, %272 : vector<16x128xf32>
    %274 = vector.extract_strided_slice %263 {offsets = [16, 0], sizes = [16, 128], strides = [1, 1]} : vector<48x128xf32> to vector<16x128xf32>
    %275 = vector.extract_strided_slice %265 {offsets = [16, 0], sizes = [16, 128], strides = [1, 1]} : vector<48x128xf32> to vector<16x128xf32>
    %276 = arith.addf %274, %275 : vector<16x128xf32>
    %277 = arith.negf %276 : vector<16x128xf32>
    %278 = math.exp %277 : vector<16x128xf32>
    %cst_89 = arith.constant 1.000000e+00 : f32
    %279 = vector.broadcast %cst_89 : f32 to vector<16x128xf32>
    %280 = arith.addf %279, %278 : vector<16x128xf32>
    %281 = arith.divf %279, %280 : vector<16x128xf32>
    %282 = vector.extract_strided_slice %263 {offsets = [32, 0], sizes = [16, 128], strides = [1, 1]} : vector<48x128xf32> to vector<16x128xf32>
    %283 = vector.extract_strided_slice %265 {offsets = [32, 0], sizes = [16, 128], strides = [1, 1]} : vector<48x128xf32> to vector<16x128xf32>
    %284 = arith.mulf %273, %283 : vector<16x128xf32>
    %285 = arith.addf %282, %284 : vector<16x128xf32>
    %286 = math.tanh %285 : vector<16x128xf32>
    %cst_90 = arith.constant 1.000000e+00 : f32
    %287 = vector.broadcast %cst_90 : f32 to vector<16x128xf32>
    %288 = arith.subf %287, %281 : vector<16x128xf32>
    %289 = arith.mulf %288, %286 : vector<16x128xf32>
    %290 = arith.mulf %281, %256 : vector<16x128xf32>
    %291 = arith.addf %289, %290 : vector<16x128xf32>
    %c0_91 = arith.constant 0 : index
    %c0_92 = arith.constant 0 : index
    %c0_93 = arith.constant 0 : index
    %292 = vector.load %arg3[%c0_91, %c0_92, %c0_93] : memref<3x48x32xf32, #tpu.memory_space<vmem>>, vector<1x48x32xf32>
    %293 = vector.shape_cast %292 : vector<1x48x32xf32> to vector<48x32xf32>
    %c1_94 = arith.constant 1 : index
    %c0_95 = arith.constant 0 : index
    %c0_96 = arith.constant 0 : index
    %294 = vector.load %arg5[%c1_94, %c0_95, %c0_96] : memref<4x48x1xf32, #tpu.memory_space<vmem>>, vector<1x48x1xf32>
    %295 = vector.shape_cast %294 : vector<1x48x1xf32> to vector<48x1xf32>
    %296 = vector.shape_cast %295 : vector<48x1xf32> to vector<48x1xf32>
    %297 = vector.broadcast %296 : vector<48x1xf32> to vector<48x128xf32>
    %c1_97 = arith.constant 1 : index
    %c0_98 = arith.constant 0 : index
    %c0_99 = arith.constant 0 : index
    %298 = vector.load %arg6[%c1_97, %c0_98, %c0_99] : memref<4x48x1xf32, #tpu.memory_space<vmem>>, vector<1x48x1xf32>
    %299 = vector.shape_cast %298 : vector<1x48x1xf32> to vector<48x1xf32>
    %300 = vector.shape_cast %299 : vector<48x1xf32> to vector<48x1xf32>
    %301 = vector.broadcast %300 : vector<48x1xf32> to vector<48x128xf32>
    %c1_100 = arith.constant 1 : index
    %c0_101 = arith.constant 0 : index
    %c0_102 = arith.constant 0 : index
    %302 = vector.load %arg4[%c1_100, %c0_101, %c0_102] : memref<4x48x16xf32, #tpu.memory_space<vmem>>, vector<1x48x16xf32>
    %303 = vector.shape_cast %302 : vector<1x48x16xf32> to vector<48x16xf32>
    %cst_103 = arith.constant 0.000000e+00 : f32
    %304 = vector.broadcast %cst_103 : f32 to vector<16x128xf32>
    %305 = tpu.concatenate %46, %291 in 0 : vector<16x128xf32>, vector<16x128xf32> -> vector<32x128xf32>
    %cst_104 = arith.constant dense<0.000000e+00> : vector<48x128xf32>
    %306 = tpu.matmul %293, %305, %cst_104 {dimension_numbers = #tpu.dot_dimension_numbers<[1], [0], [0], [1], [0, 0, 1, 1], [], []>} : vector<48x32xf32>, vector<32x128xf32>, vector<48x128xf32> -> vector<48x128xf32>
    %307 = arith.addf %306, %297 : vector<48x128xf32>
    %cst_105 = arith.constant dense<0.000000e+00> : vector<48x128xf32>
    %308 = tpu.matmul %303, %304, %cst_105 {dimension_numbers = #tpu.dot_dimension_numbers<[1], [0], [0], [1], [0, 0, 1, 1], [], []>} : vector<48x16xf32>, vector<16x128xf32>, vector<48x128xf32> -> vector<48x128xf32>
    %309 = arith.addf %308, %301 : vector<48x128xf32>
    %310 = vector.extract_strided_slice %307 {offsets = [0, 0], sizes = [16, 128], strides = [1, 1]} : vector<48x128xf32> to vector<16x128xf32>
    %311 = vector.extract_strided_slice %309 {offsets = [0, 0], sizes = [16, 128], strides = [1, 1]} : vector<48x128xf32> to vector<16x128xf32>
    %312 = arith.addf %310, %311 : vector<16x128xf32>
    %313 = arith.negf %312 : vector<16x128xf32>
    %314 = math.exp %313 : vector<16x128xf32>
    %cst_106 = arith.constant 1.000000e+00 : f32
    %315 = vector.broadcast %cst_106 : f32 to vector<16x128xf32>
    %316 = arith.addf %315, %314 : vector<16x128xf32>
    %317 = arith.divf %315, %316 : vector<16x128xf32>
    %318 = vector.extract_strided_slice %307 {offsets = [16, 0], sizes = [16, 128], strides = [1, 1]} : vector<48x128xf32> to vector<16x128xf32>
    %319 = vector.extract_strided_slice %309 {offsets = [16, 0], sizes = [16, 128], strides = [1, 1]} : vector<48x128xf32> to vector<16x128xf32>
    %320 = arith.addf %318, %319 : vector<16x128xf32>
    %321 = arith.negf %320 : vector<16x128xf32>
    %322 = math.exp %321 : vector<16x128xf32>
    %cst_107 = arith.constant 1.000000e+00 : f32
    %323 = vector.broadcast %cst_107 : f32 to vector<16x128xf32>
    %324 = arith.addf %323, %322 : vector<16x128xf32>
    %325 = arith.divf %323, %324 : vector<16x128xf32>
    %326 = vector.extract_strided_slice %307 {offsets = [32, 0], sizes = [16, 128], strides = [1, 1]} : vector<48x128xf32> to vector<16x128xf32>
    %327 = vector.extract_strided_slice %309 {offsets = [32, 0], sizes = [16, 128], strides = [1, 1]} : vector<48x128xf32> to vector<16x128xf32>
    %328 = arith.mulf %317, %327 : vector<16x128xf32>
    %329 = arith.addf %326, %328 : vector<16x128xf32>
    %330 = math.tanh %329 : vector<16x128xf32>
    %cst_108 = arith.constant 1.000000e+00 : f32
    %331 = vector.broadcast %cst_108 : f32 to vector<16x128xf32>
    %332 = arith.subf %331, %325 : vector<16x128xf32>
    %333 = arith.mulf %332, %330 : vector<16x128xf32>
    %334 = arith.mulf %325, %304 : vector<16x128xf32>
    %335 = arith.addf %333, %334 : vector<16x128xf32>
    %336 = tpu.concatenate %81, %256 in 0 : vector<16x128xf32>, vector<16x128xf32> -> vector<32x128xf32>
    %cst_109 = arith.constant dense<0.000000e+00> : vector<48x128xf32>
    %337 = tpu.matmul %293, %336, %cst_109 {dimension_numbers = #tpu.dot_dimension_numbers<[1], [0], [0], [1], [0, 0, 1, 1], [], []>} : vector<48x32xf32>, vector<32x128xf32>, vector<48x128xf32> -> vector<48x128xf32>
    %338 = arith.addf %337, %297 : vector<48x128xf32>
    %cst_110 = arith.constant dense<0.000000e+00> : vector<48x128xf32>
    %339 = tpu.matmul %303, %335, %cst_110 {dimension_numbers = #tpu.dot_dimension_numbers<[1], [0], [0], [1], [0, 0, 1, 1], [], []>} : vector<48x16xf32>, vector<16x128xf32>, vector<48x128xf32> -> vector<48x128xf32>
    %340 = arith.addf %339, %301 : vector<48x128xf32>
    %341 = vector.extract_strided_slice %338 {offsets = [0, 0], sizes = [16, 128], strides = [1, 1]} : vector<48x128xf32> to vector<16x128xf32>
    %342 = vector.extract_strided_slice %340 {offsets = [0, 0], sizes = [16, 128], strides = [1, 1]} : vector<48x128xf32> to vector<16x128xf32>
    %343 = arith.addf %341, %342 : vector<16x128xf32>
    %344 = arith.negf %343 : vector<16x128xf32>
    %345 = math.exp %344 : vector<16x128xf32>
    %cst_111 = arith.constant 1.000000e+00 : f32
    %346 = vector.broadcast %cst_111 : f32 to vector<16x128xf32>
    %347 = arith.addf %346, %345 : vector<16x128xf32>
    %348 = arith.divf %346, %347 : vector<16x128xf32>
    %349 = vector.extract_strided_slice %338 {offsets = [16, 0], sizes = [16, 128], strides = [1, 1]} : vector<48x128xf32> to vector<16x128xf32>
    %350 = vector.extract_strided_slice %340 {offsets = [16, 0], sizes = [16, 128], strides = [1, 1]} : vector<48x128xf32> to vector<16x128xf32>
    %351 = arith.addf %349, %350 : vector<16x128xf32>
    %352 = arith.negf %351 : vector<16x128xf32>
    %353 = math.exp %352 : vector<16x128xf32>
    %cst_112 = arith.constant 1.000000e+00 : f32
    %354 = vector.broadcast %cst_112 : f32 to vector<16x128xf32>
    %355 = arith.addf %354, %353 : vector<16x128xf32>
    %356 = arith.divf %354, %355 : vector<16x128xf32>
    %357 = vector.extract_strided_slice %338 {offsets = [32, 0], sizes = [16, 128], strides = [1, 1]} : vector<48x128xf32> to vector<16x128xf32>
    %358 = vector.extract_strided_slice %340 {offsets = [32, 0], sizes = [16, 128], strides = [1, 1]} : vector<48x128xf32> to vector<16x128xf32>
    %359 = arith.mulf %348, %358 : vector<16x128xf32>
    %360 = arith.addf %357, %359 : vector<16x128xf32>
    %361 = math.tanh %360 : vector<16x128xf32>
    %cst_113 = arith.constant 1.000000e+00 : f32
    %362 = vector.broadcast %cst_113 : f32 to vector<16x128xf32>
    %363 = arith.subf %362, %356 : vector<16x128xf32>
    %364 = arith.mulf %363, %361 : vector<16x128xf32>
    %365 = arith.mulf %356, %335 : vector<16x128xf32>
    %366 = arith.addf %364, %365 : vector<16x128xf32>
    %367 = tpu.concatenate %116, %221 in 0 : vector<16x128xf32>, vector<16x128xf32> -> vector<32x128xf32>
    %cst_114 = arith.constant dense<0.000000e+00> : vector<48x128xf32>
    %368 = tpu.matmul %293, %367, %cst_114 {dimension_numbers = #tpu.dot_dimension_numbers<[1], [0], [0], [1], [0, 0, 1, 1], [], []>} : vector<48x32xf32>, vector<32x128xf32>, vector<48x128xf32> -> vector<48x128xf32>
    %369 = arith.addf %368, %297 : vector<48x128xf32>
    %cst_115 = arith.constant dense<0.000000e+00> : vector<48x128xf32>
    %370 = tpu.matmul %303, %366, %cst_115 {dimension_numbers = #tpu.dot_dimension_numbers<[1], [0], [0], [1], [0, 0, 1, 1], [], []>} : vector<48x16xf32>, vector<16x128xf32>, vector<48x128xf32> -> vector<48x128xf32>
    %371 = arith.addf %370, %301 : vector<48x128xf32>
    %372 = vector.extract_strided_slice %369 {offsets = [0, 0], sizes = [16, 128], strides = [1, 1]} : vector<48x128xf32> to vector<16x128xf32>
    %373 = vector.extract_strided_slice %371 {offsets = [0, 0], sizes = [16, 128], strides = [1, 1]} : vector<48x128xf32> to vector<16x128xf32>
    %374 = arith.addf %372, %373 : vector<16x128xf32>
    %375 = arith.negf %374 : vector<16x128xf32>
    %376 = math.exp %375 : vector<16x128xf32>
    %cst_116 = arith.constant 1.000000e+00 : f32
    %377 = vector.broadcast %cst_116 : f32 to vector<16x128xf32>
    %378 = arith.addf %377, %376 : vector<16x128xf32>
    %379 = arith.divf %377, %378 : vector<16x128xf32>
    %380 = vector.extract_strided_slice %369 {offsets = [16, 0], sizes = [16, 128], strides = [1, 1]} : vector<48x128xf32> to vector<16x128xf32>
    %381 = vector.extract_strided_slice %371 {offsets = [16, 0], sizes = [16, 128], strides = [1, 1]} : vector<48x128xf32> to vector<16x128xf32>
    %382 = arith.addf %380, %381 : vector<16x128xf32>
    %383 = arith.negf %382 : vector<16x128xf32>
    %384 = math.exp %383 : vector<16x128xf32>
    %cst_117 = arith.constant 1.000000e+00 : f32
    %385 = vector.broadcast %cst_117 : f32 to vector<16x128xf32>
    %386 = arith.addf %385, %384 : vector<16x128xf32>
    %387 = arith.divf %385, %386 : vector<16x128xf32>
    %388 = vector.extract_strided_slice %369 {offsets = [32, 0], sizes = [16, 128], strides = [1, 1]} : vector<48x128xf32> to vector<16x128xf32>
    %389 = vector.extract_strided_slice %371 {offsets = [32, 0], sizes = [16, 128], strides = [1, 1]} : vector<48x128xf32> to vector<16x128xf32>
    %390 = arith.mulf %379, %389 : vector<16x128xf32>
    %391 = arith.addf %388, %390 : vector<16x128xf32>
    %392 = math.tanh %391 : vector<16x128xf32>
    %cst_118 = arith.constant 1.000000e+00 : f32
    %393 = vector.broadcast %cst_118 : f32 to vector<16x128xf32>
    %394 = arith.subf %393, %387 : vector<16x128xf32>
    %395 = arith.mulf %394, %392 : vector<16x128xf32>
    %396 = arith.mulf %387, %366 : vector<16x128xf32>
    %397 = arith.addf %395, %396 : vector<16x128xf32>
    %398 = tpu.concatenate %151, %186 in 0 : vector<16x128xf32>, vector<16x128xf32> -> vector<32x128xf32>
    %cst_119 = arith.constant dense<0.000000e+00> : vector<48x128xf32>
    %399 = tpu.matmul %293, %398, %cst_119 {dimension_numbers = #tpu.dot_dimension_numbers<[1], [0], [0], [1], [0, 0, 1, 1], [], []>} : vector<48x32xf32>, vector<32x128xf32>, vector<48x128xf32> -> vector<48x128xf32>
    %400 = arith.addf %399, %297 : vector<48x128xf32>
    %cst_120 = arith.constant dense<0.000000e+00> : vector<48x128xf32>
    %401 = tpu.matmul %303, %397, %cst_120 {dimension_numbers = #tpu.dot_dimension_numbers<[1], [0], [0], [1], [0, 0, 1, 1], [], []>} : vector<48x16xf32>, vector<16x128xf32>, vector<48x128xf32> -> vector<48x128xf32>
    %402 = arith.addf %401, %301 : vector<48x128xf32>
    %403 = vector.extract_strided_slice %400 {offsets = [0, 0], sizes = [16, 128], strides = [1, 1]} : vector<48x128xf32> to vector<16x128xf32>
    %404 = vector.extract_strided_slice %402 {offsets = [0, 0], sizes = [16, 128], strides = [1, 1]} : vector<48x128xf32> to vector<16x128xf32>
    %405 = arith.addf %403, %404 : vector<16x128xf32>
    %406 = arith.negf %405 : vector<16x128xf32>
    %407 = math.exp %406 : vector<16x128xf32>
    %cst_121 = arith.constant 1.000000e+00 : f32
    %408 = vector.broadcast %cst_121 : f32 to vector<16x128xf32>
    %409 = arith.addf %408, %407 : vector<16x128xf32>
    %410 = arith.divf %408, %409 : vector<16x128xf32>
    %411 = vector.extract_strided_slice %400 {offsets = [16, 0], sizes = [16, 128], strides = [1, 1]} : vector<48x128xf32> to vector<16x128xf32>
    %412 = vector.extract_strided_slice %402 {offsets = [16, 0], sizes = [16, 128], strides = [1, 1]} : vector<48x128xf32> to vector<16x128xf32>
    %413 = arith.addf %411, %412 : vector<16x128xf32>
    %414 = arith.negf %413 : vector<16x128xf32>
    %415 = math.exp %414 : vector<16x128xf32>
    %cst_122 = arith.constant 1.000000e+00 : f32
    %416 = vector.broadcast %cst_122 : f32 to vector<16x128xf32>
    %417 = arith.addf %416, %415 : vector<16x128xf32>
    %418 = arith.divf %416, %417 : vector<16x128xf32>
    %419 = vector.extract_strided_slice %400 {offsets = [32, 0], sizes = [16, 128], strides = [1, 1]} : vector<48x128xf32> to vector<16x128xf32>
    %420 = vector.extract_strided_slice %402 {offsets = [32, 0], sizes = [16, 128], strides = [1, 1]} : vector<48x128xf32> to vector<16x128xf32>
    %421 = arith.mulf %410, %420 : vector<16x128xf32>
    %422 = arith.addf %419, %421 : vector<16x128xf32>
    %423 = math.tanh %422 : vector<16x128xf32>
    %cst_123 = arith.constant 1.000000e+00 : f32
    %424 = vector.broadcast %cst_123 : f32 to vector<16x128xf32>
    %425 = arith.subf %424, %418 : vector<16x128xf32>
    %426 = arith.mulf %425, %423 : vector<16x128xf32>
    %427 = arith.mulf %418, %397 : vector<16x128xf32>
    %428 = arith.addf %426, %427 : vector<16x128xf32>
    %429 = tpu.concatenate %186, %151 in 0 : vector<16x128xf32>, vector<16x128xf32> -> vector<32x128xf32>
    %cst_124 = arith.constant dense<0.000000e+00> : vector<48x128xf32>
    %430 = tpu.matmul %293, %429, %cst_124 {dimension_numbers = #tpu.dot_dimension_numbers<[1], [0], [0], [1], [0, 0, 1, 1], [], []>} : vector<48x32xf32>, vector<32x128xf32>, vector<48x128xf32> -> vector<48x128xf32>
    %431 = arith.addf %430, %297 : vector<48x128xf32>
    %cst_125 = arith.constant dense<0.000000e+00> : vector<48x128xf32>
    %432 = tpu.matmul %303, %428, %cst_125 {dimension_numbers = #tpu.dot_dimension_numbers<[1], [0], [0], [1], [0, 0, 1, 1], [], []>} : vector<48x16xf32>, vector<16x128xf32>, vector<48x128xf32> -> vector<48x128xf32>
    %433 = arith.addf %432, %301 : vector<48x128xf32>
    %434 = vector.extract_strided_slice %431 {offsets = [0, 0], sizes = [16, 128], strides = [1, 1]} : vector<48x128xf32> to vector<16x128xf32>
    %435 = vector.extract_strided_slice %433 {offsets = [0, 0], sizes = [16, 128], strides = [1, 1]} : vector<48x128xf32> to vector<16x128xf32>
    %436 = arith.addf %434, %435 : vector<16x128xf32>
    %437 = arith.negf %436 : vector<16x128xf32>
    %438 = math.exp %437 : vector<16x128xf32>
    %cst_126 = arith.constant 1.000000e+00 : f32
    %439 = vector.broadcast %cst_126 : f32 to vector<16x128xf32>
    %440 = arith.addf %439, %438 : vector<16x128xf32>
    %441 = arith.divf %439, %440 : vector<16x128xf32>
    %442 = vector.extract_strided_slice %431 {offsets = [16, 0], sizes = [16, 128], strides = [1, 1]} : vector<48x128xf32> to vector<16x128xf32>
    %443 = vector.extract_strided_slice %433 {offsets = [16, 0], sizes = [16, 128], strides = [1, 1]} : vector<48x128xf32> to vector<16x128xf32>
    %444 = arith.addf %442, %443 : vector<16x128xf32>
    %445 = arith.negf %444 : vector<16x128xf32>
    %446 = math.exp %445 : vector<16x128xf32>
    %cst_127 = arith.constant 1.000000e+00 : f32
    %447 = vector.broadcast %cst_127 : f32 to vector<16x128xf32>
    %448 = arith.addf %447, %446 : vector<16x128xf32>
    %449 = arith.divf %447, %448 : vector<16x128xf32>
    %450 = vector.extract_strided_slice %431 {offsets = [32, 0], sizes = [16, 128], strides = [1, 1]} : vector<48x128xf32> to vector<16x128xf32>
    %451 = vector.extract_strided_slice %433 {offsets = [32, 0], sizes = [16, 128], strides = [1, 1]} : vector<48x128xf32> to vector<16x128xf32>
    %452 = arith.mulf %441, %451 : vector<16x128xf32>
    %453 = arith.addf %450, %452 : vector<16x128xf32>
    %454 = math.tanh %453 : vector<16x128xf32>
    %cst_128 = arith.constant 1.000000e+00 : f32
    %455 = vector.broadcast %cst_128 : f32 to vector<16x128xf32>
    %456 = arith.subf %455, %449 : vector<16x128xf32>
    %457 = arith.mulf %456, %454 : vector<16x128xf32>
    %458 = arith.mulf %449, %428 : vector<16x128xf32>
    %459 = arith.addf %457, %458 : vector<16x128xf32>
    %460 = tpu.concatenate %221, %116 in 0 : vector<16x128xf32>, vector<16x128xf32> -> vector<32x128xf32>
    %cst_129 = arith.constant dense<0.000000e+00> : vector<48x128xf32>
    %461 = tpu.matmul %293, %460, %cst_129 {dimension_numbers = #tpu.dot_dimension_numbers<[1], [0], [0], [1], [0, 0, 1, 1], [], []>} : vector<48x32xf32>, vector<32x128xf32>, vector<48x128xf32> -> vector<48x128xf32>
    %462 = arith.addf %461, %297 : vector<48x128xf32>
    %cst_130 = arith.constant dense<0.000000e+00> : vector<48x128xf32>
    %463 = tpu.matmul %303, %459, %cst_130 {dimension_numbers = #tpu.dot_dimension_numbers<[1], [0], [0], [1], [0, 0, 1, 1], [], []>} : vector<48x16xf32>, vector<16x128xf32>, vector<48x128xf32> -> vector<48x128xf32>
    %464 = arith.addf %463, %301 : vector<48x128xf32>
    %465 = vector.extract_strided_slice %462 {offsets = [0, 0], sizes = [16, 128], strides = [1, 1]} : vector<48x128xf32> to vector<16x128xf32>
    %466 = vector.extract_strided_slice %464 {offsets = [0, 0], sizes = [16, 128], strides = [1, 1]} : vector<48x128xf32> to vector<16x128xf32>
    %467 = arith.addf %465, %466 : vector<16x128xf32>
    %468 = arith.negf %467 : vector<16x128xf32>
    %469 = math.exp %468 : vector<16x128xf32>
    %cst_131 = arith.constant 1.000000e+00 : f32
    %470 = vector.broadcast %cst_131 : f32 to vector<16x128xf32>
    %471 = arith.addf %470, %469 : vector<16x128xf32>
    %472 = arith.divf %470, %471 : vector<16x128xf32>
    %473 = vector.extract_strided_slice %462 {offsets = [16, 0], sizes = [16, 128], strides = [1, 1]} : vector<48x128xf32> to vector<16x128xf32>
    %474 = vector.extract_strided_slice %464 {offsets = [16, 0], sizes = [16, 128], strides = [1, 1]} : vector<48x128xf32> to vector<16x128xf32>
    %475 = arith.addf %473, %474 : vector<16x128xf32>
    %476 = arith.negf %475 : vector<16x128xf32>
    %477 = math.exp %476 : vector<16x128xf32>
    %cst_132 = arith.constant 1.000000e+00 : f32
    %478 = vector.broadcast %cst_132 : f32 to vector<16x128xf32>
    %479 = arith.addf %478, %477 : vector<16x128xf32>
    %480 = arith.divf %478, %479 : vector<16x128xf32>
    %481 = vector.extract_strided_slice %462 {offsets = [32, 0], sizes = [16, 128], strides = [1, 1]} : vector<48x128xf32> to vector<16x128xf32>
    %482 = vector.extract_strided_slice %464 {offsets = [32, 0], sizes = [16, 128], strides = [1, 1]} : vector<48x128xf32> to vector<16x128xf32>
    %483 = arith.mulf %472, %482 : vector<16x128xf32>
    %484 = arith.addf %481, %483 : vector<16x128xf32>
    %485 = math.tanh %484 : vector<16x128xf32>
    %cst_133 = arith.constant 1.000000e+00 : f32
    %486 = vector.broadcast %cst_133 : f32 to vector<16x128xf32>
    %487 = arith.subf %486, %480 : vector<16x128xf32>
    %488 = arith.mulf %487, %485 : vector<16x128xf32>
    %489 = arith.mulf %480, %459 : vector<16x128xf32>
    %490 = arith.addf %488, %489 : vector<16x128xf32>
    %491 = tpu.concatenate %256, %81 in 0 : vector<16x128xf32>, vector<16x128xf32> -> vector<32x128xf32>
    %cst_134 = arith.constant dense<0.000000e+00> : vector<48x128xf32>
    %492 = tpu.matmul %293, %491, %cst_134 {dimension_numbers = #tpu.dot_dimension_numbers<[1], [0], [0], [1], [0, 0, 1, 1], [], []>} : vector<48x32xf32>, vector<32x128xf32>, vector<48x128xf32> -> vector<48x128xf32>
    %493 = arith.addf %492, %297 : vector<48x128xf32>
    %cst_135 = arith.constant dense<0.000000e+00> : vector<48x128xf32>
    %494 = tpu.matmul %303, %490, %cst_135 {dimension_numbers = #tpu.dot_dimension_numbers<[1], [0], [0], [1], [0, 0, 1, 1], [], []>} : vector<48x16xf32>, vector<16x128xf32>, vector<48x128xf32> -> vector<48x128xf32>
    %495 = arith.addf %494, %301 : vector<48x128xf32>
    %496 = vector.extract_strided_slice %493 {offsets = [0, 0], sizes = [16, 128], strides = [1, 1]} : vector<48x128xf32> to vector<16x128xf32>
    %497 = vector.extract_strided_slice %495 {offsets = [0, 0], sizes = [16, 128], strides = [1, 1]} : vector<48x128xf32> to vector<16x128xf32>
    %498 = arith.addf %496, %497 : vector<16x128xf32>
    %499 = arith.negf %498 : vector<16x128xf32>
    %500 = math.exp %499 : vector<16x128xf32>
    %cst_136 = arith.constant 1.000000e+00 : f32
    %501 = vector.broadcast %cst_136 : f32 to vector<16x128xf32>
    %502 = arith.addf %501, %500 : vector<16x128xf32>
    %503 = arith.divf %501, %502 : vector<16x128xf32>
    %504 = vector.extract_strided_slice %493 {offsets = [16, 0], sizes = [16, 128], strides = [1, 1]} : vector<48x128xf32> to vector<16x128xf32>
    %505 = vector.extract_strided_slice %495 {offsets = [16, 0], sizes = [16, 128], strides = [1, 1]} : vector<48x128xf32> to vector<16x128xf32>
    %506 = arith.addf %504, %505 : vector<16x128xf32>
    %507 = arith.negf %506 : vector<16x128xf32>
    %508 = math.exp %507 : vector<16x128xf32>
    %cst_137 = arith.constant 1.000000e+00 : f32
    %509 = vector.broadcast %cst_137 : f32 to vector<16x128xf32>
    %510 = arith.addf %509, %508 : vector<16x128xf32>
    %511 = arith.divf %509, %510 : vector<16x128xf32>
    %512 = vector.extract_strided_slice %493 {offsets = [32, 0], sizes = [16, 128], strides = [1, 1]} : vector<48x128xf32> to vector<16x128xf32>
    %513 = vector.extract_strided_slice %495 {offsets = [32, 0], sizes = [16, 128], strides = [1, 1]} : vector<48x128xf32> to vector<16x128xf32>
    %514 = arith.mulf %503, %513 : vector<16x128xf32>
    %515 = arith.addf %512, %514 : vector<16x128xf32>
    %516 = math.tanh %515 : vector<16x128xf32>
    %cst_138 = arith.constant 1.000000e+00 : f32
    %517 = vector.broadcast %cst_138 : f32 to vector<16x128xf32>
    %518 = arith.subf %517, %511 : vector<16x128xf32>
    %519 = arith.mulf %518, %516 : vector<16x128xf32>
    %520 = arith.mulf %511, %490 : vector<16x128xf32>
    %521 = arith.addf %519, %520 : vector<16x128xf32>
    %522 = tpu.concatenate %291, %46 in 0 : vector<16x128xf32>, vector<16x128xf32> -> vector<32x128xf32>
    %cst_139 = arith.constant dense<0.000000e+00> : vector<48x128xf32>
    %523 = tpu.matmul %293, %522, %cst_139 {dimension_numbers = #tpu.dot_dimension_numbers<[1], [0], [0], [1], [0, 0, 1, 1], [], []>} : vector<48x32xf32>, vector<32x128xf32>, vector<48x128xf32> -> vector<48x128xf32>
    %524 = arith.addf %523, %297 : vector<48x128xf32>
    %cst_140 = arith.constant dense<0.000000e+00> : vector<48x128xf32>
    %525 = tpu.matmul %303, %521, %cst_140 {dimension_numbers = #tpu.dot_dimension_numbers<[1], [0], [0], [1], [0, 0, 1, 1], [], []>} : vector<48x16xf32>, vector<16x128xf32>, vector<48x128xf32> -> vector<48x128xf32>
    %526 = arith.addf %525, %301 : vector<48x128xf32>
    %527 = vector.extract_strided_slice %524 {offsets = [0, 0], sizes = [16, 128], strides = [1, 1]} : vector<48x128xf32> to vector<16x128xf32>
    %528 = vector.extract_strided_slice %526 {offsets = [0, 0], sizes = [16, 128], strides = [1, 1]} : vector<48x128xf32> to vector<16x128xf32>
    %529 = arith.addf %527, %528 : vector<16x128xf32>
    %530 = arith.negf %529 : vector<16x128xf32>
    %531 = math.exp %530 : vector<16x128xf32>
    %cst_141 = arith.constant 1.000000e+00 : f32
    %532 = vector.broadcast %cst_141 : f32 to vector<16x128xf32>
    %533 = arith.addf %532, %531 : vector<16x128xf32>
    %534 = arith.divf %532, %533 : vector<16x128xf32>
    %535 = vector.extract_strided_slice %524 {offsets = [16, 0], sizes = [16, 128], strides = [1, 1]} : vector<48x128xf32> to vector<16x128xf32>
    %536 = vector.extract_strided_slice %526 {offsets = [16, 0], sizes = [16, 128], strides = [1, 1]} : vector<48x128xf32> to vector<16x128xf32>
    %537 = arith.addf %535, %536 : vector<16x128xf32>
    %538 = arith.negf %537 : vector<16x128xf32>
    %539 = math.exp %538 : vector<16x128xf32>
    %cst_142 = arith.constant 1.000000e+00 : f32
    %540 = vector.broadcast %cst_142 : f32 to vector<16x128xf32>
    %541 = arith.addf %540, %539 : vector<16x128xf32>
    %542 = arith.divf %540, %541 : vector<16x128xf32>
    %543 = vector.extract_strided_slice %524 {offsets = [32, 0], sizes = [16, 128], strides = [1, 1]} : vector<48x128xf32> to vector<16x128xf32>
    %544 = vector.extract_strided_slice %526 {offsets = [32, 0], sizes = [16, 128], strides = [1, 1]} : vector<48x128xf32> to vector<16x128xf32>
    %545 = arith.mulf %534, %544 : vector<16x128xf32>
    %546 = arith.addf %543, %545 : vector<16x128xf32>
    %547 = math.tanh %546 : vector<16x128xf32>
    %cst_143 = arith.constant 1.000000e+00 : f32
    %548 = vector.broadcast %cst_143 : f32 to vector<16x128xf32>
    %549 = arith.subf %548, %542 : vector<16x128xf32>
    %550 = arith.mulf %549, %547 : vector<16x128xf32>
    %551 = arith.mulf %542, %521 : vector<16x128xf32>
    %552 = arith.addf %550, %551 : vector<16x128xf32>
    %c1_144 = arith.constant 1 : index
    %c0_145 = arith.constant 0 : index
    %c0_146 = arith.constant 0 : index
    %553 = vector.load %arg3[%c1_144, %c0_145, %c0_146] : memref<3x48x32xf32, #tpu.memory_space<vmem>>, vector<1x48x32xf32>
    %554 = vector.shape_cast %553 : vector<1x48x32xf32> to vector<48x32xf32>
    %c2_147 = arith.constant 2 : index
    %c0_148 = arith.constant 0 : index
    %c0_149 = arith.constant 0 : index
    %555 = vector.load %arg5[%c2_147, %c0_148, %c0_149] : memref<4x48x1xf32, #tpu.memory_space<vmem>>, vector<1x48x1xf32>
    %556 = vector.shape_cast %555 : vector<1x48x1xf32> to vector<48x1xf32>
    %557 = vector.shape_cast %556 : vector<48x1xf32> to vector<48x1xf32>
    %558 = vector.broadcast %557 : vector<48x1xf32> to vector<48x128xf32>
    %c2_150 = arith.constant 2 : index
    %c0_151 = arith.constant 0 : index
    %c0_152 = arith.constant 0 : index
    %559 = vector.load %arg6[%c2_150, %c0_151, %c0_152] : memref<4x48x1xf32, #tpu.memory_space<vmem>>, vector<1x48x1xf32>
    %560 = vector.shape_cast %559 : vector<1x48x1xf32> to vector<48x1xf32>
    %561 = vector.shape_cast %560 : vector<48x1xf32> to vector<48x1xf32>
    %562 = vector.broadcast %561 : vector<48x1xf32> to vector<48x128xf32>
    %c2_153 = arith.constant 2 : index
    %c0_154 = arith.constant 0 : index
    %c0_155 = arith.constant 0 : index
    %563 = vector.load %arg4[%c2_153, %c0_154, %c0_155] : memref<4x48x16xf32, #tpu.memory_space<vmem>>, vector<1x48x16xf32>
    %564 = vector.shape_cast %563 : vector<1x48x16xf32> to vector<48x16xf32>
    %cst_156 = arith.constant 0.000000e+00 : f32
    %565 = vector.broadcast %cst_156 : f32 to vector<16x128xf32>
    %566 = tpu.concatenate %335, %552 in 0 : vector<16x128xf32>, vector<16x128xf32> -> vector<32x128xf32>
    %cst_157 = arith.constant dense<0.000000e+00> : vector<48x128xf32>
    %567 = tpu.matmul %554, %566, %cst_157 {dimension_numbers = #tpu.dot_dimension_numbers<[1], [0], [0], [1], [0, 0, 1, 1], [], []>} : vector<48x32xf32>, vector<32x128xf32>, vector<48x128xf32> -> vector<48x128xf32>
    %568 = arith.addf %567, %558 : vector<48x128xf32>
    %cst_158 = arith.constant dense<0.000000e+00> : vector<48x128xf32>
    %569 = tpu.matmul %564, %565, %cst_158 {dimension_numbers = #tpu.dot_dimension_numbers<[1], [0], [0], [1], [0, 0, 1, 1], [], []>} : vector<48x16xf32>, vector<16x128xf32>, vector<48x128xf32> -> vector<48x128xf32>
    %570 = arith.addf %569, %562 : vector<48x128xf32>
    %571 = vector.extract_strided_slice %568 {offsets = [0, 0], sizes = [16, 128], strides = [1, 1]} : vector<48x128xf32> to vector<16x128xf32>
    %572 = vector.extract_strided_slice %570 {offsets = [0, 0], sizes = [16, 128], strides = [1, 1]} : vector<48x128xf32> to vector<16x128xf32>
    %573 = arith.addf %571, %572 : vector<16x128xf32>
    %574 = arith.negf %573 : vector<16x128xf32>
    %575 = math.exp %574 : vector<16x128xf32>
    %cst_159 = arith.constant 1.000000e+00 : f32
    %576 = vector.broadcast %cst_159 : f32 to vector<16x128xf32>
    %577 = arith.addf %576, %575 : vector<16x128xf32>
    %578 = arith.divf %576, %577 : vector<16x128xf32>
    %579 = vector.extract_strided_slice %568 {offsets = [16, 0], sizes = [16, 128], strides = [1, 1]} : vector<48x128xf32> to vector<16x128xf32>
    %580 = vector.extract_strided_slice %570 {offsets = [16, 0], sizes = [16, 128], strides = [1, 1]} : vector<48x128xf32> to vector<16x128xf32>
    %581 = arith.addf %579, %580 : vector<16x128xf32>
    %582 = arith.negf %581 : vector<16x128xf32>
    %583 = math.exp %582 : vector<16x128xf32>
    %cst_160 = arith.constant 1.000000e+00 : f32
    %584 = vector.broadcast %cst_160 : f32 to vector<16x128xf32>
    %585 = arith.addf %584, %583 : vector<16x128xf32>
    %586 = arith.divf %584, %585 : vector<16x128xf32>
    %587 = vector.extract_strided_slice %568 {offsets = [32, 0], sizes = [16, 128], strides = [1, 1]} : vector<48x128xf32> to vector<16x128xf32>
    %588 = vector.extract_strided_slice %570 {offsets = [32, 0], sizes = [16, 128], strides = [1, 1]} : vector<48x128xf32> to vector<16x128xf32>
    %589 = arith.mulf %578, %588 : vector<16x128xf32>
    %590 = arith.addf %587, %589 : vector<16x128xf32>
    %591 = math.tanh %590 : vector<16x128xf32>
    %cst_161 = arith.constant 1.000000e+00 : f32
    %592 = vector.broadcast %cst_161 : f32 to vector<16x128xf32>
    %593 = arith.subf %592, %586 : vector<16x128xf32>
    %594 = arith.mulf %593, %591 : vector<16x128xf32>
    %595 = arith.mulf %586, %565 : vector<16x128xf32>
    %596 = arith.addf %594, %595 : vector<16x128xf32>
    %597 = tpu.concatenate %366, %521 in 0 : vector<16x128xf32>, vector<16x128xf32> -> vector<32x128xf32>
    %cst_162 = arith.constant dense<0.000000e+00> : vector<48x128xf32>
    %598 = tpu.matmul %554, %597, %cst_162 {dimension_numbers = #tpu.dot_dimension_numbers<[1], [0], [0], [1], [0, 0, 1, 1], [], []>} : vector<48x32xf32>, vector<32x128xf32>, vector<48x128xf32> -> vector<48x128xf32>
    %599 = arith.addf %598, %558 : vector<48x128xf32>
    %cst_163 = arith.constant dense<0.000000e+00> : vector<48x128xf32>
    %600 = tpu.matmul %564, %596, %cst_163 {dimension_numbers = #tpu.dot_dimension_numbers<[1], [0], [0], [1], [0, 0, 1, 1], [], []>} : vector<48x16xf32>, vector<16x128xf32>, vector<48x128xf32> -> vector<48x128xf32>
    %601 = arith.addf %600, %562 : vector<48x128xf32>
    %602 = vector.extract_strided_slice %599 {offsets = [0, 0], sizes = [16, 128], strides = [1, 1]} : vector<48x128xf32> to vector<16x128xf32>
    %603 = vector.extract_strided_slice %601 {offsets = [0, 0], sizes = [16, 128], strides = [1, 1]} : vector<48x128xf32> to vector<16x128xf32>
    %604 = arith.addf %602, %603 : vector<16x128xf32>
    %605 = arith.negf %604 : vector<16x128xf32>
    %606 = math.exp %605 : vector<16x128xf32>
    %cst_164 = arith.constant 1.000000e+00 : f32
    %607 = vector.broadcast %cst_164 : f32 to vector<16x128xf32>
    %608 = arith.addf %607, %606 : vector<16x128xf32>
    %609 = arith.divf %607, %608 : vector<16x128xf32>
    %610 = vector.extract_strided_slice %599 {offsets = [16, 0], sizes = [16, 128], strides = [1, 1]} : vector<48x128xf32> to vector<16x128xf32>
    %611 = vector.extract_strided_slice %601 {offsets = [16, 0], sizes = [16, 128], strides = [1, 1]} : vector<48x128xf32> to vector<16x128xf32>
    %612 = arith.addf %610, %611 : vector<16x128xf32>
    %613 = arith.negf %612 : vector<16x128xf32>
    %614 = math.exp %613 : vector<16x128xf32>
    %cst_165 = arith.constant 1.000000e+00 : f32
    %615 = vector.broadcast %cst_165 : f32 to vector<16x128xf32>
    %616 = arith.addf %615, %614 : vector<16x128xf32>
    %617 = arith.divf %615, %616 : vector<16x128xf32>
    %618 = vector.extract_strided_slice %599 {offsets = [32, 0], sizes = [16, 128], strides = [1, 1]} : vector<48x128xf32> to vector<16x128xf32>
    %619 = vector.extract_strided_slice %601 {offsets = [32, 0], sizes = [16, 128], strides = [1, 1]} : vector<48x128xf32> to vector<16x128xf32>
    %620 = arith.mulf %609, %619 : vector<16x128xf32>
    %621 = arith.addf %618, %620 : vector<16x128xf32>
    %622 = math.tanh %621 : vector<16x128xf32>
    %cst_166 = arith.constant 1.000000e+00 : f32
    %623 = vector.broadcast %cst_166 : f32 to vector<16x128xf32>
    %624 = arith.subf %623, %617 : vector<16x128xf32>
    %625 = arith.mulf %624, %622 : vector<16x128xf32>
    %626 = arith.mulf %617, %596 : vector<16x128xf32>
    %627 = arith.addf %625, %626 : vector<16x128xf32>
    %628 = tpu.concatenate %397, %490 in 0 : vector<16x128xf32>, vector<16x128xf32> -> vector<32x128xf32>
    %cst_167 = arith.constant dense<0.000000e+00> : vector<48x128xf32>
    %629 = tpu.matmul %554, %628, %cst_167 {dimension_numbers = #tpu.dot_dimension_numbers<[1], [0], [0], [1], [0, 0, 1, 1], [], []>} : vector<48x32xf32>, vector<32x128xf32>, vector<48x128xf32> -> vector<48x128xf32>
    %630 = arith.addf %629, %558 : vector<48x128xf32>
    %cst_168 = arith.constant dense<0.000000e+00> : vector<48x128xf32>
    %631 = tpu.matmul %564, %627, %cst_168 {dimension_numbers = #tpu.dot_dimension_numbers<[1], [0], [0], [1], [0, 0, 1, 1], [], []>} : vector<48x16xf32>, vector<16x128xf32>, vector<48x128xf32> -> vector<48x128xf32>
    %632 = arith.addf %631, %562 : vector<48x128xf32>
    %633 = vector.extract_strided_slice %630 {offsets = [0, 0], sizes = [16, 128], strides = [1, 1]} : vector<48x128xf32> to vector<16x128xf32>
    %634 = vector.extract_strided_slice %632 {offsets = [0, 0], sizes = [16, 128], strides = [1, 1]} : vector<48x128xf32> to vector<16x128xf32>
    %635 = arith.addf %633, %634 : vector<16x128xf32>
    %636 = arith.negf %635 : vector<16x128xf32>
    %637 = math.exp %636 : vector<16x128xf32>
    %cst_169 = arith.constant 1.000000e+00 : f32
    %638 = vector.broadcast %cst_169 : f32 to vector<16x128xf32>
    %639 = arith.addf %638, %637 : vector<16x128xf32>
    %640 = arith.divf %638, %639 : vector<16x128xf32>
    %641 = vector.extract_strided_slice %630 {offsets = [16, 0], sizes = [16, 128], strides = [1, 1]} : vector<48x128xf32> to vector<16x128xf32>
    %642 = vector.extract_strided_slice %632 {offsets = [16, 0], sizes = [16, 128], strides = [1, 1]} : vector<48x128xf32> to vector<16x128xf32>
    %643 = arith.addf %641, %642 : vector<16x128xf32>
    %644 = arith.negf %643 : vector<16x128xf32>
    %645 = math.exp %644 : vector<16x128xf32>
    %cst_170 = arith.constant 1.000000e+00 : f32
    %646 = vector.broadcast %cst_170 : f32 to vector<16x128xf32>
    %647 = arith.addf %646, %645 : vector<16x128xf32>
    %648 = arith.divf %646, %647 : vector<16x128xf32>
    %649 = vector.extract_strided_slice %630 {offsets = [32, 0], sizes = [16, 128], strides = [1, 1]} : vector<48x128xf32> to vector<16x128xf32>
    %650 = vector.extract_strided_slice %632 {offsets = [32, 0], sizes = [16, 128], strides = [1, 1]} : vector<48x128xf32> to vector<16x128xf32>
    %651 = arith.mulf %640, %650 : vector<16x128xf32>
    %652 = arith.addf %649, %651 : vector<16x128xf32>
    %653 = math.tanh %652 : vector<16x128xf32>
    %cst_171 = arith.constant 1.000000e+00 : f32
    %654 = vector.broadcast %cst_171 : f32 to vector<16x128xf32>
    %655 = arith.subf %654, %648 : vector<16x128xf32>
    %656 = arith.mulf %655, %653 : vector<16x128xf32>
    %657 = arith.mulf %648, %627 : vector<16x128xf32>
    %658 = arith.addf %656, %657 : vector<16x128xf32>
    %659 = tpu.concatenate %428, %459 in 0 : vector<16x128xf32>, vector<16x128xf32> -> vector<32x128xf32>
    %cst_172 = arith.constant dense<0.000000e+00> : vector<48x128xf32>
    %660 = tpu.matmul %554, %659, %cst_172 {dimension_numbers = #tpu.dot_dimension_numbers<[1], [0], [0], [1], [0, 0, 1, 1], [], []>} : vector<48x32xf32>, vector<32x128xf32>, vector<48x128xf32> -> vector<48x128xf32>
    %661 = arith.addf %660, %558 : vector<48x128xf32>
    %cst_173 = arith.constant dense<0.000000e+00> : vector<48x128xf32>
    %662 = tpu.matmul %564, %658, %cst_173 {dimension_numbers = #tpu.dot_dimension_numbers<[1], [0], [0], [1], [0, 0, 1, 1], [], []>} : vector<48x16xf32>, vector<16x128xf32>, vector<48x128xf32> -> vector<48x128xf32>
    %663 = arith.addf %662, %562 : vector<48x128xf32>
    %664 = vector.extract_strided_slice %661 {offsets = [0, 0], sizes = [16, 128], strides = [1, 1]} : vector<48x128xf32> to vector<16x128xf32>
    %665 = vector.extract_strided_slice %663 {offsets = [0, 0], sizes = [16, 128], strides = [1, 1]} : vector<48x128xf32> to vector<16x128xf32>
    %666 = arith.addf %664, %665 : vector<16x128xf32>
    %667 = arith.negf %666 : vector<16x128xf32>
    %668 = math.exp %667 : vector<16x128xf32>
    %cst_174 = arith.constant 1.000000e+00 : f32
    %669 = vector.broadcast %cst_174 : f32 to vector<16x128xf32>
    %670 = arith.addf %669, %668 : vector<16x128xf32>
    %671 = arith.divf %669, %670 : vector<16x128xf32>
    %672 = vector.extract_strided_slice %661 {offsets = [16, 0], sizes = [16, 128], strides = [1, 1]} : vector<48x128xf32> to vector<16x128xf32>
    %673 = vector.extract_strided_slice %663 {offsets = [16, 0], sizes = [16, 128], strides = [1, 1]} : vector<48x128xf32> to vector<16x128xf32>
    %674 = arith.addf %672, %673 : vector<16x128xf32>
    %675 = arith.negf %674 : vector<16x128xf32>
    %676 = math.exp %675 : vector<16x128xf32>
    %cst_175 = arith.constant 1.000000e+00 : f32
    %677 = vector.broadcast %cst_175 : f32 to vector<16x128xf32>
    %678 = arith.addf %677, %676 : vector<16x128xf32>
    %679 = arith.divf %677, %678 : vector<16x128xf32>
    %680 = vector.extract_strided_slice %661 {offsets = [32, 0], sizes = [16, 128], strides = [1, 1]} : vector<48x128xf32> to vector<16x128xf32>
    %681 = vector.extract_strided_slice %663 {offsets = [32, 0], sizes = [16, 128], strides = [1, 1]} : vector<48x128xf32> to vector<16x128xf32>
    %682 = arith.mulf %671, %681 : vector<16x128xf32>
    %683 = arith.addf %680, %682 : vector<16x128xf32>
    %684 = math.tanh %683 : vector<16x128xf32>
    %cst_176 = arith.constant 1.000000e+00 : f32
    %685 = vector.broadcast %cst_176 : f32 to vector<16x128xf32>
    %686 = arith.subf %685, %679 : vector<16x128xf32>
    %687 = arith.mulf %686, %684 : vector<16x128xf32>
    %688 = arith.mulf %679, %658 : vector<16x128xf32>
    %689 = arith.addf %687, %688 : vector<16x128xf32>
    %690 = tpu.concatenate %459, %428 in 0 : vector<16x128xf32>, vector<16x128xf32> -> vector<32x128xf32>
    %cst_177 = arith.constant dense<0.000000e+00> : vector<48x128xf32>
    %691 = tpu.matmul %554, %690, %cst_177 {dimension_numbers = #tpu.dot_dimension_numbers<[1], [0], [0], [1], [0, 0, 1, 1], [], []>} : vector<48x32xf32>, vector<32x128xf32>, vector<48x128xf32> -> vector<48x128xf32>
    %692 = arith.addf %691, %558 : vector<48x128xf32>
    %cst_178 = arith.constant dense<0.000000e+00> : vector<48x128xf32>
    %693 = tpu.matmul %564, %689, %cst_178 {dimension_numbers = #tpu.dot_dimension_numbers<[1], [0], [0], [1], [0, 0, 1, 1], [], []>} : vector<48x16xf32>, vector<16x128xf32>, vector<48x128xf32> -> vector<48x128xf32>
    %694 = arith.addf %693, %562 : vector<48x128xf32>
    %695 = vector.extract_strided_slice %692 {offsets = [0, 0], sizes = [16, 128], strides = [1, 1]} : vector<48x128xf32> to vector<16x128xf32>
    %696 = vector.extract_strided_slice %694 {offsets = [0, 0], sizes = [16, 128], strides = [1, 1]} : vector<48x128xf32> to vector<16x128xf32>
    %697 = arith.addf %695, %696 : vector<16x128xf32>
    %698 = arith.negf %697 : vector<16x128xf32>
    %699 = math.exp %698 : vector<16x128xf32>
    %cst_179 = arith.constant 1.000000e+00 : f32
    %700 = vector.broadcast %cst_179 : f32 to vector<16x128xf32>
    %701 = arith.addf %700, %699 : vector<16x128xf32>
    %702 = arith.divf %700, %701 : vector<16x128xf32>
    %703 = vector.extract_strided_slice %692 {offsets = [16, 0], sizes = [16, 128], strides = [1, 1]} : vector<48x128xf32> to vector<16x128xf32>
    %704 = vector.extract_strided_slice %694 {offsets = [16, 0], sizes = [16, 128], strides = [1, 1]} : vector<48x128xf32> to vector<16x128xf32>
    %705 = arith.addf %703, %704 : vector<16x128xf32>
    %706 = arith.negf %705 : vector<16x128xf32>
    %707 = math.exp %706 : vector<16x128xf32>
    %cst_180 = arith.constant 1.000000e+00 : f32
    %708 = vector.broadcast %cst_180 : f32 to vector<16x128xf32>
    %709 = arith.addf %708, %707 : vector<16x128xf32>
    %710 = arith.divf %708, %709 : vector<16x128xf32>
    %711 = vector.extract_strided_slice %692 {offsets = [32, 0], sizes = [16, 128], strides = [1, 1]} : vector<48x128xf32> to vector<16x128xf32>
    %712 = vector.extract_strided_slice %694 {offsets = [32, 0], sizes = [16, 128], strides = [1, 1]} : vector<48x128xf32> to vector<16x128xf32>
    %713 = arith.mulf %702, %712 : vector<16x128xf32>
    %714 = arith.addf %711, %713 : vector<16x128xf32>
    %715 = math.tanh %714 : vector<16x128xf32>
    %cst_181 = arith.constant 1.000000e+00 : f32
    %716 = vector.broadcast %cst_181 : f32 to vector<16x128xf32>
    %717 = arith.subf %716, %710 : vector<16x128xf32>
    %718 = arith.mulf %717, %715 : vector<16x128xf32>
    %719 = arith.mulf %710, %689 : vector<16x128xf32>
    %720 = arith.addf %718, %719 : vector<16x128xf32>
    %721 = tpu.concatenate %490, %397 in 0 : vector<16x128xf32>, vector<16x128xf32> -> vector<32x128xf32>
    %cst_182 = arith.constant dense<0.000000e+00> : vector<48x128xf32>
    %722 = tpu.matmul %554, %721, %cst_182 {dimension_numbers = #tpu.dot_dimension_numbers<[1], [0], [0], [1], [0, 0, 1, 1], [], []>} : vector<48x32xf32>, vector<32x128xf32>, vector<48x128xf32> -> vector<48x128xf32>
    %723 = arith.addf %722, %558 : vector<48x128xf32>
    %cst_183 = arith.constant dense<0.000000e+00> : vector<48x128xf32>
    %724 = tpu.matmul %564, %720, %cst_183 {dimension_numbers = #tpu.dot_dimension_numbers<[1], [0], [0], [1], [0, 0, 1, 1], [], []>} : vector<48x16xf32>, vector<16x128xf32>, vector<48x128xf32> -> vector<48x128xf32>
    %725 = arith.addf %724, %562 : vector<48x128xf32>
    %726 = vector.extract_strided_slice %723 {offsets = [0, 0], sizes = [16, 128], strides = [1, 1]} : vector<48x128xf32> to vector<16x128xf32>
    %727 = vector.extract_strided_slice %725 {offsets = [0, 0], sizes = [16, 128], strides = [1, 1]} : vector<48x128xf32> to vector<16x128xf32>
    %728 = arith.addf %726, %727 : vector<16x128xf32>
    %729 = arith.negf %728 : vector<16x128xf32>
    %730 = math.exp %729 : vector<16x128xf32>
    %cst_184 = arith.constant 1.000000e+00 : f32
    %731 = vector.broadcast %cst_184 : f32 to vector<16x128xf32>
    %732 = arith.addf %731, %730 : vector<16x128xf32>
    %733 = arith.divf %731, %732 : vector<16x128xf32>
    %734 = vector.extract_strided_slice %723 {offsets = [16, 0], sizes = [16, 128], strides = [1, 1]} : vector<48x128xf32> to vector<16x128xf32>
    %735 = vector.extract_strided_slice %725 {offsets = [16, 0], sizes = [16, 128], strides = [1, 1]} : vector<48x128xf32> to vector<16x128xf32>
    %736 = arith.addf %734, %735 : vector<16x128xf32>
    %737 = arith.negf %736 : vector<16x128xf32>
    %738 = math.exp %737 : vector<16x128xf32>
    %cst_185 = arith.constant 1.000000e+00 : f32
    %739 = vector.broadcast %cst_185 : f32 to vector<16x128xf32>
    %740 = arith.addf %739, %738 : vector<16x128xf32>
    %741 = arith.divf %739, %740 : vector<16x128xf32>
    %742 = vector.extract_strided_slice %723 {offsets = [32, 0], sizes = [16, 128], strides = [1, 1]} : vector<48x128xf32> to vector<16x128xf32>
    %743 = vector.extract_strided_slice %725 {offsets = [32, 0], sizes = [16, 128], strides = [1, 1]} : vector<48x128xf32> to vector<16x128xf32>
    %744 = arith.mulf %733, %743 : vector<16x128xf32>
    %745 = arith.addf %742, %744 : vector<16x128xf32>
    %746 = math.tanh %745 : vector<16x128xf32>
    %cst_186 = arith.constant 1.000000e+00 : f32
    %747 = vector.broadcast %cst_186 : f32 to vector<16x128xf32>
    %748 = arith.subf %747, %741 : vector<16x128xf32>
    %749 = arith.mulf %748, %746 : vector<16x128xf32>
    %750 = arith.mulf %741, %720 : vector<16x128xf32>
    %751 = arith.addf %749, %750 : vector<16x128xf32>
    %752 = tpu.concatenate %521, %366 in 0 : vector<16x128xf32>, vector<16x128xf32> -> vector<32x128xf32>
    %cst_187 = arith.constant dense<0.000000e+00> : vector<48x128xf32>
    %753 = tpu.matmul %554, %752, %cst_187 {dimension_numbers = #tpu.dot_dimension_numbers<[1], [0], [0], [1], [0, 0, 1, 1], [], []>} : vector<48x32xf32>, vector<32x128xf32>, vector<48x128xf32> -> vector<48x128xf32>
    %754 = arith.addf %753, %558 : vector<48x128xf32>
    %cst_188 = arith.constant dense<0.000000e+00> : vector<48x128xf32>
    %755 = tpu.matmul %564, %751, %cst_188 {dimension_numbers = #tpu.dot_dimension_numbers<[1], [0], [0], [1], [0, 0, 1, 1], [], []>} : vector<48x16xf32>, vector<16x128xf32>, vector<48x128xf32> -> vector<48x128xf32>
    %756 = arith.addf %755, %562 : vector<48x128xf32>
    %757 = vector.extract_strided_slice %754 {offsets = [0, 0], sizes = [16, 128], strides = [1, 1]} : vector<48x128xf32> to vector<16x128xf32>
    %758 = vector.extract_strided_slice %756 {offsets = [0, 0], sizes = [16, 128], strides = [1, 1]} : vector<48x128xf32> to vector<16x128xf32>
    %759 = arith.addf %757, %758 : vector<16x128xf32>
    %760 = arith.negf %759 : vector<16x128xf32>
    %761 = math.exp %760 : vector<16x128xf32>
    %cst_189 = arith.constant 1.000000e+00 : f32
    %762 = vector.broadcast %cst_189 : f32 to vector<16x128xf32>
    %763 = arith.addf %762, %761 : vector<16x128xf32>
    %764 = arith.divf %762, %763 : vector<16x128xf32>
    %765 = vector.extract_strided_slice %754 {offsets = [16, 0], sizes = [16, 128], strides = [1, 1]} : vector<48x128xf32> to vector<16x128xf32>
    %766 = vector.extract_strided_slice %756 {offsets = [16, 0], sizes = [16, 128], strides = [1, 1]} : vector<48x128xf32> to vector<16x128xf32>
    %767 = arith.addf %765, %766 : vector<16x128xf32>
    %768 = arith.negf %767 : vector<16x128xf32>
    %769 = math.exp %768 : vector<16x128xf32>
    %cst_190 = arith.constant 1.000000e+00 : f32
    %770 = vector.broadcast %cst_190 : f32 to vector<16x128xf32>
    %771 = arith.addf %770, %769 : vector<16x128xf32>
    %772 = arith.divf %770, %771 : vector<16x128xf32>
    %773 = vector.extract_strided_slice %754 {offsets = [32, 0], sizes = [16, 128], strides = [1, 1]} : vector<48x128xf32> to vector<16x128xf32>
    %774 = vector.extract_strided_slice %756 {offsets = [32, 0], sizes = [16, 128], strides = [1, 1]} : vector<48x128xf32> to vector<16x128xf32>
    %775 = arith.mulf %764, %774 : vector<16x128xf32>
    %776 = arith.addf %773, %775 : vector<16x128xf32>
    %777 = math.tanh %776 : vector<16x128xf32>
    %cst_191 = arith.constant 1.000000e+00 : f32
    %778 = vector.broadcast %cst_191 : f32 to vector<16x128xf32>
    %779 = arith.subf %778, %772 : vector<16x128xf32>
    %780 = arith.mulf %779, %777 : vector<16x128xf32>
    %781 = arith.mulf %772, %751 : vector<16x128xf32>
    %782 = arith.addf %780, %781 : vector<16x128xf32>
    %783 = tpu.concatenate %552, %335 in 0 : vector<16x128xf32>, vector<16x128xf32> -> vector<32x128xf32>
    %cst_192 = arith.constant dense<0.000000e+00> : vector<48x128xf32>
    %784 = tpu.matmul %554, %783, %cst_192 {dimension_numbers = #tpu.dot_dimension_numbers<[1], [0], [0], [1], [0, 0, 1, 1], [], []>} : vector<48x32xf32>, vector<32x128xf32>, vector<48x128xf32> -> vector<48x128xf32>
    %785 = arith.addf %784, %558 : vector<48x128xf32>
    %cst_193 = arith.constant dense<0.000000e+00> : vector<48x128xf32>
    %786 = tpu.matmul %564, %782, %cst_193 {dimension_numbers = #tpu.dot_dimension_numbers<[1], [0], [0], [1], [0, 0, 1, 1], [], []>} : vector<48x16xf32>, vector<16x128xf32>, vector<48x128xf32> -> vector<48x128xf32>
    %787 = arith.addf %786, %562 : vector<48x128xf32>
    %788 = vector.extract_strided_slice %785 {offsets = [0, 0], sizes = [16, 128], strides = [1, 1]} : vector<48x128xf32> to vector<16x128xf32>
    %789 = vector.extract_strided_slice %787 {offsets = [0, 0], sizes = [16, 128], strides = [1, 1]} : vector<48x128xf32> to vector<16x128xf32>
    %790 = arith.addf %788, %789 : vector<16x128xf32>
    %791 = arith.negf %790 : vector<16x128xf32>
    %792 = math.exp %791 : vector<16x128xf32>
    %cst_194 = arith.constant 1.000000e+00 : f32
    %793 = vector.broadcast %cst_194 : f32 to vector<16x128xf32>
    %794 = arith.addf %793, %792 : vector<16x128xf32>
    %795 = arith.divf %793, %794 : vector<16x128xf32>
    %796 = vector.extract_strided_slice %785 {offsets = [16, 0], sizes = [16, 128], strides = [1, 1]} : vector<48x128xf32> to vector<16x128xf32>
    %797 = vector.extract_strided_slice %787 {offsets = [16, 0], sizes = [16, 128], strides = [1, 1]} : vector<48x128xf32> to vector<16x128xf32>
    %798 = arith.addf %796, %797 : vector<16x128xf32>
    %799 = arith.negf %798 : vector<16x128xf32>
    %800 = math.exp %799 : vector<16x128xf32>
    %cst_195 = arith.constant 1.000000e+00 : f32
    %801 = vector.broadcast %cst_195 : f32 to vector<16x128xf32>
    %802 = arith.addf %801, %800 : vector<16x128xf32>
    %803 = arith.divf %801, %802 : vector<16x128xf32>
    %804 = vector.extract_strided_slice %785 {offsets = [32, 0], sizes = [16, 128], strides = [1, 1]} : vector<48x128xf32> to vector<16x128xf32>
    %805 = vector.extract_strided_slice %787 {offsets = [32, 0], sizes = [16, 128], strides = [1, 1]} : vector<48x128xf32> to vector<16x128xf32>
    %806 = arith.mulf %795, %805 : vector<16x128xf32>
    %807 = arith.addf %804, %806 : vector<16x128xf32>
    %808 = math.tanh %807 : vector<16x128xf32>
    %cst_196 = arith.constant 1.000000e+00 : f32
    %809 = vector.broadcast %cst_196 : f32 to vector<16x128xf32>
    %810 = arith.subf %809, %803 : vector<16x128xf32>
    %811 = arith.mulf %810, %808 : vector<16x128xf32>
    %812 = arith.mulf %803, %782 : vector<16x128xf32>
    %813 = arith.addf %811, %812 : vector<16x128xf32>
    %c2_197 = arith.constant 2 : index
    %c0_198 = arith.constant 0 : index
    %c0_199 = arith.constant 0 : index
    %814 = vector.load %arg3[%c2_197, %c0_198, %c0_199] : memref<3x48x32xf32, #tpu.memory_space<vmem>>, vector<1x48x32xf32>
    %815 = vector.shape_cast %814 : vector<1x48x32xf32> to vector<48x32xf32>
    %c3_200 = arith.constant 3 : index
    %c0_201 = arith.constant 0 : index
    %c0_202 = arith.constant 0 : index
    %816 = vector.load %arg5[%c3_200, %c0_201, %c0_202] : memref<4x48x1xf32, #tpu.memory_space<vmem>>, vector<1x48x1xf32>
    %817 = vector.shape_cast %816 : vector<1x48x1xf32> to vector<48x1xf32>
    %818 = vector.shape_cast %817 : vector<48x1xf32> to vector<48x1xf32>
    %819 = vector.broadcast %818 : vector<48x1xf32> to vector<48x128xf32>
    %c3_203 = arith.constant 3 : index
    %c0_204 = arith.constant 0 : index
    %c0_205 = arith.constant 0 : index
    %820 = vector.load %arg6[%c3_203, %c0_204, %c0_205] : memref<4x48x1xf32, #tpu.memory_space<vmem>>, vector<1x48x1xf32>
    %821 = vector.shape_cast %820 : vector<1x48x1xf32> to vector<48x1xf32>
    %822 = vector.shape_cast %821 : vector<48x1xf32> to vector<48x1xf32>
    %823 = vector.broadcast %822 : vector<48x1xf32> to vector<48x128xf32>
    %c3_206 = arith.constant 3 : index
    %c0_207 = arith.constant 0 : index
    %c0_208 = arith.constant 0 : index
    %824 = vector.load %arg4[%c3_206, %c0_207, %c0_208] : memref<4x48x16xf32, #tpu.memory_space<vmem>>, vector<1x48x16xf32>
    %825 = vector.shape_cast %824 : vector<1x48x16xf32> to vector<48x16xf32>
    %cst_209 = arith.constant 0.000000e+00 : f32
    %826 = vector.broadcast %cst_209 : f32 to vector<16x128xf32>
    %827 = tpu.concatenate %596, %813 in 0 : vector<16x128xf32>, vector<16x128xf32> -> vector<32x128xf32>
    %cst_210 = arith.constant dense<0.000000e+00> : vector<48x128xf32>
    %828 = tpu.matmul %815, %827, %cst_210 {dimension_numbers = #tpu.dot_dimension_numbers<[1], [0], [0], [1], [0, 0, 1, 1], [], []>} : vector<48x32xf32>, vector<32x128xf32>, vector<48x128xf32> -> vector<48x128xf32>
    %829 = arith.addf %828, %819 : vector<48x128xf32>
    %cst_211 = arith.constant dense<0.000000e+00> : vector<48x128xf32>
    %830 = tpu.matmul %825, %826, %cst_211 {dimension_numbers = #tpu.dot_dimension_numbers<[1], [0], [0], [1], [0, 0, 1, 1], [], []>} : vector<48x16xf32>, vector<16x128xf32>, vector<48x128xf32> -> vector<48x128xf32>
    %831 = arith.addf %830, %823 : vector<48x128xf32>
    %832 = vector.extract_strided_slice %829 {offsets = [0, 0], sizes = [16, 128], strides = [1, 1]} : vector<48x128xf32> to vector<16x128xf32>
    %833 = vector.extract_strided_slice %831 {offsets = [0, 0], sizes = [16, 128], strides = [1, 1]} : vector<48x128xf32> to vector<16x128xf32>
    %834 = arith.addf %832, %833 : vector<16x128xf32>
    %835 = arith.negf %834 : vector<16x128xf32>
    %836 = math.exp %835 : vector<16x128xf32>
    %cst_212 = arith.constant 1.000000e+00 : f32
    %837 = vector.broadcast %cst_212 : f32 to vector<16x128xf32>
    %838 = arith.addf %837, %836 : vector<16x128xf32>
    %839 = arith.divf %837, %838 : vector<16x128xf32>
    %840 = vector.extract_strided_slice %829 {offsets = [16, 0], sizes = [16, 128], strides = [1, 1]} : vector<48x128xf32> to vector<16x128xf32>
    %841 = vector.extract_strided_slice %831 {offsets = [16, 0], sizes = [16, 128], strides = [1, 1]} : vector<48x128xf32> to vector<16x128xf32>
    %842 = arith.addf %840, %841 : vector<16x128xf32>
    %843 = arith.negf %842 : vector<16x128xf32>
    %844 = math.exp %843 : vector<16x128xf32>
    %cst_213 = arith.constant 1.000000e+00 : f32
    %845 = vector.broadcast %cst_213 : f32 to vector<16x128xf32>
    %846 = arith.addf %845, %844 : vector<16x128xf32>
    %847 = arith.divf %845, %846 : vector<16x128xf32>
    %848 = vector.extract_strided_slice %829 {offsets = [32, 0], sizes = [16, 128], strides = [1, 1]} : vector<48x128xf32> to vector<16x128xf32>
    %849 = vector.extract_strided_slice %831 {offsets = [32, 0], sizes = [16, 128], strides = [1, 1]} : vector<48x128xf32> to vector<16x128xf32>
    %850 = arith.mulf %839, %849 : vector<16x128xf32>
    %851 = arith.addf %848, %850 : vector<16x128xf32>
    %852 = math.tanh %851 : vector<16x128xf32>
    %cst_214 = arith.constant 1.000000e+00 : f32
    %853 = vector.broadcast %cst_214 : f32 to vector<16x128xf32>
    %854 = arith.subf %853, %847 : vector<16x128xf32>
    %855 = arith.mulf %854, %852 : vector<16x128xf32>
    %856 = arith.mulf %847, %826 : vector<16x128xf32>
    %857 = arith.addf %855, %856 : vector<16x128xf32>
    %858 = tpu.concatenate %627, %782 in 0 : vector<16x128xf32>, vector<16x128xf32> -> vector<32x128xf32>
    %cst_215 = arith.constant dense<0.000000e+00> : vector<48x128xf32>
    %859 = tpu.matmul %815, %858, %cst_215 {dimension_numbers = #tpu.dot_dimension_numbers<[1], [0], [0], [1], [0, 0, 1, 1], [], []>} : vector<48x32xf32>, vector<32x128xf32>, vector<48x128xf32> -> vector<48x128xf32>
    %860 = arith.addf %859, %819 : vector<48x128xf32>
    %cst_216 = arith.constant dense<0.000000e+00> : vector<48x128xf32>
    %861 = tpu.matmul %825, %857, %cst_216 {dimension_numbers = #tpu.dot_dimension_numbers<[1], [0], [0], [1], [0, 0, 1, 1], [], []>} : vector<48x16xf32>, vector<16x128xf32>, vector<48x128xf32> -> vector<48x128xf32>
    %862 = arith.addf %861, %823 : vector<48x128xf32>
    %863 = vector.extract_strided_slice %860 {offsets = [0, 0], sizes = [16, 128], strides = [1, 1]} : vector<48x128xf32> to vector<16x128xf32>
    %864 = vector.extract_strided_slice %862 {offsets = [0, 0], sizes = [16, 128], strides = [1, 1]} : vector<48x128xf32> to vector<16x128xf32>
    %865 = arith.addf %863, %864 : vector<16x128xf32>
    %866 = arith.negf %865 : vector<16x128xf32>
    %867 = math.exp %866 : vector<16x128xf32>
    %cst_217 = arith.constant 1.000000e+00 : f32
    %868 = vector.broadcast %cst_217 : f32 to vector<16x128xf32>
    %869 = arith.addf %868, %867 : vector<16x128xf32>
    %870 = arith.divf %868, %869 : vector<16x128xf32>
    %871 = vector.extract_strided_slice %860 {offsets = [16, 0], sizes = [16, 128], strides = [1, 1]} : vector<48x128xf32> to vector<16x128xf32>
    %872 = vector.extract_strided_slice %862 {offsets = [16, 0], sizes = [16, 128], strides = [1, 1]} : vector<48x128xf32> to vector<16x128xf32>
    %873 = arith.addf %871, %872 : vector<16x128xf32>
    %874 = arith.negf %873 : vector<16x128xf32>
    %875 = math.exp %874 : vector<16x128xf32>
    %cst_218 = arith.constant 1.000000e+00 : f32
    %876 = vector.broadcast %cst_218 : f32 to vector<16x128xf32>
    %877 = arith.addf %876, %875 : vector<16x128xf32>
    %878 = arith.divf %876, %877 : vector<16x128xf32>
    %879 = vector.extract_strided_slice %860 {offsets = [32, 0], sizes = [16, 128], strides = [1, 1]} : vector<48x128xf32> to vector<16x128xf32>
    %880 = vector.extract_strided_slice %862 {offsets = [32, 0], sizes = [16, 128], strides = [1, 1]} : vector<48x128xf32> to vector<16x128xf32>
    %881 = arith.mulf %870, %880 : vector<16x128xf32>
    %882 = arith.addf %879, %881 : vector<16x128xf32>
    %883 = math.tanh %882 : vector<16x128xf32>
    %cst_219 = arith.constant 1.000000e+00 : f32
    %884 = vector.broadcast %cst_219 : f32 to vector<16x128xf32>
    %885 = arith.subf %884, %878 : vector<16x128xf32>
    %886 = arith.mulf %885, %883 : vector<16x128xf32>
    %887 = arith.mulf %878, %857 : vector<16x128xf32>
    %888 = arith.addf %886, %887 : vector<16x128xf32>
    %889 = tpu.concatenate %658, %751 in 0 : vector<16x128xf32>, vector<16x128xf32> -> vector<32x128xf32>
    %cst_220 = arith.constant dense<0.000000e+00> : vector<48x128xf32>
    %890 = tpu.matmul %815, %889, %cst_220 {dimension_numbers = #tpu.dot_dimension_numbers<[1], [0], [0], [1], [0, 0, 1, 1], [], []>} : vector<48x32xf32>, vector<32x128xf32>, vector<48x128xf32> -> vector<48x128xf32>
    %891 = arith.addf %890, %819 : vector<48x128xf32>
    %cst_221 = arith.constant dense<0.000000e+00> : vector<48x128xf32>
    %892 = tpu.matmul %825, %888, %cst_221 {dimension_numbers = #tpu.dot_dimension_numbers<[1], [0], [0], [1], [0, 0, 1, 1], [], []>} : vector<48x16xf32>, vector<16x128xf32>, vector<48x128xf32> -> vector<48x128xf32>
    %893 = arith.addf %892, %823 : vector<48x128xf32>
    %894 = vector.extract_strided_slice %891 {offsets = [0, 0], sizes = [16, 128], strides = [1, 1]} : vector<48x128xf32> to vector<16x128xf32>
    %895 = vector.extract_strided_slice %893 {offsets = [0, 0], sizes = [16, 128], strides = [1, 1]} : vector<48x128xf32> to vector<16x128xf32>
    %896 = arith.addf %894, %895 : vector<16x128xf32>
    %897 = arith.negf %896 : vector<16x128xf32>
    %898 = math.exp %897 : vector<16x128xf32>
    %cst_222 = arith.constant 1.000000e+00 : f32
    %899 = vector.broadcast %cst_222 : f32 to vector<16x128xf32>
    %900 = arith.addf %899, %898 : vector<16x128xf32>
    %901 = arith.divf %899, %900 : vector<16x128xf32>
    %902 = vector.extract_strided_slice %891 {offsets = [16, 0], sizes = [16, 128], strides = [1, 1]} : vector<48x128xf32> to vector<16x128xf32>
    %903 = vector.extract_strided_slice %893 {offsets = [16, 0], sizes = [16, 128], strides = [1, 1]} : vector<48x128xf32> to vector<16x128xf32>
    %904 = arith.addf %902, %903 : vector<16x128xf32>
    %905 = arith.negf %904 : vector<16x128xf32>
    %906 = math.exp %905 : vector<16x128xf32>
    %cst_223 = arith.constant 1.000000e+00 : f32
    %907 = vector.broadcast %cst_223 : f32 to vector<16x128xf32>
    %908 = arith.addf %907, %906 : vector<16x128xf32>
    %909 = arith.divf %907, %908 : vector<16x128xf32>
    %910 = vector.extract_strided_slice %891 {offsets = [32, 0], sizes = [16, 128], strides = [1, 1]} : vector<48x128xf32> to vector<16x128xf32>
    %911 = vector.extract_strided_slice %893 {offsets = [32, 0], sizes = [16, 128], strides = [1, 1]} : vector<48x128xf32> to vector<16x128xf32>
    %912 = arith.mulf %901, %911 : vector<16x128xf32>
    %913 = arith.addf %910, %912 : vector<16x128xf32>
    %914 = math.tanh %913 : vector<16x128xf32>
    %cst_224 = arith.constant 1.000000e+00 : f32
    %915 = vector.broadcast %cst_224 : f32 to vector<16x128xf32>
    %916 = arith.subf %915, %909 : vector<16x128xf32>
    %917 = arith.mulf %916, %914 : vector<16x128xf32>
    %918 = arith.mulf %909, %888 : vector<16x128xf32>
    %919 = arith.addf %917, %918 : vector<16x128xf32>
    %920 = tpu.concatenate %689, %720 in 0 : vector<16x128xf32>, vector<16x128xf32> -> vector<32x128xf32>
    %cst_225 = arith.constant dense<0.000000e+00> : vector<48x128xf32>
    %921 = tpu.matmul %815, %920, %cst_225 {dimension_numbers = #tpu.dot_dimension_numbers<[1], [0], [0], [1], [0, 0, 1, 1], [], []>} : vector<48x32xf32>, vector<32x128xf32>, vector<48x128xf32> -> vector<48x128xf32>
    %922 = arith.addf %921, %819 : vector<48x128xf32>
    %cst_226 = arith.constant dense<0.000000e+00> : vector<48x128xf32>
    %923 = tpu.matmul %825, %919, %cst_226 {dimension_numbers = #tpu.dot_dimension_numbers<[1], [0], [0], [1], [0, 0, 1, 1], [], []>} : vector<48x16xf32>, vector<16x128xf32>, vector<48x128xf32> -> vector<48x128xf32>
    %924 = arith.addf %923, %823 : vector<48x128xf32>
    %925 = vector.extract_strided_slice %922 {offsets = [0, 0], sizes = [16, 128], strides = [1, 1]} : vector<48x128xf32> to vector<16x128xf32>
    %926 = vector.extract_strided_slice %924 {offsets = [0, 0], sizes = [16, 128], strides = [1, 1]} : vector<48x128xf32> to vector<16x128xf32>
    %927 = arith.addf %925, %926 : vector<16x128xf32>
    %928 = arith.negf %927 : vector<16x128xf32>
    %929 = math.exp %928 : vector<16x128xf32>
    %cst_227 = arith.constant 1.000000e+00 : f32
    %930 = vector.broadcast %cst_227 : f32 to vector<16x128xf32>
    %931 = arith.addf %930, %929 : vector<16x128xf32>
    %932 = arith.divf %930, %931 : vector<16x128xf32>
    %933 = vector.extract_strided_slice %922 {offsets = [16, 0], sizes = [16, 128], strides = [1, 1]} : vector<48x128xf32> to vector<16x128xf32>
    %934 = vector.extract_strided_slice %924 {offsets = [16, 0], sizes = [16, 128], strides = [1, 1]} : vector<48x128xf32> to vector<16x128xf32>
    %935 = arith.addf %933, %934 : vector<16x128xf32>
    %936 = arith.negf %935 : vector<16x128xf32>
    %937 = math.exp %936 : vector<16x128xf32>
    %cst_228 = arith.constant 1.000000e+00 : f32
    %938 = vector.broadcast %cst_228 : f32 to vector<16x128xf32>
    %939 = arith.addf %938, %937 : vector<16x128xf32>
    %940 = arith.divf %938, %939 : vector<16x128xf32>
    %941 = vector.extract_strided_slice %922 {offsets = [32, 0], sizes = [16, 128], strides = [1, 1]} : vector<48x128xf32> to vector<16x128xf32>
    %942 = vector.extract_strided_slice %924 {offsets = [32, 0], sizes = [16, 128], strides = [1, 1]} : vector<48x128xf32> to vector<16x128xf32>
    %943 = arith.mulf %932, %942 : vector<16x128xf32>
    %944 = arith.addf %941, %943 : vector<16x128xf32>
    %945 = math.tanh %944 : vector<16x128xf32>
    %cst_229 = arith.constant 1.000000e+00 : f32
    %946 = vector.broadcast %cst_229 : f32 to vector<16x128xf32>
    %947 = arith.subf %946, %940 : vector<16x128xf32>
    %948 = arith.mulf %947, %945 : vector<16x128xf32>
    %949 = arith.mulf %940, %919 : vector<16x128xf32>
    %950 = arith.addf %948, %949 : vector<16x128xf32>
    %951 = tpu.concatenate %720, %689 in 0 : vector<16x128xf32>, vector<16x128xf32> -> vector<32x128xf32>
    %cst_230 = arith.constant dense<0.000000e+00> : vector<48x128xf32>
    %952 = tpu.matmul %815, %951, %cst_230 {dimension_numbers = #tpu.dot_dimension_numbers<[1], [0], [0], [1], [0, 0, 1, 1], [], []>} : vector<48x32xf32>, vector<32x128xf32>, vector<48x128xf32> -> vector<48x128xf32>
    %953 = arith.addf %952, %819 : vector<48x128xf32>
    %cst_231 = arith.constant dense<0.000000e+00> : vector<48x128xf32>
    %954 = tpu.matmul %825, %950, %cst_231 {dimension_numbers = #tpu.dot_dimension_numbers<[1], [0], [0], [1], [0, 0, 1, 1], [], []>} : vector<48x16xf32>, vector<16x128xf32>, vector<48x128xf32> -> vector<48x128xf32>
    %955 = arith.addf %954, %823 : vector<48x128xf32>
    %956 = vector.extract_strided_slice %953 {offsets = [0, 0], sizes = [16, 128], strides = [1, 1]} : vector<48x128xf32> to vector<16x128xf32>
    %957 = vector.extract_strided_slice %955 {offsets = [0, 0], sizes = [16, 128], strides = [1, 1]} : vector<48x128xf32> to vector<16x128xf32>
    %958 = arith.addf %956, %957 : vector<16x128xf32>
    %959 = arith.negf %958 : vector<16x128xf32>
    %960 = math.exp %959 : vector<16x128xf32>
    %cst_232 = arith.constant 1.000000e+00 : f32
    %961 = vector.broadcast %cst_232 : f32 to vector<16x128xf32>
    %962 = arith.addf %961, %960 : vector<16x128xf32>
    %963 = arith.divf %961, %962 : vector<16x128xf32>
    %964 = vector.extract_strided_slice %953 {offsets = [16, 0], sizes = [16, 128], strides = [1, 1]} : vector<48x128xf32> to vector<16x128xf32>
    %965 = vector.extract_strided_slice %955 {offsets = [16, 0], sizes = [16, 128], strides = [1, 1]} : vector<48x128xf32> to vector<16x128xf32>
    %966 = arith.addf %964, %965 : vector<16x128xf32>
    %967 = arith.negf %966 : vector<16x128xf32>
    %968 = math.exp %967 : vector<16x128xf32>
    %cst_233 = arith.constant 1.000000e+00 : f32
    %969 = vector.broadcast %cst_233 : f32 to vector<16x128xf32>
    %970 = arith.addf %969, %968 : vector<16x128xf32>
    %971 = arith.divf %969, %970 : vector<16x128xf32>
    %972 = vector.extract_strided_slice %953 {offsets = [32, 0], sizes = [16, 128], strides = [1, 1]} : vector<48x128xf32> to vector<16x128xf32>
    %973 = vector.extract_strided_slice %955 {offsets = [32, 0], sizes = [16, 128], strides = [1, 1]} : vector<48x128xf32> to vector<16x128xf32>
    %974 = arith.mulf %963, %973 : vector<16x128xf32>
    %975 = arith.addf %972, %974 : vector<16x128xf32>
    %976 = math.tanh %975 : vector<16x128xf32>
    %cst_234 = arith.constant 1.000000e+00 : f32
    %977 = vector.broadcast %cst_234 : f32 to vector<16x128xf32>
    %978 = arith.subf %977, %971 : vector<16x128xf32>
    %979 = arith.mulf %978, %976 : vector<16x128xf32>
    %980 = arith.mulf %971, %950 : vector<16x128xf32>
    %981 = arith.addf %979, %980 : vector<16x128xf32>
    %982 = tpu.concatenate %751, %658 in 0 : vector<16x128xf32>, vector<16x128xf32> -> vector<32x128xf32>
    %cst_235 = arith.constant dense<0.000000e+00> : vector<48x128xf32>
    %983 = tpu.matmul %815, %982, %cst_235 {dimension_numbers = #tpu.dot_dimension_numbers<[1], [0], [0], [1], [0, 0, 1, 1], [], []>} : vector<48x32xf32>, vector<32x128xf32>, vector<48x128xf32> -> vector<48x128xf32>
    %984 = arith.addf %983, %819 : vector<48x128xf32>
    %cst_236 = arith.constant dense<0.000000e+00> : vector<48x128xf32>
    %985 = tpu.matmul %825, %981, %cst_236 {dimension_numbers = #tpu.dot_dimension_numbers<[1], [0], [0], [1], [0, 0, 1, 1], [], []>} : vector<48x16xf32>, vector<16x128xf32>, vector<48x128xf32> -> vector<48x128xf32>
    %986 = arith.addf %985, %823 : vector<48x128xf32>
    %987 = vector.extract_strided_slice %984 {offsets = [0, 0], sizes = [16, 128], strides = [1, 1]} : vector<48x128xf32> to vector<16x128xf32>
    %988 = vector.extract_strided_slice %986 {offsets = [0, 0], sizes = [16, 128], strides = [1, 1]} : vector<48x128xf32> to vector<16x128xf32>
    %989 = arith.addf %987, %988 : vector<16x128xf32>
    %990 = arith.negf %989 : vector<16x128xf32>
    %991 = math.exp %990 : vector<16x128xf32>
    %cst_237 = arith.constant 1.000000e+00 : f32
    %992 = vector.broadcast %cst_237 : f32 to vector<16x128xf32>
    %993 = arith.addf %992, %991 : vector<16x128xf32>
    %994 = arith.divf %992, %993 : vector<16x128xf32>
    %995 = vector.extract_strided_slice %984 {offsets = [16, 0], sizes = [16, 128], strides = [1, 1]} : vector<48x128xf32> to vector<16x128xf32>
    %996 = vector.extract_strided_slice %986 {offsets = [16, 0], sizes = [16, 128], strides = [1, 1]} : vector<48x128xf32> to vector<16x128xf32>
    %997 = arith.addf %995, %996 : vector<16x128xf32>
    %998 = arith.negf %997 : vector<16x128xf32>
    %999 = math.exp %998 : vector<16x128xf32>
    %cst_238 = arith.constant 1.000000e+00 : f32
    %1000 = vector.broadcast %cst_238 : f32 to vector<16x128xf32>
    %1001 = arith.addf %1000, %999 : vector<16x128xf32>
    %1002 = arith.divf %1000, %1001 : vector<16x128xf32>
    %1003 = vector.extract_strided_slice %984 {offsets = [32, 0], sizes = [16, 128], strides = [1, 1]} : vector<48x128xf32> to vector<16x128xf32>
    %1004 = vector.extract_strided_slice %986 {offsets = [32, 0], sizes = [16, 128], strides = [1, 1]} : vector<48x128xf32> to vector<16x128xf32>
    %1005 = arith.mulf %994, %1004 : vector<16x128xf32>
    %1006 = arith.addf %1003, %1005 : vector<16x128xf32>
    %1007 = math.tanh %1006 : vector<16x128xf32>
    %cst_239 = arith.constant 1.000000e+00 : f32
    %1008 = vector.broadcast %cst_239 : f32 to vector<16x128xf32>
    %1009 = arith.subf %1008, %1002 : vector<16x128xf32>
    %1010 = arith.mulf %1009, %1007 : vector<16x128xf32>
    %1011 = arith.mulf %1002, %981 : vector<16x128xf32>
    %1012 = arith.addf %1010, %1011 : vector<16x128xf32>
    %1013 = tpu.concatenate %782, %627 in 0 : vector<16x128xf32>, vector<16x128xf32> -> vector<32x128xf32>
    %cst_240 = arith.constant dense<0.000000e+00> : vector<48x128xf32>
    %1014 = tpu.matmul %815, %1013, %cst_240 {dimension_numbers = #tpu.dot_dimension_numbers<[1], [0], [0], [1], [0, 0, 1, 1], [], []>} : vector<48x32xf32>, vector<32x128xf32>, vector<48x128xf32> -> vector<48x128xf32>
    %1015 = arith.addf %1014, %819 : vector<48x128xf32>
    %cst_241 = arith.constant dense<0.000000e+00> : vector<48x128xf32>
    %1016 = tpu.matmul %825, %1012, %cst_241 {dimension_numbers = #tpu.dot_dimension_numbers<[1], [0], [0], [1], [0, 0, 1, 1], [], []>} : vector<48x16xf32>, vector<16x128xf32>, vector<48x128xf32> -> vector<48x128xf32>
    %1017 = arith.addf %1016, %823 : vector<48x128xf32>
    %1018 = vector.extract_strided_slice %1015 {offsets = [0, 0], sizes = [16, 128], strides = [1, 1]} : vector<48x128xf32> to vector<16x128xf32>
    %1019 = vector.extract_strided_slice %1017 {offsets = [0, 0], sizes = [16, 128], strides = [1, 1]} : vector<48x128xf32> to vector<16x128xf32>
    %1020 = arith.addf %1018, %1019 : vector<16x128xf32>
    %1021 = arith.negf %1020 : vector<16x128xf32>
    %1022 = math.exp %1021 : vector<16x128xf32>
    %cst_242 = arith.constant 1.000000e+00 : f32
    %1023 = vector.broadcast %cst_242 : f32 to vector<16x128xf32>
    %1024 = arith.addf %1023, %1022 : vector<16x128xf32>
    %1025 = arith.divf %1023, %1024 : vector<16x128xf32>
    %1026 = vector.extract_strided_slice %1015 {offsets = [16, 0], sizes = [16, 128], strides = [1, 1]} : vector<48x128xf32> to vector<16x128xf32>
    %1027 = vector.extract_strided_slice %1017 {offsets = [16, 0], sizes = [16, 128], strides = [1, 1]} : vector<48x128xf32> to vector<16x128xf32>
    %1028 = arith.addf %1026, %1027 : vector<16x128xf32>
    %1029 = arith.negf %1028 : vector<16x128xf32>
    %1030 = math.exp %1029 : vector<16x128xf32>
    %cst_243 = arith.constant 1.000000e+00 : f32
    %1031 = vector.broadcast %cst_243 : f32 to vector<16x128xf32>
    %1032 = arith.addf %1031, %1030 : vector<16x128xf32>
    %1033 = arith.divf %1031, %1032 : vector<16x128xf32>
    %1034 = vector.extract_strided_slice %1015 {offsets = [32, 0], sizes = [16, 128], strides = [1, 1]} : vector<48x128xf32> to vector<16x128xf32>
    %1035 = vector.extract_strided_slice %1017 {offsets = [32, 0], sizes = [16, 128], strides = [1, 1]} : vector<48x128xf32> to vector<16x128xf32>
    %1036 = arith.mulf %1025, %1035 : vector<16x128xf32>
    %1037 = arith.addf %1034, %1036 : vector<16x128xf32>
    %1038 = math.tanh %1037 : vector<16x128xf32>
    %cst_244 = arith.constant 1.000000e+00 : f32
    %1039 = vector.broadcast %cst_244 : f32 to vector<16x128xf32>
    %1040 = arith.subf %1039, %1033 : vector<16x128xf32>
    %1041 = arith.mulf %1040, %1038 : vector<16x128xf32>
    %1042 = arith.mulf %1033, %1012 : vector<16x128xf32>
    %1043 = arith.addf %1041, %1042 : vector<16x128xf32>
    %1044 = tpu.concatenate %813, %596 in 0 : vector<16x128xf32>, vector<16x128xf32> -> vector<32x128xf32>
    %cst_245 = arith.constant dense<0.000000e+00> : vector<48x128xf32>
    %1045 = tpu.matmul %815, %1044, %cst_245 {dimension_numbers = #tpu.dot_dimension_numbers<[1], [0], [0], [1], [0, 0, 1, 1], [], []>} : vector<48x32xf32>, vector<32x128xf32>, vector<48x128xf32> -> vector<48x128xf32>
    %1046 = arith.addf %1045, %819 : vector<48x128xf32>
    %cst_246 = arith.constant dense<0.000000e+00> : vector<48x128xf32>
    %1047 = tpu.matmul %825, %1043, %cst_246 {dimension_numbers = #tpu.dot_dimension_numbers<[1], [0], [0], [1], [0, 0, 1, 1], [], []>} : vector<48x16xf32>, vector<16x128xf32>, vector<48x128xf32> -> vector<48x128xf32>
    %1048 = arith.addf %1047, %823 : vector<48x128xf32>
    %1049 = vector.extract_strided_slice %1046 {offsets = [0, 0], sizes = [16, 128], strides = [1, 1]} : vector<48x128xf32> to vector<16x128xf32>
    %1050 = vector.extract_strided_slice %1048 {offsets = [0, 0], sizes = [16, 128], strides = [1, 1]} : vector<48x128xf32> to vector<16x128xf32>
    %1051 = arith.addf %1049, %1050 : vector<16x128xf32>
    %1052 = arith.negf %1051 : vector<16x128xf32>
    %1053 = math.exp %1052 : vector<16x128xf32>
    %cst_247 = arith.constant 1.000000e+00 : f32
    %1054 = vector.broadcast %cst_247 : f32 to vector<16x128xf32>
    %1055 = arith.addf %1054, %1053 : vector<16x128xf32>
    %1056 = arith.divf %1054, %1055 : vector<16x128xf32>
    %1057 = vector.extract_strided_slice %1046 {offsets = [16, 0], sizes = [16, 128], strides = [1, 1]} : vector<48x128xf32> to vector<16x128xf32>
    %1058 = vector.extract_strided_slice %1048 {offsets = [16, 0], sizes = [16, 128], strides = [1, 1]} : vector<48x128xf32> to vector<16x128xf32>
    %1059 = arith.addf %1057, %1058 : vector<16x128xf32>
    %1060 = arith.negf %1059 : vector<16x128xf32>
    %1061 = math.exp %1060 : vector<16x128xf32>
    %cst_248 = arith.constant 1.000000e+00 : f32
    %1062 = vector.broadcast %cst_248 : f32 to vector<16x128xf32>
    %1063 = arith.addf %1062, %1061 : vector<16x128xf32>
    %1064 = arith.divf %1062, %1063 : vector<16x128xf32>
    %1065 = vector.extract_strided_slice %1046 {offsets = [32, 0], sizes = [16, 128], strides = [1, 1]} : vector<48x128xf32> to vector<16x128xf32>
    %1066 = vector.extract_strided_slice %1048 {offsets = [32, 0], sizes = [16, 128], strides = [1, 1]} : vector<48x128xf32> to vector<16x128xf32>
    %1067 = arith.mulf %1056, %1066 : vector<16x128xf32>
    %1068 = arith.addf %1065, %1067 : vector<16x128xf32>
    %1069 = math.tanh %1068 : vector<16x128xf32>
    %cst_249 = arith.constant 1.000000e+00 : f32
    %1070 = vector.broadcast %cst_249 : f32 to vector<16x128xf32>
    %1071 = arith.subf %1070, %1064 : vector<16x128xf32>
    %1072 = arith.mulf %1071, %1069 : vector<16x128xf32>
    %1073 = arith.mulf %1064, %1043 : vector<16x128xf32>
    %1074 = arith.addf %1072, %1073 : vector<16x128xf32>
    %1075 = vector.extract_strided_slice %1074 {offsets = [0, 0], sizes = [8, 128], strides = [1, 1]} : vector<16x128xf32> to vector<8x128xf32>
    %1076 = vector.extract_strided_slice %857 {offsets = [8, 0], sizes = [8, 128], strides = [1, 1]} : vector<16x128xf32> to vector<8x128xf32>
    %1077 = tpu.concatenate %1075, %1076 in 0 : vector<8x128xf32>, vector<8x128xf32> -> vector<16x128xf32>
    %c0_250 = arith.constant 0 : index
    %c0_251 = arith.constant 0 : index
    %1078 = vector.load %arg7[%c0_250, %c0_251] : memref<8x16xf32, #tpu.memory_space<vmem>>, vector<8x16xf32>
    %cst_252 = arith.constant dense<0.000000e+00> : vector<8x128xf32>
    %1079 = tpu.matmul %1078, %1077, %cst_252 {dimension_numbers = #tpu.dot_dimension_numbers<[1], [0], [0], [1], [0, 0, 1, 1], [], []>} : vector<8x16xf32>, vector<16x128xf32>, vector<8x128xf32> -> vector<8x128xf32>
    %c0_253 = arith.constant 0 : index
    %c0_254 = arith.constant 0 : index
    %1080 = vector.load %arg8[%c0_253, %c0_254] : memref<8x1xf32, #tpu.memory_space<vmem>>, vector<8x1xf32>
    %1081 = vector.broadcast %1080 : vector<8x1xf32> to vector<8x128xf32>
    %1082 = arith.addf %1079, %1081 : vector<8x128xf32>
    %cst_255 = arith.constant 0.000000e+00 : f32
    %1083 = vector.broadcast %cst_255 : f32 to vector<8x128xf32>
    %1084 = arith.cmpf oge, %1082, %1083 : vector<8x128xf32>
    %cst_256 = arith.constant 2.000000e-01 : f32
    %1085 = vector.broadcast %cst_256 : f32 to vector<8x128xf32>
    %1086 = arith.mulf %1085, %1082 : vector<8x128xf32>
    %1087 = arith.select %1084, %1082, %1086 : vector<8x128xi1>, vector<8x128xf32>
    %c0_257 = arith.constant 0 : index
    %c0_258 = arith.constant 0 : index
    %1088 = vector.load %arg9[%c0_257, %c0_258] : memref<8x8xf32, #tpu.memory_space<vmem>>, vector<8x8xf32>
    %cst_259 = arith.constant dense<0.000000e+00> : vector<8x128xf32>
    %1089 = tpu.matmul %1088, %1087, %cst_259 {dimension_numbers = #tpu.dot_dimension_numbers<[1], [0], [0], [1], [0, 0, 1, 1], [], []>} : vector<8x8xf32>, vector<8x128xf32>, vector<8x128xf32> -> vector<8x128xf32>
    %c0_260 = arith.constant 0 : index
    %c0_261 = arith.constant 0 : index
    %1090 = vector.load %arg10[%c0_260, %c0_261] : memref<8x1xf32, #tpu.memory_space<vmem>>, vector<8x1xf32>
    %1091 = vector.broadcast %1090 : vector<8x1xf32> to vector<8x128xf32>
    %1092 = arith.addf %1089, %1091 : vector<8x128xf32>
    %c0_262 = arith.constant 0 : index
    %c0_263 = arith.constant 0 : index
    %1093 = vector.load %arg11[%c0_262, %c0_263] : memref<8x128xf32, #tpu.memory_space<vmem>>, vector<8x128xf32>
    tpu.vector_store %arg11[%c0_262, %c0_263], %1092 {strides = array<i32>} : memref<8x128xf32, #tpu.memory_space<vmem>>, vector<8x128xf32>,
    return
  }
  func.func @transform_0(%arg0: i32) -> (i32, i32, i32) {
    %c0_i32 = arith.constant 0 : i32
    %c0_i32_0 = arith.constant 0 : i32
    %c0_i32_1 = arith.constant 0 : i32
    return %c0_i32, %c0_i32_0, %arg0 : i32, i32, i32
  }
  func.func @transform_1(%arg0: i32) -> (i32, i32) {
    %c0_i32 = arith.constant 0 : i32
    %c0_i32_0 = arith.constant 0 : i32
    %c0_i32_1 = arith.constant 0 : i32
    return %c0_i32, %c0_i32_0 : i32, i32
  }
  func.func @transform_2(%arg0: i32) -> (i32, i32, i32) {
    %c0_i32 = arith.constant 0 : i32
    %c0_i32_0 = arith.constant 0 : i32
    %c0_i32_1 = arith.constant 0 : i32
    %c0_i32_2 = arith.constant 0 : i32
    return %c0_i32, %c0_i32_0, %c0_i32_1 : i32, i32, i32
  }
  func.func @transform_3(%arg0: i32) -> (i32, i32, i32) {
    %c0_i32 = arith.constant 0 : i32
    %c0_i32_0 = arith.constant 0 : i32
    %c0_i32_1 = arith.constant 0 : i32
    %c0_i32_2 = arith.constant 0 : i32
    return %c0_i32, %c0_i32_0, %c0_i32_1 : i32, i32, i32
  }
  func.func @transform_4(%arg0: i32) -> (i32, i32, i32) {
    %c0_i32 = arith.constant 0 : i32
    %c0_i32_0 = arith.constant 0 : i32
    %c0_i32_1 = arith.constant 0 : i32
    %c0_i32_2 = arith.constant 0 : i32
    return %c0_i32, %c0_i32_0, %c0_i32_1 : i32, i32, i32
  }
  func.func @transform_5(%arg0: i32) -> (i32, i32, i32) {
    %c0_i32 = arith.constant 0 : i32
    %c0_i32_0 = arith.constant 0 : i32
    %c0_i32_1 = arith.constant 0 : i32
    %c0_i32_2 = arith.constant 0 : i32
    return %c0_i32, %c0_i32_0, %c0_i32_1 : i32, i32, i32
  }
  func.func @transform_6(%arg0: i32) -> (i32, i32) {
    %c0_i32 = arith.constant 0 : i32
    %c0_i32_0 = arith.constant 0 : i32
    %c0_i32_1 = arith.constant 0 : i32
    return %c0_i32, %c0_i32_0 : i32, i32
  }
  func.func @transform_7(%arg0: i32) -> (i32, i32) {
    %c0_i32 = arith.constant 0 : i32
    %c0_i32_0 = arith.constant 0 : i32
    %c0_i32_1 = arith.constant 0 : i32
    return %c0_i32, %c0_i32_0 : i32, i32
  }
  func.func @transform_8(%arg0: i32) -> (i32, i32) {
    %c0_i32 = arith.constant 0 : i32
    %c0_i32_0 = arith.constant 0 : i32
    %c0_i32_1 = arith.constant 0 : i32
    return %c0_i32, %c0_i32_0 : i32, i32
  }
  func.func @transform_9(%arg0: i32) -> (i32, i32) {
    %c0_i32 = arith.constant 0 : i32
    %c0_i32_0 = arith.constant 0 : i32
    %c0_i32_1 = arith.constant 0 : i32
    return %c0_i32, %c0_i32_0 : i32, i32
  }
  func.func @transform_10(%arg0: i32) -> (i32, i32) {
    %c0_i32 = arith.constant 0 : i32
    %c0_i32_0 = arith.constant 0 : i32
    return %c0_i32, %arg0 : i32, i32
  }
}

</mosaic_0001>

<bundles_post_ra>
// kernel: tpu_custom_call.1
= control target key start
LH: loop header
LB: loop body
LE: loop exit
PB: predicated region body
PF: predicated region fallthrough
CT: control target
= control target key end

     0   :  { %15 = vsyncpa [#allocation4], 0  ;;  %s13989_s0 = inlined_call_operand.vmem [shape: f32[8,8,256], index: 0, kind: input, shape index: {}]   ;;  %s13990_s1 = inlined_call_operand.vmem [shape: f32[48,16], index: 1, kind: input, shape index: {}]   ;;  %s13991_s2 = inlined_call_operand.vmem [shape: f32[3,48,32], index: 2, kind: input, shape index: {}]   ;;  %s13992_s3 = inlined_call_operand.vmem [shape: f32[4,48,16], index: 3, kind: input, shape index: {}]   ;;  %s13993_s4 = inlined_call_operand.vmem [shape: f32[4,48,1], index: 4, kind: input, shape index: {}]   ;;  %s13994_s5 = inlined_call_operand.vmem [shape: f32[4,48,1], index: 5, kind: input, shape index: {}]   ;;  %s13995_s6 = inlined_call_operand.vmem [shape: f32[8,16], index: 6, kind: input, shape index: {}]   ;;  %s13996_s7 = inlined_call_operand.vmem [shape: f32[8,1], index: 7, kind: input, shape index: {}]   ;;  %s13997_s8 = inlined_call_operand.vmem [shape: f32[8,8], index: 8, kind: input, shape index: {}]   ;;  %s13998_s9 = inlined_call_operand.vmem [shape: f32[8,1], index: 9, kind: input, shape index: {}]   ;;  %s13999_s10 = inlined_call_operand.hbm [shape: f32[8,256], index: 10, kind: output, shape index: {}]  }
   0x1   :  { %17 = vsyncpa [#allocation4 + $0x1], 0  ;;  %s11479_s13 = smov 0   ;;  %s11481_s14 = smov 0  }
   0x2   :  { %s11483_s15 = smov 0   ;;  %s11485_s16 = smov 0  }
   0x3 LB: > { %s8569_s17 = sadd.s32 4294967295, %s11418_s16   ;;  %s8570_s18 = sadd.s32 4294967294, %s11418_s16   ;;  %s11418_s16 = sphi %s11485_s16, %s14028_s16   ;;  %s11414_s15 = sphi %s11483_s15, %s14027_s15   ;;  %s11410_s14 = sphi %s11481_s14, %s14026_s14   ;;  %s11406_s13 = sphi %s11479_s13, %s14025_s13  }
   0x4   : > { %s11502_s19 = sadd.s32 1, %s11418_s16   ;;  %s30_s20 = sadd.s32 1, %s11414_s15 }
   0x5   : > { %s27_s21 = ssub.s32 %s11418_s16, %s11502_s19  ;;  %p37_p0 = scmp.ne.s32.totalorder %s11414_s15, %s11410_s14 }
   0x6   : > { %p28_p1 = scmp.eq.s32.totalorder %s27_s21, 0  ;;  %p38_p2 = scmp.eq.s32.totalorder %s11418_s16, 0 }
   0x7   : > { %p256_p3 = scmp.eq.s32.totalorder %s8569_s17, 1  ;;  %p261_p4 = scmp.ne.s32.totalorder %s11410_s14, %s11406_s13 }
   0x8   : > { %s11515_s22 = scalar_select %p28_p1, %s11414_s15, %s30_s20  }
   0x9   : > { %p39_p5 = por %p38_p2, %p37_p0  ;;  %p11517_p6 = por %p256_p3, %p37_p0 }
   0xa   : > { %p262_p7 = scmp.eq.s32.totalorder %s8570_s18, 1  ;;  %p8572_p9 = scmp.ge.s32.totalorder %s11418_s16, 2 }
   0xc   : > { %p11521_p8 = por %p262_p7, %p261_p4  ;;  %305 = sbr.rel (%p8572_p9) target bundleno = 25 (0x19), region = 52 }
  0x11   : > { %308 = sbr.rel (!%p39_p5) target bundleno = 25 (0x19), region = 56  ;;  %s310_s25 = sand.u32 (%p39_p5), 1, %s11414_s15  }
  0x12   : > { %s8574_s26 = sshll.u32 (%p39_p5), %s11418_s16, 3  ;;  %s8573_s27 = sshll.u32 (%p39_p5), %s310_s25, 6 }
  0x13   : > { %s314_s30 = scalar_lea.vmem (%p39_p5), %s13989_s0, %s8574_s26  ;;  %s312_s11 = scalar_lea.vmem (%p39_p5), [#allocation2], %s8573_s27 }
  0x14   : > { %v357_v0 = vld [vmem:[%s314_s30] sm:$0xff] (%p39_p5)  ;;  %v359_v1 = vld [vmem:[%s314_s30 + $0x10] sm:$0xff] (%p39_p5) }
  0x15   : > { %v361_v2 = vld [vmem:[%s314_s30 + $0x20] sm:$0xff] (%p39_p5)  ;;  %358 = vst [vmem:[%s312_s11] sm:$0xff] (%p39_p5), %v357_v0  ;;  %360 = vst [vmem:[%s312_s11 + $0x8] sm:$0xff] (%p39_p5), %v359_v1  ;;  %v363_v3 = vld [vmem:[%s314_s30 + $0x30] sm:$0xff] (%p39_p5) }
  0x16   : > { %362 = vst [vmem:[%s312_s11 + $0x10] sm:$0xff] %v361_v2  ;;  %v365_v4 = vld [vmem:[%s314_s30 + $0x40] sm:$0xff]  ;;  %v367_v5 = vld [vmem:[%s314_s30 + $0x50] sm:$0xff]  ;;  %364 = vst [vmem:[%s312_s11 + $0x18] sm:$0xff] %v363_v3 }
  0x17   : > { %366 = vst [vmem:[%s312_s11 + $0x20] sm:$0xff] %v365_v4  ;;  %368 = vst [vmem:[%s312_s11 + $0x28] sm:$0xff] %v367_v5  ;;  %v369_v6 = vld [vmem:[%s314_s30 + $0x60] sm:$0xff]  ;;  %v371_v7 = vld [vmem:[%s314_s30 + $0x70] sm:$0xff] }
  0x18   : > { %370 = vst [vmem:[%s312_s11 + $0x30] sm:$0xff] %v369_v6  ;;  %372 = vst [vmem:[%s312_s11 + $0x38] sm:$0xff] %v371_v7 }
  0x19 PF: > { %p8575_p10 = scmp.ge.s32.totalorder %s11418_s16, 1  ;;  %p377_p11 = scmp.lt.s32.totalorder %s11418_s16, 3 }
  0x1b   : > { %p378_p12 = pnand %p8575_p10, %p377_p11 }
  0x1d   : > { %381 = sbr.rel (%p378_p12) target bundleno = 8621 (0x21ad), region = 94 }
  0x22   : > { %v11538_v8 = vld [vmem:[%s13992_s3] sm:$0xff]  ;;  %vm508_vm0 = vcmask 130048   ;;  %v428_v9 = vld [vmem:[%s13993_s4 + $0x8] sm:$0xff]  ;;  %v14000_v10 = vmov 0.0   ;;  %v11421_v11 = vmov 0   ;;  %s11553_s29 = sand.u32 1, %s11410_s14  }
  0x23   : > { %9741 = vmatprep.subr.mxu1 %v14000_v10  ;;  %10703 = vset.pattern.permute.xlu1 %v11421_v11  ;;  %v427_v12 = vld [vmem:[%s13993_s4] sm:$0xff]  ;;  %v11550_v13 = vld [vmem:[%s13992_s3 + $0x8] sm:$0xff]  ;;  %s8576_s30 = sshll.u32 %s11553_s29, 6  ;;  %v11560_v14 = vld [vmem:[%s13992_s3 + $0x10] sm:$0xff]  ;;  %vm2500_vm1 = vcmask 261120   ;;  %vm11422_vm2 = vmmov 0  }
  0x24   : > { %10702 = vset.pattern.permute.xlu0 %v11421_v11  ;;  %9742 = vmatpush3.msra.mxu1 %v14000_v10  ;;  %v11567_v15 = vld [vmem:[%s13990_s1] sm:$0xff]  ;;  %s11571_s21 = scalar_lea.vmem [#allocation2], %s8576_s30  ;;  %v464_v17 = vld [vmem:[%s13994_s5 + $0x8] sm:$0xff]  ;;  %v11594_v20 = vld [vmem:[%s13992_s3 + $0x18] sm:$0xff]  ;;  %vm8416_vm4 = vcmask 64512   ;;  %s9164_s26 = sshll.u32 %s8569_s17, 7 }
  0x25   : > { %9743 = vmatprep.mubr.msk.f32.mxu1 %vm508_vm0, %v11538_v8  ;;  %440 = vperm.xlu0 %10702, %v428_v9   ;;  %v11574_v16 = vld [vmem:[%s11571_s21 + $0x38] sm:$0xff]  ;;  %v11580_v18 = vld [vmem:[%s11571_s21] sm:$0xff]  ;;  %v11599_v21 = vld [vmem:[%s13990_s1 + $0x8] sm:$0xff]  ;;  %s13952_s12 = scalar_lea.hbm %s13999_s10, %s9164_s26  ;;  %s8492_s18 = scalar_lea.sflag [#allocation4], %s11553_s29 }
  0x26   : > { %435 = vperm.xlu1 %10703, %v427_v12   ;;  %9744 = vmatmul.mubr.msk.f32.vlgmr.msra.gmra.mxu1 %vm508_vm0, %v11550_v13  ;;  %v463_v19 = vld [vmem:[%s13994_s5] sm:$0xff]  ;;  %v11610_v23 = vld [vmem:[%s13990_s1 + $0x10] sm:$0xff]  ;;  %v430_v24 = vld [vmem:[%s13993_s4 + $0x18] sm:$0xff]  ;;  %s11423_s17 = smov [#allocation3]  }
  0x27   : > { %9728 = vmatprep.subr.mxu0 %v11574_v16  ;;  %9746 = vmatprep.mubr.msk.f32.mxu1 %vm508_vm0, %v11560_v14  ;;  %v11605_v22 = vld [vmem:[%s13992_s3 + $0x20] sm:$0xff]  ;;  %v11617_v25 = vld [vmem:[%s11571_s21 + $0x30] sm:$0xff]  ;;  %v466_v26 = vld [vmem:[%s13994_s5 + $0x18] sm:$0xff]  ;;  %s11362_s25 = sshll.u32 %s11423_s17, 4  ;;  %s11363_s25 = int_to_ptr.vmem [resolvable:$false] %s11362_s25 }
  0x28   : > { %9729 = vmatpush3.msra.mxu0 %v11574_v16  ;;  %9732 = vmatprep.mubr.msk.f32.mxu0 %vm508_vm0, %v11567_v15  ;;  %v11633_v27 = vld [vmem:[%s13992_s3 + $0x28] sm:$0xff]  ;;  %v11638_v28 = vld [vmem:[%s13990_s1 + $0x18] sm:$0xff]  ;;  %v429_v30 = vld [vmem:[%s13993_s4 + $0x10] sm:$0xff] }
  0x29   : > { %476 = vperm.xlu0 %10702, %v464_v17   ;;  %9730 = vmatprep.subr.mxu0 %v11580_v18  ;;  %v11642_v29 = vld [vmem:[%s11571_s21 + $0x8] sm:$0xff]  ;;  %v465_v31 = vld [vmem:[%s13994_s5 + $0x10] sm:$0xff]  ;;  %v11658_v32 = vld [vmem:[%s13990_s1 + $0x20] sm:$0xff] }
  0x2a   : > { %471 = vperm.xlu1 %10703, %v463_v19   ;;  %9731 = vmatpush3.msra.mxu0 %v11580_v18  ;;  %v11666_v33 = vld [vmem:[%s13990_s1 + $0x28] sm:$0xff]  ;;  %v11685_v37 = vld [vmem:[%s11571_s21 + $0x10] sm:$0xff]  ;;  %v467_v38 = vld [vmem:[%s13994_s5 + $0x20] sm:$0xff] }
  0x2b   : > { %9747 = vmatmul.mubr.msk.f32.gmra.mxu1 %vm508_vm0, %v11594_v20  ;;  %9733 = vmatmul.mubr.msk.f32.vlgmr.msra.gmra.mxu0 %vm508_vm0, %v11599_v21  ;;  %v11670_v34 = vld [vmem:[%s11571_s21 + $0x28] sm:$0xff]  ;;  %v8632_v39 = vld [vmem:[%s11571_s21 + $0x20] sm:$0xff]  ;;  %v8714_v41 = vld [vmem:[%s13993_s4 + $0x38] sm:$0xff] }
  0x2c   : > { %9749 = vmatprep.mubr.msk.f32.mxu1 %vm508_vm0, %v11605_v22  ;;  %9735 = vmatprep.mubr.msk.f32.mxu0 %vm508_vm0, %v11610_v23  ;;  %v468_v35 = vld [vmem:[%s13994_s5 + $0x28] sm:$0xff]  ;;  %v431_v40 = vld [vmem:[%s13993_s4 + $0x20] sm:$0xff]  ;;  %v8720_v42 = vld [vmem:[%s13994_s5 + $0x38] sm:$0xff] }
  0x2d   : > { %450 = vperm.xlu0 %10702, %v430_v24   ;;  %9752 = vmatprep.subr.mxu1 %v11617_v25  ;;  %v432_v36 = vld [vmem:[%s13993_s4 + $0x28] sm:$0xff]  ;;  %v8713_v43 = vld [vmem:[%s13993_s4 + $0x30] sm:$0xff]  ;;  %v8631_v44 = vld [vmem:[%s11571_s21 + $0x18] sm:$0xff]  ;;  %s8577_s21 = sshll.u32 %s11553_s29, 3 }
  0x2e   : > { %486 = vperm.xlu1 %10703, %v466_v26   ;;  %9753 = vmatpush3.msra.mxu1 %v11617_v25  ;;  %v8719_v45 = vld [vmem:[%s13994_s5 + $0x30] sm:$0xff]  ;;  %v8716_v46 = vld [vmem:[%s13993_s4 + $0x48] sm:$0xff]  ;;  %v8715_v48 = vld [vmem:[%s13993_s4 + $0x40] sm:$0xff]  ;;  %s420_s27 = scalar_lea.vmem [#allocation3], %s8577_s21  ;;  %s11364_s21 = scalar_lea.vmem %s11363_s25, 256 }
  0x2f   : > { %9750 = vmatmul.mubr.msk.f32.gmra.mxu1 %vm508_vm0, %v11633_v27  ;;  %9736 = vmatmul.mubr.msk.f32.gmra.mxu0 %vm508_vm0, %v11638_v28  ;;  %v8722_v47 = vld [vmem:[%s13994_s5 + $0x48] sm:$0xff]  ;;  %v8721_v49 = vld [vmem:[%s13994_s5 + $0x40] sm:$0xff]  ;;  %v8724_v50 = vld [vmem:[%s13994_s5 + $0x58] sm:$0xff]  ;;  %s8505_s28 = sshll.u32 %s420_s27, 4  ;;  %s8506_s28 = int_to_ptr.vmem [resolvable:$true] %s8505_s28 }
  0x30   : > { %9754 = vmatprep.subr.mxu1 %v11642_v29  ;;  %9756 = vmatprep.mubr.msk.f32.mxu1 %vm508_vm0, %v11567_v15  ;;  %v8718_v51 = vld [vmem:[%s13993_s4 + $0x58] sm:$0xff]  ;;  %v8723_v52 = vld [vmem:[%s13994_s5 + $0x50] sm:$0xff]  ;;  %v8866_v54 = vld [vmem:[%s13993_s4 + $0x68] sm:$0xff]  ;;  %s11358_s20 = scalar_lea.vmem %s8506_s28, 128  ;;  %p11365_p2 = scmp.lt.s32.totalorder %s8506_s28, %s11363_s25 }
  0x31   : > { %445 = vperm.xlu0 %10702, %v429_v30   ;;  %9755 = vmatpush3.msra.mxu1 %v11642_v29  ;;  %v8717_v53 = vld [vmem:[%s13993_s4 + $0x50] sm:$0xff]  ;;  %v8872_v55 = vld [vmem:[%s13994_s5 + $0x68] sm:$0xff]  ;;  %v8865_v56 = vld [vmem:[%s13993_s4 + $0x60] sm:$0xff]  ;;  %p11359_p13 = scmp.ne.s32.totalorder %s8506_s28, %s11358_s20  ;;  %p11366_p3 = scmp.lt.s32.totalorder %s11364_s21, %s11358_s20 }
  0x32   : > { %481 = vperm.xlu1 %10703, %v465_v31   ;;  %9738 = vmatprep.mubr.msk.f32.mxu0 %vm508_vm0, %v11658_v32  ;;  %v8871_v57 = vld [vmem:[%s13994_s5 + $0x60] sm:$0xff]  ;;  %v8868_v58 = vld [vmem:[%s13993_s4 + $0x78] sm:$0xff]  ;;  %v8867_v60 = vld [vmem:[%s13993_s4 + $0x70] sm:$0xff] }
  0x33   : > { %9757 = vmatmul.mubr.msk.f32.vlgmr.msra.gmra.mxu1 %vm508_vm0, %v11599_v21  ;;  %9739 = vmatmul.mubr.msk.f32.gmra.mxu0 %vm508_vm0, %v11666_v33  ;;  %v8874_v59 = vld [vmem:[%s13994_s5 + $0x78] sm:$0xff]  ;;  %v8873_v61 = vld [vmem:[%s13994_s5 + $0x70] sm:$0xff]  ;;  %v8876_v62 = vld [vmem:[%s13994_s5 + $0x88] sm:$0xff]  ;;  %p11360_p0 = pnand %p11359_p13, %p11517_p6  ;;  %p11367_p4 = por %p11366_p3, %p11365_p2 }
  0x34   : > { %9759 = vmatprep.mubr.msk.f32.mxu1 %vm508_vm0, %v11610_v23  ;;  %9778 = vmatprep.subr.mxu1 %v11670_v34  ;;  %v8870_v63 = vld [vmem:[%s13993_s4 + $0x88] sm:$0xff]  ;;  %v8875_v0 = vld [vmem:[%s13994_s5 + $0x80] sm:$0xff]  ;;  %v9018_v2 = vld [vmem:[%s13993_s4 + $0x98] sm:$0xff] }
  0x35   : > { %496 = vperm.xlu0 %10702, %v468_v35   ;;  %9779 = vmatpush3.msra.mxu1 %v11670_v34  ;;  %v8869_v1 = vld [vmem:[%s13993_s4 + $0x80] sm:$0xff]  ;;  %v9024_v3 = vld [vmem:[%s13994_s5 + $0x98] sm:$0xff]  ;;  %v9017_v4 = vld [vmem:[%s13993_s4 + $0x90] sm:$0xff]  ;;  %p11361_p1 = pneg %p11360_p0 }
  0x36   : > { %460 = vperm.xlu1 %10703, %v432_v36   ;;  %9780 = vmatprep.subr.mxu1 %v11685_v37  ;;  %v9023_v5 = vld [vmem:[%s13994_s5 + $0x90] sm:$0xff]  ;;  %v9020_v6 = vld [vmem:[%s13993_s4 + $0xa8] sm:$0xff]  ;;  %v9019_v9 = vld [vmem:[%s13993_s4 + $0xa0] sm:$0xff] }
  0x37   : > { %9760 = vmatmul.mubr.msk.f32.gmra.mxu1 %vm508_vm0, %v11638_v28  ;;  %9769 = vmatprep.mubr.msk.f32.mxu0 %vm508_vm0, %v11538_v8  ;;  %v9026_v7 = vld [vmem:[%s13994_s5 + $0xa8] sm:$0xff]  ;;  %v9025_v11 = vld [vmem:[%s13994_s5 + $0xa0] sm:$0xff]  ;;  %v9028_v12 = vld [vmem:[%s13994_s5 + $0xb8] sm:$0xff]  ;;  %p11368_p5 = pnand %p11367_p4, %p11361_p1 }
  0x38   : > { %9762 = vmatprep.mubr.msk.f32.mxu1 %vm508_vm0, %v11658_v32  ;;  %9781 = vmatpush3.msra.mxu1 %v11685_v37  ;;  %v9021_v17 = vld [vmem:[%s13993_s4 + $0xb0] sm:$0xff]  ;;  %v8410_v19 = vld [vmem:[%s13998_s9] sm:$0xff] }
  0x39   : > { %491 = vperm.xlu0 %10702, %v467_v38   ;;  %9804 = vmatprep.subr.mxu1 %v8632_v39 }
  0x3a   : > { %455 = vperm.xlu1 %10703, %v431_v40  }
  0x3b   : > { %9763 = vmatmul.mubr.msk.f32.gmra.mxu1 %vm508_vm0, %v11666_v33 }
  0x3c   : > { %9782 = vmatprep.mubr.msk.f32.mxu1 %vm508_vm0, %v11567_v15 }
  0x3d   : > { %2433 = vperm.xlu0 %10702, %v8714_v41  }
  0x3e   : > { %2470 = vperm.xlu1 %10703, %v8720_v42  }
  0x3f   : > { %9783 = vmatmul.mubr.msk.f32.vlgmr.msra.gmra.mxu1 %vm508_vm0, %v11599_v21 }
  0x40   : > { %9785 = vmatprep.mubr.msk.f32.mxu1 %vm508_vm0, %v11610_v23  ;;  %9805 = vmatpush3.msra.mxu1 %v8632_v39 }
  0x41   : > { %2428 = vperm.xlu0 %10702, %v8713_v43   ;;  %9806 = vmatprep.subr.mxu1 %v8631_v44 }
  0x42   : > { %2465 = vperm.xlu1 %10703, %v8719_v45   ;;  %9807 = vmatpush3.msra.mxu1 %v8631_v44 }
  0x43   : > { %9786 = vmatmul.mubr.msk.f32.gmra.mxu1 %vm508_vm0, %v11638_v28  ;;  %9830 = vmatprep.subr.mxu1 %v8631_v44 }
  0x44   : > { %9788 = vmatprep.mubr.msk.f32.mxu1 %vm508_vm0, %v11658_v32 }
  0x45   : > { %2443 = vperm.xlu0 %10702, %v8716_v46  }
  0x46   : > { %2480 = vperm.xlu1 %10703, %v8722_v47  }
  0x47   : > { %9789 = vmatmul.mubr.msk.f32.gmra.mxu1 %vm508_vm0, %v11666_v33 }
  0x48   : > { %9808 = vmatprep.mubr.msk.f32.mxu1 %vm508_vm0, %v11567_v15 }
  0x49   : > { %2438 = vperm.xlu0 %10702, %v8715_v48  }
  0x4a   : > { %2475 = vperm.xlu1 %10703, %v8721_v49  }
  0x4b   : > { %9809 = vmatmul.mubr.msk.f32.vlgmr.msra.gmra.mxu1 %vm508_vm0, %v11599_v21 }
  0x4c   : > { %9811 = vmatprep.mubr.msk.f32.mxu1 %vm508_vm0, %v11610_v23  ;;  %9831 = vmatpush3.msra.mxu1 %v8631_v44 }
  0x4d   : > { %2490 = vperm.xlu0 %10702, %v8724_v50   ;;  %9832 = vmatprep.subr.mxu1 %v8632_v39 }
  0x4e   : > { %2453 = vperm.xlu1 %10703, %v8718_v51   ;;  %9833 = vmatpush3.msra.mxu1 %v8632_v39 }
  0x4f   : > { %9812 = vmatmul.mubr.msk.f32.gmra.mxu1 %vm508_vm0, %v11638_v28  ;;  %9856 = vmatprep.subr.mxu1 %v11685_v37 }
  0x50   : > { %9814 = vmatprep.mubr.msk.f32.mxu1 %vm508_vm0, %v11658_v32 }
  0x51   : > { %2485 = vperm.xlu0 %10702, %v8723_v52  }
  0x52   : > { %2448 = vperm.xlu1 %10703, %v8717_v53  }
  0x53   : > { %9815 = vmatmul.mubr.msk.f32.gmra.mxu1 %vm508_vm0, %v11666_v33 }
  0x54   : > { %9834 = vmatprep.mubr.msk.f32.mxu1 %vm508_vm0, %v11567_v15 }
  0x55   : > { %4414 = vperm.xlu0 %10702, %v8866_v54  }
  0x56   : > { %4451 = vperm.xlu1 %10703, %v8872_v55  }
  0x57   : > { %9835 = vmatmul.mubr.msk.f32.vlgmr.msra.gmra.mxu1 %vm508_vm0, %v11599_v21 }
  0x58   : > { %9837 = vmatprep.mubr.msk.f32.mxu1 %vm508_vm0, %v11610_v23  ;;  %9857 = vmatpush3.msra.mxu1 %v11685_v37 }
  0x59   : > { %4409 = vperm.xlu0 %10702, %v8865_v56   ;;  %9858 = vmatprep.subr.mxu1 %v11670_v34 }
  0x5a   : > { %4446 = vperm.xlu1 %10703, %v8871_v57   ;;  %9859 = vmatpush3.msra.mxu1 %v11670_v34 }
  0x5b   : > { %9838 = vmatmul.mubr.msk.f32.gmra.mxu1 %vm508_vm0, %v11638_v28  ;;  %9882 = vmatprep.subr.mxu1 %v11642_v29 }
  0x5c   : > { %9840 = vmatprep.mubr.msk.f32.mxu1 %vm508_vm0, %v11658_v32 }
  0x5d   : > { %4424 = vperm.xlu0 %10702, %v8868_v58  }
  0x5e   : > { %4461 = vperm.xlu1 %10703, %v8874_v59  }
  0x5f   : > { %9841 = vmatmul.mubr.msk.f32.gmra.mxu1 %vm508_vm0, %v11666_v33 }
  0x60   : > { %9860 = vmatprep.mubr.msk.f32.mxu1 %vm508_vm0, %v11567_v15 }
  0x61   : > { %4419 = vperm.xlu0 %10702, %v8867_v60  }
  0x62   : > { %4456 = vperm.xlu1 %10703, %v8873_v61  }
  0x63   : > { %9861 = vmatmul.mubr.msk.f32.vlgmr.msra.gmra.mxu1 %vm508_vm0, %v11599_v21 }
  0x64   : > { %9863 = vmatprep.mubr.msk.f32.mxu1 %vm508_vm0, %v11610_v23  ;;  %9883 = vmatpush3.msra.mxu1 %v11642_v29 }
  0x65   : > { %4471 = vperm.xlu0 %10702, %v8876_v62   ;;  %9884 = vmatprep.subr.mxu1 %v11617_v25 }
  0x66   : > { %4434 = vperm.xlu1 %10703, %v8870_v63   ;;  %9885 = vmatpush3.msra.mxu1 %v11617_v25 }
  0x67   : > { %9864 = vmatmul.mubr.msk.f32.gmra.mxu1 %vm508_vm0, %v11638_v28  ;;  %9908 = vmatprep.subr.mxu1 %v11580_v18 }
  0x68   : > { %9866 = vmatprep.mubr.msk.f32.mxu1 %vm508_vm0, %v11658_v32 }
  0x69   : > { %4466 = vperm.xlu0 %10702, %v8875_v0  }
  0x6a   : > { %4429 = vperm.xlu1 %10703, %v8869_v1  }
  0x6b   : > { %9867 = vmatmul.mubr.msk.f32.gmra.mxu1 %vm508_vm0, %v11666_v33 }
  0x6c   : > { %9886 = vmatprep.mubr.msk.f32.mxu1 %vm508_vm0, %v11567_v15 }
  0x6d   : > { %6394 = vperm.xlu0 %10702, %v9018_v2  }
  0x6e   : > { %6431 = vperm.xlu1 %10703, %v9024_v3  }
  0x6f   : > { %9887 = vmatmul.mubr.msk.f32.vlgmr.msra.gmra.mxu1 %vm508_vm0, %v11599_v21 }
  0x70   : > { %9889 = vmatprep.mubr.msk.f32.mxu1 %vm508_vm0, %v11610_v23  ;;  %9909 = vmatpush3.msra.mxu1 %v11580_v18  ;;  %v8327_v18 = vld [vmem:[%s13996_s7] sm:$0xff] }
  0x71   : > { %6389 = vperm.xlu0 %10702, %v9017_v4   ;;  %9910 = vmatprep.subr.mxu1 %v11574_v16 }
  0x72   : > { %6426 = vperm.xlu1 %10703, %v9023_v5   ;;  %9911 = vmatpush3.msra.mxu1 %v11574_v16  ;;  %v9022_v16 = vld [vmem:[%s13993_s4 + $0xb8] sm:$0xff] }
  0x73   : > { %9890 = vmatmul.mubr.msk.f32.gmra.mxu1 %vm508_vm0, %v11638_v28 }
  0x74   : > { %9892 = vmatprep.mubr.msk.f32.mxu1 %vm508_vm0, %v11658_v32 }
  0x75   : > { %6404 = vperm.xlu0 %10702, %v9020_v6  }
  0x76   : > { %6441 = vperm.xlu1 %10703, %v9026_v7  }
  0x77   : > { %9893 = vmatmul.mubr.msk.f32.gmra.mxu1 %vm508_vm0, %v11666_v33 }
  0x78   : > { %9912 = vmatprep.mubr.msk.f32.mxu1 %vm508_vm0, %v11567_v15  ;;  %v9027_v15 = vld [vmem:[%s13994_s5 + $0xb0] sm:$0xff] }
  0x79   : > { %6399 = vperm.xlu0 %10702, %v9019_v9  }
  0x7a   : > { %6436 = vperm.xlu1 %10703, %v9025_v11  }
  0x7b   : > { %9913 = vmatmul.mubr.msk.f32.vlgmr.msra.gmra.mxu1 %vm508_vm0, %v11599_v21 }
  0x7c   : > { %9915 = vmatprep.mubr.msk.f32.mxu1 %vm508_vm0, %v11610_v23 }
  0x7d   : > { %6451 = vperm.xlu0 %10702, %v9028_v12  }
  0x7e   : > { %6414 = vperm.xlu1 %10703, %v9022_v16  }
  0x7f   : > { %9916 = vmatmul.mubr.msk.f32.gmra.mxu1 %vm508_vm0, %v11638_v28 }
  0x80   : > { %9918 = vmatprep.mubr.msk.f32.mxu1 %vm508_vm0, %v11658_v32 }
  0x81   : > { %6446 = vperm.xlu0 %10702, %v9027_v15  }
  0x82   : > { %6409 = vperm.xlu1 %10703, %v9021_v17  }
  0x83   : > { %9919 = vmatmul.mubr.msk.f32.gmra.mxu1 %vm508_vm0, %v11666_v33 }
  0x85   : > { %8330 = vperm.xlu0 %10702, %v8327_v18  }
  0x86   : > { %8413 = vperm.xlu1 %10703, %v8410_v19  }
  0xa0   : > { %v11907_v21 = vpop.permute.xlu0 %440 }
  0xa1   : > { %v11909_v23 = vpop.permute.xlu1 %435 }
  0xa4   : > { %v11911_v24 = vpop.permute.xlu0 %476 }
  0xa5   : > { %v11913_v26 = vpop.permute.xlu1 %471 }
  0xa8   : > { %v11915_v29 = vpop.permute.xlu0 %450 }
  0xa9   : > { %v11919_v33 = vpop.permute.xlu1 %486 }
  0xac   : > { %v11923_v41 = vpop.permute.xlu0 %445 }
  0xad   : > { %v11928_v49 = vpop.permute.xlu1 %481 }
  0xb0   : > { %v11931_v60 = vpop.permute.xlu0 %496 }
  0xb1   : > { %v11933_v63 = vpop.permute.xlu1 %460 }
  0xb4   : > { %v11936_v6 = vpop.permute.xlu0 %491 }
  0xb5   : > { %v11940_v15 = vpop.permute.xlu1 %455 }
  0xe6   : > { %v9745_v25 = vpop.f32.mrf.mxu1 }
  0xe7   : > { %v712_v31 = vadd.f32 %v9745_v25, %v11911_v24 }
  0xe8   : > { %v706_v28 = vpop.f32.mrf.mxu1 }
  0xe9   : > { %v707_v37 = vadd.f32 %v706_v28, %v11913_v26 }
  0xeb   : > { %v9734_v30 = vpop.f32.mrf.mxu0  ;;  %v9748_v34 = vpop.f32.mrf.mxu1 }
  0xec   : > { %v599_v32 = vadd.f32 %v9734_v30, %v11907_v21  ;;  %v722_v44 = vadd.f32 %v9748_v34, %v11919_v33 }
  0xed   : > { %v593_v36 = vpop.f32.mrf.mxu0  ;;  %v716_v45 = vpop.f32.mrf.mxu1 }
  0xee   : > { %v736_v35 = vadd.f32 %v712_v31, %v599_v32  ;;  %v594_v38 = vadd.f32 %v593_v36, %v11909_v23  ;;  %v717_v51 = vadd.f32 %v716_v45, %v11928_v49 }
  0xef   : > { %v9737_v40 = vpop.f32.mrf.mxu0  ;;  %v9751_v61 = vpop.f32.mrf.mxu1 }
  0xf0   : > { %v8592_v39 = vmul.f32 -1.442695, %v736_v35  ;;  %v735_v42 = vadd.f32 %v707_v37, %v594_v38  ;;  %v609_v43 = vadd.f32 %v9737_v40, %v11915_v29  ;;  %v732_v2 = vadd.f32 %v9751_v61, %v11931_v60 }
  0xf1   : > { %v603_v46 = vpop.f32.mrf.mxu0  ;;  %v726_v3 = vpop.f32.mrf.mxu1 }
  0xf2   : > { %10704 = vpow2.f32 %v8592_v39  ;;  %v8591_v47 = vmul.f32 -1.442695, %v735_v42  ;;  %v604_v48 = vadd.f32 %v603_v46, %v11923_v41  ;;  %v750_v50 = vadd.f32 %v722_v44, %v609_v43 }
  0xf3   : > { %v9740_v1 = vpop.f32.mrf.mxu0  ;;  %v727_v12 = vadd.f32 %v726_v3, %v11936_v6  ;;  %v9758_v43 = vpop.f32.mrf.mxu1 }
  0xf4   : > { %10706 = vpow2.f32 %v8591_v47  ;;  %v749_v52 = vadd.f32 %v717_v51, %v604_v48  ;;  %v8594_v53 = vmul.f32 -1.442695, %v750_v50  ;;  %v619_v9 = vadd.f32 %v9740_v1, %v11933_v63 }
  0xf5   : > { %v613_v11 = vpop.f32.mrf.mxu0  ;;  %v847_v44 = vpop.f32.mrf.mxu1  ;;  %v853_v46 = vadd.f32 %v9758_v43, %v11907_v21 }
  0xf6   : > { %v8593_v54 = vmul.f32 -1.442695, %v749_v52  ;;  %10708 = vpow2.f32 %v8594_v53  ;;  %v614_v19 = vadd.f32 %v613_v11, %v11940_v15  ;;  %v848_v51 = vadd.f32 %v847_v44, %v11909_v23 }
  0xf7   : > { %v9761_v48 = vpop.f32.mrf.mxu1 }
  0xf8   : > { %10710 = vpow2.f32 %v8593_v54  ;;  %v863_v61 = vadd.f32 %v9761_v48, %v11915_v29 }
  0xff   : > { %v10705_v55 = vpop.eup %10704 }
 0x100   : > { %v744_v56 = vadd.f32 1.0, %v10705_v55 }
 0x101   : > { %v10707_v57 = vpop.eup %10706 }
 0x102   : > { %10712 = vrcp.f32 %v744_v56  ;;  %v743_v58 = vadd.f32 1.0, %v10707_v57 }
 0x103   : > { %v10709_v59 = vpop.eup %10708 }
 0x104   : > { %10714 = vrcp.f32 %v743_v58  ;;  %v758_v0 = vadd.f32 1.0, %v10709_v59  ;;  %v857_v58 = vpop.f32.mrf.mxu1 }
 0x105   : > { %v10711_v62 = vpop.eup %10710  ;;  %v858_v1 = vadd.f32 %v857_v58, %v11923_v41 }
 0x106   : > { %v757_v5 = vadd.f32 1.0, %v10711_v62  ;;  %10716 = vrcp.f32 %v758_v0 }
 0x108   : > { %10718 = vrcp.f32 %v757_v5 }
 0x10f   : > { %v10713_v4 = vpop.eup %10712 }
 0x110   : > { %v764_v7 = vmul.f32 %v10713_v4, %v732_v2 }
 0x111   : > { %v10715_v16 = vpop.eup %10714 }
 0x112   : > { %v766_v17 = vadd.f32 %v764_v7, %v619_v9  ;;  %v763_v18 = vmul.f32 %v10715_v16, %v727_v12 }
 0x113   : > { %v10717_v28 = vpop.eup %10716 }
 0x114   : > { %10720 = vtanh.f32 %v766_v17  ;;  %v765_v25 = vadd.f32 %v763_v18, %v614_v19  ;;  %v770_v31 = vsub.f32 1.0, %v10717_v28  ;;  %v774_v35 = vmul.f32 0.0, %v10717_v28  ;;  %v9764_v19 = vpop.f32.mrf.mxu1 }
 0x115   : > { %v10719_v30 = vpop.eup %10718 }
 0x116   : > { %10722 = vtanh.f32 %v765_v25  ;;  %v769_v36 = vsub.f32 1.0, %v10719_v30  ;;  %v773_v40 = vmul.f32 0.0, %v10719_v30 }
 0x121   : > { %v10721_v32 = vpop.eup %10720 }
 0x122   : > { %v772_v34 = vmul.f32 %v10721_v32, %v770_v31 }
 0x123   : > { %v10723_v37 = vpop.eup %10722 }
 0x124   : > { %v11943_v38 = vadd.f32 %v774_v35, %v772_v34  ;;  %v771_v39 = vmul.f32 %v10723_v37, %v769_v36  ;;  %v867_v34 = vpop.f32.mrf.mxu1  ;;  %v873_v35 = vadd.f32 %v9764_v19, %v11933_v63 }
 0x126   : > { %9765 = vmatprep.subr.mxu0 %v11943_v38  ;;  %v11946_v42 = vadd.f32 %v773_v40, %v771_v39  ;;  %v868_v40 = vadd.f32 %v867_v34, %v11940_v15 }
 0x127   : > { %9766 = vmatpush3.msra.mxu0 %v11943_v38 }
 0x128   : > { %9767 = vmatprep.subr.mxu0 %v11946_v42 }
 0x129   : > { %9768 = vmatpush3.msra.mxu0 %v11946_v42 }
 0x12a   : > { %9770 = vmatmul.mubr.msk.f32.vlgmr.msra.gmra.mxu0 %vm508_vm0, %v11550_v13 }
 0x12b   : > { %9772 = vmatprep.mubr.msk.f32.mxu0 %vm508_vm0, %v11560_v14 }
 0x12e   : > { %9773 = vmatmul.mubr.msk.f32.gmra.mxu0 %vm508_vm0, %v11594_v20 }
 0x12f   : > { %9775 = vmatprep.mubr.msk.f32.mxu0 %vm508_vm0, %v11605_v22 }
 0x132   : > { %9776 = vmatmul.mubr.msk.f32.gmra.mxu0 %vm508_vm0, %v11633_v27 }
 0x133   : > { %9795 = vmatprep.mubr.msk.f32.mxu0 %vm508_vm0, %v11538_v8 }
 0x1ea   : > { %v9771_v45 = vpop.f32.mrf.mxu0 }
 0x1eb   : > { %v948_v47 = vadd.f32 %v9771_v45, %v11911_v24 }
 0x1ec   : > { %v942_v50 = vpop.f32.mrf.mxu0 }
 0x1ed   : > { %v972_v52 = vadd.f32 %v948_v47, %v853_v46  ;;  %v943_v53 = vadd.f32 %v942_v50, %v11913_v26 }
 0x1ee   : > { %v9774_v54 = vpop.f32.mrf.mxu0 }
 0x1ef   : > { %v8610_v55 = vmul.f32 -1.442695, %v972_v52  ;;  %v971_v56 = vadd.f32 %v943_v53, %v848_v51  ;;  %v958_v57 = vadd.f32 %v9774_v54, %v11919_v33 }
 0x1f0   : > { %v952_v59 = vpop.f32.mrf.mxu0 }
 0x1f1   : > { %10724 = vpow2.f32 %v8610_v55  ;;  %v8609_v62 = vmul.f32 -1.442695, %v971_v56  ;;  %v953_v0 = vadd.f32 %v952_v59, %v11928_v49  ;;  %v986_v2 = vadd.f32 %v958_v57, %v863_v61  ;;  %v9784_v59 = vpop.f32.mrf.mxu1 }
 0x1f2   : > { %v9777_v17 = vpop.f32.mrf.mxu0 }
 0x1f3   : > { %10726 = vpow2.f32 %v8609_v62  ;;  %v985_v3 = vadd.f32 %v953_v0, %v858_v1  ;;  %v8612_v4 = vmul.f32 -1.442695, %v986_v2  ;;  %v968_v31 = vadd.f32 %v9777_v17, %v11931_v60  ;;  %v1083_v61 = vpop.f32.mrf.mxu1 }
 0x1f4   : > { %v962_v28 = vpop.f32.mrf.mxu0  ;;  %v1089_v0 = vadd.f32 %v9784_v59, %v11907_v21 }
 0x1f5   : > { %v8611_v5 = vmul.f32 -1.442695, %v985_v3  ;;  %10728 = vpow2.f32 %v8612_v4  ;;  %v963_v37 = vadd.f32 %v962_v28, %v11936_v6  ;;  %v9787_v2 = vpop.f32.mrf.mxu1  ;;  %v1084_v4 = vadd.f32 %v1083_v61, %v11909_v23 }
 0x1f6   : > { %v1099_v19 = vadd.f32 %v9787_v2, %v11915_v29 }
 0x1f7   : > { %10730 = vpow2.f32 %v8611_v5  ;;  %v1093_v17 = vpop.f32.mrf.mxu1 }
 0x1fe   : > { %v10725_v7 = vpop.eup %10724 }
 0x1ff   : > { %v980_v9 = vadd.f32 1.0, %v10725_v7 }
 0x200   : > { %v10727_v11 = vpop.eup %10726 }
 0x201   : > { %10732 = vrcp.f32 %v980_v9  ;;  %v979_v12 = vadd.f32 1.0, %v10727_v11 }
 0x202   : > { %v10729_v16 = vpop.eup %10728 }
 0x203   : > { %10734 = vrcp.f32 %v979_v12  ;;  %v994_v25 = vadd.f32 1.0, %v10729_v16 }
 0x204   : > { %v10731_v18 = vpop.eup %10730 }
 0x205   : > { %v993_v30 = vadd.f32 1.0, %v10731_v18  ;;  %10736 = vrcp.f32 %v994_v25 }
 0x207   : > { %10738 = vrcp.f32 %v993_v30  ;;  %v1094_v30 = vadd.f32 %v1093_v17, %v11923_v41 }
 0x20e   : > { %v10733_v32 = vpop.eup %10732 }
 0x20f   : > { %v1000_v36 = vmul.f32 %v10733_v32, %v968_v31 }
 0x210   : > { %v10735_v39 = vpop.eup %10734 }
 0x211   : > { %v1002_v43 = vadd.f32 %v1000_v36, %v873_v35  ;;  %v999_v44 = vmul.f32 %v10735_v39, %v963_v37 }
 0x212   : > { %v10737_v46 = vpop.eup %10736 }
 0x213   : > { %10740 = vtanh.f32 %v1002_v43  ;;  %v1001_v45 = vadd.f32 %v999_v44, %v868_v40  ;;  %v1006_v48 = vsub.f32 1.0, %v10737_v46  ;;  %v1010_v51 = vmul.f32 %v10737_v46, %v11943_v38  ;;  %v9790_v46 = vpop.f32.mrf.mxu1 }
 0x214   : > { %v10739_v47 = vpop.eup %10738 }
 0x215   : > { %10742 = vtanh.f32 %v1001_v45  ;;  %v1005_v53 = vsub.f32 1.0, %v10739_v47  ;;  %v1009_v55 = vmul.f32 %v10739_v47, %v11946_v42 }
 0x220   : > { %v10741_v50 = vpop.eup %10740 }
 0x221   : > { %v1008_v52 = vmul.f32 %v10741_v50, %v1006_v48 }
 0x222   : > { %v10743_v54 = vpop.eup %10742 }
 0x223   : > { %v11977_v56 = vadd.f32 %v1010_v51, %v1008_v52  ;;  %v1007_v57 = vmul.f32 %v10743_v54, %v1005_v53  ;;  %v1103_v53 = vpop.f32.mrf.mxu1  ;;  %v1109_v54 = vadd.f32 %v9790_v46, %v11933_v63 }
 0x224   : > { %v1104_v61 = vadd.f32 %v1103_v53, %v11940_v15 }
 0x225   : > { %v11979_v58 = vadd.f32 %v1009_v55, %v1007_v57  ;;  %9791 = vmatprep.subr.mxu0 %v11977_v56 }
 0x226   : > { %9792 = vmatpush3.msra.mxu0 %v11977_v56 }
 0x227   : > { %9793 = vmatprep.subr.mxu0 %v11979_v58 }
 0x228   : > { %9794 = vmatpush3.msra.mxu0 %v11979_v58 }
 0x229   : > { %9796 = vmatmul.mubr.msk.f32.vlgmr.msra.gmra.mxu0 %vm508_vm0, %v11550_v13 }
 0x22a   : > { %9798 = vmatprep.mubr.msk.f32.mxu0 %vm508_vm0, %v11560_v14 }
 0x22d   : > { %9799 = vmatmul.mubr.msk.f32.gmra.mxu0 %vm508_vm0, %v11594_v20 }
 0x22e   : > { %9801 = vmatprep.mubr.msk.f32.mxu0 %vm508_vm0, %v11605_v22 }
 0x231   : > { %9802 = vmatmul.mubr.msk.f32.gmra.mxu0 %vm508_vm0, %v11633_v27 }
 0x232   : > { %9821 = vmatprep.mubr.msk.f32.mxu0 %vm508_vm0, %v11538_v8 }
 0x2e9   : > { %v9797_v62 = vpop.f32.mrf.mxu0 }
 0x2ea   : > { %v1184_v1 = vadd.f32 %v9797_v62, %v11911_v24 }
 0x2eb   : > { %v1178_v3 = vpop.f32.mrf.mxu0 }
 0x2ec   : > { %v1208_v5 = vadd.f32 %v1184_v1, %v1089_v0  ;;  %v1179_v7 = vadd.f32 %v1178_v3, %v11913_v26 }
 0x2ed   : > { %v9800_v9 = vpop.f32.mrf.mxu0 }
 0x2ee   : > { %v8628_v11 = vmul.f32 -1.442695, %v1208_v5  ;;  %v1207_v12 = vadd.f32 %v1179_v7, %v1084_v4  ;;  %v1194_v16 = vadd.f32 %v9800_v9, %v11919_v33 }
 0x2ef   : > { %v1188_v18 = vpop.f32.mrf.mxu0 }
 0x2f0   : > { %10744 = vpow2.f32 %v8628_v11  ;;  %v8627_v25 = vmul.f32 -1.442695, %v1207_v12  ;;  %v1189_v28 = vadd.f32 %v1188_v18, %v11928_v49  ;;  %v1222_v31 = vadd.f32 %v1194_v16, %v1099_v19 }
 0x2f1   : > { %v9803_v44 = vpop.f32.mrf.mxu0 }
 0x2f2   : > { %10746 = vpow2.f32 %v8627_v25  ;;  %v1221_v32 = vadd.f32 %v1189_v28, %v1094_v30  ;;  %v8630_v34 = vmul.f32 -1.442695, %v1222_v31  ;;  %v1204_v51 = vadd.f32 %v9803_v44, %v11931_v60  ;;  %v9810_v25 = vpop.f32.mrf.mxu1 }
 0x2f3   : > { %v1198_v48 = vpop.f32.mrf.mxu0 }
 0x2f4   : > { %v8629_v35 = vmul.f32 -1.442695, %v1221_v32  ;;  %10748 = vpow2.f32 %v8630_v34  ;;  %v1199_v57 = vadd.f32 %v1198_v48, %v11936_v6  ;;  %v1319_v28 = vpop.f32.mrf.mxu1 }
 0x2f5   : > { %v1320_v34 = vadd.f32 %v1319_v28, %v11909_v23 }
 0x2f6   : > { %10750 = vpow2.f32 %v8629_v35 }
 0x2fd   : > { %v10745_v36 = vpop.eup %10744 }
 0x2fe   : > { %v1216_v37 = vadd.f32 1.0, %v10745_v36 }
 0x2ff   : > { %v10747_v39 = vpop.eup %10746 }
 0x300   : > { %10752 = vrcp.f32 %v1216_v37  ;;  %v1215_v40 = vadd.f32 1.0, %v10747_v39 }
 0x301   : > { %v10749_v43 = vpop.eup %10748 }
 0x302   : > { %10754 = vrcp.f32 %v1215_v40  ;;  %v1230_v47 = vadd.f32 1.0, %v10749_v43 }
 0x303   : > { %v10751_v45 = vpop.eup %10750 }
 0x304   : > { %v1229_v50 = vadd.f32 1.0, %v10751_v45  ;;  %10756 = vrcp.f32 %v1230_v47 }
 0x306   : > { %10758 = vrcp.f32 %v1229_v50 }
 0x30d   : > { %v10753_v52 = vpop.eup %10752 }
 0x30e   : > { %v1236_v55 = vmul.f32 %v10753_v52, %v1204_v51 }
 0x30f   : > { %v10755_v59 = vpop.eup %10754 }
 0x310   : > { %v1238_v62 = vadd.f32 %v1236_v55, %v1109_v54  ;;  %v1235_v0 = vmul.f32 %v10755_v59, %v1199_v57 }
 0x311   : > { %v10757_v2 = vpop.eup %10756 }
 0x312   : > { %10760 = vtanh.f32 %v1238_v62  ;;  %v1237_v1 = vadd.f32 %v1235_v0, %v1104_v61  ;;  %v1242_v4 = vsub.f32 1.0, %v10757_v2  ;;  %v1246_v7 = vmul.f32 %v10757_v2, %v11977_v56 }
 0x313   : > { %v10759_v3 = vpop.eup %10758 }
 0x314   : > { %10762 = vtanh.f32 %v1237_v1  ;;  %v1241_v11 = vsub.f32 1.0, %v10759_v3  ;;  %v1245_v16 = vmul.f32 %v10759_v3, %v11979_v58 }
 0x31f   : > { %v10761_v5 = vpop.eup %10760 }
 0x320   : > { %v1244_v9 = vmul.f32 %v10761_v5, %v1242_v4 }
 0x321   : > { %v10763_v12 = vpop.eup %10762 }
 0x322   : > { %v12011_v17 = vadd.f32 %v1246_v7, %v1244_v9  ;;  %v1243_v18 = vmul.f32 %v10763_v12, %v1241_v11 }
 0x324   : > { %v12013_v19 = vadd.f32 %v1245_v16, %v1243_v18  ;;  %9817 = vmatprep.subr.mxu0 %v12011_v17 }
 0x325   : > { %9818 = vmatpush3.msra.mxu0 %v12011_v17 }
 0x326   : > { %9819 = vmatprep.subr.mxu0 %v12013_v19 }
 0x327   : > { %9820 = vmatpush3.msra.mxu0 %v12013_v19 }
 0x328   : > { %9822 = vmatmul.mubr.msk.f32.vlgmr.msra.gmra.mxu0 %vm508_vm0, %v11550_v13  ;;  %v1325_v13 = vadd.f32 %v9810_v25, %v11907_v21 }
 0x329   : > { %9824 = vmatprep.mubr.msk.f32.mxu0 %vm508_vm0, %v11560_v14  ;;  %v9813_v14 = vpop.f32.mrf.mxu1 }
 0x32a   : > { %v1335_v45 = vadd.f32 %v9813_v14, %v11915_v29 }
 0x32c   : > { %9825 = vmatmul.mubr.msk.f32.gmra.mxu0 %vm508_vm0, %v11594_v20 }
 0x32d   : > { %9827 = vmatprep.mubr.msk.f32.mxu0 %vm508_vm0, %v11605_v22 }
 0x330   : > { %9828 = vmatmul.mubr.msk.f32.gmra.mxu0 %vm508_vm0, %v11633_v27 }
 0x331   : > { %9847 = vmatprep.mubr.msk.f32.mxu0 %vm508_vm0, %v11538_v8  ;;  %v1329_v8 = vpop.f32.mrf.mxu1 }
 0x332   : > { %v1330_v48 = vadd.f32 %v1329_v8, %v11923_v41 }
 0x333   : > { %v9816_v1 = vpop.f32.mrf.mxu1 }
 0x334   : > { %v1345_v11 = vadd.f32 %v9816_v1, %v11933_v63 }
 0x335   : > { %v1339_v9 = vpop.f32.mrf.mxu1 }
 0x336   : > { %v1340_v25 = vadd.f32 %v1339_v9, %v11940_v15 }
 0x3e8   : > { %v9823_v30 = vpop.f32.mrf.mxu0 }
 0x3e9   : > { %v1420_v31 = vadd.f32 %v9823_v30, %v11911_v24 }
 0x3ea   : > { %v1414_v32 = vpop.f32.mrf.mxu0 }
 0x3eb   : > { %v1444_v35 = vadd.f32 %v1420_v31, %v1325_v13  ;;  %v1415_v36 = vadd.f32 %v1414_v32, %v11913_v26 }
 0x3ec   : > { %v9826_v37 = vpop.f32.mrf.mxu0 }
 0x3ed   : > { %v8646_v39 = vmul.f32 -1.442695, %v1444_v35  ;;  %v1443_v40 = vadd.f32 %v1415_v36, %v1320_v34  ;;  %v1430_v43 = vadd.f32 %v9826_v37, %v11919_v33 }
 0x3ee   : > { %v1424_v44 = vpop.f32.mrf.mxu0 }
 0x3ef   : > { %10764 = vpow2.f32 %v8646_v39  ;;  %v8645_v46 = vmul.f32 -1.442695, %v1443_v40  ;;  %v1425_v47 = vadd.f32 %v1424_v44, %v11928_v49  ;;  %v1458_v50 = vadd.f32 %v1430_v43, %v1335_v45  ;;  %v12056_v45 = vld [vmem:[%s13992_s3 + $0x8] sm:$0xff] }
 0x3f0   : > { %v9829_v62 = vpop.f32.mrf.mxu0 }
 0x3f1   : > { %10766 = vpow2.f32 %v8645_v46  ;;  %v1457_v51 = vadd.f32 %v1425_v47, %v1330_v48  ;;  %v8648_v52 = vmul.f32 -1.442695, %v1458_v50  ;;  %v1440_v5 = vadd.f32 %v9829_v62, %v11931_v60  ;;  %v12063_v46 = vld [vmem:[%s13992_s3 + $0x10] sm:$0xff]  ;;  %v12076_v47 = vld [vmem:[%s13992_s3] sm:$0xff]  ;;  %v9836_v48 = vpop.f32.mrf.mxu1 }
 0x3f2   : > { %v1434_v3 = vpop.f32.mrf.mxu0 }
 0x3f3   : > { %v8647_v53 = vmul.f32 -1.442695, %v1457_v51  ;;  %10768 = vpow2.f32 %v8648_v52  ;;  %v1435_v16 = vadd.f32 %v1434_v3, %v11936_v6  ;;  %v1551_v50 = vpop.f32.mrf.mxu1  ;;  %v1557_v52 = vadd.f32 %v9836_v48, %v11907_v21 }
 0x3f5   : > { %10770 = vpow2.f32 %v8647_v53  ;;  %v9839_v53 = vpop.f32.mrf.mxu1 }
 0x3fc   : > { %v10765_v54 = vpop.eup %10764 }
 0x3fd   : > { %v1452_v55 = vadd.f32 1.0, %v10765_v54  ;;  %v1552_v54 = vadd.f32 %v1551_v50, %v11909_v23 }
 0x3fe   : > { %v10767_v57 = vpop.eup %10766 }
 0x3ff   : > { %10772 = vrcp.f32 %v1452_v55  ;;  %v1451_v59 = vadd.f32 1.0, %v10767_v57 }
 0x400   : > { %v10769_v61 = vpop.eup %10768 }
 0x401   : > { %10774 = vrcp.f32 %v1451_v59  ;;  %v1466_v2 = vadd.f32 1.0, %v10769_v61 }
 0x402   : > { %v10771_v0 = vpop.eup %10770 }
 0x403   : > { %v1465_v4 = vadd.f32 1.0, %v10771_v0  ;;  %10776 = vrcp.f32 %v1466_v2  ;;  %v1561_v0 = vpop.f32.mrf.mxu1  ;;  %v1567_v2 = vadd.f32 %v9839_v53, %v11915_v29 }
 0x405   : > { %10778 = vrcp.f32 %v1465_v4 }
 0x40c   : > { %v10773_v7 = vpop.eup %10772 }
 0x40d   : > { %v1472_v12 = vmul.f32 %v10773_v7, %v1440_v5  ;;  %v1562_v5 = vadd.f32 %v1561_v0, %v11923_v41 }
 0x40e   : > { %v10775_v18 = vpop.eup %10774 }
 0x40f   : > { %v1474_v28 = vadd.f32 %v1472_v12, %v1345_v11  ;;  %v1471_v30 = vmul.f32 %v10775_v18, %v1435_v16 }
 0x410   : > { %v10777_v31 = vpop.eup %10776 }
 0x411   : > { %10780 = vtanh.f32 %v1474_v28  ;;  %v1473_v13 = vadd.f32 %v1471_v30, %v1340_v25  ;;  %v1478_v32 = vsub.f32 1.0, %v10777_v31  ;;  %v1482_v35 = vmul.f32 %v10777_v31, %v12011_v17 }
 0x412   : > { %v10779_v14 = vpop.eup %10778 }
 0x413   : > { %10782 = vtanh.f32 %v1473_v13  ;;  %v1477_v37 = vsub.f32 1.0, %v10779_v14  ;;  %v1481_v40 = vmul.f32 %v10779_v14, %v12013_v19  ;;  %v9842_v14 = vpop.f32.mrf.mxu1 }
 0x41e   : > { %v10781_v34 = vpop.eup %10780 }
 0x41f   : > { %v1480_v36 = vmul.f32 %v10781_v34, %v1478_v32 }
 0x420   : > { %v10783_v39 = vpop.eup %10782 }
 0x421   : > { %v12045_v43 = vadd.f32 %v1482_v35, %v1480_v36  ;;  %v1479_v8 = vmul.f32 %v10783_v39, %v1477_v37  ;;  %v1571_v39 = vpop.f32.mrf.mxu1 }
 0x423   : > { %v12047_v44 = vadd.f32 %v1481_v40, %v1479_v8  ;;  %9843 = vmatprep.subr.mxu0 %v12045_v43  ;;  %v1577_v40 = vadd.f32 %v9842_v14, %v11933_v63 }
 0x424   : > { %9844 = vmatpush3.msra.mxu0 %v12045_v43 }
 0x425   : > { %9845 = vmatprep.subr.mxu0 %v12047_v44 }
 0x426   : > { %9846 = vmatpush3.msra.mxu0 %v12047_v44 }
 0x427   : > { %9848 = vmatmul.mubr.msk.f32.vlgmr.msra.gmra.mxu0 %vm508_vm0, %v12056_v45 }
 0x428   : > { %9850 = vmatprep.mubr.msk.f32.mxu0 %vm508_vm0, %v12063_v46 }
 0x42b   : > { %9851 = vmatmul.mubr.msk.f32.gmra.mxu0 %vm508_vm0, %v11594_v20 }
 0x42c   : > { %9853 = vmatprep.mubr.msk.f32.mxu0 %vm508_vm0, %v11605_v22 }
 0x42f   : > { %9854 = vmatmul.mubr.msk.f32.gmra.mxu0 %vm508_vm0, %v11633_v27 }
 0x430   : > { %9873 = vmatprep.mubr.msk.f32.mxu0 %vm508_vm0, %v12076_v47 }
 0x4e7   : > { %v9849_v51 = vpop.f32.mrf.mxu0 }
 0x4e8   : > { %v1652_v20 = vadd.f32 %v9849_v51, %v11911_v24  ;;  %v1572_v51 = vadd.f32 %v1571_v39, %v11940_v15 }
 0x4e9   : > { %v1646_v22 = vpop.f32.mrf.mxu0 }
 0x4ea   : > { %v1676_v27 = vadd.f32 %v1652_v20, %v1557_v52  ;;  %v1647_v55 = vadd.f32 %v1646_v22, %v11913_v26 }
 0x4eb   : > { %v9852_v57 = vpop.f32.mrf.mxu0 }
 0x4ec   : > { %v8662_v59 = vmul.f32 -1.442695, %v1676_v27  ;;  %v1675_v61 = vadd.f32 %v1647_v55, %v1552_v54  ;;  %v1662_v62 = vadd.f32 %v9852_v57, %v11919_v33 }
 0x4ed   : > { %v1656_v1 = vpop.f32.mrf.mxu0 }
 0x4ee   : > { %10784 = vpow2.f32 %v8662_v59  ;;  %v8661_v3 = vmul.f32 -1.442695, %v1675_v61  ;;  %v1657_v4 = vadd.f32 %v1656_v1, %v11928_v49  ;;  %v1690_v7 = vadd.f32 %v1662_v62, %v1567_v2 }
 0x4ef   : > { %v9855_v13 = vpop.f32.mrf.mxu0 }
 0x4f0   : > { %10786 = vpow2.f32 %v8661_v3  ;;  %v1689_v9 = vadd.f32 %v1657_v4, %v1562_v5  ;;  %v8664_v11 = vmul.f32 -1.442695, %v1690_v7  ;;  %v1672_v36 = vadd.f32 %v9855_v13, %v11931_v60  ;;  %v12109_v4 = vld [vmem:[%s13992_s3 + $0x18] sm:$0xff]  ;;  %v12116_v5 = vld [vmem:[%s13992_s3 + $0x20] sm:$0xff]  ;;  %v12123_v7 = vld [vmem:[%s13992_s3 + $0x28] sm:$0xff] }
 0x4f1   : > { %v1666_v34 = vpop.f32.mrf.mxu0 }
 0x4f2   : > { %v8663_v12 = vmul.f32 -1.442695, %v1689_v9  ;;  %10788 = vpow2.f32 %v8664_v11  ;;  %v1667_v48 = vadd.f32 %v1666_v34, %v11936_v6  ;;  %v9862_v9 = vpop.f32.mrf.mxu1 }
 0x4f4   : > { %10790 = vpow2.f32 %v8663_v12  ;;  %v1783_v11 = vpop.f32.mrf.mxu1 }
 0x4fb   : > { %v10785_v16 = vpop.eup %10784 }
 0x4fc   : > { %v1684_v18 = vadd.f32 1.0, %v10785_v16  ;;  %v1789_v16 = vadd.f32 %v9862_v9, %v11907_v21 }
 0x4fd   : > { %v10787_v25 = vpop.eup %10786 }
 0x4fe   : > { %10792 = vrcp.f32 %v1684_v18  ;;  %v1683_v28 = vadd.f32 1.0, %v10787_v25  ;;  %v9865_v25 = vpop.f32.mrf.mxu1 }
 0x4ff   : > { %v10789_v30 = vpop.eup %10788  ;;  %v1799_v39 = vadd.f32 %v9865_v25, %v11915_v29 }
 0x500   : > { %10794 = vrcp.f32 %v1683_v28  ;;  %v1698_v32 = vadd.f32 1.0, %v10789_v30  ;;  %v1784_v30 = vadd.f32 %v1783_v11, %v11909_v23 }
 0x501   : > { %v10791_v31 = vpop.eup %10790 }
 0x502   : > { %v1697_v35 = vadd.f32 1.0, %v10791_v31  ;;  %10796 = vrcp.f32 %v1698_v32 }
 0x504   : > { %10798 = vrcp.f32 %v1697_v35 }
 0x50b   : > { %v10793_v37 = vpop.eup %10792 }
 0x50c   : > { %v1704_v8 = vmul.f32 %v10793_v37, %v1672_v36  ;;  %v1793_v36 = vpop.f32.mrf.mxu1 }
 0x50d   : > { %v10795_v50 = vpop.eup %10794 }
 0x50e   : > { %v1706_v52 = vadd.f32 %v1704_v8, %v1577_v40  ;;  %v1703_v20 = vmul.f32 %v10795_v50, %v1667_v48  ;;  %v1794_v48 = vadd.f32 %v1793_v36, %v11923_v41 }
 0x50f   : > { %v10797_v22 = vpop.eup %10796 }
 0x510   : > { %10800 = vtanh.f32 %v1706_v52  ;;  %v1705_v53 = vadd.f32 %v1703_v20, %v1572_v51  ;;  %v1710_v27 = vsub.f32 1.0, %v10797_v22  ;;  %v1714_v57 = vmul.f32 %v10797_v22, %v12045_v43 }
 0x511   : > { %v10799_v54 = vpop.eup %10798 }
 0x512   : > { %10802 = vtanh.f32 %v1705_v53  ;;  %v1709_v61 = vsub.f32 1.0, %v10799_v54  ;;  %v1713_v0 = vmul.f32 %v10799_v54, %v12047_v44 }
 0x51d   : > { %v10801_v55 = vpop.eup %10800 }
 0x51e   : > { %v1712_v59 = vmul.f32 %v10801_v55, %v1710_v27 }
 0x51f   : > { %v10803_v62 = vpop.eup %10802 }
 0x520   : > { %v12094_v1 = vadd.f32 %v1714_v57, %v1712_v59  ;;  %v1711_v2 = vmul.f32 %v10803_v62, %v1709_v61  ;;  %v9868_v61 = vpop.f32.mrf.mxu1 }
 0x522   : > { %v12096_v3 = vadd.f32 %v1713_v0, %v1711_v2  ;;  %9869 = vmatprep.subr.mxu0 %v12094_v1 }
 0x523   : > { %9870 = vmatpush3.msra.mxu0 %v12094_v1 }
 0x524   : > { %9871 = vmatprep.subr.mxu0 %v12096_v3 }
 0x525   : > { %9872 = vmatpush3.msra.mxu0 %v12096_v3 }
 0x526   : > { %9874 = vmatmul.mubr.msk.f32.vlgmr.msra.gmra.mxu0 %vm508_vm0, %v12056_v45 }
 0x527   : > { %9876 = vmatprep.mubr.msk.f32.mxu0 %vm508_vm0, %v12063_v46 }
 0x52a   : > { %9877 = vmatmul.mubr.msk.f32.gmra.mxu0 %vm508_vm0, %v12109_v4 }
 0x52b   : > { %9879 = vmatprep.mubr.msk.f32.mxu0 %vm508_vm0, %v12116_v5 }
 0x52e   : > { %9880 = vmatmul.mubr.msk.f32.gmra.mxu0 %vm508_vm0, %v12123_v7 }
 0x52f   : > { %9899 = vmatprep.mubr.msk.f32.mxu0 %vm508_vm0, %v12076_v47 }
 0x5e6   : > { %v9875_v12 = vpop.f32.mrf.mxu0 }
 0x5e7   : > { %v1884_v18 = vadd.f32 %v9875_v12, %v11911_v24  ;;  %v1803_v12 = vpop.f32.mrf.mxu1 }
 0x5e8   : > { %v1878_v28 = vpop.f32.mrf.mxu0 }
 0x5e9   : > { %v1908_v13 = vadd.f32 %v1884_v18, %v1789_v16  ;;  %v1879_v31 = vadd.f32 %v1878_v28, %v11913_v26  ;;  %v1809_v16 = vadd.f32 %v9868_v61, %v11933_v63 }
 0x5ea   : > { %v9878_v14 = vpop.f32.mrf.mxu0 }
 0x5eb   : > { %v8678_v32 = vmul.f32 -1.442695, %v1908_v13  ;;  %v1907_v34 = vadd.f32 %v1879_v31, %v1784_v30  ;;  %v1894_v35 = vadd.f32 %v9878_v14, %v11919_v33  ;;  %v1804_v30 = vadd.f32 %v1803_v12, %v11940_v15 }
 0x5ec   : > { %v1888_v37 = vpop.f32.mrf.mxu0 }
 0x5ed   : > { %10804 = vpow2.f32 %v8678_v32  ;;  %v8677_v40 = vmul.f32 -1.442695, %v1907_v34  ;;  %v1889_v8 = vadd.f32 %v1888_v37, %v11928_v49  ;;  %v1922_v50 = vadd.f32 %v1894_v35, %v1799_v39 }
 0x5ee   : > { %v9881_v57 = vpop.f32.mrf.mxu0 }
 0x5ef   : > { %10806 = vpow2.f32 %v8677_v40  ;;  %v1921_v51 = vadd.f32 %v1889_v8, %v1794_v48  ;;  %v8680_v52 = vmul.f32 -1.442695, %v1922_v50  ;;  %v1904_v9 = vadd.f32 %v9881_v57, %v11931_v60 }
 0x5f0   : > { %v1898_v0 = vpop.f32.mrf.mxu0 }
 0x5f1   : > { %v8679_v20 = vmul.f32 -1.442695, %v1921_v51  ;;  %10808 = vpow2.f32 %v8680_v52  ;;  %v1899_v25 = vadd.f32 %v1898_v0, %v11936_v6 }
 0x5f3   : > { %10810 = vpow2.f32 %v8679_v20  ;;  %v9888_v20 = vpop.f32.mrf.mxu1 }
 0x5fa   : > { %v10805_v53 = vpop.eup %10804 }
 0x5fb   : > { %v1916_v22 = vadd.f32 1.0, %v10805_v53  ;;  %v2015_v53 = vpop.f32.mrf.mxu1 }
 0x5fc   : > { %v10807_v54 = vpop.eup %10806 }
 0x5fd   : > { %10812 = vrcp.f32 %v1916_v22  ;;  %v1915_v27 = vadd.f32 1.0, %v10807_v54  ;;  %v2021_v54 = vadd.f32 %v9888_v20, %v11907_v21 }
 0x5fe   : > { %v10809_v55 = vpop.eup %10808 }
 0x5ff   : > { %10814 = vrcp.f32 %v1915_v27  ;;  %v1930_v62 = vadd.f32 1.0, %v10809_v55  ;;  %v9891_v55 = vpop.f32.mrf.mxu1 }
 0x600   : > { %v10811_v59 = vpop.eup %10810 }
 0x601   : > { %v1929_v2 = vadd.f32 1.0, %v10811_v59  ;;  %10816 = vrcp.f32 %v1930_v62  ;;  %v2016_v59 = vadd.f32 %v2015_v53, %v11909_v23 }
 0x603   : > { %10818 = vrcp.f32 %v1929_v2 }
 0x60a   : > { %v10813_v11 = vpop.eup %10812 }
 0x60b   : > { %v1936_v18 = vmul.f32 %v10813_v11, %v1904_v9 }
 0x60c   : > { %v10815_v28 = vpop.eup %10814 }
 0x60d   : > { %v1938_v13 = vadd.f32 %v1936_v18, %v1809_v16  ;;  %v1935_v31 = vmul.f32 %v10815_v28, %v1899_v25  ;;  %v2031_v16 = vadd.f32 %v9891_v55, %v11915_v29 }
 0x60e   : > { %v10817_v32 = vpop.eup %10816 }
 0x60f   : > { %10820 = vtanh.f32 %v1938_v13  ;;  %v1937_v14 = vadd.f32 %v1935_v31, %v1804_v30  ;;  %v1942_v35 = vsub.f32 1.0, %v10817_v32  ;;  %v1946_v37 = vmul.f32 %v10817_v32, %v12094_v1 }
 0x610   : > { %v10819_v34 = vpop.eup %10818 }
 0x611   : > { %10822 = vtanh.f32 %v1937_v14  ;;  %v1941_v40 = vsub.f32 1.0, %v10819_v34  ;;  %v1945_v48 = vmul.f32 %v10819_v34, %v12096_v3 }
 0x61c   : > { %v10821_v36 = vpop.eup %10820 }
 0x61d   : > { %v1944_v39 = vmul.f32 %v10821_v36, %v1942_v35 }
 0x61e   : > { %v10823_v8 = vpop.eup %10822 }
 0x61f   : > { %v12143_v50 = vadd.f32 %v1946_v37, %v1944_v39  ;;  %v1943_v51 = vmul.f32 %v10823_v8, %v1941_v40 }
 0x621   : > { %v12145_v52 = vadd.f32 %v1945_v48, %v1943_v51  ;;  %9895 = vmatprep.subr.mxu0 %v12143_v50 }
 0x622   : > { %9896 = vmatpush3.msra.mxu0 %v12143_v50 }
 0x623   : > { %9897 = vmatprep.subr.mxu0 %v12145_v52 }
 0x624   : > { %9898 = vmatpush3.msra.mxu0 %v12145_v52 }
 0x625   : > { %9900 = vmatmul.mubr.msk.f32.vlgmr.msra.gmra.mxu0 %vm508_vm0, %v12056_v45 }
 0x626   : > { %9902 = vmatprep.mubr.msk.f32.mxu0 %vm508_vm0, %v12063_v46 }
 0x629   : > { %9903 = vmatmul.mubr.msk.f32.gmra.mxu0 %vm508_vm0, %v12109_v4 }
 0x62a   : > { %9905 = vmatprep.mubr.msk.f32.mxu0 %vm508_vm0, %v12116_v5 }
 0x62d   : > { %9906 = vmatmul.mubr.msk.f32.gmra.mxu0 %vm508_vm0, %v12123_v7 }
 0x62e   : > { %9925 = vmatprep.mubr.msk.f32.mxu0 %vm508_vm0, %v12076_v47  ;;  %v2025_v47 = vpop.f32.mrf.mxu1 }
 0x62f   : > { %v2026_v28 = vadd.f32 %v2025_v47, %v11923_v41 }
 0x630   : > { %v9894_v8 = vpop.f32.mrf.mxu1 }
 0x6e5   : > { %v9901_v22 = vpop.f32.mrf.mxu0 }
 0x6e6   : > { %v2116_v27 = vadd.f32 %v9901_v22, %v11911_v24 }
 0x6e7   : > { %v2110_v57 = vpop.f32.mrf.mxu0 }
 0x6e8   : > { %v2140_v61 = vadd.f32 %v2116_v27, %v2021_v54  ;;  %v2111_v62 = vadd.f32 %v2110_v57, %v11913_v26  ;;  %v2035_v54 = vpop.f32.mrf.mxu1  ;;  %v2041_v27 = vadd.f32 %v9894_v8, %v11933_v63 }
 0x6e9   : > { %v9904_v0 = vpop.f32.mrf.mxu0 }
 0x6ea   : > { %v8694_v2 = vmul.f32 -1.442695, %v2140_v61  ;;  %v2139_v9 = vadd.f32 %v2111_v62, %v2016_v59  ;;  %v2126_v11 = vadd.f32 %v9904_v0, %v11919_v33  ;;  %v2036_v61 = vadd.f32 %v2035_v54, %v11940_v15 }
 0x6eb   : > { %v2120_v12 = vpop.f32.mrf.mxu0 }
 0x6ec   : > { %10824 = vpow2.f32 %v8694_v2  ;;  %v8693_v18 = vmul.f32 -1.442695, %v2139_v9  ;;  %v2121_v25 = vadd.f32 %v2120_v12, %v11928_v49  ;;  %v2154_v30 = vadd.f32 %v2126_v11, %v2031_v16 }
 0x6ed   : > { %v9907_v39 = vpop.f32.mrf.mxu0 }
 0x6ee   : > { %10826 = vpow2.f32 %v8693_v18  ;;  %v2153_v13 = vadd.f32 %v2121_v25, %v2026_v28  ;;  %v8696_v31 = vmul.f32 -1.442695, %v2154_v30  ;;  %v2136_v53 = vadd.f32 %v9907_v39, %v11931_v60 }
 0x6ef   : > { %v2130_v51 = vpop.f32.mrf.mxu0 }
 0x6f0   : > { %v8695_v14 = vmul.f32 -1.442695, %v2153_v13  ;;  %10828 = vpow2.f32 %v8696_v31  ;;  %v2131_v57 = vadd.f32 %v2130_v51, %v11936_v6 }
 0x6f2   : > { %10830 = vpow2.f32 %v8695_v14 }
 0x6f9   : > { %v10825_v32 = vpop.eup %10824 }
 0x6fa   : > { %v2148_v34 = vadd.f32 1.0, %v10825_v32  ;;  %v12198_v32 = vld [vmem:[%s13992_s3 + $0x30] sm:$0xff] }
 0x6fb   : > { %v10827_v35 = vpop.eup %10826 }
 0x6fc   : > { %10832 = vrcp.f32 %v2148_v34  ;;  %v2147_v36 = vadd.f32 1.0, %v10827_v35  ;;  %v12244_v34 = vld [vmem:[%s13991_s2] sm:$0xff]  ;;  %v9914_v35 = vpop.f32.mrf.mxu1 }
 0x6fd   : > { %v10829_v37 = vpop.eup %10828  ;;  %9942 = vmatprep.mubr.msk.f32.mxu1 %vm2500_vm1, %v12244_v34  ;;  %v2253_v39 = vadd.f32 %v9914_v35, %v11907_v21 }
 0x6fe   : > { %10834 = vrcp.f32 %v2147_v36  ;;  %v2162_v48 = vadd.f32 1.0, %v10829_v37  ;;  %v2247_v36 = vpop.f32.mrf.mxu1 }
 0x6ff   : > { %v10831_v40 = vpop.eup %10830  ;;  %v2248_v51 = vadd.f32 %v2247_v36, %v11909_v23 }
 0x700   : > { %v2161_v20 = vadd.f32 1.0, %v10831_v40  ;;  %10836 = vrcp.f32 %v2162_v48  ;;  %v9917_v8 = vpop.f32.mrf.mxu1 }
 0x702   : > { %10838 = vrcp.f32 %v2161_v20 }
 0x709   : > { %v10833_v22 = vpop.eup %10832 }
 0x70a   : > { %v2168_v55 = vmul.f32 %v10833_v22, %v2136_v53 }
 0x70b   : > { %v10835_v59 = vpop.eup %10834 }
 0x70c   : > { %v2170_v62 = vadd.f32 %v2168_v55, %v2041_v27  ;;  %v2167_v0 = vmul.f32 %v10835_v59, %v2131_v57  ;;  %v2257_v57 = vpop.f32.mrf.mxu1 }
 0x70d   : > { %v10837_v9 = vpop.eup %10836 }
 0x70e   : > { %10840 = vtanh.f32 %v2170_v62  ;;  %v2169_v2 = vadd.f32 %v2167_v0, %v2036_v61  ;;  %v2174_v47 = vsub.f32 1.0, %v10837_v9  ;;  %v2178_v16 = vmul.f32 %v10837_v9, %v12143_v50 }
 0x70f   : > { %v10839_v11 = vpop.eup %10838  ;;  %v2263_v61 = vadd.f32 %v9917_v8, %v11915_v29  ;;  %v2258_v62 = vadd.f32 %v2257_v57, %v11923_v41 }
 0x710   : > { %10842 = vtanh.f32 %v2169_v2  ;;  %v2173_v25 = vsub.f32 1.0, %v10839_v11  ;;  %v2177_v30 = vmul.f32 %v10839_v11, %v12145_v52 }
 0x71b   : > { %v10841_v12 = vpop.eup %10840 }
 0x71c   : > { %v2176_v18 = vmul.f32 %v10841_v12, %v2174_v47 }
 0x71d   : > { %v10843_v28 = vpop.eup %10842 }
 0x71e   : > { %v12177_v13 = vadd.f32 %v2178_v16, %v2176_v18  ;;  %v2175_v31 = vmul.f32 %v10843_v28, %v2173_v25  ;;  %v9920_v18 = vpop.f32.mrf.mxu1 }
 0x71f   : > { %v2273_v35 = vadd.f32 %v9920_v18, %v11933_v63 }
 0x720   : > { %v12179_v14 = vadd.f32 %v2177_v30, %v2175_v31  ;;  %9921 = vmatprep.subr.mxu0 %v12177_v13  ;;  %v2267_v31 = vpop.f32.mrf.mxu1 }
 0x721   : > { %9922 = vmatpush3.msra.mxu0 %v12177_v13 }
 0x722   : > { %9923 = vmatprep.subr.mxu0 %v12179_v14 }
 0x723   : > { %9924 = vmatpush3.msra.mxu0 %v12179_v14 }
 0x724   : > { %9926 = vmatmul.mubr.msk.f32.vlgmr.msra.gmra.mxu0 %vm508_vm0, %v12056_v45  ;;  %9951 = vmatprep.subr.mxu0 %v14000_v10  ;;  %v12207_v45 = vld [vmem:[%s13992_s3 + $0x38] sm:$0xff] }
 0x725   : > { %9928 = vmatprep.mubr.msk.f32.mxu0 %vm508_vm0, %v12063_v46  ;;  %9952 = vmatpush3.msra.mxu0 %v14000_v10  ;;  %v12212_v46 = vld [vmem:[%s13992_s3 + $0x40] sm:$0xff] }
 0x728   : > { %9929 = vmatmul.mubr.msk.f32.gmra.mxu0 %vm508_vm0, %v12109_v4  ;;  %v12221_v4 = vld [vmem:[%s13992_s3 + $0x48] sm:$0xff] }
 0x729   : > { %9931 = vmatprep.mubr.msk.f32.mxu0 %vm508_vm0, %v12116_v5  ;;  %v12226_v5 = vld [vmem:[%s13992_s3 + $0x50] sm:$0xff] }
 0x72c   : > { %9932 = vmatmul.mubr.msk.f32.gmra.mxu0 %vm508_vm0, %v12123_v7  ;;  %v12235_v7 = vld [vmem:[%s13992_s3 + $0x58] sm:$0xff] }
 0x72d   : > { %9953 = vmatprep.mubr.msk.f32.mxu0 %vm508_vm0, %v12198_v32 }
 0x730   : > { %9954 = vmatmul.mubr.msk.f32.vlgmr.msra.gmra.mxu0 %vm508_vm0, %v12207_v45 }
 0x731   : > { %9956 = vmatprep.mubr.msk.f32.mxu0 %vm508_vm0, %v12212_v46 }
 0x734   : > { %9957 = vmatmul.mubr.msk.f32.gmra.mxu0 %vm508_vm0, %v12221_v4 }
 0x735   : > { %9959 = vmatprep.mubr.msk.f32.mxu0 %vm508_vm0, %v12226_v5 }
 0x738   : > { %9960 = vmatmul.mubr.msk.f32.gmra.mxu0 %vm508_vm0, %v12235_v7 }
 0x739   : > { %9983 = vmatprep.mubr.msk.f32.mxu0 %vm508_vm0, %v12198_v32 }
 0x7e4   : > { %v9927_v37 = vpop.f32.mrf.mxu0 }
 0x7e5   : > { %v2348_v40 = vadd.f32 %v9927_v37, %v11911_v24 }
 0x7e6   : > { %v2342_v48 = vpop.f32.mrf.mxu0 }
 0x7e7   : > { %v2372_v20 = vadd.f32 %v2348_v40, %v2253_v39  ;;  %v2343_v53 = vadd.f32 %v2342_v48, %v11913_v26  ;;  %v2268_v40 = vadd.f32 %v2267_v31, %v11940_v15 }
 0x7e8   : > { %v9930_v22 = vpop.f32.mrf.mxu0 }
 0x7e9   : > { %v8710_v54 = vmul.f32 -1.442695, %v2372_v20  ;;  %v2371_v27 = vadd.f32 %v2343_v53, %v2248_v51  ;;  %v2358_v55 = vadd.f32 %v9930_v22, %v11919_v33 }
 0x7ea   : > { %v2352_v59 = vpop.f32.mrf.mxu0 }
 0x7eb   : > { %10844 = vpow2.f32 %v8710_v54  ;;  %v8709_v21 = vmul.f32 -1.442695, %v2371_v27  ;;  %v2353_v24 = vadd.f32 %v2352_v59, %v11928_v49  ;;  %v2386_v23 = vadd.f32 %v2358_v55, %v2263_v61  ;;  %v12275_v61 = vld [vmem:[%s13991_s2 + $0x8] sm:$0xff] }
 0x7ec   : > { %v9933_v12 = vpop.f32.mrf.mxu0 }
 0x7ed   : > { %10846 = vpow2.f32 %v8709_v21  ;;  %v2385_v0 = vadd.f32 %v2353_v24, %v2258_v62  ;;  %v8712_v2 = vmul.f32 -1.442695, %v2386_v23  ;;  %v2368_v28 = vadd.f32 %v9933_v12, %v11931_v60  ;;  %v12281_v21 = vld [vmem:[%s13991_s2 + $0x10] sm:$0xff]  ;;  %v12293_v24 = vld [vmem:[%s13991_s2 + $0x18] sm:$0xff]  ;;  %v12299_v62 = vld [vmem:[%s13991_s2 + $0x20] sm:$0xff] }
 0x7ee   : > { %v2362_v25 = vpop.f32.mrf.mxu0  ;;  %v12311_v23 = vld [vmem:[%s13991_s2 + $0x28] sm:$0xff] }
 0x7ef   : > { %v8711_v26 = vmul.f32 -1.442695, %v2385_v0  ;;  %10848 = vpow2.f32 %v8712_v2  ;;  %v2363_v37 = vadd.f32 %v2362_v25, %v11936_v6 }
 0x7f1   : > { %10850 = vpow2.f32 %v8711_v26 }
 0x7f8   : > { %v10845_v9 = vpop.eup %10844 }
 0x7f9   : > { %v2380_v11 = vadd.f32 1.0, %v10845_v9 }
 0x7fa   : > { %v10847_v33 = vpop.eup %10846 }
 0x7fb   : > { %10852 = vrcp.f32 %v2380_v11  ;;  %v2379_v47 = vadd.f32 1.0, %v10847_v33 }
 0x7fc   : > { %v10849_v29 = vpop.eup %10848 }
 0x7fd   : > { %10854 = vrcp.f32 %v2379_v47  ;;  %v2394_v49 = vadd.f32 1.0, %v10849_v29 }
 0x7fe   : > { %v10851_v16 = vpop.eup %10850 }
 0x7ff   : > { %v2393_v41 = vadd.f32 1.0, %v10851_v16  ;;  %10856 = vrcp.f32 %v2394_v49 }
 0x801   : > { %10858 = vrcp.f32 %v2393_v41 }
 0x808   : > { %v10853_v30 = vpop.eup %10852 }
 0x809   : > { %v2400_v36 = vmul.f32 %v10853_v30, %v2368_v28 }
 0x80a   : > { %v10855_v39 = vpop.eup %10854 }
 0x80b   : > { %v2402_v8 = vadd.f32 %v2400_v36, %v2273_v35  ;;  %v2399_v48 = vmul.f32 %v10855_v39, %v2363_v37 }
 0x80c   : > { %v10857_v20 = vpop.eup %10856 }
 0x80d   : > { %10860 = vtanh.f32 %v2402_v8  ;;  %v2401_v51 = vadd.f32 %v2399_v48, %v2268_v40  ;;  %v2406_v60 = vsub.f32 1.0, %v10857_v20  ;;  %v2410_v63 = vmul.f32 %v10857_v20, %v12177_v13 }
 0x80e   : > { %v10859_v53 = vpop.eup %10858 }
 0x80f   : > { %10862 = vtanh.f32 %v2401_v51  ;;  %v2405_v27 = vsub.f32 1.0, %v10859_v53  ;;  %v2409_v15 = vmul.f32 %v10859_v53, %v12179_v14 }
 0x81a   : > { %v10861_v22 = vpop.eup %10860 }
 0x81b   : > { %v2408_v54 = vmul.f32 %v10861_v22, %v2406_v60 }
 0x81c   : > { %v10863_v55 = vpop.eup %10862 }
 0x81d   : > { %v12261_v57 = vadd.f32 %v2410_v63, %v2408_v54  ;;  %v2407_v6 = vmul.f32 %v10863_v55, %v2405_v27 }
 0x81f   : > { %9934 = vmatprep.subr.mxu1 %v12261_v57  ;;  %v12265_v59 = vadd.f32 %v2409_v15, %v2407_v6 }
 0x820   : > { %9935 = vmatpush3.msra.mxu1 %v12261_v57 }
 0x821   : > { %9936 = vmatprep.subr.mxu1 %v12265_v59 }
 0x822   : > { %9937 = vmatpush3.msra.mxu1 %v12265_v59 }
 0x823   : > { %9938 = vmatprep.subr.mxu1 %v11943_v38 }
 0x824   : > { %9939 = vmatpush3.msra.mxu1 %v11943_v38 }
 0x825   : > { %9940 = vmatprep.subr.mxu1 %v11946_v42 }
 0x826   : > { %9941 = vmatpush3.msra.mxu1 %v11946_v42 }
 0x827   : > { %9943 = vmatmul.mubr.msk.f32.vlgmr.msra.gmra.mxu1 %vm2500_vm1, %v12275_v61  ;;  %9962 = vmatprep.subr.mxu1 %v12177_v13 }
 0x828   : > { %9963 = vmatpush3.msra.mxu1 %v12177_v13  ;;  %9945 = vmatprep.mubr.msk.f32.mxu1 %vm2500_vm1, %v12281_v21 }
 0x829   : > { %9964 = vmatprep.subr.mxu1 %v12179_v14 }
 0x82a   : > { %9965 = vmatpush3.msra.mxu1 %v12179_v14 }
 0x82b   : > { %9946 = vmatmul.mubr.msk.f32.gmra.mxu1 %vm2500_vm1, %v12293_v24  ;;  %9966 = vmatprep.subr.mxu1 %v11977_v56 }
 0x82c   : > { %9967 = vmatpush3.msra.mxu1 %v11977_v56  ;;  %9948 = vmatprep.mubr.msk.f32.mxu1 %vm2500_vm1, %v12299_v62 }
 0x82d   : > { %9968 = vmatprep.subr.mxu1 %v11979_v58 }
 0x82e   : > { %9969 = vmatpush3.msra.mxu1 %v11979_v58 }
 0x82f   : > { %9949 = vmatmul.mubr.msk.f32.gmra.mxu1 %vm2500_vm1, %v12311_v23  ;;  %9992 = vmatprep.subr.mxu1 %v12143_v50 }
 0x830   : > { %9970 = vmatprep.mubr.msk.f32.mxu1 %vm2500_vm1, %v12244_v34 }
 0x833   : > { %9971 = vmatmul.mubr.msk.f32.vlgmr.msra.gmra.mxu1 %vm2500_vm1, %v12275_v61 }
 0x834   : > { %9993 = vmatpush3.msra.mxu1 %v12143_v50  ;;  %9973 = vmatprep.mubr.msk.f32.mxu1 %vm2500_vm1, %v12281_v21 }
 0x835   : > { %9994 = vmatprep.subr.mxu1 %v12145_v52 }
 0x836   : > { %9995 = vmatpush3.msra.mxu1 %v12145_v52 }
 0x837   : > { %9996 = vmatprep.subr.mxu1 %v12011_v17  ;;  %9974 = vmatmul.mubr.msk.f32.gmra.mxu1 %vm2500_vm1, %v12293_v24 }
 0x838   : > { %9997 = vmatpush3.msra.mxu1 %v12011_v17  ;;  %9976 = vmatprep.mubr.msk.f32.mxu1 %vm2500_vm1, %v12299_v62 }
 0x839   : > { %9998 = vmatprep.subr.mxu1 %v12013_v19 }
 0x83a   : > { %9999 = vmatpush3.msra.mxu1 %v12013_v19 }
 0x83b   : > { %10022 = vmatprep.subr.mxu1 %v12094_v1  ;;  %9977 = vmatmul.mubr.msk.f32.gmra.mxu1 %vm2500_vm1, %v12311_v23 }
 0x83c   : > { %10000 = vmatprep.mubr.msk.f32.mxu1 %vm2500_vm1, %v12244_v34 }
 0x83f   : > { %10001 = vmatmul.mubr.msk.f32.vlgmr.msra.gmra.mxu1 %vm2500_vm1, %v12275_v61 }
 0x840   : > { %10023 = vmatpush3.msra.mxu1 %v12094_v1  ;;  %10003 = vmatprep.mubr.msk.f32.mxu1 %vm2500_vm1, %v12281_v21 }
 0x841   : > { %10024 = vmatprep.subr.mxu1 %v12096_v3 }
 0x842   : > { %10025 = vmatpush3.msra.mxu1 %v12096_v3 }
 0x843   : > { %10026 = vmatprep.subr.mxu1 %v12045_v43  ;;  %10004 = vmatmul.mubr.msk.f32.gmra.mxu1 %vm2500_vm1, %v12293_v24 }
 0x844   : > { %10027 = vmatpush3.msra.mxu1 %v12045_v43  ;;  %10006 = vmatprep.mubr.msk.f32.mxu1 %vm2500_vm1, %v12299_v62 }
 0x845   : > { %10028 = vmatprep.subr.mxu1 %v12047_v44 }
 0x846   : > { %10029 = vmatpush3.msra.mxu1 %v12047_v44 }
 0x847   : > { %10052 = vmatprep.subr.mxu1 %v12045_v43  ;;  %10007 = vmatmul.mubr.msk.f32.gmra.mxu1 %vm2500_vm1, %v12311_v23 }
 0x848   : > { %10030 = vmatprep.mubr.msk.f32.mxu1 %vm2500_vm1, %v12244_v34 }
 0x84b   : > { %10031 = vmatmul.mubr.msk.f32.vlgmr.msra.gmra.mxu1 %vm2500_vm1, %v12275_v61 }
 0x84c   : > { %10053 = vmatpush3.msra.mxu1 %v12045_v43  ;;  %10033 = vmatprep.mubr.msk.f32.mxu1 %vm2500_vm1, %v12281_v21 }
 0x84d   : > { %10054 = vmatprep.subr.mxu1 %v12047_v44 }
 0x84e   : > { %10055 = vmatpush3.msra.mxu1 %v12047_v44 }
 0x84f   : > { %10056 = vmatprep.subr.mxu1 %v12094_v1  ;;  %10034 = vmatmul.mubr.msk.f32.gmra.mxu1 %vm2500_vm1, %v12293_v24 }
 0x850   : > { %10057 = vmatpush3.msra.mxu1 %v12094_v1  ;;  %10036 = vmatprep.mubr.msk.f32.mxu1 %vm2500_vm1, %v12299_v62 }
 0x851   : > { %10058 = vmatprep.subr.mxu1 %v12096_v3 }
 0x852   : > { %10059 = vmatpush3.msra.mxu1 %v12096_v3 }
 0x853   : > { %10082 = vmatprep.subr.mxu1 %v12011_v17  ;;  %10037 = vmatmul.mubr.msk.f32.gmra.mxu1 %vm2500_vm1, %v12311_v23 }
 0x854   : > { %10060 = vmatprep.mubr.msk.f32.mxu1 %vm2500_vm1, %v12244_v34 }
 0x857   : > { %10061 = vmatmul.mubr.msk.f32.vlgmr.msra.gmra.mxu1 %vm2500_vm1, %v12275_v61 }
 0x858   : > { %10083 = vmatpush3.msra.mxu1 %v12011_v17  ;;  %10063 = vmatprep.mubr.msk.f32.mxu1 %vm2500_vm1, %v12281_v21 }
 0x859   : > { %10084 = vmatprep.subr.mxu1 %v12013_v19 }
 0x85a   : > { %10085 = vmatpush3.msra.mxu1 %v12013_v19 }
 0x85b   : > { %10086 = vmatprep.subr.mxu1 %v12143_v50  ;;  %10064 = vmatmul.mubr.msk.f32.gmra.mxu1 %vm2500_vm1, %v12293_v24 }
 0x85c   : > { %10087 = vmatpush3.msra.mxu1 %v12143_v50  ;;  %10066 = vmatprep.mubr.msk.f32.mxu1 %vm2500_vm1, %v12299_v62 }
 0x85d   : > { %10088 = vmatprep.subr.mxu1 %v12145_v52 }
 0x85e   : > { %10089 = vmatpush3.msra.mxu1 %v12145_v52 }
 0x85f   : > { %10112 = vmatprep.subr.mxu1 %v11977_v56  ;;  %10067 = vmatmul.mubr.msk.f32.gmra.mxu1 %vm2500_vm1, %v12311_v23 }
 0x860   : > { %10090 = vmatprep.mubr.msk.f32.mxu1 %vm2500_vm1, %v12244_v34 }
 0x863   : > { %10091 = vmatmul.mubr.msk.f32.vlgmr.msra.gmra.mxu1 %vm2500_vm1, %v12275_v61 }
 0x864   : > { %10113 = vmatpush3.msra.mxu1 %v11977_v56  ;;  %10093 = vmatprep.mubr.msk.f32.mxu1 %vm2500_vm1, %v12281_v21 }
 0x865   : > { %10114 = vmatprep.subr.mxu1 %v11979_v58 }
 0x866   : > { %10115 = vmatpush3.msra.mxu1 %v11979_v58  ;;  %v9955_v58 = vpop.f32.mrf.mxu0 }
 0x867   : > { %10116 = vmatprep.subr.mxu1 %v12177_v13  ;;  %10094 = vmatmul.mubr.msk.f32.gmra.mxu1 %vm2500_vm1, %v12293_v24 }
 0x868   : > { %10117 = vmatpush3.msra.mxu1 %v12177_v13  ;;  %10096 = vmatprep.mubr.msk.f32.mxu1 %vm2500_vm1, %v12299_v62  ;;  %v2698_v19 = vpop.f32.mrf.mxu0 }
 0x869   : > { %10118 = vmatprep.subr.mxu1 %v12179_v14 }
 0x86a   : > { %10119 = vmatpush3.msra.mxu1 %v12179_v14  ;;  %v9958_v52 = vpop.f32.mrf.mxu0 }
 0x86b   : > { %10142 = vmatprep.subr.mxu1 %v11943_v38  ;;  %10097 = vmatmul.mubr.msk.f32.gmra.mxu1 %vm2500_vm1, %v12311_v23 }
 0x86c   : > { %10120 = vmatprep.mubr.msk.f32.mxu1 %vm2500_vm1, %v12244_v34  ;;  %v2708_v47 = vpop.f32.mrf.mxu0 }
 0x86e   : > { %v9961_v48 = vpop.f32.mrf.mxu0 }
 0x86f   : > { %10121 = vmatmul.mubr.msk.f32.vlgmr.msra.gmra.mxu1 %vm2500_vm1, %v12275_v61 }
 0x870   : > { %10143 = vmatpush3.msra.mxu1 %v11943_v38  ;;  %10123 = vmatprep.mubr.msk.f32.mxu1 %vm2500_vm1, %v12281_v21  ;;  %v12449_v38 = vpop.permute.xlu0 %2433  ;;  %v2718_v22 = vpop.f32.mrf.mxu0 }
 0x871   : > { %10144 = vmatprep.subr.mxu1 %v11946_v42 }
 0x872   : > { %10145 = vmatpush3.msra.mxu1 %v11946_v42  ;;  %v12451_v42 = vpop.permute.xlu1 %2470 }
 0x873   : > { %10146 = vmatprep.subr.mxu1 %v12261_v57  ;;  %10124 = vmatmul.mubr.msk.f32.gmra.mxu1 %vm2500_vm1, %v12293_v24  ;;  %v2704_v3 = vadd.f32 %v9955_v58, %v12451_v42 }
 0x874   : > { %10147 = vmatpush3.msra.mxu1 %v12261_v57  ;;  %10126 = vmatprep.mubr.msk.f32.mxu1 %vm2500_vm1, %v12299_v62  ;;  %v12453_v56 = vpop.permute.xlu0 %2428 }
 0x875   : > { %10148 = vmatprep.subr.mxu1 %v12265_v59 }
 0x876   : > { %10149 = vmatpush3.msra.mxu1 %v12265_v59  ;;  %v12455_v17 = vpop.permute.xlu1 %2465 }
 0x877   : > { %10127 = vmatmul.mubr.msk.f32.gmra.mxu1 %vm2500_vm1, %v12311_v23  ;;  %v2699_v14 = vadd.f32 %v2698_v19, %v12455_v17 }
 0x878   : > { %10150 = vmatprep.mubr.msk.f32.mxu1 %vm2500_vm1, %v12244_v34  ;;  %v12457_v43 = vpop.permute.xlu0 %2443 }
 0x87a   : > { %v12459_v1 = vpop.permute.xlu1 %2480 }
 0x87b   : > { %10151 = vmatmul.mubr.msk.f32.vlgmr.msra.gmra.mxu1 %vm2500_vm1, %v12275_v61  ;;  %v2714_v12 = vadd.f32 %v9958_v52, %v12459_v1 }
 0x87c   : > { %10153 = vmatprep.mubr.msk.f32.mxu1 %vm2500_vm1, %v12281_v21  ;;  %v12465_v26 = vpop.permute.xlu0 %2438 }
 0x87e   : > { %v12470_v49 = vpop.permute.xlu1 %2475 }
 0x87f   : > { %10154 = vmatmul.mubr.msk.f32.gmra.mxu1 %vm2500_vm1, %v12293_v24  ;;  %v2709_v25 = vadd.f32 %v2708_v47, %v12470_v49 }
 0x880   : > { %10156 = vmatprep.mubr.msk.f32.mxu1 %vm2500_vm1, %v12299_v62  ;;  %v12473_v8 = vpop.permute.xlu0 %2490 }
 0x881   : > { %v2724_v54 = vadd.f32 %v9961_v48, %v12473_v8 }
 0x882   : > { %v12475_v20 = vpop.permute.xlu1 %2453 }
 0x883   : > { %10157 = vmatmul.mubr.msk.f32.gmra.mxu1 %vm2500_vm1, %v12311_v23 }
 0x884   : > { %v12478_v55 = vpop.permute.xlu0 %2485 }
 0x885   : > { %v2719_v6 = vadd.f32 %v2718_v22, %v12478_v55 }
 0x886   : > { %v12482_v21 = vpop.permute.xlu1 %2448 }
 0x8e7   : > { %v9944_v44 = vpop.f32.mrf.mxu1 }
 0x8e8   : > { %v2591_v50 = vadd.f32 %v9944_v44, %v12449_v38 }
 0x8e9   : > { %v2585_v13 = vpop.f32.mrf.mxu1 }
 0x8ea   : > { %v2728_v34 = vadd.f32 %v2704_v3, %v2591_v50  ;;  %v2586_v0 = vadd.f32 %v2585_v13, %v12453_v56 }
 0x8eb   : > { %v9947_v2 = vpop.f32.mrf.mxu1 }
 0x8ec   : > { %v8744_v9 = vmul.f32 -1.442695, %v2728_v34  ;;  %v2727_v11 = vadd.f32 %v2699_v14, %v2586_v0  ;;  %v2601_v33 = vadd.f32 %v9947_v2, %v12457_v43 }
 0x8ed   : > { %v2595_v29 = vpop.f32.mrf.mxu1 }
 0x8ee   : > { %10864 = vpow2.f32 %v8744_v9  ;;  %v8743_v16 = vmul.f32 -1.442695, %v2727_v11  ;;  %v2596_v18 = vadd.f32 %v2595_v29, %v12465_v26  ;;  %v2742_v41 = vadd.f32 %v2714_v12, %v2601_v33 }
 0x8ef   : > { %v9950_v53 = vpop.f32.mrf.mxu1 }
 0x8f0   : > { %10866 = vpow2.f32 %v8743_v16  ;;  %v2741_v28 = vadd.f32 %v2709_v25, %v2596_v18  ;;  %v8746_v30 = vmul.f32 -1.442695, %v2742_v41  ;;  %v2611_v15 = vadd.f32 %v9950_v53, %v12475_v20 }
 0x8f1   : > { %v2605_v57 = vpop.f32.mrf.mxu1 }
 0x8f2   : > { %v8745_v31 = vmul.f32 -1.442695, %v2741_v28  ;;  %10868 = vpow2.f32 %v8746_v30  ;;  %v2606_v62 = vadd.f32 %v2605_v57, %v12482_v21 }
 0x8f3   : > { %v9972_v33 = vpop.f32.mrf.mxu1 }
 0x8f4   : > { %10870 = vpow2.f32 %v8745_v31  ;;  %v2841_v12 = vadd.f32 %v9972_v33, %v12449_v38 }
 0x8f5   : > { %v2835_v47 = vpop.f32.mrf.mxu1 }
 0x8f6   : > { %v2836_v41 = vadd.f32 %v2835_v47, %v12453_v56 }
 0x8f7   : > { %v9975_v18 = vpop.f32.mrf.mxu1 }
 0x8f8   : > { %v2851_v48 = vadd.f32 %v9975_v18, %v12457_v43 }
 0x8fb   : > { %v10865_v35 = vpop.eup %10864 }
 0x8fc   : > { %v2736_v36 = vadd.f32 1.0, %v10865_v35 }
 0x8fd   : > { %v10867_v37 = vpop.eup %10866 }
 0x8fe   : > { %10872 = vrcp.f32 %v2736_v36  ;;  %v2735_v39 = vadd.f32 1.0, %v10867_v37 }
 0x8ff   : > { %v10869_v40 = vpop.eup %10868 }
 0x900   : > { %10874 = vrcp.f32 %v2735_v39  ;;  %v2750_v60 = vadd.f32 1.0, %v10869_v40  ;;  %v2845_v39 = vpop.f32.mrf.mxu1 }
 0x901   : > { %v10871_v51 = vpop.eup %10870 }
 0x902   : > { %v2749_v63 = vadd.f32 1.0, %v10871_v51  ;;  %10876 = vrcp.f32 %v2750_v60  ;;  %v2846_v60 = vadd.f32 %v2845_v39, %v12465_v26 }
 0x904   : > { %10878 = vrcp.f32 %v2749_v63 }
 0x90b   : > { %v10873_v27 = vpop.eup %10872 }
 0x90c   : > { %v2756_v59 = vmul.f32 %v10873_v27, %v2724_v54 }
 0x90d   : > { %v10875_v61 = vpop.eup %10874 }
 0x90e   : > { %v2758_v24 = vadd.f32 %v2756_v59, %v2611_v15  ;;  %v2755_v23 = vmul.f32 %v10875_v61, %v2719_v6 }
 0x90f   : > { %v10877_v19 = vpop.eup %10876 }
 0x910   : > { %10880 = vtanh.f32 %v2758_v24  ;;  %v2757_v58 = vadd.f32 %v2755_v23, %v2606_v62  ;;  %v2762_v3 = vsub.f32 1.0, %v10877_v19  ;;  %v2766_v13 = vmul.f32 0.0, %v10877_v19  ;;  %v9978_v23 = vpop.f32.mrf.mxu1 }
 0x911   : > { %v10879_v44 = vpop.eup %10878 }
 0x912   : > { %10882 = vtanh.f32 %v2757_v58  ;;  %v2761_v14 = vsub.f32 1.0, %v10879_v44  ;;  %v2765_v9 = vmul.f32 0.0, %v10879_v44 }
 0x91d   : > { %v10881_v50 = vpop.eup %10880 }
 0x91e   : > { %v2764_v52 = vmul.f32 %v10881_v50, %v2762_v3 }
 0x91f   : > { %v10883_v34 = vpop.eup %10882 }
 0x920   : > { %v12485_v0 = vadd.f32 %v2766_v13, %v2764_v52  ;;  %v2763_v2 = vmul.f32 %v10883_v34, %v2761_v14  ;;  %v2855_v52 = vpop.f32.mrf.mxu1  ;;  %v2861_v13 = vadd.f32 %v9978_v23, %v12475_v20 }
 0x922   : > { %v12487_v11 = vadd.f32 %v2765_v9, %v2763_v2  ;;  %9979 = vmatprep.subr.mxu0 %v12485_v0  ;;  %v2856_v9 = vadd.f32 %v2855_v52, %v12482_v21 }
 0x923   : > { %9980 = vmatpush3.msra.mxu0 %v12485_v0 }
 0x924   : > { %9981 = vmatprep.subr.mxu0 %v12487_v11 }
 0x925   : > { %9982 = vmatpush3.msra.mxu0 %v12487_v11 }
 0x926   : > { %9984 = vmatmul.mubr.msk.f32.vlgmr.msra.gmra.mxu0 %vm508_vm0, %v12207_v45 }
 0x927   : > { %9986 = vmatprep.mubr.msk.f32.mxu0 %vm508_vm0, %v12212_v46 }
 0x92a   : > { %9987 = vmatmul.mubr.msk.f32.gmra.mxu0 %vm508_vm0, %v12221_v4 }
 0x92b   : > { %9989 = vmatprep.mubr.msk.f32.mxu0 %vm508_vm0, %v12226_v5 }
 0x92e   : > { %9990 = vmatmul.mubr.msk.f32.gmra.mxu0 %vm508_vm0, %v12235_v7 }
 0x92f   : > { %10013 = vmatprep.mubr.msk.f32.mxu0 %vm508_vm0, %v12198_v32 }
 0x9e6   : > { %v9985_v29 = vpop.f32.mrf.mxu0 }
 0x9e7   : > { %v2936_v16 = vadd.f32 %v9985_v29, %v12451_v42 }
 0x9e8   : > { %v2930_v25 = vpop.f32.mrf.mxu0 }
 0x9e9   : > { %v2960_v28 = vadd.f32 %v2936_v16, %v2841_v12  ;;  %v2931_v30 = vadd.f32 %v2930_v25, %v12455_v17 }
 0x9ea   : > { %v9988_v31 = vpop.f32.mrf.mxu0 }
 0x9eb   : > { %v8760_v35 = vmul.f32 -1.442695, %v2960_v28  ;;  %v2959_v36 = vadd.f32 %v2931_v30, %v2836_v41  ;;  %v2946_v37 = vadd.f32 %v9988_v31, %v12459_v1 }
 0x9ec   : > { %v2940_v40 = vpop.f32.mrf.mxu0 }
 0x9ed   : > { %10884 = vpow2.f32 %v8760_v35  ;;  %v8759_v51 = vmul.f32 -1.442695, %v2959_v36  ;;  %v2941_v53 = vadd.f32 %v2940_v40, %v12470_v49  ;;  %v2974_v22 = vadd.f32 %v2946_v37, %v2851_v48  ;;  %v10002_v40 = vpop.f32.mrf.mxu1 }
 0x9ee   : > { %v9991_v24 = vpop.f32.mrf.mxu0 }
 0x9ef   : > { %10886 = vpow2.f32 %v8759_v51  ;;  %v2973_v54 = vadd.f32 %v2941_v53, %v2846_v60  ;;  %v8762_v63 = vmul.f32 -1.442695, %v2974_v22  ;;  %v2956_v3 = vadd.f32 %v9991_v24, %v12473_v8  ;;  %v3067_v48 = vpop.f32.mrf.mxu1 }
 0x9f0   : > { %v2950_v19 = vpop.f32.mrf.mxu0  ;;  %v3073_v53 = vadd.f32 %v10002_v40, %v12449_v38 }
 0x9f1   : > { %v8761_v27 = vmul.f32 -1.442695, %v2973_v54  ;;  %10888 = vpow2.f32 %v8762_v63  ;;  %v2951_v34 = vadd.f32 %v2950_v19, %v12478_v55  ;;  %v10005_v22 = vpop.f32.mrf.mxu1  ;;  %v3068_v63 = vadd.f32 %v3067_v48, %v12453_v56 }
 0x9f2   : > { %v3083_v23 = vadd.f32 %v10005_v22, %v12457_v43 }
 0x9f3   : > { %10890 = vpow2.f32 %v8761_v27  ;;  %v3077_v24 = vpop.f32.mrf.mxu1 }
 0x9fa   : > { %v10885_v57 = vpop.eup %10884 }
 0x9fb   : > { %v2968_v6 = vadd.f32 1.0, %v10885_v57 }
 0x9fc   : > { %v10887_v15 = vpop.eup %10886 }
 0x9fd   : > { %10892 = vrcp.f32 %v2968_v6  ;;  %v2967_v59 = vadd.f32 1.0, %v10887_v15 }
 0x9fe   : > { %v10889_v61 = vpop.eup %10888 }
 0x9ff   : > { %10894 = vrcp.f32 %v2967_v59  ;;  %v2982_v58 = vadd.f32 1.0, %v10889_v61 }
 0xa00   : > { %v10891_v62 = vpop.eup %10890 }
 0xa01   : > { %v2981_v44 = vadd.f32 1.0, %v10891_v62  ;;  %10896 = vrcp.f32 %v2982_v58 }
 0xa03   : > { %10898 = vrcp.f32 %v2981_v44  ;;  %v3078_v44 = vadd.f32 %v3077_v24, %v12465_v26 }
 0xa0a   : > { %v10893_v50 = vpop.eup %10892 }
 0xa0b   : > { %v2988_v14 = vmul.f32 %v10893_v50, %v2956_v3 }
 0xa0c   : > { %v10895_v2 = vpop.eup %10894 }
 0xa0d   : > { %v2990_v33 = vadd.f32 %v2988_v14, %v2861_v13  ;;  %v2987_v47 = vmul.f32 %v10895_v2, %v2951_v34 }
 0xa0e   : > { %v10897_v12 = vpop.eup %10896 }
 0xa0f   : > { %10900 = vtanh.f32 %v2990_v33  ;;  %v2989_v29 = vadd.f32 %v2987_v47, %v2856_v9  ;;  %v2994_v18 = vsub.f32 1.0, %v10897_v12  ;;  %v2998_v41 = vmul.f32 %v10897_v12, %v12485_v0  ;;  %v10008_v12 = vpop.f32.mrf.mxu1 }
 0xa10   : > { %v10899_v16 = vpop.eup %10898 }
 0xa11   : > { %10902 = vtanh.f32 %v2989_v29  ;;  %v2993_v30 = vsub.f32 1.0, %v10899_v16  ;;  %v2997_v35 = vmul.f32 %v10899_v16, %v12487_v11 }
 0xa1c   : > { %v10901_v25 = vpop.eup %10900 }
 0xa1d   : > { %v2996_v28 = vmul.f32 %v10901_v25, %v2994_v18 }
 0xa1e   : > { %v10903_v31 = vpop.eup %10902 }
 0xa1f   : > { %v12519_v36 = vadd.f32 %v2998_v41, %v2996_v28  ;;  %v2995_v37 = vmul.f32 %v10903_v31, %v2993_v30  ;;  %v3087_v30 = vpop.f32.mrf.mxu1  ;;  %v3093_v31 = vadd.f32 %v10008_v12, %v12475_v20 }
 0xa20   : > { %v3088_v48 = vadd.f32 %v3087_v30, %v12482_v21 }
 0xa21   : > { %v12521_v39 = vadd.f32 %v2997_v35, %v2995_v37  ;;  %10009 = vmatprep.subr.mxu0 %v12519_v36 }
 0xa22   : > { %10010 = vmatpush3.msra.mxu0 %v12519_v36 }
 0xa23   : > { %10011 = vmatprep.subr.mxu0 %v12521_v39 }
 0xa24   : > { %10012 = vmatpush3.msra.mxu0 %v12521_v39 }
 0xa25   : > { %10014 = vmatmul.mubr.msk.f32.vlgmr.msra.gmra.mxu0 %vm508_vm0, %v12207_v45 }
 0xa26   : > { %10016 = vmatprep.mubr.msk.f32.mxu0 %vm508_vm0, %v12212_v46 }
 0xa29   : > { %10017 = vmatmul.mubr.msk.f32.gmra.mxu0 %vm508_vm0, %v12221_v4 }
 0xa2a   : > { %10019 = vmatprep.mubr.msk.f32.mxu0 %vm508_vm0, %v12226_v5 }
 0xa2d   : > { %10020 = vmatmul.mubr.msk.f32.gmra.mxu0 %vm508_vm0, %v12235_v7 }
 0xa2e   : > { %10043 = vmatprep.mubr.msk.f32.mxu0 %vm508_vm0, %v12198_v32 }
 0xae5   : > { %v10015_v51 = vpop.f32.mrf.mxu0 }
 0xae6   : > { %v3168_v60 = vadd.f32 %v10015_v51, %v12451_v42 }
 0xae7   : > { %v3162_v54 = vpop.f32.mrf.mxu0 }
 0xae8   : > { %v3192_v27 = vadd.f32 %v3168_v60, %v3073_v53  ;;  %v3163_v57 = vadd.f32 %v3162_v54, %v12455_v17 }
 0xae9   : > { %v10018_v6 = vpop.f32.mrf.mxu0 }
 0xaea   : > { %v8776_v15 = vmul.f32 -1.442695, %v3192_v27  ;;  %v3191_v59 = vadd.f32 %v3163_v57, %v3068_v63  ;;  %v3178_v61 = vadd.f32 %v10018_v6, %v12459_v1 }
 0xaeb   : > { %v3172_v62 = vpop.f32.mrf.mxu0 }
 0xaec   : > { %10904 = vpow2.f32 %v8776_v15  ;;  %v8775_v58 = vmul.f32 -1.442695, %v3191_v59  ;;  %v3173_v19 = vadd.f32 %v3172_v62, %v12470_v49  ;;  %v3206_v3 = vadd.f32 %v3178_v61, %v3083_v23 }
 0xaed   : > { %v10021_v47 = vpop.f32.mrf.mxu0 }
 0xaee   : > { %10906 = vpow2.f32 %v8775_v58  ;;  %v3205_v50 = vadd.f32 %v3173_v19, %v3078_v44  ;;  %v8778_v52 = vmul.f32 -1.442695, %v3206_v3  ;;  %v3188_v41 = vadd.f32 %v10021_v47, %v12473_v8  ;;  %v10032_v58 = vpop.f32.mrf.mxu1 }
 0xaef   : > { %v3182_v18 = vpop.f32.mrf.mxu0 }
 0xaf0   : > { %v8777_v13 = vmul.f32 -1.442695, %v3205_v50  ;;  %10908 = vpow2.f32 %v8778_v52  ;;  %v3183_v37 = vadd.f32 %v3182_v18, %v12478_v55  ;;  %v3299_v19 = vpop.f32.mrf.mxu1 }
 0xaf2   : > { %10910 = vpow2.f32 %v8777_v13 }
 0xaf9   : > { %v10905_v14 = vpop.eup %10904 }
 0xafa   : > { %v3200_v34 = vadd.f32 1.0, %v10905_v14 }
 0xafb   : > { %v10907_v2 = vpop.eup %10906 }
 0xafc   : > { %10912 = vrcp.f32 %v3200_v34  ;;  %v3199_v9 = vadd.f32 1.0, %v10907_v2 }
 0xafd   : > { %v10909_v33 = vpop.eup %10908 }
 0xafe   : > { %10914 = vrcp.f32 %v3199_v9  ;;  %v3214_v16 = vadd.f32 1.0, %v10909_v33 }
 0xaff   : > { %v10911_v29 = vpop.eup %10910 }
 0xb00   : > { %v3213_v25 = vadd.f32 1.0, %v10911_v29  ;;  %10916 = vrcp.f32 %v3214_v16 }
 0xb02   : > { %10918 = vrcp.f32 %v3213_v25 }
 0xb09   : > { %v10913_v28 = vpop.eup %10912 }
 0xb0a   : > { %v3220_v35 = vmul.f32 %v10913_v28, %v3188_v41 }
 0xb0b   : > { %v10915_v40 = vpop.eup %10914 }
 0xb0c   : > { %v3222_v51 = vadd.f32 %v3220_v35, %v3093_v31  ;;  %v3219_v53 = vmul.f32 %v10915_v40, %v3183_v37 }
 0xb0d   : > { %v10917_v22 = vpop.eup %10916 }
 0xb0e   : > { %10920 = vtanh.f32 %v3222_v51  ;;  %v3221_v60 = vadd.f32 %v3219_v53, %v3088_v48  ;;  %v3226_v63 = vsub.f32 1.0, %v10917_v22  ;;  %v3230_v57 = vmul.f32 %v10917_v22, %v12519_v36 }
 0xb0f   : > { %v10919_v54 = vpop.eup %10918 }
 0xb10   : > { %10922 = vtanh.f32 %v3221_v60  ;;  %v3225_v15 = vsub.f32 1.0, %v10919_v54  ;;  %v3229_v61 = vmul.f32 %v10919_v54, %v12521_v39 }
 0xb1b   : > { %v10921_v27 = vpop.eup %10920 }
 0xb1c   : > { %v3228_v6 = vmul.f32 %v10921_v27, %v3226_v63 }
 0xb1d   : > { %v10923_v59 = vpop.eup %10922 }
 0xb1e   : > { %v12553_v24 = vadd.f32 %v3230_v57, %v3228_v6  ;;  %v3227_v62 = vmul.f32 %v10923_v59, %v3225_v15 }
 0xb20   : > { %v12555_v23 = vadd.f32 %v3229_v61, %v3227_v62  ;;  %10039 = vmatprep.subr.mxu0 %v12553_v24 }
 0xb21   : > { %10040 = vmatpush3.msra.mxu0 %v12553_v24 }
 0xb22   : > { %10041 = vmatprep.subr.mxu0 %v12555_v23 }
 0xb23   : > { %10042 = vmatpush3.msra.mxu0 %v12555_v23 }
 0xb24   : > { %10044 = vmatmul.mubr.msk.f32.vlgmr.msra.gmra.mxu0 %vm508_vm0, %v12207_v45  ;;  %v3305_v45 = vadd.f32 %v10032_v58, %v12449_v38 }
 0xb25   : > { %10046 = vmatprep.mubr.msk.f32.mxu0 %vm508_vm0, %v12212_v46  ;;  %v10035_v46 = vpop.f32.mrf.mxu1 }
 0xb26   : > { %v3315_v9 = vadd.f32 %v10035_v46, %v12457_v43 }
 0xb28   : > { %10047 = vmatmul.mubr.msk.f32.gmra.mxu0 %vm508_vm0, %v12221_v4  ;;  %v3300_v4 = vadd.f32 %v3299_v19, %v12453_v56 }
 0xb29   : > { %10049 = vmatprep.mubr.msk.f32.mxu0 %vm508_vm0, %v12226_v5 }
 0xb2c   : > { %10050 = vmatmul.mubr.msk.f32.gmra.mxu0 %vm508_vm0, %v12235_v7 }
 0xb2d   : > { %10073 = vmatprep.mubr.msk.f32.mxu0 %vm508_vm0, %v12198_v32  ;;  %v3309_v32 = vpop.f32.mrf.mxu1 }
 0xb2e   : > { %v3310_v29 = vadd.f32 %v3309_v32, %v12465_v26  ;;  %v12605_v32 = vld [vmem:[%s13992_s3 + $0x40] sm:$0xff] }
 0xb2f   : > { %v10038_v48 = vpop.f32.mrf.mxu1 }
 0xb30   : > { %v3325_v27 = vadd.f32 %v10038_v48, %v12475_v20 }
 0xb31   : > { %v3319_v63 = vpop.f32.mrf.mxu1 }
 0xb32   : > { %v3320_v59 = vadd.f32 %v3319_v63, %v12482_v21 }
 0xbe4   : > { %v10045_v44 = vpop.f32.mrf.mxu0 }
 0xbe5   : > { %v3400_v3 = vadd.f32 %v10045_v44, %v12451_v42 }
 0xbe6   : > { %v3394_v50 = vpop.f32.mrf.mxu0 }
 0xbe7   : > { %v3424_v52 = vadd.f32 %v3400_v3, %v3305_v45  ;;  %v3395_v5 = vadd.f32 %v3394_v50, %v12455_v17 }
 0xbe8   : > { %v10048_v13 = vpop.f32.mrf.mxu0 }
 0xbe9   : > { %v8792_v14 = vmul.f32 -1.442695, %v3424_v52  ;;  %v3423_v7 = vadd.f32 %v3395_v5, %v3300_v4  ;;  %v3410_v34 = vadd.f32 %v10048_v13, %v12459_v1 }
 0xbea   : > { %v3404_v2 = vpop.f32.mrf.mxu0 }
 0xbeb   : > { %10924 = vpow2.f32 %v8792_v14  ;;  %v8791_v33 = vmul.f32 -1.442695, %v3423_v7  ;;  %v3405_v47 = vadd.f32 %v3404_v2, %v12470_v49  ;;  %v3438_v12 = vadd.f32 %v3410_v34, %v3315_v9  ;;  %v12598_v34 = vld [vmem:[%s13992_s3 + $0x38] sm:$0xff]  ;;  %v12612_v2 = vld [vmem:[%s13992_s3 + $0x48] sm:$0xff]  ;;  %v12619_v9 = vld [vmem:[%s13992_s3 + $0x50] sm:$0xff] }
 0xbec   : > { %v10051_v37 = vpop.f32.mrf.mxu0 }
 0xbed   : > { %10926 = vpow2.f32 %v8791_v33  ;;  %v3437_v16 = vadd.f32 %v3405_v47, %v3310_v29  ;;  %v8794_v18 = vmul.f32 -1.442695, %v3438_v12  ;;  %v3420_v22 = vadd.f32 %v10051_v37, %v12473_v8  ;;  %v12626_v33 = vld [vmem:[%s13992_s3 + $0x58] sm:$0xff]  ;;  %v12633_v47 = vld [vmem:[%s13992_s3 + $0x30] sm:$0xff]  ;;  %v10062_v29 = vpop.f32.mrf.mxu1 }
 0xbee   : > { %v3414_v53 = vpop.f32.mrf.mxu0 }
 0xbef   : > { %v8793_v25 = vmul.f32 -1.442695, %v3437_v16  ;;  %10928 = vpow2.f32 %v8794_v18  ;;  %v3415_v6 = vadd.f32 %v3414_v53, %v12478_v55  ;;  %v3531_v12 = vpop.f32.mrf.mxu1  ;;  %v3537_v18 = vadd.f32 %v10062_v29, %v12449_v38 }
 0xbf1   : > { %10930 = vpow2.f32 %v8793_v25 }
 0xbf8   : > { %v10925_v41 = vpop.eup %10924 }
 0xbf9   : > { %v3432_v28 = vadd.f32 1.0, %v10925_v41  ;;  %v10065_v41 = vpop.f32.mrf.mxu1 }
 0xbfa   : > { %v10927_v30 = vpop.eup %10926 }
 0xbfb   : > { %10932 = vrcp.f32 %v3432_v28  ;;  %v3431_v31 = vadd.f32 1.0, %v10927_v30  ;;  %v3532_v30 = vadd.f32 %v3531_v12, %v12453_v56  ;;  %v3541_v53 = vpop.f32.mrf.mxu1 }
 0xbfc   : > { %v10929_v35 = vpop.eup %10928 }
 0xbfd   : > { %10934 = vrcp.f32 %v3431_v31  ;;  %v3446_v51 = vadd.f32 1.0, %v10929_v35 }
 0xbfe   : > { %v10931_v40 = vpop.eup %10930 }
 0xbff   : > { %v3445_v60 = vadd.f32 1.0, %v10931_v40  ;;  %10936 = vrcp.f32 %v3446_v51 }
 0xc01   : > { %10938 = vrcp.f32 %v3445_v60 }
 0xc08   : > { %v10933_v54 = vpop.eup %10932 }
 0xc09   : > { %v3452_v57 = vmul.f32 %v10933_v54, %v3420_v22  ;;  %v3547_v22 = vadd.f32 %v10065_v41, %v12457_v43 }
 0xc0a   : > { %v10935_v15 = vpop.eup %10934 }
 0xc0b   : > { %v3454_v61 = vadd.f32 %v3452_v57, %v3325_v27  ;;  %v3451_v62 = vmul.f32 %v10935_v15, %v3415_v6  ;;  %v3542_v27 = vadd.f32 %v3541_v53, %v12465_v26 }
 0xc0c   : > { %v10937_v19 = vpop.eup %10936 }
 0xc0d   : > { %10940 = vtanh.f32 %v3454_v61  ;;  %v3453_v58 = vadd.f32 %v3451_v62, %v3320_v59  ;;  %v3458_v45 = vsub.f32 1.0, %v10937_v19  ;;  %v3462_v46 = vmul.f32 %v10937_v19, %v12553_v24 }
 0xc0e   : > { %v10939_v44 = vpop.eup %10938 }
 0xc0f   : > { %10942 = vtanh.f32 %v3453_v58  ;;  %v3457_v4 = vsub.f32 1.0, %v10939_v44  ;;  %v3461_v5 = vmul.f32 %v10939_v44, %v12555_v23 }
 0xc1a   : > { %v10941_v3 = vpop.eup %10940 }
 0xc1b   : > { %v3460_v50 = vmul.f32 %v10941_v3, %v3458_v45 }
 0xc1c   : > { %v10943_v52 = vpop.eup %10942 }
 0xc1d   : > { %v12587_v13 = vadd.f32 %v3462_v46, %v3460_v50  ;;  %v3459_v14 = vmul.f32 %v10943_v52, %v3457_v4  ;;  %v10068_v46 = vpop.f32.mrf.mxu1 }
 0xc1e   : > { %v3557_v12 = vadd.f32 %v10068_v46, %v12475_v20 }
 0xc1f   : > { %v12589_v7 = vadd.f32 %v3461_v5, %v3459_v14  ;;  %10069 = vmatprep.subr.mxu0 %v12587_v13  ;;  %v3551_v29 = vpop.f32.mrf.mxu1 }
 0xc20   : > { %10070 = vmatpush3.msra.mxu0 %v12587_v13  ;;  %v3552_v41 = vadd.f32 %v3551_v29, %v12482_v21 }
 0xc21   : > { %10071 = vmatprep.subr.mxu0 %v12589_v7 }
 0xc22   : > { %10072 = vmatpush3.msra.mxu0 %v12589_v7 }
 0xc23   : > { %10074 = vmatmul.mubr.msk.f32.vlgmr.msra.gmra.mxu0 %vm508_vm0, %v12598_v34 }
 0xc24   : > { %10076 = vmatprep.mubr.msk.f32.mxu0 %vm508_vm0, %v12605_v32 }
 0xc27   : > { %10077 = vmatmul.mubr.msk.f32.gmra.mxu0 %vm508_vm0, %v12612_v2 }
 0xc28   : > { %10079 = vmatprep.mubr.msk.f32.mxu0 %vm508_vm0, %v12619_v9 }
 0xc2b   : > { %10080 = vmatmul.mubr.msk.f32.gmra.mxu0 %vm508_vm0, %v12626_v33 }
 0xc2c   : > { %10103 = vmatprep.mubr.msk.f32.mxu0 %vm508_vm0, %v12633_v47 }
 0xce3   : > { %v10075_v16 = vpop.f32.mrf.mxu0 }
 0xce4   : > { %v3632_v25 = vadd.f32 %v10075_v16, %v12451_v42 }
 0xce5   : > { %v3626_v28 = vpop.f32.mrf.mxu0 }
 0xce6   : > { %v3656_v31 = vadd.f32 %v3632_v25, %v3537_v18  ;;  %v3627_v35 = vadd.f32 %v3626_v28, %v12455_v17 }
 0xce7   : > { %v10078_v37 = vpop.f32.mrf.mxu0 }
 0xce8   : > { %v8808_v40 = vmul.f32 -1.442695, %v3656_v31  ;;  %v3655_v48 = vadd.f32 %v3627_v35, %v3532_v30  ;;  %v3642_v51 = vadd.f32 %v10078_v37, %v12459_v1 }
 0xce9   : > { %v3636_v60 = vpop.f32.mrf.mxu0 }
 0xcea   : > { %10944 = vpow2.f32 %v8808_v40  ;;  %v8807_v54 = vmul.f32 -1.442695, %v3655_v48  ;;  %v3637_v63 = vadd.f32 %v3636_v60, %v12470_v49  ;;  %v3670_v57 = vadd.f32 %v3642_v51, %v3547_v22 }
 0xceb   : > { %v10081_v45 = vpop.f32.mrf.mxu0 }
 0xcec   : > { %10946 = vpow2.f32 %v8807_v54  ;;  %v3669_v6 = vadd.f32 %v3637_v63, %v3542_v27  ;;  %v8810_v15 = vmul.f32 -1.442695, %v3670_v57  ;;  %v3652_v5 = vadd.f32 %v10081_v45, %v12473_v8 }
 0xced   : > { %v3646_v4 = vpop.f32.mrf.mxu0 }
 0xcee   : > { %v8809_v59 = vmul.f32 -1.442695, %v3669_v6  ;;  %10948 = vpow2.f32 %v8810_v15  ;;  %v3647_v18 = vadd.f32 %v3646_v4, %v12478_v55  ;;  %v10092_v6 = vpop.f32.mrf.mxu1 }
 0xcf0   : > { %10950 = vpow2.f32 %v8809_v59  ;;  %v3763_v15 = vpop.f32.mrf.mxu1 }
 0xcf7   : > { %v10945_v61 = vpop.eup %10944 }
 0xcf8   : > { %v3664_v62 = vadd.f32 1.0, %v10945_v61  ;;  %v3769_v61 = vadd.f32 %v10092_v6, %v12449_v38 }
 0xcf9   : > { %v10947_v58 = vpop.eup %10946 }
 0xcfa   : > { %10952 = vrcp.f32 %v3664_v62  ;;  %v3663_v19 = vadd.f32 1.0, %v10947_v58  ;;  %v10095_v58 = vpop.f32.mrf.mxu1 }
 0xcfb   : > { %v10949_v44 = vpop.eup %10948  ;;  %v3779_v29 = vadd.f32 %v10095_v58, %v12457_v43 }
 0xcfc   : > { %10954 = vrcp.f32 %v3663_v19  ;;  %v3678_v50 = vadd.f32 1.0, %v10949_v44  ;;  %v3764_v44 = vadd.f32 %v3763_v15, %v12453_v56 }
 0xcfd   : > { %v10951_v3 = vpop.eup %10950 }
 0xcfe   : > { %v3677_v52 = vadd.f32 1.0, %v10951_v3  ;;  %10956 = vrcp.f32 %v3678_v50 }
 0xd00   : > { %10958 = vrcp.f32 %v3677_v52 }
 0xd07   : > { %v10953_v14 = vpop.eup %10952 }
 0xd08   : > { %v3684_v16 = vmul.f32 %v10953_v14, %v3652_v5  ;;  %v3773_v5 = vpop.f32.mrf.mxu1 }
 0xd09   : > { %v10955_v25 = vpop.eup %10954 }
 0xd0a   : > { %v3686_v28 = vadd.f32 %v3684_v16, %v3557_v12  ;;  %v3683_v30 = vmul.f32 %v10955_v25, %v3647_v18  ;;  %v3774_v18 = vadd.f32 %v3773_v5, %v12465_v26 }
 0xd0b   : > { %v10957_v35 = vpop.eup %10956 }
 0xd0c   : > { %10960 = vtanh.f32 %v3686_v28  ;;  %v3685_v31 = vadd.f32 %v3683_v30, %v3552_v41  ;;  %v3690_v40 = vsub.f32 1.0, %v10957_v35  ;;  %v3694_v51 = vmul.f32 %v10957_v35, %v12587_v13 }
 0xd0d   : > { %v10959_v37 = vpop.eup %10958 }
 0xd0e   : > { %10962 = vtanh.f32 %v3685_v31  ;;  %v3689_v60 = vsub.f32 1.0, %v10959_v37  ;;  %v3693_v54 = vmul.f32 %v10959_v37, %v12589_v7 }
 0xd19   : > { %v10961_v48 = vpop.eup %10960 }
 0xd1a   : > { %v3692_v53 = vmul.f32 %v10961_v48, %v3690_v40 }
 0xd1b   : > { %v10963_v22 = vpop.eup %10962 }
 0xd1c   : > { %v12651_v63 = vadd.f32 %v3694_v51, %v3692_v53  ;;  %v3691_v27 = vmul.f32 %v10963_v22, %v3689_v60  ;;  %v10098_v60 = vpop.f32.mrf.mxu1 }
 0xd1e   : > { %v12653_v57 = vadd.f32 %v3693_v54, %v3691_v27  ;;  %10099 = vmatprep.subr.mxu0 %v12651_v63 }
 0xd1f   : > { %10100 = vmatpush3.msra.mxu0 %v12651_v63 }
 0xd20   : > { %10101 = vmatprep.subr.mxu0 %v12653_v57 }
 0xd21   : > { %10102 = vmatpush3.msra.mxu0 %v12653_v57 }
 0xd22   : > { %10104 = vmatmul.mubr.msk.f32.vlgmr.msra.gmra.mxu0 %vm508_vm0, %v12598_v34 }
 0xd23   : > { %10106 = vmatprep.mubr.msk.f32.mxu0 %vm508_vm0, %v12605_v32 }
 0xd26   : > { %10107 = vmatmul.mubr.msk.f32.gmra.mxu0 %vm508_vm0, %v12612_v2 }
 0xd27   : > { %10109 = vmatprep.mubr.msk.f32.mxu0 %vm508_vm0, %v12619_v9 }
 0xd2a   : > { %10110 = vmatmul.mubr.msk.f32.gmra.mxu0 %vm508_vm0, %v12626_v33 }
 0xd2b   : > { %10133 = vmatprep.mubr.msk.f32.mxu0 %vm508_vm0, %v12633_v47 }
 0xde2   : > { %v10105_v59 = vpop.f32.mrf.mxu0 }
 0xde3   : > { %v3864_v62 = vadd.f32 %v10105_v59, %v12451_v42  ;;  %v3783_v59 = vpop.f32.mrf.mxu1 }
 0xde4   : > { %v3858_v19 = vpop.f32.mrf.mxu0 }
 0xde5   : > { %v3888_v45 = vadd.f32 %v3864_v62, %v3769_v61  ;;  %v3859_v3 = vadd.f32 %v3858_v19, %v12455_v17  ;;  %v3789_v61 = vadd.f32 %v10098_v60, %v12475_v20 }
 0xde6   : > { %v10108_v46 = vpop.f32.mrf.mxu0 }
 0xde7   : > { %v8824_v50 = vmul.f32 -1.442695, %v3888_v45  ;;  %v3887_v4 = vadd.f32 %v3859_v3, %v3764_v44  ;;  %v3874_v52 = vadd.f32 %v10108_v46, %v12459_v1  ;;  %v3784_v44 = vadd.f32 %v3783_v59, %v12482_v21 }
 0xde8   : > { %v3868_v14 = vpop.f32.mrf.mxu0 }
 0xde9   : > { %10964 = vpow2.f32 %v8824_v50  ;;  %v8823_v12 = vmul.f32 -1.442695, %v3887_v4  ;;  %v3869_v16 = vadd.f32 %v3868_v14, %v12470_v49  ;;  %v3902_v25 = vadd.f32 %v3874_v52, %v3779_v29 }
 0xdea   : > { %v10111_v51 = vpop.f32.mrf.mxu0 }
 0xdeb   : > { %10966 = vpow2.f32 %v8823_v12  ;;  %v3901_v41 = vadd.f32 %v3869_v16, %v3774_v18  ;;  %v8826_v28 = vmul.f32 -1.442695, %v3902_v25  ;;  %v3884_v6 = vadd.f32 %v10111_v51, %v12473_v8 }
 0xdec   : > { %v3878_v54 = vpop.f32.mrf.mxu0 }
 0xded   : > { %v8825_v30 = vmul.f32 -1.442695, %v3901_v41  ;;  %10968 = vpow2.f32 %v8826_v28  ;;  %v3879_v58 = vadd.f32 %v3878_v54, %v12478_v55 }
 0xdef   : > { %10970 = vpow2.f32 %v8825_v30  ;;  %v10122_v30 = vpop.f32.mrf.mxu1 }
 0xdf6   : > { %v10965_v31 = vpop.eup %10964 }
 0xdf7   : > { %v3896_v35 = vadd.f32 1.0, %v10965_v31  ;;  %v3995_v31 = vpop.f32.mrf.mxu1 }
 0xdf8   : > { %v10967_v37 = vpop.eup %10966 }
 0xdf9   : > { %10972 = vrcp.f32 %v3896_v35  ;;  %v3895_v40 = vadd.f32 1.0, %v10967_v37  ;;  %v4001_v37 = vadd.f32 %v10122_v30, %v12449_v38 }
 0xdfa   : > { %v10969_v48 = vpop.eup %10968 }
 0xdfb   : > { %10974 = vrcp.f32 %v3895_v40  ;;  %v3910_v22 = vadd.f32 1.0, %v10969_v48  ;;  %v10125_v48 = vpop.f32.mrf.mxu1 }
 0xdfc   : > { %v10971_v53 = vpop.eup %10970 }
 0xdfd   : > { %v3909_v27 = vadd.f32 1.0, %v10971_v53  ;;  %10976 = vrcp.f32 %v3910_v22  ;;  %v3996_v53 = vadd.f32 %v3995_v31, %v12453_v56 }
 0xdff   : > { %10978 = vrcp.f32 %v3909_v27 }
 0xe06   : > { %v10973_v15 = vpop.eup %10972 }
 0xe07   : > { %v3916_v62 = vmul.f32 %v10973_v15, %v3884_v6 }
 0xe08   : > { %v10975_v19 = vpop.eup %10974 }
 0xe09   : > { %v3918_v45 = vadd.f32 %v3916_v62, %v3789_v61  ;;  %v3915_v3 = vmul.f32 %v10975_v19, %v3879_v58  ;;  %v4011_v61 = vadd.f32 %v10125_v48, %v12457_v43 }
 0xe0a   : > { %v10977_v50 = vpop.eup %10976 }
 0xe0b   : > { %10980 = vtanh.f32 %v3918_v45  ;;  %v3917_v46 = vadd.f32 %v3915_v3, %v3784_v44  ;;  %v3922_v52 = vsub.f32 1.0, %v10977_v50  ;;  %v3926_v14 = vmul.f32 %v10977_v50, %v12651_v63 }
 0xe0c   : > { %v10979_v4 = vpop.eup %10978 }
 0xe0d   : > { %10982 = vtanh.f32 %v3917_v46  ;;  %v3921_v12 = vsub.f32 1.0, %v10979_v4  ;;  %v3925_v18 = vmul.f32 %v10979_v4, %v12653_v57 }
 0xe18   : > { %v10981_v5 = vpop.eup %10980 }
 0xe19   : > { %v3924_v29 = vmul.f32 %v10981_v5, %v3922_v52 }
 0xe1a   : > { %v10983_v16 = vpop.eup %10982 }
 0xe1b   : > { %v12685_v25 = vadd.f32 %v3926_v14, %v3924_v29  ;;  %v3923_v41 = vmul.f32 %v10983_v16, %v3921_v12 }
 0xe1d   : > { %v12687_v28 = vadd.f32 %v3925_v18, %v3923_v41  ;;  %10129 = vmatprep.subr.mxu0 %v12685_v25 }
 0xe1e   : > { %10130 = vmatpush3.msra.mxu0 %v12685_v25 }
 0xe1f   : > { %10131 = vmatprep.subr.mxu0 %v12687_v28 }
 0xe20   : > { %10132 = vmatpush3.msra.mxu0 %v12687_v28 }
 0xe21   : > { %10134 = vmatmul.mubr.msk.f32.vlgmr.msra.gmra.mxu0 %vm508_vm0, %v12598_v34 }
 0xe22   : > { %10136 = vmatprep.mubr.msk.f32.mxu0 %vm508_vm0, %v12605_v32 }
 0xe25   : > { %10137 = vmatmul.mubr.msk.f32.gmra.mxu0 %vm508_vm0, %v12612_v2 }
 0xe26   : > { %10139 = vmatprep.mubr.msk.f32.mxu0 %vm508_vm0, %v12619_v9 }
 0xe29   : > { %10140 = vmatmul.mubr.msk.f32.gmra.mxu0 %vm508_vm0, %v12626_v33 }
 0xe2a   : > { %10163 = vmatprep.mubr.msk.f32.mxu0 %vm508_vm0, %v12633_v47  ;;  %v4005_v47 = vpop.f32.mrf.mxu1 }
 0xe2b   : > { %v4006_v19 = vadd.f32 %v4005_v47, %v12465_v26 }
 0xe2c   : > { %v10128_v16 = vpop.f32.mrf.mxu1 }
 0xee1   : > { %v10135_v35 = vpop.f32.mrf.mxu0 }
 0xee2   : > { %v4096_v40 = vadd.f32 %v10135_v35, %v12451_v42 }
 0xee3   : > { %v4090_v51 = vpop.f32.mrf.mxu0 }
 0xee4   : > { %v4120_v60 = vadd.f32 %v4096_v40, %v4001_v37  ;;  %v4091_v22 = vadd.f32 %v4090_v51, %v12455_v17  ;;  %v4015_v37 = vpop.f32.mrf.mxu1  ;;  %v4021_v40 = vadd.f32 %v10128_v16, %v12475_v20 }
 0xee5   : > { %v10138_v54 = vpop.f32.mrf.mxu0 }
 0xee6   : > { %v8840_v27 = vmul.f32 -1.442695, %v4120_v60  ;;  %v4119_v6 = vadd.f32 %v4091_v22, %v3996_v53  ;;  %v4106_v15 = vadd.f32 %v10138_v54, %v12459_v1  ;;  %v4016_v60 = vadd.f32 %v4015_v37, %v12482_v21 }
 0xee7   : > { %v4100_v59 = vpop.f32.mrf.mxu0 }
 0xee8   : > { %10984 = vpow2.f32 %v8840_v27  ;;  %v8839_v62 = vmul.f32 -1.442695, %v4119_v6  ;;  %v4101_v58 = vadd.f32 %v4100_v59, %v12470_v49  ;;  %v4134_v44 = vadd.f32 %v4106_v15, %v4011_v61 }
 0xee9   : > { %v10141_v29 = vpop.f32.mrf.mxu0 }
 0xeea   : > { %10986 = vpow2.f32 %v8839_v62  ;;  %v4133_v45 = vadd.f32 %v4101_v58, %v4006_v19  ;;  %v8842_v3 = vmul.f32 -1.442695, %v4134_v44  ;;  %v4116_v31 = vadd.f32 %v10141_v29, %v12473_v8 }
 0xeeb   : > { %v4110_v41 = vpop.f32.mrf.mxu0 }
 0xeec   : > { %v8841_v46 = vmul.f32 -1.442695, %v4133_v45  ;;  %10988 = vpow2.f32 %v8842_v3  ;;  %v4111_v51 = vadd.f32 %v4110_v41, %v12478_v55 }
 0xeee   : > { %10990 = vpow2.f32 %v8841_v46 }
 0xef5   : > { %v10985_v50 = vpop.eup %10984 }
 0xef6   : > { %v4128_v4 = vadd.f32 1.0, %v10985_v50  ;;  %v12740_v50 = vld [vmem:[%s13992_s3 + $0x60] sm:$0xff] }
 0xef7   : > { %v10987_v52 = vpop.eup %10986 }
 0xef8   : > { %10992 = vrcp.f32 %v4128_v4  ;;  %v4127_v5 = vadd.f32 1.0, %v10987_v52  ;;  %v12786_v4 = vld [vmem:[%s13991_s2 + $0x30] sm:$0xff]  ;;  %v10152_v52 = vpop.f32.mrf.mxu1 }
 0xef9   : > { %v10989_v14 = vpop.eup %10988  ;;  %10180 = vmatprep.mubr.msk.f32.mxu1 %vm2500_vm1, %v12786_v4  ;;  %v4233_v29 = vadd.f32 %v10152_v52, %v12449_v38 }
 0xefa   : > { %10994 = vrcp.f32 %v4127_v5  ;;  %v4142_v18 = vadd.f32 1.0, %v10989_v14  ;;  %v4227_v5 = vpop.f32.mrf.mxu1 }
 0xefb   : > { %v10991_v12 = vpop.eup %10990  ;;  %v4228_v41 = vadd.f32 %v4227_v5, %v12453_v56 }
 0xefc   : > { %v4141_v30 = vadd.f32 1.0, %v10991_v12  ;;  %10996 = vrcp.f32 %v4142_v18  ;;  %v10155_v16 = vpop.f32.mrf.mxu1 }
 0xefe   : > { %10998 = vrcp.f32 %v4141_v30 }
 0xf05   : > { %v10993_v35 = vpop.eup %10992 }
 0xf06   : > { %v4148_v48 = vmul.f32 %v10993_v35, %v4116_v31 }
 0xf07   : > { %v10995_v53 = vpop.eup %10994 }
 0xf08   : > { %v4150_v22 = vadd.f32 %v4148_v48, %v4021_v40  ;;  %v4147_v54 = vmul.f32 %v10995_v53, %v4111_v51  ;;  %v4237_v51 = vpop.f32.mrf.mxu1 }
 0xf09   : > { %v10997_v6 = vpop.eup %10996 }
 0xf0a   : > { %11000 = vtanh.f32 %v4150_v22  ;;  %v4149_v27 = vadd.f32 %v4147_v54, %v4016_v60  ;;  %v4154_v47 = vsub.f32 1.0, %v10997_v6  ;;  %v4158_v61 = vmul.f32 %v10997_v6, %v12685_v25 }
 0xf0b   : > { %v10999_v15 = vpop.eup %10998  ;;  %v4243_v60 = vadd.f32 %v10155_v16, %v12457_v43  ;;  %v4238_v22 = vadd.f32 %v4237_v51, %v12465_v26 }
 0xf0c   : > { %11002 = vtanh.f32 %v4149_v27  ;;  %v4153_v58 = vsub.f32 1.0, %v10999_v15  ;;  %v4157_v44 = vmul.f32 %v10999_v15, %v12687_v28 }
 0xf17   : > { %v11001_v59 = vpop.eup %11000 }
 0xf18   : > { %v4156_v62 = vmul.f32 %v11001_v59, %v4154_v47 }
 0xf19   : > { %v11003_v19 = vpop.eup %11002 }
 0xf1a   : > { %v12719_v45 = vadd.f32 %v4158_v61, %v4156_v62  ;;  %v4155_v3 = vmul.f32 %v11003_v19, %v4153_v58  ;;  %v10158_v62 = vpop.f32.mrf.mxu1 }
 0xf1b   : > { %v4253_v52 = vadd.f32 %v10158_v62, %v12475_v20 }
 0xf1c   : > { %v12721_v46 = vadd.f32 %v4157_v44, %v4155_v3  ;;  %10159 = vmatprep.subr.mxu0 %v12719_v45  ;;  %v4247_v3 = vpop.f32.mrf.mxu1 }
 0xf1d   : > { %10160 = vmatpush3.msra.mxu0 %v12719_v45 }
 0xf1e   : > { %10161 = vmatprep.subr.mxu0 %v12721_v46 }
 0xf1f   : > { %10162 = vmatpush3.msra.mxu0 %v12721_v46 }
 0xf20   : > { %10164 = vmatmul.mubr.msk.f32.vlgmr.msra.gmra.mxu0 %vm508_vm0, %v12598_v34  ;;  %10189 = vmatprep.subr.mxu0 %v14000_v10  ;;  %v12749_v34 = vld [vmem:[%s13992_s3 + $0x68] sm:$0xff] }
 0xf21   : > { %10166 = vmatprep.mubr.msk.f32.mxu0 %vm508_vm0, %v12605_v32  ;;  %10190 = vmatpush3.msra.mxu0 %v14000_v10  ;;  %v12754_v32 = vld [vmem:[%s13992_s3 + $0x70] sm:$0xff] }
 0xf24   : > { %10167 = vmatmul.mubr.msk.f32.gmra.mxu0 %vm508_vm0, %v12612_v2  ;;  %v12763_v2 = vld [vmem:[%s13992_s3 + $0x78] sm:$0xff] }
 0xf25   : > { %10169 = vmatprep.mubr.msk.f32.mxu0 %vm508_vm0, %v12619_v9  ;;  %v12768_v9 = vld [vmem:[%s13992_s3 + $0x80] sm:$0xff] }
 0xf28   : > { %10170 = vmatmul.mubr.msk.f32.gmra.mxu0 %vm508_vm0, %v12626_v33  ;;  %v12777_v33 = vld [vmem:[%s13992_s3 + $0x88] sm:$0xff] }
 0xf29   : > { %10191 = vmatprep.mubr.msk.f32.mxu0 %vm508_vm0, %v12740_v50 }
 0xf2c   : > { %10192 = vmatmul.mubr.msk.f32.vlgmr.msra.gmra.mxu0 %vm508_vm0, %v12749_v34 }
 0xf2d   : > { %10194 = vmatprep.mubr.msk.f32.mxu0 %vm508_vm0, %v12754_v32 }
 0xf30   : > { %10195 = vmatmul.mubr.msk.f32.gmra.mxu0 %vm508_vm0, %v12763_v2 }
 0xf31   : > { %10197 = vmatprep.mubr.msk.f32.mxu0 %vm508_vm0, %v12768_v9 }
 0xf34   : > { %10198 = vmatmul.mubr.msk.f32.gmra.mxu0 %vm508_vm0, %v12777_v33 }
 0xf35   : > { %10221 = vmatprep.mubr.msk.f32.mxu0 %vm508_vm0, %v12740_v50 }
 0xfe0   : > { %v10165_v14 = vpop.f32.mrf.mxu0 }
 0xfe1   : > { %v4328_v12 = vadd.f32 %v10165_v14, %v12451_v42 }
 0xfe2   : > { %v4322_v18 = vpop.f32.mrf.mxu0 }
 0xfe3   : > { %v4352_v30 = vadd.f32 %v4328_v12, %v4233_v29  ;;  %v4323_v31 = vadd.f32 %v4322_v18, %v12455_v17  ;;  %v4248_v12 = vadd.f32 %v4247_v3, %v12482_v21 }
 0xfe4   : > { %v10168_v35 = vpop.f32.mrf.mxu0 }
 0xfe5   : > { %v8856_v37 = vmul.f32 -1.442695, %v4352_v30  ;;  %v4351_v40 = vadd.f32 %v4323_v31, %v4228_v41  ;;  %v4338_v48 = vadd.f32 %v10168_v35, %v12459_v1 }
 0xfe6   : > { %v4332_v53 = vpop.f32.mrf.mxu0 }
 0xfe7   : > { %11004 = vpow2.f32 %v8856_v37  ;;  %v8855_v38 = vmul.f32 -1.442695, %v4351_v40  ;;  %v4333_v42 = vadd.f32 %v4332_v53, %v12470_v49  ;;  %v4366_v56 = vadd.f32 %v4338_v48, %v4243_v60  ;;  %v12817_v60 = vld [vmem:[%s13991_s2 + $0x38] sm:$0xff] }
 0xfe8   : > { %v10171_v59 = vpop.f32.mrf.mxu0 }
 0xfe9   : > { %11006 = vpow2.f32 %v8855_v38  ;;  %v4365_v54 = vadd.f32 %v4333_v42, %v4238_v22  ;;  %v8858_v27 = vmul.f32 -1.442695, %v4366_v56  ;;  %v4348_v19 = vadd.f32 %v10171_v59, %v12473_v8  ;;  %v12823_v38 = vld [vmem:[%s13991_s2 + $0x40] sm:$0xff]  ;;  %v12835_v42 = vld [vmem:[%s13991_s2 + $0x48] sm:$0xff]  ;;  %v12841_v22 = vld [vmem:[%s13991_s2 + $0x50] sm:$0xff] }
 0xfea   : > { %v4342_v58 = vpop.f32.mrf.mxu0  ;;  %v12853_v56 = vld [vmem:[%s13991_s2 + $0x58] sm:$0xff] }
 0xfeb   : > { %v8857_v17 = vmul.f32 -1.442695, %v4365_v54  ;;  %11008 = vpow2.f32 %v8858_v27  ;;  %v4343_v14 = vadd.f32 %v4342_v58, %v12478_v55 }
 0xfed   : > { %11010 = vpow2.f32 %v8857_v17 }
 0xff4   : > { %v11005_v6 = vpop.eup %11004 }
 0xff5   : > { %v4360_v15 = vadd.f32 1.0, %v11005_v6 }
 0xff6   : > { %v11007_v1 = vpop.eup %11006 }
 0xff7   : > { %11012 = vrcp.f32 %v4360_v15  ;;  %v4359_v47 = vadd.f32 1.0, %v11007_v1 }
 0xff8   : > { %v11009_v43 = vpop.eup %11008 }
 0xff9   : > { %11014 = vrcp.f32 %v4359_v47  ;;  %v4374_v49 = vadd.f32 1.0, %v11009_v43 }
 0xffa   : > { %v11011_v61 = vpop.eup %11010 }
 0xffb   : > { %v4373_v26 = vadd.f32 1.0, %v11011_v61  ;;  %11016 = vrcp.f32 %v4374_v49 }
 0xffd   : > { %11018 = vrcp.f32 %v4373_v26 }
0x1004   : > { %v11013_v44 = vpop.eup %11012 }
0x1005   : > { %v4380_v5 = vmul.f32 %v11013_v44, %v4348_v19 }
0x1006   : > { %v11015_v29 = vpop.eup %11014 }
0x1007   : > { %v4382_v16 = vadd.f32 %v4380_v5, %v4253_v52  ;;  %v4379_v18 = vmul.f32 %v11015_v29, %v4343_v14 }
0x1008   : > { %v11017_v30 = vpop.eup %11016 }
0x1009   : > { %11020 = vtanh.f32 %v4382_v16  ;;  %v4381_v41 = vadd.f32 %v4379_v18, %v4248_v12  ;;  %v4386_v8 = vsub.f32 1.0, %v11017_v30  ;;  %v4390_v20 = vmul.f32 %v11017_v30, %v12719_v45 }
0x100a   : > { %v11019_v31 = vpop.eup %11018 }
0x100b   : > { %11022 = vtanh.f32 %v4381_v41  ;;  %v4385_v40 = vsub.f32 1.0, %v11019_v31  ;;  %v4389_v21 = vmul.f32 %v11019_v31, %v12721_v46 }
0x1016   : > { %v11021_v35 = vpop.eup %11020 }
0x1017   : > { %v4388_v37 = vmul.f32 %v11021_v35, %v4386_v8 }
0x1018   : > { %v11023_v48 = vpop.eup %11022 }
0x1019   : > { %v12803_v51 = vadd.f32 %v4390_v20, %v4388_v37  ;;  %v4387_v55 = vmul.f32 %v11023_v48, %v4385_v40 }
0x101b   : > { %10172 = vmatprep.subr.mxu1 %v12803_v51  ;;  %v12807_v53 = vadd.f32 %v4389_v21, %v4387_v55 }
0x101c   : > { %10173 = vmatpush3.msra.mxu1 %v12803_v51 }
0x101d   : > { %10174 = vmatprep.subr.mxu1 %v12807_v53 }
0x101e   : > { %10175 = vmatpush3.msra.mxu1 %v12807_v53 }
0x101f   : > { %10176 = vmatprep.subr.mxu1 %v12485_v0 }
0x1020   : > { %10177 = vmatpush3.msra.mxu1 %v12485_v0 }
0x1021   : > { %10178 = vmatprep.subr.mxu1 %v12487_v11 }
0x1022   : > { %10179 = vmatpush3.msra.mxu1 %v12487_v11 }
0x1023   : > { %10181 = vmatmul.mubr.msk.f32.vlgmr.msra.gmra.mxu1 %vm2500_vm1, %v12817_v60  ;;  %10200 = vmatprep.subr.mxu1 %v12719_v45 }
0x1024   : > { %10201 = vmatpush3.msra.mxu1 %v12719_v45  ;;  %10183 = vmatprep.mubr.msk.f32.mxu1 %vm2500_vm1, %v12823_v38 }
0x1025   : > { %10202 = vmatprep.subr.mxu1 %v12721_v46 }
0x1026   : > { %10203 = vmatpush3.msra.mxu1 %v12721_v46 }
0x1027   : > { %10184 = vmatmul.mubr.msk.f32.gmra.mxu1 %vm2500_vm1, %v12835_v42  ;;  %10204 = vmatprep.subr.mxu1 %v12519_v36 }
0x1028   : > { %10205 = vmatpush3.msra.mxu1 %v12519_v36  ;;  %10186 = vmatprep.mubr.msk.f32.mxu1 %vm2500_vm1, %v12841_v22 }
0x1029   : > { %10206 = vmatprep.subr.mxu1 %v12521_v39 }
0x102a   : > { %10207 = vmatpush3.msra.mxu1 %v12521_v39 }
0x102b   : > { %10187 = vmatmul.mubr.msk.f32.gmra.mxu1 %vm2500_vm1, %v12853_v56  ;;  %10230 = vmatprep.subr.mxu1 %v12685_v25 }
0x102c   : > { %10208 = vmatprep.mubr.msk.f32.mxu1 %vm2500_vm1, %v12786_v4 }
0x102f   : > { %10209 = vmatmul.mubr.msk.f32.vlgmr.msra.gmra.mxu1 %vm2500_vm1, %v12817_v60 }
0x1030   : > { %10231 = vmatpush3.msra.mxu1 %v12685_v25  ;;  %10211 = vmatprep.mubr.msk.f32.mxu1 %vm2500_vm1, %v12823_v38 }
0x1031   : > { %10232 = vmatprep.subr.mxu1 %v12687_v28 }
0x1032   : > { %10233 = vmatpush3.msra.mxu1 %v12687_v28 }
0x1033   : > { %10234 = vmatprep.subr.mxu1 %v12553_v24  ;;  %10212 = vmatmul.mubr.msk.f32.gmra.mxu1 %vm2500_vm1, %v12835_v42 }
0x1034   : > { %10235 = vmatpush3.msra.mxu1 %v12553_v24  ;;  %10214 = vmatprep.mubr.msk.f32.mxu1 %vm2500_vm1, %v12841_v22 }
0x1035   : > { %10236 = vmatprep.subr.mxu1 %v12555_v23 }
0x1036   : > { %10237 = vmatpush3.msra.mxu1 %v12555_v23 }
0x1037   : > { %10260 = vmatprep.subr.mxu1 %v12651_v63  ;;  %10215 = vmatmul.mubr.msk.f32.gmra.mxu1 %vm2500_vm1, %v12853_v56 }
0x1038   : > { %10238 = vmatprep.mubr.msk.f32.mxu1 %vm2500_vm1, %v12786_v4 }
0x103b   : > { %10239 = vmatmul.mubr.msk.f32.vlgmr.msra.gmra.mxu1 %vm2500_vm1, %v12817_v60 }
0x103c   : > { %10261 = vmatpush3.msra.mxu1 %v12651_v63  ;;  %10241 = vmatprep.mubr.msk.f32.mxu1 %vm2500_vm1, %v12823_v38 }
0x103d   : > { %10262 = vmatprep.subr.mxu1 %v12653_v57 }
0x103e   : > { %10263 = vmatpush3.msra.mxu1 %v12653_v57 }
0x103f   : > { %10264 = vmatprep.subr.mxu1 %v12587_v13  ;;  %10242 = vmatmul.mubr.msk.f32.gmra.mxu1 %vm2500_vm1, %v12835_v42 }
0x1040   : > { %10265 = vmatpush3.msra.mxu1 %v12587_v13  ;;  %10244 = vmatprep.mubr.msk.f32.mxu1 %vm2500_vm1, %v12841_v22 }
0x1041   : > { %10266 = vmatprep.subr.mxu1 %v12589_v7 }
0x1042   : > { %10267 = vmatpush3.msra.mxu1 %v12589_v7 }
0x1043   : > { %10290 = vmatprep.subr.mxu1 %v12587_v13  ;;  %10245 = vmatmul.mubr.msk.f32.gmra.mxu1 %vm2500_vm1, %v12853_v56 }
0x1044   : > { %10268 = vmatprep.mubr.msk.f32.mxu1 %vm2500_vm1, %v12786_v4 }
0x1047   : > { %10269 = vmatmul.mubr.msk.f32.vlgmr.msra.gmra.mxu1 %vm2500_vm1, %v12817_v60 }
0x1048   : > { %10291 = vmatpush3.msra.mxu1 %v12587_v13  ;;  %10271 = vmatprep.mubr.msk.f32.mxu1 %vm2500_vm1, %v12823_v38 }
0x1049   : > { %10292 = vmatprep.subr.mxu1 %v12589_v7 }
0x104a   : > { %10293 = vmatpush3.msra.mxu1 %v12589_v7 }
0x104b   : > { %10294 = vmatprep.subr.mxu1 %v12651_v63  ;;  %10272 = vmatmul.mubr.msk.f32.gmra.mxu1 %vm2500_vm1, %v12835_v42 }
0x104c   : > { %10295 = vmatpush3.msra.mxu1 %v12651_v63  ;;  %10274 = vmatprep.mubr.msk.f32.mxu1 %vm2500_vm1, %v12841_v22 }
0x104d   : > { %10296 = vmatprep.subr.mxu1 %v12653_v57 }
0x104e   : > { %10297 = vmatpush3.msra.mxu1 %v12653_v57 }
0x104f   : > { %10320 = vmatprep.subr.mxu1 %v12553_v24  ;;  %10275 = vmatmul.mubr.msk.f32.gmra.mxu1 %vm2500_vm1, %v12853_v56 }
0x1050   : > { %10298 = vmatprep.mubr.msk.f32.mxu1 %vm2500_vm1, %v12786_v4 }
0x1053   : > { %10299 = vmatmul.mubr.msk.f32.vlgmr.msra.gmra.mxu1 %vm2500_vm1, %v12817_v60 }
0x1054   : > { %10321 = vmatpush3.msra.mxu1 %v12553_v24  ;;  %10301 = vmatprep.mubr.msk.f32.mxu1 %vm2500_vm1, %v12823_v38 }
0x1055   : > { %10322 = vmatprep.subr.mxu1 %v12555_v23 }
0x1056   : > { %10323 = vmatpush3.msra.mxu1 %v12555_v23 }
0x1057   : > { %10324 = vmatprep.subr.mxu1 %v12685_v25  ;;  %10302 = vmatmul.mubr.msk.f32.gmra.mxu1 %vm2500_vm1, %v12835_v42 }
0x1058   : > { %10325 = vmatpush3.msra.mxu1 %v12685_v25  ;;  %10304 = vmatprep.mubr.msk.f32.mxu1 %vm2500_vm1, %v12841_v22 }
0x1059   : > { %10326 = vmatprep.subr.mxu1 %v12687_v28 }
0x105a   : > { %10327 = vmatpush3.msra.mxu1 %v12687_v28 }
0x105b   : > { %10350 = vmatprep.subr.mxu1 %v12519_v36  ;;  %10305 = vmatmul.mubr.msk.f32.gmra.mxu1 %vm2500_vm1, %v12853_v56 }
0x105c   : > { %10328 = vmatprep.mubr.msk.f32.mxu1 %vm2500_vm1, %v12786_v4 }
0x105f   : > { %10329 = vmatmul.mubr.msk.f32.vlgmr.msra.gmra.mxu1 %vm2500_vm1, %v12817_v60 }
0x1060   : > { %10351 = vmatpush3.msra.mxu1 %v12519_v36  ;;  %10331 = vmatprep.mubr.msk.f32.mxu1 %vm2500_vm1, %v12823_v38 }
0x1061   : > { %10352 = vmatprep.subr.mxu1 %v12521_v39 }
0x1062   : > { %10353 = vmatpush3.msra.mxu1 %v12521_v39  ;;  %v10193_v39 = vpop.f32.mrf.mxu0 }
0x1063   : > { %10354 = vmatprep.subr.mxu1 %v12719_v45  ;;  %10332 = vmatmul.mubr.msk.f32.gmra.mxu1 %vm2500_vm1, %v12835_v42 }
0x1064   : > { %10355 = vmatpush3.msra.mxu1 %v12719_v45  ;;  %10334 = vmatprep.mubr.msk.f32.mxu1 %vm2500_vm1, %v12841_v22  ;;  %v4678_v23 = vpop.f32.mrf.mxu0 }
0x1065   : > { %10356 = vmatprep.subr.mxu1 %v12721_v46 }
0x1066   : > { %10357 = vmatpush3.msra.mxu1 %v12721_v46  ;;  %v10196_v28 = vpop.f32.mrf.mxu0 }
0x1067   : > { %10380 = vmatprep.subr.mxu1 %v12485_v0  ;;  %10335 = vmatmul.mubr.msk.f32.gmra.mxu1 %vm2500_vm1, %v12853_v56 }
0x1068   : > { %10358 = vmatprep.mubr.msk.f32.mxu1 %vm2500_vm1, %v12786_v4  ;;  %v4688_v47 = vpop.f32.mrf.mxu0 }
0x106a   : > { %v10199_v18 = vpop.f32.mrf.mxu0 }
0x106b   : > { %10359 = vmatmul.mubr.msk.f32.vlgmr.msra.gmra.mxu1 %vm2500_vm1, %v12817_v60 }
0x106c   : > { %10381 = vmatpush3.msra.mxu1 %v12485_v0  ;;  %10361 = vmatprep.mubr.msk.f32.mxu1 %vm2500_vm1, %v12823_v38  ;;  %v12991_v0 = vpop.permute.xlu0 %4414  ;;  %v4698_v35 = vpop.f32.mrf.mxu0 }
0x106d   : > { %10382 = vmatprep.subr.mxu1 %v12487_v11 }
0x106e   : > { %10383 = vmatpush3.msra.mxu1 %v12487_v11  ;;  %v12993_v11 = vpop.permute.xlu1 %4451 }
0x106f   : > { %10384 = vmatprep.subr.mxu1 %v12803_v51  ;;  %10362 = vmatmul.mubr.msk.f32.gmra.mxu1 %vm2500_vm1, %v12835_v42  ;;  %v4684_v57 = vadd.f32 %v10193_v39, %v12993_v11 }
0x1070   : > { %10385 = vmatpush3.msra.mxu1 %v12803_v51  ;;  %10364 = vmatprep.mubr.msk.f32.mxu1 %vm2500_vm1, %v12841_v22  ;;  %v12995_v36 = vpop.permute.xlu0 %4409 }
0x1071   : > { %10386 = vmatprep.subr.mxu1 %v12807_v53 }
0x1072   : > { %10387 = vmatpush3.msra.mxu1 %v12807_v53  ;;  %v12997_v24 = vpop.permute.xlu1 %4446 }
0x1073   : > { %10365 = vmatmul.mubr.msk.f32.gmra.mxu1 %vm2500_vm1, %v12853_v56  ;;  %v4679_v46 = vadd.f32 %v4678_v23, %v12997_v24 }
0x1074   : > { %10388 = vmatprep.mubr.msk.f32.mxu1 %vm2500_vm1, %v12786_v4  ;;  %v12999_v13 = vpop.permute.xlu0 %4424 }
0x1076   : > { %v13001_v63 = vpop.permute.xlu1 %4461 }
0x1077   : > { %10389 = vmatmul.mubr.msk.f32.vlgmr.msra.gmra.mxu1 %vm2500_vm1, %v12817_v60  ;;  %v4694_v59 = vadd.f32 %v10196_v28, %v13001_v63 }
0x1078   : > { %10391 = vmatprep.mubr.msk.f32.mxu1 %vm2500_vm1, %v12823_v38  ;;  %v13007_v17 = vpop.permute.xlu0 %4419 }
0x107a   : > { %v13012_v49 = vpop.permute.xlu1 %4456 }
0x107b   : > { %10392 = vmatmul.mubr.msk.f32.gmra.mxu1 %vm2500_vm1, %v12835_v42  ;;  %v4689_v58 = vadd.f32 %v4688_v47, %v13012_v49 }
0x107c   : > { %10394 = vmatprep.mubr.msk.f32.mxu1 %vm2500_vm1, %v12841_v22  ;;  %v13015_v16 = vpop.permute.xlu0 %4471 }
0x107d   : > { %v4704_v37 = vadd.f32 %v10199_v18, %v13015_v16 }
0x107e   : > { %v13017_v30 = vpop.permute.xlu1 %4434 }
0x107f   : > { %10395 = vmatmul.mubr.msk.f32.gmra.mxu1 %vm2500_vm1, %v12853_v56 }
0x1080   : > { %v13020_v48 = vpop.permute.xlu0 %4466 }
0x1081   : > { %v4699_v55 = vadd.f32 %v4698_v35, %v13020_v48 }
0x1082   : > { %v13024_v38 = vpop.permute.xlu1 %4429 }
0x10e3   : > { %v10182_v7 = vpop.f32.mrf.mxu1 }
0x10e4   : > { %v4571_v25 = vadd.f32 %v10182_v7, %v12991_v0 }
0x10e5   : > { %v4565_v45 = vpop.f32.mrf.mxu1 }
0x10e6   : > { %v4708_v4 = vadd.f32 %v4684_v57, %v4571_v25  ;;  %v4566_v54 = vadd.f32 %v4565_v45, %v12995_v36 }
0x10e7   : > { %v10185_v27 = vpop.f32.mrf.mxu1 }
0x10e8   : > { %v8896_v6 = vmul.f32 -1.442695, %v4708_v4  ;;  %v4707_v15 = vadd.f32 %v4679_v46, %v4566_v54  ;;  %v4581_v1 = vadd.f32 %v10185_v27, %v12999_v13 }
0x10e9   : > { %v4575_v43 = vpop.f32.mrf.mxu1 }
0x10ea   : > { %11024 = vpow2.f32 %v8896_v6  ;;  %v8895_v61 = vmul.f32 -1.442695, %v4707_v15  ;;  %v4576_v62 = vadd.f32 %v4575_v43, %v13007_v17  ;;  %v4722_v26 = vadd.f32 %v4694_v59, %v4581_v1 }
0x10eb   : > { %v10188_v31 = vpop.f32.mrf.mxu1 }
0x10ec   : > { %11026 = vpow2.f32 %v8895_v61  ;;  %v4721_v19 = vadd.f32 %v4689_v58, %v4576_v62  ;;  %v8898_v44 = vmul.f32 -1.442695, %v4722_v26  ;;  %v4591_v21 = vadd.f32 %v10188_v31, %v13017_v30 }
0x10ed   : > { %v4585_v51 = vpop.f32.mrf.mxu1 }
0x10ee   : > { %v8897_v3 = vmul.f32 -1.442695, %v4721_v19  ;;  %11028 = vpow2.f32 %v8898_v44  ;;  %v4586_v22 = vadd.f32 %v4585_v51, %v13024_v38 }
0x10ef   : > { %v10210_v1 = vpop.f32.mrf.mxu1 }
0x10f0   : > { %11030 = vpow2.f32 %v8897_v3  ;;  %v4821_v59 = vadd.f32 %v10210_v1, %v12991_v0 }
0x10f1   : > { %v4815_v47 = vpop.f32.mrf.mxu1 }
0x10f2   : > { %v4816_v26 = vadd.f32 %v4815_v47, %v12995_v36 }
0x10f3   : > { %v10213_v62 = vpop.f32.mrf.mxu1 }
0x10f4   : > { %v4831_v18 = vadd.f32 %v10213_v62, %v12999_v13 }
0x10f7   : > { %v11025_v52 = vpop.eup %11024 }
0x10f8   : > { %v4716_v5 = vadd.f32 1.0, %v11025_v52 }
0x10f9   : > { %v11027_v14 = vpop.eup %11026 }
0x10fa   : > { %11032 = vrcp.f32 %v4716_v5  ;;  %v4715_v29 = vadd.f32 1.0, %v11027_v14 }
0x10fb   : > { %v11029_v12 = vpop.eup %11028 }
0x10fc   : > { %11034 = vrcp.f32 %v4715_v29  ;;  %v4730_v8 = vadd.f32 1.0, %v11029_v12  ;;  %v4825_v29 = vpop.f32.mrf.mxu1 }
0x10fd   : > { %v11031_v41 = vpop.eup %11030 }
0x10fe   : > { %v4729_v20 = vadd.f32 1.0, %v11031_v41  ;;  %11036 = vrcp.f32 %v4730_v8  ;;  %v4826_v8 = vadd.f32 %v4825_v29, %v13007_v17 }
0x1100   : > { %11038 = vrcp.f32 %v4729_v20 }
0x1107   : > { %v11033_v40 = vpop.eup %11032 }
0x1108   : > { %v4736_v53 = vmul.f32 %v11033_v40, %v4704_v37 }
0x1109   : > { %v11035_v60 = vpop.eup %11034 }
0x110a   : > { %v4738_v42 = vadd.f32 %v4736_v53, %v4591_v21  ;;  %v4735_v56 = vmul.f32 %v11035_v60, %v4699_v55 }
0x110b   : > { %v11037_v23 = vpop.eup %11036 }
0x110c   : > { %11040 = vtanh.f32 %v4738_v42  ;;  %v4737_v39 = vadd.f32 %v4735_v56, %v4586_v22  ;;  %v4742_v57 = vsub.f32 1.0, %v11037_v23  ;;  %v4746_v45 = vmul.f32 0.0, %v11037_v23  ;;  %v10216_v56 = vpop.f32.mrf.mxu1 }
0x110d   : > { %v11039_v7 = vpop.eup %11038 }
0x110e   : > { %11042 = vtanh.f32 %v4737_v39  ;;  %v4741_v46 = vsub.f32 1.0, %v11039_v7  ;;  %v4745_v6 = vmul.f32 0.0, %v11039_v7 }
0x1119   : > { %v11041_v25 = vpop.eup %11040 }
0x111a   : > { %v4744_v28 = vmul.f32 %v11041_v25, %v4742_v57 }
0x111b   : > { %v11043_v4 = vpop.eup %11042 }
0x111c   : > { %v13027_v54 = vadd.f32 %v4746_v45, %v4744_v28  ;;  %v4743_v27 = vmul.f32 %v11043_v4, %v4741_v46  ;;  %v4835_v28 = vpop.f32.mrf.mxu1  ;;  %v4841_v45 = vadd.f32 %v10216_v56, %v13017_v30 }
0x111e   : > { %v13029_v15 = vadd.f32 %v4745_v6, %v4743_v27  ;;  %10217 = vmatprep.subr.mxu0 %v13027_v54  ;;  %v4836_v6 = vadd.f32 %v4835_v28, %v13024_v38 }
0x111f   : > { %10218 = vmatpush3.msra.mxu0 %v13027_v54 }
0x1120   : > { %10219 = vmatprep.subr.mxu0 %v13029_v15 }
0x1121   : > { %10220 = vmatpush3.msra.mxu0 %v13029_v15 }
0x1122   : > { %10222 = vmatmul.mubr.msk.f32.vlgmr.msra.gmra.mxu0 %vm508_vm0, %v12749_v34 }
0x1123   : > { %10224 = vmatprep.mubr.msk.f32.mxu0 %vm508_vm0, %v12754_v32 }
0x1126   : > { %10225 = vmatmul.mubr.msk.f32.gmra.mxu0 %vm508_vm0, %v12763_v2 }
0x1127   : > { %10227 = vmatprep.mubr.msk.f32.mxu0 %vm508_vm0, %v12768_v9 }
0x112a   : > { %10228 = vmatmul.mubr.msk.f32.gmra.mxu0 %vm508_vm0, %v12777_v33 }
0x112b   : > { %10251 = vmatprep.mubr.msk.f32.mxu0 %vm508_vm0, %v12740_v50 }
0x11e2   : > { %v10223_v43 = vpop.f32.mrf.mxu0 }
0x11e3   : > { %v4916_v61 = vadd.f32 %v10223_v43, %v12993_v11 }
0x11e4   : > { %v4910_v58 = vpop.f32.mrf.mxu0 }
0x11e5   : > { %v4940_v19 = vadd.f32 %v4916_v61, %v4821_v59  ;;  %v4911_v44 = vadd.f32 %v4910_v58, %v12997_v24 }
0x11e6   : > { %v10226_v3 = vpop.f32.mrf.mxu0 }
0x11e7   : > { %v8912_v52 = vmul.f32 -1.442695, %v4940_v19  ;;  %v4939_v5 = vadd.f32 %v4911_v44, %v4816_v26  ;;  %v4926_v14 = vadd.f32 %v10226_v3, %v13001_v63 }
0x11e8   : > { %v4920_v12 = vpop.f32.mrf.mxu0 }
0x11e9   : > { %11044 = vpow2.f32 %v8912_v52  ;;  %v8911_v41 = vmul.f32 -1.442695, %v4939_v5  ;;  %v4921_v31 = vadd.f32 %v4920_v12, %v13012_v49  ;;  %v4954_v35 = vadd.f32 %v4926_v14, %v4831_v18  ;;  %v10240_v12 = vpop.f32.mrf.mxu1 }
0x11ea   : > { %v10229_v42 = vpop.f32.mrf.mxu0 }
0x11eb   : > { %11046 = vpow2.f32 %v8911_v41  ;;  %v4953_v37 = vadd.f32 %v4921_v31, %v4826_v8  ;;  %v8914_v20 = vmul.f32 -1.442695, %v4954_v35  ;;  %v4936_v57 = vadd.f32 %v10229_v42, %v13015_v16  ;;  %v5047_v18 = vpop.f32.mrf.mxu1 }
0x11ec   : > { %v4930_v23 = vpop.f32.mrf.mxu0  ;;  %v5053_v31 = vadd.f32 %v10240_v12, %v12991_v0 }
0x11ed   : > { %v8913_v40 = vmul.f32 -1.442695, %v4953_v37  ;;  %11048 = vpow2.f32 %v8914_v20  ;;  %v4931_v4 = vadd.f32 %v4930_v23, %v13020_v48  ;;  %v10243_v35 = vpop.f32.mrf.mxu1  ;;  %v5048_v20 = vadd.f32 %v5047_v18, %v12995_v36 }
0x11ee   : > { %v5063_v56 = vadd.f32 %v10243_v35, %v12999_v13 }
0x11ef   : > { %11050 = vpow2.f32 %v8913_v40  ;;  %v5057_v42 = vpop.f32.mrf.mxu1 }
0x11f6   : > { %v11045_v51 = vpop.eup %11044 }
0x11f7   : > { %v4948_v55 = vadd.f32 1.0, %v11045_v51 }
0x11f8   : > { %v11047_v21 = vpop.eup %11046 }
0x11f9   : > { %11052 = vrcp.f32 %v4948_v55  ;;  %v4947_v53 = vadd.f32 1.0, %v11047_v21 }
0x11fa   : > { %v11049_v60 = vpop.eup %11048 }
0x11fb   : > { %11054 = vrcp.f32 %v4947_v53  ;;  %v4962_v39 = vadd.f32 1.0, %v11049_v60 }
0x11fc   : > { %v11051_v22 = vpop.eup %11050 }
0x11fd   : > { %v4961_v7 = vadd.f32 1.0, %v11051_v22  ;;  %11056 = vrcp.f32 %v4962_v39 }
0x11ff   : > { %11058 = vrcp.f32 %v4961_v7  ;;  %v5058_v7 = vadd.f32 %v5057_v42, %v13007_v17 }
0x1206   : > { %v11053_v25 = vpop.eup %11052 }
0x1207   : > { %v4968_v46 = vmul.f32 %v11053_v25, %v4936_v57 }
0x1208   : > { %v11055_v27 = vpop.eup %11054 }
0x1209   : > { %v4970_v1 = vadd.f32 %v4968_v46, %v4841_v45  ;;  %v4967_v47 = vmul.f32 %v11055_v27, %v4931_v4 }
0x120a   : > { %v11057_v59 = vpop.eup %11056 }
0x120b   : > { %11060 = vtanh.f32 %v4970_v1  ;;  %v4969_v43 = vadd.f32 %v4967_v47, %v4836_v6  ;;  %v4974_v62 = vsub.f32 1.0, %v11057_v59  ;;  %v4978_v26 = vmul.f32 %v11057_v59, %v13027_v54  ;;  %v10246_v59 = vpop.f32.mrf.mxu1 }
0x120c   : > { %v11059_v61 = vpop.eup %11058 }
0x120d   : > { %11062 = vtanh.f32 %v4969_v43  ;;  %v4973_v44 = vsub.f32 1.0, %v11059_v61  ;;  %v4977_v52 = vmul.f32 %v11059_v61, %v13029_v15 }
0x1218   : > { %v11061_v58 = vpop.eup %11060 }
0x1219   : > { %v4976_v19 = vmul.f32 %v11061_v58, %v4974_v62 }
0x121a   : > { %v11063_v3 = vpop.eup %11062 }
0x121b   : > { %v13061_v5 = vadd.f32 %v4978_v26, %v4976_v19  ;;  %v4975_v14 = vmul.f32 %v11063_v3, %v4973_v44  ;;  %v5067_v44 = vpop.f32.mrf.mxu1  ;;  %v5073_v3 = vadd.f32 %v10246_v59, %v13017_v30 }
0x121c   : > { %v5068_v18 = vadd.f32 %v5067_v44, %v13024_v38 }
0x121d   : > { %v13063_v29 = vadd.f32 %v4977_v52, %v4975_v14  ;;  %10247 = vmatprep.subr.mxu0 %v13061_v5 }
0x121e   : > { %10248 = vmatpush3.msra.mxu0 %v13061_v5 }
0x121f   : > { %10249 = vmatprep.subr.mxu0 %v13063_v29 }
0x1220   : > { %10250 = vmatpush3.msra.mxu0 %v13063_v29 }
0x1221   : > { %10252 = vmatmul.mubr.msk.f32.vlgmr.msra.gmra.mxu0 %vm508_vm0, %v12749_v34 }
0x1222   : > { %10254 = vmatprep.mubr.msk.f32.mxu0 %vm508_vm0, %v12754_v32 }
0x1225   : > { %10255 = vmatmul.mubr.msk.f32.gmra.mxu0 %vm508_vm0, %v12763_v2 }
0x1226   : > { %10257 = vmatprep.mubr.msk.f32.mxu0 %vm508_vm0, %v12768_v9 }
0x1229   : > { %10258 = vmatmul.mubr.msk.f32.gmra.mxu0 %vm508_vm0, %v12777_v33 }
0x122a   : > { %10281 = vmatprep.mubr.msk.f32.mxu0 %vm508_vm0, %v12740_v50 }
0x12e1   : > { %v10253_v41 = vpop.f32.mrf.mxu0 }
0x12e2   : > { %v5148_v8 = vadd.f32 %v10253_v41, %v12993_v11 }
0x12e3   : > { %v5142_v37 = vpop.f32.mrf.mxu0 }
0x12e4   : > { %v5172_v40 = vadd.f32 %v5148_v8, %v5053_v31  ;;  %v5143_v51 = vadd.f32 %v5142_v37, %v12997_v24 }
0x12e5   : > { %v10256_v55 = vpop.f32.mrf.mxu0 }
0x12e6   : > { %v8928_v21 = vmul.f32 -1.442695, %v5172_v40  ;;  %v5171_v53 = vadd.f32 %v5143_v51, %v5048_v20  ;;  %v5158_v60 = vadd.f32 %v10256_v55, %v13001_v63 }
0x12e7   : > { %v5152_v22 = vpop.f32.mrf.mxu0 }
0x12e8   : > { %11064 = vpow2.f32 %v8928_v21  ;;  %v8927_v39 = vmul.f32 -1.442695, %v5171_v53  ;;  %v5153_v23 = vadd.f32 %v5152_v22, %v13012_v49  ;;  %v5186_v57 = vadd.f32 %v5158_v60, %v5063_v56 }
0x12e9   : > { %v10259_v47 = vpop.f32.mrf.mxu0 }
0x12ea   : > { %11066 = vpow2.f32 %v8927_v39  ;;  %v5185_v25 = vadd.f32 %v5153_v23, %v5058_v7  ;;  %v8930_v28 = vmul.f32 -1.442695, %v5186_v57  ;;  %v5168_v26 = vadd.f32 %v10259_v47, %v13015_v16  ;;  %v10270_v39 = vpop.f32.mrf.mxu1 }
0x12eb   : > { %v5162_v62 = vpop.f32.mrf.mxu0 }
0x12ec   : > { %v8929_v45 = vmul.f32 -1.442695, %v5185_v25  ;;  %11068 = vpow2.f32 %v8930_v28  ;;  %v5163_v14 = vadd.f32 %v5162_v62, %v13020_v48  ;;  %v5279_v23 = vpop.f32.mrf.mxu1 }
0x12ee   : > { %11070 = vpow2.f32 %v8929_v45 }
0x12f5   : > { %v11065_v46 = vpop.eup %11064 }
0x12f6   : > { %v5180_v4 = vadd.f32 1.0, %v11065_v46 }
0x12f7   : > { %v11067_v27 = vpop.eup %11066 }
0x12f8   : > { %11072 = vrcp.f32 %v5180_v4  ;;  %v5179_v6 = vadd.f32 1.0, %v11067_v27 }
0x12f9   : > { %v11069_v1 = vpop.eup %11068 }
0x12fa   : > { %11074 = vrcp.f32 %v5179_v6  ;;  %v5194_v61 = vadd.f32 1.0, %v11069_v1 }
0x12fb   : > { %v11071_v43 = vpop.eup %11070 }
0x12fc   : > { %v5193_v58 = vadd.f32 1.0, %v11071_v43  ;;  %11076 = vrcp.f32 %v5194_v61 }
0x12fe   : > { %11078 = vrcp.f32 %v5193_v58 }
0x1305   : > { %v11073_v19 = vpop.eup %11072 }
0x1306   : > { %v5200_v52 = vmul.f32 %v11073_v19, %v5168_v26 }
0x1307   : > { %v11075_v12 = vpop.eup %11074 }
0x1308   : > { %v5202_v41 = vadd.f32 %v5200_v52, %v5073_v3  ;;  %v5199_v31 = vmul.f32 %v11075_v12, %v5163_v14 }
0x1309   : > { %v11077_v35 = vpop.eup %11076 }
0x130a   : > { %11080 = vtanh.f32 %v5202_v41  ;;  %v5201_v8 = vadd.f32 %v5199_v31, %v5068_v18  ;;  %v5206_v20 = vsub.f32 1.0, %v11077_v35  ;;  %v5210_v51 = vmul.f32 %v11077_v35, %v13061_v5 }
0x130b   : > { %v11079_v37 = vpop.eup %11078 }
0x130c   : > { %11082 = vtanh.f32 %v5201_v8  ;;  %v5205_v21 = vsub.f32 1.0, %v11079_v37  ;;  %v5209_v60 = vmul.f32 %v11079_v37, %v13063_v29 }
0x1317   : > { %v11081_v40 = vpop.eup %11080 }
0x1318   : > { %v5208_v55 = vmul.f32 %v11081_v40, %v5206_v20 }
0x1319   : > { %v11083_v53 = vpop.eup %11082 }
0x131a   : > { %v13095_v42 = vadd.f32 %v5210_v51, %v5208_v55  ;;  %v5207_v22 = vmul.f32 %v11083_v53, %v5205_v21 }
0x131c   : > { %v13097_v56 = vadd.f32 %v5209_v60, %v5207_v22  ;;  %10277 = vmatprep.subr.mxu0 %v13095_v42 }
0x131d   : > { %10278 = vmatpush3.msra.mxu0 %v13095_v42 }
0x131e   : > { %10279 = vmatprep.subr.mxu0 %v13097_v56 }
0x131f   : > { %10280 = vmatpush3.msra.mxu0 %v13097_v56 }
0x1320   : > { %10282 = vmatmul.mubr.msk.f32.vlgmr.msra.gmra.mxu0 %vm508_vm0, %v12749_v34  ;;  %v5285_v34 = vadd.f32 %v10270_v39, %v12991_v0 }
0x1321   : > { %10284 = vmatprep.mubr.msk.f32.mxu0 %vm508_vm0, %v12754_v32  ;;  %v10273_v32 = vpop.f32.mrf.mxu1 }
0x1322   : > { %v5295_v1 = vadd.f32 %v10273_v32, %v12999_v13 }
0x1324   : > { %10285 = vmatmul.mubr.msk.f32.gmra.mxu0 %vm508_vm0, %v12763_v2  ;;  %v5280_v2 = vadd.f32 %v5279_v23, %v12995_v36 }
0x1325   : > { %10287 = vmatprep.mubr.msk.f32.mxu0 %vm508_vm0, %v12768_v9 }
0x1328   : > { %10288 = vmatmul.mubr.msk.f32.gmra.mxu0 %vm508_vm0, %v12777_v33 }
0x1329   : > { %10311 = vmatprep.mubr.msk.f32.mxu0 %vm508_vm0, %v12740_v50  ;;  %v5289_v50 = vpop.f32.mrf.mxu1 }
0x132a   : > { %v5290_v59 = vadd.f32 %v5289_v50, %v13007_v17  ;;  %v13140_v50 = vld [vmem:[%s13992_s3 + $0x68] sm:$0xff] }
0x132b   : > { %v10276_v41 = vpop.f32.mrf.mxu1 }
0x132c   : > { %v5305_v51 = vadd.f32 %v10276_v41, %v13017_v30 }
0x132d   : > { %v5299_v40 = vpop.f32.mrf.mxu1 }
0x132e   : > { %v5300_v60 = vadd.f32 %v5299_v40, %v13024_v38 }
0x13e0   : > { %v10283_v7 = vpop.f32.mrf.mxu0 }
0x13e1   : > { %v5380_v57 = vadd.f32 %v10283_v7, %v12993_v11 }
0x13e2   : > { %v5374_v25 = vpop.f32.mrf.mxu0 }
0x13e3   : > { %v5404_v28 = vadd.f32 %v5380_v57, %v5285_v34  ;;  %v5375_v9 = vadd.f32 %v5374_v25, %v12997_v24 }
0x13e4   : > { %v10286_v45 = vpop.f32.mrf.mxu0 }
0x13e5   : > { %v8944_v46 = vmul.f32 -1.442695, %v5404_v28  ;;  %v5403_v4 = vadd.f32 %v5375_v9, %v5280_v2  ;;  %v5390_v27 = vadd.f32 %v10286_v45, %v13001_v63 }
0x13e6   : > { %v5384_v6 = vpop.f32.mrf.mxu0 }
0x13e7   : > { %11084 = vpow2.f32 %v8944_v46  ;;  %v8943_v47 = vmul.f32 -1.442695, %v5403_v4  ;;  %v5385_v43 = vadd.f32 %v5384_v6, %v13012_v49  ;;  %v5418_v61 = vadd.f32 %v5390_v27, %v5295_v1  ;;  %v13147_v6 = vld [vmem:[%s13992_s3 + $0x70] sm:$0xff]  ;;  %v13154_v1 = vld [vmem:[%s13992_s3 + $0x78] sm:$0xff] }
0x13e8   : > { %v10289_v12 = vpop.f32.mrf.mxu0 }
0x13e9   : > { %11086 = vpow2.f32 %v8943_v47  ;;  %v5417_v62 = vadd.f32 %v5385_v43, %v5290_v59  ;;  %v8946_v58 = vmul.f32 -1.442695, %v5418_v61  ;;  %v5400_v37 = vadd.f32 %v10289_v12, %v13015_v16  ;;  %v13161_v47 = vld [vmem:[%s13992_s3 + $0x80] sm:$0xff]  ;;  %v10300_v59 = vpop.f32.mrf.mxu1 }
0x13ea   : > { %v5394_v8 = vpop.f32.mrf.mxu0  ;;  %v13170_v43 = vld [vmem:[%s13992_s3 + $0x60] sm:$0xff] }
0x13eb   : > { %v8945_v26 = vmul.f32 -1.442695, %v5417_v62  ;;  %11088 = vpow2.f32 %v8946_v58  ;;  %v5395_v21 = vadd.f32 %v5394_v8, %v13020_v48  ;;  %v5511_v61 = vpop.f32.mrf.mxu1  ;;  %v5517_v58 = vadd.f32 %v10300_v59, %v12991_v0 }
0x13ed   : > { %11090 = vpow2.f32 %v8945_v26 }
0x13f4   : > { %v11085_v19 = vpop.eup %11084 }
0x13f5   : > { %v5412_v44 = vadd.f32 1.0, %v11085_v19  ;;  %v10303_v19 = vpop.f32.mrf.mxu1 }
0x13f6   : > { %v11087_v3 = vpop.eup %11086 }
0x13f7   : > { %11092 = vrcp.f32 %v5412_v44  ;;  %v5411_v52 = vadd.f32 1.0, %v11087_v3  ;;  %v5512_v3 = vadd.f32 %v5511_v61, %v12995_v36 }
0x13f8   : > { %v11089_v14 = vpop.eup %11088 }
0x13f9   : > { %11094 = vrcp.f32 %v5411_v52  ;;  %v5426_v31 = vadd.f32 1.0, %v11089_v14 }
0x13fa   : > { %v11091_v18 = vpop.eup %11090 }
0x13fb   : > { %v5425_v35 = vadd.f32 1.0, %v11091_v18  ;;  %11096 = vrcp.f32 %v5426_v31  ;;  %v5521_v31 = vpop.f32.mrf.mxu1 }
0x13fc   : > { %v5522_v40 = vadd.f32 %v5521_v31, %v13007_v17 }
0x13fd   : > { %11098 = vrcp.f32 %v5425_v35  ;;  %v5527_v35 = vadd.f32 %v10303_v19, %v12999_v13 }
0x1404   : > { %v11093_v20 = vpop.eup %11092 }
0x1405   : > { %v5432_v55 = vmul.f32 %v11093_v20, %v5400_v37 }
0x1406   : > { %v11095_v53 = vpop.eup %11094 }
0x1407   : > { %v5434_v22 = vadd.f32 %v5432_v55, %v5305_v51  ;;  %v5431_v39 = vmul.f32 %v11095_v53, %v5395_v21 }
0x1408   : > { %v11097_v7 = vpop.eup %11096 }
0x1409   : > { %11100 = vtanh.f32 %v5434_v22  ;;  %v5433_v23 = vadd.f32 %v5431_v39, %v5300_v60  ;;  %v5438_v57 = vsub.f32 1.0, %v11097_v7  ;;  %v5442_v25 = vmul.f32 %v11097_v7, %v13095_v42 }
0x140a   : > { %v11099_v34 = vpop.eup %11098 }
0x140b   : > { %11102 = vtanh.f32 %v5433_v23  ;;  %v5437_v28 = vsub.f32 1.0, %v11099_v34  ;;  %v5441_v45 = vmul.f32 %v11099_v34, %v13097_v56 }
0x1416   : > { %v11101_v32 = vpop.eup %11100 }
0x1417   : > { %v5440_v2 = vmul.f32 %v11101_v32, %v5438_v57  ;;  %v10306_v32 = vpop.f32.mrf.mxu1 }
0x1418   : > { %v11103_v9 = vpop.eup %11102  ;;  %v5537_v59 = vadd.f32 %v10306_v32, %v13017_v30 }
0x1419   : > { %v13129_v46 = vadd.f32 %v5442_v25, %v5440_v2  ;;  %v5439_v4 = vmul.f32 %v11103_v9, %v5437_v28 }
0x141b   : > { %v13131_v27 = vadd.f32 %v5441_v45, %v5439_v4  ;;  %10307 = vmatprep.subr.mxu0 %v13129_v46  ;;  %v5531_v4 = vpop.f32.mrf.mxu1 }
0x141c   : > { %10308 = vmatpush3.msra.mxu0 %v13129_v46 }
0x141d   : > { %10309 = vmatprep.subr.mxu0 %v13131_v27 }
0x141e   : > { %10310 = vmatpush3.msra.mxu0 %v13131_v27 }
0x141f   : > { %10312 = vmatmul.mubr.msk.f32.vlgmr.msra.gmra.mxu0 %vm508_vm0, %v13140_v50 }
0x1420   : > { %10314 = vmatprep.mubr.msk.f32.mxu0 %vm508_vm0, %v13147_v6 }
0x1423   : > { %10315 = vmatmul.mubr.msk.f32.gmra.mxu0 %vm508_vm0, %v13154_v1 }
0x1424   : > { %10317 = vmatprep.mubr.msk.f32.mxu0 %vm508_vm0, %v13161_v47 }
0x1427   : > { %10318 = vmatmul.mubr.msk.f32.gmra.mxu0 %vm508_vm0, %v12777_v33 }
0x1428   : > { %10341 = vmatprep.mubr.msk.f32.mxu0 %vm508_vm0, %v13170_v43 }
0x14df   : > { %v10313_v62 = vpop.f32.mrf.mxu0 }
0x14e0   : > { %v5612_v26 = vadd.f32 %v10313_v62, %v12993_v11 }
0x14e1   : > { %v5606_v44 = vpop.f32.mrf.mxu0 }
0x14e2   : > { %v5636_v33 = vadd.f32 %v5612_v26, %v5517_v58  ;;  %v5607_v52 = vadd.f32 %v5606_v44, %v12997_v24  ;;  %v5532_v26 = vadd.f32 %v5531_v4, %v13024_v38 }
0x14e3   : > { %v10316_v14 = vpop.f32.mrf.mxu0 }
0x14e4   : > { %v8960_v12 = vmul.f32 -1.442695, %v5636_v33  ;;  %v5635_v18 = vadd.f32 %v5607_v52, %v5512_v3  ;;  %v5622_v41 = vadd.f32 %v10316_v14, %v13001_v63 }
0x14e5   : > { %v5616_v8 = vpop.f32.mrf.mxu0 }
0x14e6   : > { %11104 = vpow2.f32 %v8960_v12  ;;  %v8959_v37 = vmul.f32 -1.442695, %v5635_v18  ;;  %v5617_v20 = vadd.f32 %v5616_v8, %v13012_v49  ;;  %v5650_v51 = vadd.f32 %v5622_v41, %v5527_v35 }
0x14e7   : > { %v10319_v34 = vpop.f32.mrf.mxu0 }
0x14e8   : > { %11106 = vpow2.f32 %v8959_v37  ;;  %v5649_v55 = vadd.f32 %v5617_v20, %v5522_v40  ;;  %v8962_v21 = vmul.f32 -1.442695, %v5650_v51  ;;  %v5632_v9 = vadd.f32 %v10319_v34, %v13015_v16  ;;  %v13207_v51 = vld [vmem:[%s13992_s3 + $0x88] sm:$0xff] }
0x14e9   : > { %v5626_v2 = vpop.f32.mrf.mxu0 }
0x14ea   : > { %v8961_v53 = vmul.f32 -1.442695, %v5649_v55  ;;  %11108 = vpow2.f32 %v8962_v21  ;;  %v5627_v62 = vadd.f32 %v5626_v2, %v13020_v48  ;;  %v10330_v55 = vpop.f32.mrf.mxu1 }
0x14ec   : > { %11110 = vpow2.f32 %v8961_v53  ;;  %v5743_v21 = vpop.f32.mrf.mxu1 }
0x14f3   : > { %v11105_v60 = vpop.eup %11104 }
0x14f4   : > { %v5644_v22 = vadd.f32 1.0, %v11105_v60  ;;  %v5749_v60 = vadd.f32 %v10330_v55, %v12991_v0 }
0x14f5   : > { %v11107_v39 = vpop.eup %11106 }
0x14f6   : > { %11112 = vrcp.f32 %v5644_v22  ;;  %v5643_v23 = vadd.f32 1.0, %v11107_v39  ;;  %v10333_v39 = vpop.f32.mrf.mxu1 }
0x14f7   : > { %v11109_v7 = vpop.eup %11108  ;;  %v5759_v4 = vadd.f32 %v10333_v39, %v12999_v13 }
0x14f8   : > { %11114 = vrcp.f32 %v5643_v23  ;;  %v5658_v25 = vadd.f32 1.0, %v11109_v7  ;;  %v5744_v7 = vadd.f32 %v5743_v21, %v12995_v36 }
0x14f9   : > { %v11111_v57 = vpop.eup %11110 }
0x14fa   : > { %v5657_v28 = vadd.f32 1.0, %v11111_v57  ;;  %11116 = vrcp.f32 %v5658_v25 }
0x14fc   : > { %11118 = vrcp.f32 %v5657_v28 }
0x1503   : > { %v11113_v45 = vpop.eup %11112 }
0x1504   : > { %v5664_v61 = vmul.f32 %v11113_v45, %v5632_v9  ;;  %v5753_v9 = vpop.f32.mrf.mxu1 }
0x1505   : > { %v11115_v58 = vpop.eup %11114 }
0x1506   : > { %v5666_v19 = vadd.f32 %v5664_v61, %v5537_v59  ;;  %v5663_v44 = vmul.f32 %v11115_v58, %v5627_v62  ;;  %v5754_v62 = vadd.f32 %v5753_v9, %v13007_v17 }
0x1507   : > { %v11117_v33 = vpop.eup %11116 }
0x1508   : > { %11120 = vtanh.f32 %v5666_v19  ;;  %v5665_v3 = vadd.f32 %v5663_v44, %v5532_v26  ;;  %v5670_v14 = vsub.f32 1.0, %v11117_v33  ;;  %v5674_v18 = vmul.f32 %v11117_v33, %v13129_v46 }
0x1509   : > { %v11119_v52 = vpop.eup %11118 }
0x150a   : > { %11122 = vtanh.f32 %v5665_v3  ;;  %v5669_v31 = vsub.f32 1.0, %v11119_v52  ;;  %v5673_v35 = vmul.f32 %v11119_v52, %v13131_v27 }
0x1515   : > { %v11121_v12 = vpop.eup %11120 }
0x1516   : > { %v5672_v41 = vmul.f32 %v11121_v12, %v5670_v14 }
0x1517   : > { %v11123_v8 = vpop.eup %11122 }
0x1518   : > { %v13188_v37 = vadd.f32 %v5674_v18, %v5672_v41  ;;  %v5671_v20 = vmul.f32 %v11123_v8, %v5669_v31  ;;  %v10336_v31 = vpop.f32.mrf.mxu1 }
0x151a   : > { %v13190_v40 = vadd.f32 %v5673_v35, %v5671_v20  ;;  %10337 = vmatprep.subr.mxu0 %v13188_v37 }
0x151b   : > { %10338 = vmatpush3.msra.mxu0 %v13188_v37 }
0x151c   : > { %10339 = vmatprep.subr.mxu0 %v13190_v40 }
0x151d   : > { %10340 = vmatpush3.msra.mxu0 %v13190_v40 }
0x151e   : > { %10342 = vmatmul.mubr.msk.f32.vlgmr.msra.gmra.mxu0 %vm508_vm0, %v13140_v50 }
0x151f   : > { %10344 = vmatprep.mubr.msk.f32.mxu0 %vm508_vm0, %v13147_v6 }
0x1522   : > { %10345 = vmatmul.mubr.msk.f32.gmra.mxu0 %vm508_vm0, %v13154_v1 }
0x1523   : > { %10347 = vmatprep.mubr.msk.f32.mxu0 %vm508_vm0, %v13161_v47 }
0x1526   : > { %10348 = vmatmul.mubr.msk.f32.gmra.mxu0 %vm508_vm0, %v13207_v51 }
0x1527   : > { %10371 = vmatprep.mubr.msk.f32.mxu0 %vm508_vm0, %v13170_v43 }
0x15de   : > { %v10343_v53 = vpop.f32.mrf.mxu0 }
0x15df   : > { %v5844_v22 = vadd.f32 %v10343_v53, %v12993_v11  ;;  %v5763_v53 = vpop.f32.mrf.mxu1 }
0x15e0   : > { %v5838_v23 = vpop.f32.mrf.mxu0 }
0x15e1   : > { %v5868_v34 = vadd.f32 %v5844_v22, %v5749_v60  ;;  %v5839_v57 = vadd.f32 %v5838_v23, %v12997_v24  ;;  %v5769_v60 = vadd.f32 %v10336_v31, %v13017_v30 }
0x15e2   : > { %v10346_v32 = vpop.f32.mrf.mxu0 }
0x15e3   : > { %v8976_v25 = vmul.f32 -1.442695, %v5868_v34  ;;  %v5867_v2 = vadd.f32 %v5839_v57, %v5744_v7  ;;  %v5854_v28 = vadd.f32 %v10346_v32, %v13001_v63  ;;  %v5764_v7 = vadd.f32 %v5763_v53, %v13024_v38 }
0x15e4   : > { %v5848_v45 = vpop.f32.mrf.mxu0 }
0x15e5   : > { %11124 = vpow2.f32 %v8976_v25  ;;  %v8975_v59 = vmul.f32 -1.442695, %v5867_v2  ;;  %v5849_v61 = vadd.f32 %v5848_v45, %v13012_v49  ;;  %v5882_v58 = vadd.f32 %v5854_v28, %v5759_v4 }
0x15e6   : > { %v10349_v18 = vpop.f32.mrf.mxu0 }
0x15e7   : > { %11126 = vpow2.f32 %v8975_v59  ;;  %v5881_v26 = vadd.f32 %v5849_v61, %v5754_v62  ;;  %v8978_v19 = vmul.f32 -1.442695, %v5882_v58  ;;  %v5864_v55 = vadd.f32 %v10349_v18, %v13015_v16 }
0x15e8   : > { %v5858_v35 = vpop.f32.mrf.mxu0 }
0x15e9   : > { %v8977_v44 = vmul.f32 -1.442695, %v5881_v26  ;;  %11128 = vpow2.f32 %v8978_v19  ;;  %v5859_v39 = vadd.f32 %v5858_v35, %v13020_v48 }
0x15eb   : > { %11130 = vpow2.f32 %v8977_v44  ;;  %v10360_v44 = vpop.f32.mrf.mxu1 }
0x15f2   : > { %v11125_v3 = vpop.eup %11124 }
0x15f3   : > { %v5876_v33 = vadd.f32 1.0, %v11125_v3  ;;  %v5975_v3 = vpop.f32.mrf.mxu1 }
0x15f4   : > { %v11127_v52 = vpop.eup %11126 }
0x15f5   : > { %11132 = vrcp.f32 %v5876_v33  ;;  %v5875_v14 = vadd.f32 1.0, %v11127_v52  ;;  %v5981_v52 = vadd.f32 %v10360_v44, %v12991_v0 }
0x15f6   : > { %v11129_v12 = vpop.eup %11128 }
0x15f7   : > { %11134 = vrcp.f32 %v5875_v14  ;;  %v5890_v8 = vadd.f32 1.0, %v11129_v12  ;;  %v10363_v12 = vpop.f32.mrf.mxu1 }
0x15f8   : > { %v11131_v41 = vpop.eup %11130 }
0x15f9   : > { %v5889_v20 = vadd.f32 1.0, %v11131_v41  ;;  %11136 = vrcp.f32 %v5890_v8  ;;  %v5976_v41 = vadd.f32 %v5975_v3, %v12995_v36 }
0x15fb   : > { %11138 = vrcp.f32 %v5889_v20 }
0x1602   : > { %v11133_v21 = vpop.eup %11132 }
0x1603   : > { %v5896_v22 = vmul.f32 %v11133_v21, %v5864_v55 }
0x1604   : > { %v11135_v23 = vpop.eup %11134 }
0x1605   : > { %v5898_v34 = vadd.f32 %v5896_v22, %v5769_v60  ;;  %v5895_v57 = vmul.f32 %v11135_v23, %v5859_v39  ;;  %v5991_v60 = vadd.f32 %v10363_v12, %v12999_v13 }
0x1606   : > { %v11137_v25 = vpop.eup %11136 }
0x1607   : > { %11140 = vtanh.f32 %v5898_v34  ;;  %v5897_v32 = vadd.f32 %v5895_v57, %v5764_v7  ;;  %v5902_v28 = vsub.f32 1.0, %v11137_v25  ;;  %v5906_v45 = vmul.f32 %v11137_v25, %v13188_v37 }
0x1608   : > { %v11139_v2 = vpop.eup %11138 }
0x1609   : > { %11142 = vtanh.f32 %v5897_v32  ;;  %v5901_v59 = vsub.f32 1.0, %v11139_v2  ;;  %v5905_v62 = vmul.f32 %v11139_v2, %v13190_v40 }
0x1614   : > { %v11141_v9 = vpop.eup %11140 }
0x1615   : > { %v5904_v4 = vmul.f32 %v11141_v9, %v5902_v28 }
0x1616   : > { %v11143_v61 = vpop.eup %11142 }
0x1617   : > { %v13227_v58 = vadd.f32 %v5906_v45, %v5904_v4  ;;  %v5903_v26 = vmul.f32 %v11143_v61, %v5901_v59 }
0x1619   : > { %v13229_v19 = vadd.f32 %v5905_v62, %v5903_v26  ;;  %10367 = vmatprep.subr.mxu0 %v13227_v58 }
0x161a   : > { %10368 = vmatpush3.msra.mxu0 %v13227_v58 }
0x161b   : > { %10369 = vmatprep.subr.mxu0 %v13229_v19 }
0x161c   : > { %10370 = vmatpush3.msra.mxu0 %v13229_v19 }
0x161d   : > { %10372 = vmatmul.mubr.msk.f32.vlgmr.msra.gmra.mxu0 %vm508_vm0, %v13140_v50 }
0x161e   : > { %10374 = vmatprep.mubr.msk.f32.mxu0 %vm508_vm0, %v13147_v6 }
0x1621   : > { %10375 = vmatmul.mubr.msk.f32.gmra.mxu0 %vm508_vm0, %v13154_v1 }
0x1622   : > { %10377 = vmatprep.mubr.msk.f32.mxu0 %vm508_vm0, %v13161_v47 }
0x1625   : > { %10378 = vmatmul.mubr.msk.f32.gmra.mxu0 %vm508_vm0, %v13207_v51 }
0x1626   : > { %10401 = vmatprep.mubr.msk.f32.mxu0 %vm508_vm0, %v13170_v43  ;;  %v5985_v43 = vpop.f32.mrf.mxu1 }
0x1627   : > { %v5986_v23 = vadd.f32 %v5985_v43, %v13007_v17 }
0x1628   : > { %v10366_v61 = vpop.f32.mrf.mxu1 }
0x16dd   : > { %v10373_v33 = vpop.f32.mrf.mxu0 }
0x16de   : > { %v6076_v14 = vadd.f32 %v10373_v33, %v12993_v11 }
0x16df   : > { %v6070_v18 = vpop.f32.mrf.mxu0 }
0x16e0   : > { %v6100_v31 = vadd.f32 %v6076_v14, %v5981_v52  ;;  %v6071_v8 = vadd.f32 %v6070_v18, %v12997_v24  ;;  %v5995_v52 = vpop.f32.mrf.mxu1  ;;  %v6001_v14 = vadd.f32 %v10366_v61, %v13017_v30 }
0x16e1   : > { %v10376_v35 = vpop.f32.mrf.mxu0 }
0x16e2   : > { %v8992_v20 = vmul.f32 -1.442695, %v6100_v31  ;;  %v6099_v55 = vadd.f32 %v6071_v8, %v5976_v41  ;;  %v6086_v21 = vadd.f32 %v10376_v35, %v13001_v63  ;;  %v5996_v31 = vadd.f32 %v5995_v52, %v13024_v38 }
0x16e3   : > { %v6080_v53 = vpop.f32.mrf.mxu0 }
0x16e4   : > { %11144 = vpow2.f32 %v8992_v20  ;;  %v8991_v22 = vmul.f32 -1.442695, %v6099_v55  ;;  %v6081_v39 = vadd.f32 %v6080_v53, %v13012_v49  ;;  %v6114_v7 = vadd.f32 %v6086_v21, %v5991_v60 }
0x16e5   : > { %v10379_v4 = vpop.f32.mrf.mxu0 }
0x16e6   : > { %11146 = vpow2.f32 %v8991_v22  ;;  %v6113_v34 = vadd.f32 %v6081_v39, %v5986_v23  ;;  %v8994_v57 = vmul.f32 -1.442695, %v6114_v7  ;;  %v6096_v3 = vadd.f32 %v10379_v4, %v13015_v16 }
0x16e7   : > { %v6090_v26 = vpop.f32.mrf.mxu0 }
0x16e8   : > { %v8993_v32 = vmul.f32 -1.442695, %v6113_v34  ;;  %11148 = vpow2.f32 %v8994_v57  ;;  %v6091_v18 = vadd.f32 %v6090_v26, %v13020_v48 }
0x16ea   : > { %11150 = vpow2.f32 %v8993_v32 }
0x16f1   : > { %v11145_v25 = vpop.eup %11144 }
0x16f2   : > { %v6108_v2 = vadd.f32 1.0, %v11145_v25  ;;  %v13282_v25 = vld [vmem:[%s13992_s3 + $0x90] sm:$0xff] }
0x16f3   : > { %v11147_v28 = vpop.eup %11146 }
0x16f4   : > { %11152 = vrcp.f32 %v6108_v2  ;;  %v6107_v9 = vadd.f32 1.0, %v11147_v28  ;;  %v13328_v2 = vld [vmem:[%s13991_s2 + $0x60] sm:$0xff]  ;;  %v10390_v28 = vpop.f32.mrf.mxu1 }
0x16f5   : > { %v11149_v45 = vpop.eup %11148  ;;  %10418 = vmatprep.mubr.msk.f32.mxu1 %vm2500_vm1, %v13328_v2  ;;  %v6213_v4 = vadd.f32 %v10390_v28, %v12991_v0 }
0x16f6   : > { %11154 = vrcp.f32 %v6107_v9  ;;  %v6122_v62 = vadd.f32 1.0, %v11149_v45  ;;  %v6207_v9 = vpop.f32.mrf.mxu1 }
0x16f7   : > { %v11151_v59 = vpop.eup %11150  ;;  %v6208_v26 = vadd.f32 %v6207_v9, %v12995_v36 }
0x16f8   : > { %v6121_v44 = vadd.f32 1.0, %v11151_v59  ;;  %11156 = vrcp.f32 %v6122_v62  ;;  %v10393_v61 = vpop.f32.mrf.mxu1 }
0x16fa   : > { %11158 = vrcp.f32 %v6121_v44 }
0x1701   : > { %v11153_v33 = vpop.eup %11152 }
0x1702   : > { %v6128_v12 = vmul.f32 %v11153_v33, %v6096_v3 }
0x1703   : > { %v11155_v41 = vpop.eup %11154 }
0x1704   : > { %v6130_v8 = vadd.f32 %v6128_v12, %v6001_v14  ;;  %v6127_v35 = vmul.f32 %v11155_v41, %v6091_v18  ;;  %v6217_v18 = vpop.f32.mrf.mxu1 }
0x1705   : > { %v11157_v55 = vpop.eup %11156 }
0x1706   : > { %11160 = vtanh.f32 %v6130_v8  ;;  %v6129_v20 = vadd.f32 %v6127_v35, %v5996_v31  ;;  %v6134_v43 = vsub.f32 1.0, %v11157_v55  ;;  %v6138_v60 = vmul.f32 %v11157_v55, %v13227_v58 }
0x1707   : > { %v11159_v21 = vpop.eup %11158  ;;  %v6223_v31 = vadd.f32 %v10393_v61, %v12999_v13  ;;  %v6218_v8 = vadd.f32 %v6217_v18, %v13007_v17 }
0x1708   : > { %11162 = vtanh.f32 %v6129_v20  ;;  %v6133_v39 = vsub.f32 1.0, %v11159_v21  ;;  %v6137_v7 = vmul.f32 %v11159_v21, %v13229_v19 }
0x1713   : > { %v11161_v53 = vpop.eup %11160 }
0x1714   : > { %v6136_v22 = vmul.f32 %v11161_v53, %v6134_v43 }
0x1715   : > { %v11163_v23 = vpop.eup %11162 }
0x1716   : > { %v13261_v34 = vadd.f32 %v6138_v60, %v6136_v22  ;;  %v6135_v57 = vmul.f32 %v11163_v23, %v6133_v39  ;;  %v10396_v22 = vpop.f32.mrf.mxu1 }
0x1717   : > { %v6233_v28 = vadd.f32 %v10396_v22, %v13017_v30 }
0x1718   : > { %v13263_v32 = vadd.f32 %v6137_v7, %v6135_v57  ;;  %10397 = vmatprep.subr.mxu0 %v13261_v34  ;;  %v6227_v57 = vpop.f32.mrf.mxu1 }
0x1719   : > { %10398 = vmatpush3.msra.mxu0 %v13261_v34 }
0x171a   : > { %10399 = vmatprep.subr.mxu0 %v13263_v32 }
0x171b   : > { %10400 = vmatpush3.msra.mxu0 %v13263_v32 }
0x171c   : > { %10402 = vmatmul.mubr.msk.f32.vlgmr.msra.gmra.mxu0 %vm508_vm0, %v13140_v50  ;;  %10427 = vmatprep.subr.mxu0 %v14000_v10  ;;  %v13291_v50 = vld [vmem:[%s13992_s3 + $0x98] sm:$0xff] }
0x171d   : > { %10404 = vmatprep.mubr.msk.f32.mxu0 %vm508_vm0, %v13147_v6  ;;  %10428 = vmatpush3.msra.mxu0 %v14000_v10  ;;  %v13296_v6 = vld [vmem:[%s13992_s3 + $0xa0] sm:$0xff] }
0x1720   : > { %10405 = vmatmul.mubr.msk.f32.gmra.mxu0 %vm508_vm0, %v13154_v1  ;;  %v13305_v1 = vld [vmem:[%s13992_s3 + $0xa8] sm:$0xff] }
0x1721   : > { %10407 = vmatprep.mubr.msk.f32.mxu0 %vm508_vm0, %v13161_v47  ;;  %v13310_v47 = vld [vmem:[%s13992_s3 + $0xb0] sm:$0xff] }
0x1724   : > { %10408 = vmatmul.mubr.msk.f32.gmra.mxu0 %vm508_vm0, %v13207_v51  ;;  %v13319_v51 = vld [vmem:[%s13992_s3 + $0xb8] sm:$0xff] }
0x1725   : > { %10429 = vmatprep.mubr.msk.f32.mxu0 %vm508_vm0, %v13282_v25 }
0x1728   : > { %10430 = vmatmul.mubr.msk.f32.vlgmr.msra.gmra.mxu0 %vm508_vm0, %v13291_v50 }
0x1729   : > { %10432 = vmatprep.mubr.msk.f32.mxu0 %vm508_vm0, %v13296_v6 }
0x172c   : > { %10433 = vmatmul.mubr.msk.f32.gmra.mxu0 %vm508_vm0, %v13305_v1 }
0x172d   : > { %10435 = vmatprep.mubr.msk.f32.mxu0 %vm508_vm0, %v13310_v47 }
0x1730   : > { %10436 = vmatmul.mubr.msk.f32.gmra.mxu0 %vm508_vm0, %v13319_v51 }
0x1731   : > { %10459 = vmatprep.mubr.msk.f32.mxu0 %vm508_vm0, %v13282_v25 }
0x17dc   : > { %v10403_v45 = vpop.f32.mrf.mxu0 }
0x17dd   : > { %v6308_v59 = vadd.f32 %v10403_v45, %v12993_v11 }
0x17de   : > { %v6302_v62 = vpop.f32.mrf.mxu0 }
0x17df   : > { %v6332_v44 = vadd.f32 %v6308_v59, %v6213_v4  ;;  %v6303_v3 = vadd.f32 %v6302_v62, %v12997_v24  ;;  %v6228_v59 = vadd.f32 %v6227_v57, %v13024_v38 }
0x17e0   : > { %v10406_v33 = vpop.f32.mrf.mxu0 }
0x17e1   : > { %v9008_v52 = vmul.f32 -1.442695, %v6332_v44  ;;  %v6331_v14 = vadd.f32 %v6303_v3, %v6208_v26  ;;  %v6318_v12 = vadd.f32 %v10406_v33, %v13001_v63 }
0x17e2   : > { %v6312_v41 = vpop.f32.mrf.mxu0 }
0x17e3   : > { %11164 = vpow2.f32 %v9008_v52  ;;  %v9007_v0 = vmul.f32 -1.442695, %v6331_v14  ;;  %v6313_v11 = vadd.f32 %v6312_v41, %v13012_v49  ;;  %v6346_v36 = vadd.f32 %v6318_v12, %v6223_v31  ;;  %v13359_v31 = vld [vmem:[%s13991_s2 + $0x68] sm:$0xff] }
0x17e4   : > { %v10409_v53 = vpop.f32.mrf.mxu0 }
0x17e5   : > { %11166 = vpow2.f32 %v9007_v0  ;;  %v6345_v35 = vadd.f32 %v6313_v11, %v6218_v8  ;;  %v9010_v20 = vmul.f32 -1.442695, %v6346_v36  ;;  %v6328_v23 = vadd.f32 %v10409_v53, %v13015_v16  ;;  %v13365_v0 = vld [vmem:[%s13991_s2 + $0x70] sm:$0xff]  ;;  %v13377_v11 = vld [vmem:[%s13991_s2 + $0x78] sm:$0xff]  ;;  %v13383_v8 = vld [vmem:[%s13991_s2 + $0x80] sm:$0xff] }
0x17e6   : > { %v6322_v39 = vpop.f32.mrf.mxu0  ;;  %v13395_v36 = vld [vmem:[%s13991_s2 + $0x88] sm:$0xff] }
0x17e7   : > { %v9009_v24 = vmul.f32 -1.442695, %v6345_v35  ;;  %11168 = vpow2.f32 %v9010_v20  ;;  %v6323_v45 = vadd.f32 %v6322_v39, %v13020_v48 }
0x17e9   : > { %11170 = vpow2.f32 %v9009_v24 }
0x17f0   : > { %v11165_v55 = vpop.eup %11164 }
0x17f1   : > { %v6340_v21 = vadd.f32 1.0, %v11165_v55 }
0x17f2   : > { %v11167_v63 = vpop.eup %11166 }
0x17f3   : > { %11172 = vrcp.f32 %v6340_v21  ;;  %v6339_v43 = vadd.f32 1.0, %v11167_v63 }
0x17f4   : > { %v11169_v13 = vpop.eup %11168 }
0x17f5   : > { %11174 = vrcp.f32 %v6339_v43  ;;  %v6354_v49 = vadd.f32 1.0, %v11169_v13 }
0x17f6   : > { %v11171_v60 = vpop.eup %11170 }
0x17f7   : > { %v6353_v17 = vadd.f32 1.0, %v11171_v60  ;;  %11176 = vrcp.f32 %v6354_v49 }
0x17f9   : > { %11178 = vrcp.f32 %v6353_v17 }
0x1800   : > { %v11173_v7 = vpop.eup %11172 }
0x1801   : > { %v6360_v9 = vmul.f32 %v11173_v7, %v6328_v23 }
0x1802   : > { %v11175_v4 = vpop.eup %11174 }
0x1803   : > { %v6362_v61 = vadd.f32 %v6360_v9, %v6233_v28  ;;  %v6359_v62 = vmul.f32 %v11175_v4, %v6323_v45 }
0x1804   : > { %v11177_v44 = vpop.eup %11176 }
0x1805   : > { %11180 = vtanh.f32 %v6362_v61  ;;  %v6361_v26 = vadd.f32 %v6359_v62, %v6228_v59  ;;  %v6366_v16 = vsub.f32 1.0, %v11177_v44  ;;  %v6370_v30 = vmul.f32 %v11177_v44, %v13261_v34 }
0x1806   : > { %v11179_v3 = vpop.eup %11178 }
0x1807   : > { %11182 = vtanh.f32 %v6361_v26  ;;  %v6365_v14 = vsub.f32 1.0, %v11179_v3  ;;  %v6369_v38 = vmul.f32 %v11179_v3, %v13263_v32 }
0x1812   : > { %v11181_v33 = vpop.eup %11180 }
0x1813   : > { %v6368_v52 = vmul.f32 %v11181_v33, %v6366_v16 }
0x1814   : > { %v11183_v12 = vpop.eup %11182 }
0x1815   : > { %v13345_v18 = vadd.f32 %v6370_v30, %v6368_v52  ;;  %v6367_v48 = vmul.f32 %v11183_v12, %v6365_v14 }
0x1817   : > { %10410 = vmatprep.subr.mxu1 %v13345_v18  ;;  %v13349_v41 = vadd.f32 %v6369_v38, %v6367_v48 }
0x1818   : > { %10411 = vmatpush3.msra.mxu1 %v13345_v18 }
0x1819   : > { %10412 = vmatprep.subr.mxu1 %v13349_v41 }
0x181a   : > { %10413 = vmatpush3.msra.mxu1 %v13349_v41 }
0x181b   : > { %10414 = vmatprep.subr.mxu1 %v13027_v54 }
0x181c   : > { %10415 = vmatpush3.msra.mxu1 %v13027_v54 }
0x181d   : > { %10416 = vmatprep.subr.mxu1 %v13029_v15 }
0x181e   : > { %10417 = vmatpush3.msra.mxu1 %v13029_v15 }
0x181f   : > { %10419 = vmatmul.mubr.msk.f32.vlgmr.msra.gmra.mxu1 %vm2500_vm1, %v13359_v31  ;;  %10438 = vmatprep.subr.mxu1 %v13261_v34 }
0x1820   : > { %10439 = vmatpush3.msra.mxu1 %v13261_v34  ;;  %10421 = vmatprep.mubr.msk.f32.mxu1 %vm2500_vm1, %v13365_v0 }
0x1821   : > { %10440 = vmatprep.subr.mxu1 %v13263_v32 }
0x1822   : > { %10441 = vmatpush3.msra.mxu1 %v13263_v32 }
0x1823   : > { %10422 = vmatmul.mubr.msk.f32.gmra.mxu1 %vm2500_vm1, %v13377_v11  ;;  %10442 = vmatprep.subr.mxu1 %v13061_v5 }
0x1824   : > { %10443 = vmatpush3.msra.mxu1 %v13061_v5  ;;  %10424 = vmatprep.mubr.msk.f32.mxu1 %vm2500_vm1, %v13383_v8 }
0x1825   : > { %10444 = vmatprep.subr.mxu1 %v13063_v29 }
0x1826   : > { %10445 = vmatpush3.msra.mxu1 %v13063_v29 }
0x1827   : > { %10425 = vmatmul.mubr.msk.f32.gmra.mxu1 %vm2500_vm1, %v13395_v36  ;;  %10468 = vmatprep.subr.mxu1 %v13227_v58 }
0x1828   : > { %10446 = vmatprep.mubr.msk.f32.mxu1 %vm2500_vm1, %v13328_v2 }
0x182b   : > { %10447 = vmatmul.mubr.msk.f32.vlgmr.msra.gmra.mxu1 %vm2500_vm1, %v13359_v31 }
0x182c   : > { %10469 = vmatpush3.msra.mxu1 %v13227_v58  ;;  %10449 = vmatprep.mubr.msk.f32.mxu1 %vm2500_vm1, %v13365_v0 }
0x182d   : > { %10470 = vmatprep.subr.mxu1 %v13229_v19 }
0x182e   : > { %10471 = vmatpush3.msra.mxu1 %v13229_v19 }
0x182f   : > { %10472 = vmatprep.subr.mxu1 %v13095_v42  ;;  %10450 = vmatmul.mubr.msk.f32.gmra.mxu1 %vm2500_vm1, %v13377_v11 }
0x1830   : > { %10473 = vmatpush3.msra.mxu1 %v13095_v42  ;;  %10452 = vmatprep.mubr.msk.f32.mxu1 %vm2500_vm1, %v13383_v8 }
0x1831   : > { %10474 = vmatprep.subr.mxu1 %v13097_v56 }
0x1832   : > { %10475 = vmatpush3.msra.mxu1 %v13097_v56 }
0x1833   : > { %10498 = vmatprep.subr.mxu1 %v13188_v37  ;;  %10453 = vmatmul.mubr.msk.f32.gmra.mxu1 %vm2500_vm1, %v13395_v36 }
0x1834   : > { %10476 = vmatprep.mubr.msk.f32.mxu1 %vm2500_vm1, %v13328_v2 }
0x1837   : > { %10477 = vmatmul.mubr.msk.f32.vlgmr.msra.gmra.mxu1 %vm2500_vm1, %v13359_v31 }
0x1838   : > { %10499 = vmatpush3.msra.mxu1 %v13188_v37  ;;  %10479 = vmatprep.mubr.msk.f32.mxu1 %vm2500_vm1, %v13365_v0 }
0x1839   : > { %10500 = vmatprep.subr.mxu1 %v13190_v40 }
0x183a   : > { %10501 = vmatpush3.msra.mxu1 %v13190_v40 }
0x183b   : > { %10502 = vmatprep.subr.mxu1 %v13129_v46  ;;  %10480 = vmatmul.mubr.msk.f32.gmra.mxu1 %vm2500_vm1, %v13377_v11 }
0x183c   : > { %10503 = vmatpush3.msra.mxu1 %v13129_v46  ;;  %10482 = vmatprep.mubr.msk.f32.mxu1 %vm2500_vm1, %v13383_v8 }
0x183d   : > { %10504 = vmatprep.subr.mxu1 %v13131_v27 }
0x183e   : > { %10505 = vmatpush3.msra.mxu1 %v13131_v27 }
0x183f   : > { %10528 = vmatprep.subr.mxu1 %v13129_v46  ;;  %10483 = vmatmul.mubr.msk.f32.gmra.mxu1 %vm2500_vm1, %v13395_v36 }
0x1840   : > { %10506 = vmatprep.mubr.msk.f32.mxu1 %vm2500_vm1, %v13328_v2 }
0x1843   : > { %10507 = vmatmul.mubr.msk.f32.vlgmr.msra.gmra.mxu1 %vm2500_vm1, %v13359_v31 }
0x1844   : > { %10529 = vmatpush3.msra.mxu1 %v13129_v46  ;;  %10509 = vmatprep.mubr.msk.f32.mxu1 %vm2500_vm1, %v13365_v0 }
0x1845   : > { %10530 = vmatprep.subr.mxu1 %v13131_v27 }
0x1846   : > { %10531 = vmatpush3.msra.mxu1 %v13131_v27 }
0x1847   : > { %10532 = vmatprep.subr.mxu1 %v13188_v37  ;;  %10510 = vmatmul.mubr.msk.f32.gmra.mxu1 %vm2500_vm1, %v13377_v11 }
0x1848   : > { %10533 = vmatpush3.msra.mxu1 %v13188_v37  ;;  %10512 = vmatprep.mubr.msk.f32.mxu1 %vm2500_vm1, %v13383_v8 }
0x1849   : > { %10534 = vmatprep.subr.mxu1 %v13190_v40 }
0x184a   : > { %10535 = vmatpush3.msra.mxu1 %v13190_v40 }
0x184b   : > { %10558 = vmatprep.subr.mxu1 %v13095_v42  ;;  %10513 = vmatmul.mubr.msk.f32.gmra.mxu1 %vm2500_vm1, %v13395_v36 }
0x184c   : > { %10536 = vmatprep.mubr.msk.f32.mxu1 %vm2500_vm1, %v13328_v2 }
0x184f   : > { %10537 = vmatmul.mubr.msk.f32.vlgmr.msra.gmra.mxu1 %vm2500_vm1, %v13359_v31 }
0x1850   : > { %10559 = vmatpush3.msra.mxu1 %v13095_v42  ;;  %10539 = vmatprep.mubr.msk.f32.mxu1 %vm2500_vm1, %v13365_v0 }
0x1851   : > { %10560 = vmatprep.subr.mxu1 %v13097_v56 }
0x1852   : > { %10561 = vmatpush3.msra.mxu1 %v13097_v56 }
0x1853   : > { %10562 = vmatprep.subr.mxu1 %v13227_v58  ;;  %10540 = vmatmul.mubr.msk.f32.gmra.mxu1 %vm2500_vm1, %v13377_v11 }
0x1854   : > { %10563 = vmatpush3.msra.mxu1 %v13227_v58  ;;  %10542 = vmatprep.mubr.msk.f32.mxu1 %vm2500_vm1, %v13383_v8 }
0x1855   : > { %10564 = vmatprep.subr.mxu1 %v13229_v19 }
0x1856   : > { %10565 = vmatpush3.msra.mxu1 %v13229_v19 }
0x1857   : > { %10588 = vmatprep.subr.mxu1 %v13061_v5  ;;  %10543 = vmatmul.mubr.msk.f32.gmra.mxu1 %vm2500_vm1, %v13395_v36 }
0x1858   : > { %10566 = vmatprep.mubr.msk.f32.mxu1 %vm2500_vm1, %v13328_v2 }
0x185b   : > { %10567 = vmatmul.mubr.msk.f32.vlgmr.msra.gmra.mxu1 %vm2500_vm1, %v13359_v31 }
0x185c   : > { %10589 = vmatpush3.msra.mxu1 %v13061_v5  ;;  %10569 = vmatprep.mubr.msk.f32.mxu1 %vm2500_vm1, %v13365_v0 }
0x185d   : > { %10590 = vmatprep.subr.mxu1 %v13063_v29 }
0x185e   : > { %10591 = vmatpush3.msra.mxu1 %v13063_v29  ;;  %v10431_v29 = vpop.f32.mrf.mxu0 }
0x185f   : > { %10592 = vmatprep.subr.mxu1 %v13261_v34  ;;  %10570 = vmatmul.mubr.msk.f32.gmra.mxu1 %vm2500_vm1, %v13377_v11 }
0x1860   : > { %10593 = vmatpush3.msra.mxu1 %v13261_v34  ;;  %10572 = vmatprep.mubr.msk.f32.mxu1 %vm2500_vm1, %v13383_v8  ;;  %v6658_v56 = vpop.f32.mrf.mxu0 }
0x1861   : > { %10594 = vmatprep.subr.mxu1 %v13263_v32 }
0x1862   : > { %10595 = vmatpush3.msra.mxu1 %v13263_v32  ;;  %v10434_v19 = vpop.f32.mrf.mxu0 }
0x1863   : > { %10618 = vmatprep.subr.mxu1 %v13027_v54  ;;  %10573 = vmatmul.mubr.msk.f32.gmra.mxu1 %vm2500_vm1, %v13395_v36 }
0x1864   : > { %10596 = vmatprep.mubr.msk.f32.mxu1 %vm2500_vm1, %v13328_v2  ;;  %v6668_v43 = vpop.f32.mrf.mxu0 }
0x1866   : > { %v10437_v48 = vpop.f32.mrf.mxu0 }
0x1867   : > { %10597 = vmatmul.mubr.msk.f32.vlgmr.msra.gmra.mxu1 %vm2500_vm1, %v13359_v31 }
0x1868   : > { %10619 = vmatpush3.msra.mxu1 %v13027_v54  ;;  %10599 = vmatprep.mubr.msk.f32.mxu1 %vm2500_vm1, %v13365_v0  ;;  %v13534_v54 = vpop.permute.xlu0 %6394 }
0x1869   : > { %10620 = vmatprep.subr.mxu1 %v13029_v15 }
0x186a   : > { %10621 = vmatpush3.msra.mxu1 %v13029_v15  ;;  %v13536_v15 = vpop.permute.xlu1 %6431 }
0x186b   : > { %10622 = vmatprep.subr.mxu1 %v13345_v18  ;;  %10600 = vmatmul.mubr.msk.f32.gmra.mxu1 %vm2500_vm1, %v13377_v11  ;;  %v6664_v40 = vadd.f32 %v10431_v29, %v13536_v15 }
0x186c   : > { %10623 = vmatpush3.msra.mxu1 %v13345_v18  ;;  %10602 = vmatprep.mubr.msk.f32.mxu1 %vm2500_vm1, %v13383_v8  ;;  %v13538_v5 = vpop.permute.xlu0 %6389 }
0x186d   : > { %10624 = vmatprep.subr.mxu1 %v13349_v41 }
0x186e   : > { %10625 = vmatpush3.msra.mxu1 %v13349_v41  ;;  %v13540_v42 = vpop.permute.xlu1 %6426 }
0x186f   : > { %10603 = vmatmul.mubr.msk.f32.gmra.mxu1 %vm2500_vm1, %v13395_v36  ;;  %10648 = vmatprep.subr.mxu1 %v14000_v10  ;;  %v6659_v32 = vadd.f32 %v6658_v56, %v13540_v42 }
0x1870   : > { %10626 = vmatprep.mubr.msk.f32.mxu1 %vm2500_vm1, %v13328_v2  ;;  %v13542_v46 = vpop.permute.xlu0 %6404 }
0x1872   : > { %v13544_v37 = vpop.permute.xlu1 %6441 }
0x1873   : > { %10627 = vmatmul.mubr.msk.f32.vlgmr.msra.gmra.mxu1 %vm2500_vm1, %v13359_v31  ;;  %v6674_v53 = vadd.f32 %v10434_v19, %v13544_v37 }
0x1874   : > { %10629 = vmatprep.mubr.msk.f32.mxu1 %vm2500_vm1, %v13365_v0  ;;  %v13550_v24 = vpop.permute.xlu0 %6399 }
0x1876   : > { %v13555_v49 = vpop.permute.xlu1 %6436 }
0x1877   : > { %10630 = vmatmul.mubr.msk.f32.gmra.mxu1 %vm2500_vm1, %v13377_v11  ;;  %v6669_v17 = vadd.f32 %v6668_v43, %v13555_v49 }
0x1878   : > { %10632 = vmatprep.mubr.msk.f32.mxu1 %vm2500_vm1, %v13383_v8  ;;  %v13576_v12 = vpop.permute.xlu0 %6451  ;;  %v6678_v8 = vpop.f32.mrf.mxu0 }
0x1879   : > { %v6684_v29 = vadd.f32 %v10437_v48, %v13576_v12 }
0x187a   : > { %v13580_v31 = vpop.permute.xlu1 %6414 }
0x187b   : > { %10633 = vmatmul.mubr.msk.f32.gmra.mxu1 %vm2500_vm1, %v13395_v36 }
0x18df   : > { %v10420_v27 = vpop.f32.mrf.mxu1 }
0x18e0   : > { %v6551_v58 = vadd.f32 %v10420_v27, %v13534_v54 }
0x18e1   : > { %v6545_v34 = vpop.f32.mrf.mxu1 }
0x18e2   : > { %v6688_v2 = vadd.f32 %v6664_v40, %v6551_v58  ;;  %v6546_v35 = vadd.f32 %v6545_v34, %v13538_v5  ;;  %v13587_v40 = vpop.permute.xlu0 %6446 }
0x18e3   : > { %v10423_v20 = vpop.f32.mrf.mxu1  ;;  %v6679_v19 = vadd.f32 %v6678_v8, %v13587_v40 }
0x18e4   : > { %v9048_v55 = vmul.f32 -1.442695, %v6688_v2  ;;  %v6687_v21 = vadd.f32 %v6659_v32, %v6546_v35  ;;  %v6561_v63 = vadd.f32 %v10423_v20, %v13542_v46  ;;  %v13593_v35 = vpop.permute.xlu1 %6409 }
0x18e5   : > { %v6555_v13 = vpop.f32.mrf.mxu1 }
0x18e6   : > { %11184 = vpow2.f32 %v9048_v55  ;;  %v9047_v60 = vmul.f32 -1.442695, %v6687_v21  ;;  %v6556_v22 = vadd.f32 %v6555_v13, %v13550_v24  ;;  %v6702_v23 = vadd.f32 %v6674_v53, %v6561_v63 }
0x18e7   : > { %v10426_v39 = vpop.f32.mrf.mxu1 }
0x18e8   : > { %11186 = vpow2.f32 %v9047_v60  ;;  %v6701_v57 = vadd.f32 %v6669_v17, %v6556_v22  ;;  %v9050_v9 = vmul.f32 -1.442695, %v6702_v23  ;;  %v6571_v34 = vadd.f32 %v10426_v39, %v13580_v31 }
0x18e9   : > { %v6565_v7 = vpop.f32.mrf.mxu1 }
0x18ea   : > { %v9049_v4 = vmul.f32 -1.442695, %v6701_v57  ;;  %11188 = vpow2.f32 %v9050_v9  ;;  %v6566_v21 = vadd.f32 %v6565_v7, %v13593_v35 }
0x18eb   : > { %v13558_v28 = vpop.f32.mrf.mxu1 }
0x18ec   : > { %11190 = vpow2.f32 %v9049_v4 }
0x18ed   : > { %v13560_v45 = vpop.f32.mrf.mxu1 }
0x18ef   : > { %v13562_v59 = vpop.f32.mrf.mxu1 }
0x18f1   : > { %v13564_v61 = vpop.f32.mrf.mxu1 }
0x18f3   : > { %v11185_v62 = vpop.eup %11184  ;;  %v13566_v26 = vpop.f32.mrf.mxu1 }
0x18f4   : > { %v6696_v44 = vadd.f32 1.0, %v11185_v62 }
0x18f5   : > { %v11187_v3 = vpop.eup %11186  ;;  %v13568_v16 = vpop.f32.mrf.mxu1 }
0x18f6   : > { %11192 = vrcp.f32 %v6696_v44  ;;  %v6695_v33 = vadd.f32 1.0, %v11187_v3 }
0x18f7   : > { %v13570_v52 = vpop.f32.mrf.mxu1  ;;  %v11189_v18 = vpop.eup %11188 }
0x18f8   : > { %11194 = vrcp.f32 %v6695_v33  ;;  %v6710_v11 = vadd.f32 1.0, %v11189_v18 }
0x18f9   : > { %v13572_v30 = vpop.f32.mrf.mxu1  ;;  %v11191_v41 = vpop.eup %11190 }
0x18fa   : > { %v6709_v56 = vadd.f32 1.0, %v11191_v41  ;;  %11196 = vrcp.f32 %v6710_v11 }
0x18fb   : > { %v13574_v14 = vpop.f32.mrf.mxu1 }
0x18fc   : > { %11198 = vrcp.f32 %v6709_v56 }
0x18fd   : > { %v13578_v38 = vpop.f32.mrf.mxu1 }
0x18ff   : > { %v13582_v0 = vpop.f32.mrf.mxu1 }
0x1901   : > { %v13584_v36 = vpop.f32.mrf.mxu1 }
0x1903   : > { %v11193_v27 = vpop.eup %11192  ;;  %v13589_v58 = vpop.f32.mrf.mxu1 }
0x1904   : > { %v6716_v32 = vmul.f32 %v11193_v27, %v6684_v29 }
0x1905   : > { %v11195_v2 = vpop.eup %11194  ;;  %v13595_v20 = vpop.f32.mrf.mxu1 }
0x1906   : > { %v6718_v55 = vadd.f32 %v6716_v32, %v6571_v34  ;;  %v6715_v63 = vmul.f32 %v11195_v2, %v6679_v19 }
0x1907   : > { %v13598_v43 = vpop.f32.mrf.mxu1  ;;  %v11197_v17 = vpop.eup %11196 }
0x1908   : > { %11200 = vtanh.f32 %v6718_v55  ;;  %v6717_v13 = vadd.f32 %v6715_v63, %v6566_v21  ;;  %v6722_v7 = vsub.f32 1.0, %v11197_v17  ;;  %v6726_v3 = vmul.f32 0.0, %v11197_v17 }
0x1909   : > { %v13600_v53 = vpop.f32.mrf.mxu1  ;;  %v11199_v57 = vpop.eup %11198 }
0x190a   : > { %11202 = vtanh.f32 %v6717_v13  ;;  %v6721_v33 = vsub.f32 1.0, %v11199_v57  ;;  %v6725_v8 = vmul.f32 0.0, %v11199_v57 }
0x190b   : > { %v13602_v60 = vpop.f32.mrf.mxu1 }
0x190d   : > { %v13604_v22 = vpop.f32.mrf.mxu1 }
0x190f   : > { %v13606_v39 = vpop.f32.mrf.mxu1 }
0x1911   : > { %v13608_v23 = vpop.f32.mrf.mxu1 }
0x1913   : > { %v13610_v9 = vpop.f32.mrf.mxu1 }
0x1915   : > { %v11201_v4 = vpop.eup %11200  ;;  %v13612_v62 = vpop.f32.mrf.mxu1 }
0x1916   : > { %v6724_v44 = vmul.f32 %v11201_v4, %v6722_v7 }
0x1917   : > { %v11203_v18 = vpop.eup %11202  ;;  %v13614_v48 = vpop.f32.mrf.mxu1 }
0x1918   : > { %v13616_v41 = vadd.f32 %v6726_v3, %v6724_v44  ;;  %v6723_v11 = vmul.f32 %v11203_v18, %v6721_v33 }
0x1919   : > { %v13618_v29 = vpop.f32.mrf.mxu1 }
0x191a   : > { %10455 = vmatprep.subr.mxu0 %v13616_v41  ;;  %10649 = vmatpush3.msra.mxu1 %v13616_v41  ;;  %v13622_v56 = vadd.f32 %v6725_v8, %v6723_v11  ;;  %v6801_v8 = vadd.f32 %v13558_v28, %v13534_v54 }
0x191b   : > { %10456 = vmatpush3.msra.mxu0 %v13616_v41  ;;  %v13625_v27 = vpop.f32.mrf.mxu1  ;;  %10650 = vmatprep.subr.mxu1 %v14000_v10 }
0x191c   : > { %10457 = vmatprep.subr.mxu0 %v13622_v56 }
0x191d   : > { %10458 = vmatpush3.msra.mxu0 %v13622_v56  ;;  %v13630_v19 = vpop.f32.mrf.mxu1 }
0x191e   : > { %10460 = vmatmul.mubr.msk.f32.vlgmr.msra.gmra.mxu0 %vm508_vm0, %v13291_v50 }
0x191f   : > { %v13634_v34 = vpop.f32.mrf.mxu1  ;;  %10462 = vmatprep.mubr.msk.f32.mxu0 %vm508_vm0, %v13296_v6 }
0x1921   : > { %v13638_v32 = vpop.f32.mrf.mxu1 }
0x1922   : > { %10463 = vmatmul.mubr.msk.f32.gmra.mxu0 %vm508_vm0, %v13305_v1 }
0x1923   : > { %v13642_v2 = vpop.f32.mrf.mxu1  ;;  %10465 = vmatprep.mubr.msk.f32.mxu0 %vm508_vm0, %v13310_v47 }
0x1924   : > { %14004 = vst [vmem:[#allocation6_spill] sm:$0xff] %v13642_v2 }
0x1925   : > { %v13646_v55 = vpop.f32.mrf.mxu1 }
0x1926   : > { %14005 = vst [vmem:[#allocation7_spill] sm:$0xff] %v13646_v55  ;;  %10466 = vmatmul.mubr.msk.f32.gmra.mxu0 %vm508_vm0, %v13319_v51 }
0x1927   : > { %v13650_v21 = vpop.f32.mrf.mxu1  ;;  %10489 = vmatprep.mubr.msk.f32.mxu0 %vm508_vm0, %v13282_v25 }
0x1928   : > { %14006 = vst [vmem:[#allocation8_spill] sm:$0xff] %v13650_v21  ;;  %v6806_v21 = vadd.f32 %v13564_v61, %v13550_v24 }
0x1929   : > { %v13654_v63 = vpop.f32.mrf.mxu1 }
0x192a   : > { %14007 = vst [vmem:[#allocation9_spill] sm:$0xff] %v13654_v63 }
0x192b   : > { %v13656_v13 = vpop.f32.mrf.mxu1 }
0x192c   : > { %14008 = vst [vmem:[#allocation10_spill] sm:$0xff] %v13656_v13 }
0x192d   : > { %v13658_v17 = vpop.f32.mrf.mxu1 }
0x192e   : > { %14009 = vst [vmem:[#allocation11_spill] sm:$0xff] %v13658_v17  ;;  %v6796_v17 = vadd.f32 %v13560_v45, %v13538_v5 }
0x192f   : > { %v13660_v57 = vpop.f32.mrf.mxu1 }
0x1930   : > { %14010 = vst [vmem:[#allocation12_spill] sm:$0xff] %v13660_v57 }
0x1931   : > { %v13662_v7 = vpop.f32.mrf.mxu1 }
0x1932   : > { %14011 = vst [vmem:[#allocation13_spill] sm:$0xff] %v13662_v7 }
0x1933   : > { %v10628_v4 = vpop.f32.mrf.mxu1 }
0x1935   : > { %v13664_v44 = vpop.f32.mrf.mxu1 }
0x1936   : > { %14012 = vst [vmem:[#allocation14_spill] sm:$0xff] %v13664_v44 }
0x1937   : > { %v10631_v3 = vpop.f32.mrf.mxu1 }
0x1939   : > { %v13666_v33 = vpop.f32.mrf.mxu1 }
0x193a   : > { %14013 = vst [vmem:[#allocation15_spill] sm:$0xff] %v13666_v33 }
0x193b   : > { %v10634_v18 = vpop.f32.mrf.mxu1 }
0x193c   : > { %v6811_v18 = vadd.f32 %v13562_v59, %v13542_v46 }
0x19de   : > { %v10461_v11 = vpop.f32.mrf.mxu0 }
0x19df   : > { %v6896_v10 = vadd.f32 %v10461_v11, %v13536_v15 }
0x19e0   : > { %v6890_v13 = vpop.f32.mrf.mxu0 }
0x19e1   : > { %v6920_v57 = vadd.f32 %v6896_v10, %v6801_v8  ;;  %v6891_v7 = vadd.f32 %v6890_v13, %v13540_v42 }
0x19e2   : > { %v10464_v4 = vpop.f32.mrf.mxu0 }
0x19e3   : > { %v9064_v63 = vmul.f32 -1.442695, %v6920_v57  ;;  %v6919_v44 = vadd.f32 %v6891_v7, %v6796_v17  ;;  %v6906_v3 = vadd.f32 %v10464_v4, %v13544_v37 }
0x19e4   : > { %v6900_v33 = vpop.f32.mrf.mxu0 }
0x19e5   : > { %11204 = vpow2.f32 %v9064_v63  ;;  %v9063_v28 = vmul.f32 -1.442695, %v6919_v44  ;;  %v6901_v11 = vadd.f32 %v6900_v33, %v13555_v49  ;;  %v6934_v10 = vadd.f32 %v6906_v3, %v6811_v18 }
0x19e6   : > { %v10467_v63 = vpop.f32.mrf.mxu0 }
0x19e7   : > { %11206 = vpow2.f32 %v9063_v28  ;;  %v6933_v45 = vadd.f32 %v6901_v11, %v6806_v21  ;;  %v9066_v13 = vmul.f32 -1.442695, %v6934_v10  ;;  %v6916_v61 = vadd.f32 %v10467_v63, %v13576_v12 }
0x19e8   : > { %v6910_v55 = vpop.f32.mrf.mxu0  ;;  %v6821_v21 = vadd.f32 %v13566_v26, %v13580_v31  ;;  %v6816_v10 = vadd.f32 %v13568_v16, %v13593_v35 }
0x19e9   : > { %v9065_v8 = vmul.f32 -1.442695, %v6933_v45  ;;  %11208 = vpow2.f32 %v9066_v13  ;;  %v6911_v28 = vadd.f32 %v6910_v55, %v13587_v40 }
0x19eb   : > { %11210 = vpow2.f32 %v9065_v8 }
0x19f2   : > { %v11205_v17 = vpop.eup %11204 }
0x19f3   : > { %v6928_v57 = vadd.f32 1.0, %v11205_v17 }
0x19f4   : > { %v11207_v7 = vpop.eup %11206 }
0x19f5   : > { %11212 = vrcp.f32 %v6928_v57  ;;  %v6927_v4 = vadd.f32 1.0, %v11207_v7 }
0x19f6   : > { %v11209_v59 = vpop.eup %11208 }
0x19f7   : > { %11214 = vrcp.f32 %v6927_v4  ;;  %v6942_v33 = vadd.f32 1.0, %v11209_v59 }
0x19f8   : > { %v11211_v44 = vpop.eup %11210 }
0x19f9   : > { %v6941_v2 = vadd.f32 1.0, %v11211_v44  ;;  %11216 = vrcp.f32 %v6942_v33 }
0x19fb   : > { %11218 = vrcp.f32 %v6941_v2 }
0x1a02   : > { %v11213_v3 = vpop.eup %11212 }
0x1a03   : > { %v6948_v18 = vmul.f32 %v11213_v3, %v6916_v61 }
0x1a04   : > { %v11215_v11 = vpop.eup %11214 }
0x1a05   : > { %v6950_v45 = vadd.f32 %v6948_v18, %v6821_v21  ;;  %v6947_v13 = vmul.f32 %v11215_v11, %v6911_v28  ;;  %v7028_v21 = vadd.f32 %v13572_v30, %v13538_v5 }
0x1a06   : > { %v11217_v17 = vpop.eup %11216 }
0x1a07   : > { %11220 = vtanh.f32 %v6950_v45  ;;  %v6949_v8 = vadd.f32 %v6947_v13, %v6816_v10  ;;  %v6954_v7 = vsub.f32 1.0, %v11217_v17  ;;  %v6958_v26 = vmul.f32 %v11217_v17, %v13616_v41 }
0x1a08   : > { %v11219_v57 = vpop.eup %11218  ;;  %v7043_v17 = vadd.f32 %v13574_v14, %v13542_v46 }
0x1a09   : > { %11222 = vtanh.f32 %v6949_v8  ;;  %v6953_v63 = vsub.f32 1.0, %v11219_v57  ;;  %v6957_v16 = vmul.f32 %v11219_v57, %v13622_v56  ;;  %v7033_v56 = vadd.f32 %v13570_v52, %v13534_v54 }
0x1a14   : > { %v11221_v4 = vpop.eup %11220 }
0x1a15   : > { %v6956_v59 = vmul.f32 %v11221_v4, %v6954_v7  ;;  %v7038_v7 = vadd.f32 %v13578_v38, %v13550_v24 }
0x1a16   : > { %v11223_v44 = vpop.eup %11222 }
0x1a17   : > { %v13687_v55 = vadd.f32 %v6958_v26, %v6956_v59  ;;  %v6955_v33 = vmul.f32 %v11223_v44, %v6953_v63 }
0x1a19   : > { %10485 = vmatprep.subr.mxu0 %v13687_v55  ;;  %v13691_v2 = vadd.f32 %v6957_v16, %v6955_v33 }
0x1a1a   : > { %10486 = vmatpush3.msra.mxu0 %v13687_v55 }
0x1a1b   : > { %10487 = vmatprep.subr.mxu0 %v13691_v2 }
0x1a1c   : > { %10488 = vmatpush3.msra.mxu0 %v13691_v2 }
0x1a1d   : > { %10490 = vmatmul.mubr.msk.f32.vlgmr.msra.gmra.mxu0 %vm508_vm0, %v13291_v50 }
0x1a1e   : > { %10492 = vmatprep.mubr.msk.f32.mxu0 %vm508_vm0, %v13296_v6 }
0x1a21   : > { %10493 = vmatmul.mubr.msk.f32.gmra.mxu0 %vm508_vm0, %v13305_v1 }
0x1a22   : > { %10495 = vmatprep.mubr.msk.f32.mxu0 %vm508_vm0, %v13310_v47 }
0x1a25   : > { %10496 = vmatmul.mubr.msk.f32.gmra.mxu0 %vm508_vm0, %v13319_v51 }
0x1a26   : > { %10519 = vmatprep.mubr.msk.f32.mxu0 %vm508_vm0, %v13282_v25 }
0x1add   : > { %v10491_v41 = vpop.f32.mrf.mxu0 }
0x1ade   : > { %v7128_v61 = vadd.f32 %v10491_v41, %v13536_v15 }
0x1adf   : > { %v7122_v3 = vpop.f32.mrf.mxu0 }
0x1ae0   : > { %v7152_v18 = vadd.f32 %v7128_v61, %v7033_v56  ;;  %v7123_v28 = vadd.f32 %v7122_v3, %v13540_v42 }
0x1ae1   : > { %v10494_v11 = vpop.f32.mrf.mxu0 }
0x1ae2   : > { %v9080_v10 = vmul.f32 -1.442695, %v7152_v18  ;;  %v7151_v45 = vadd.f32 %v7123_v28, %v7028_v21  ;;  %v7138_v13 = vadd.f32 %v10494_v11, %v13544_v37  ;;  %v7053_v28 = vadd.f32 %v13582_v0, %v13580_v31 }
0x1ae3   : > { %v7132_v8 = vpop.f32.mrf.mxu0 }
0x1ae4   : > { %11224 = vpow2.f32 %v9080_v10  ;;  %v9079_v52 = vmul.f32 -1.442695, %v7151_v45  ;;  %v7133_v57 = vadd.f32 %v7132_v8, %v13555_v49  ;;  %v7166_v30 = vadd.f32 %v7138_v13, %v7043_v17 }
0x1ae5   : > { %v10497_v41 = vpop.f32.mrf.mxu0  ;;  %v7048_v13 = vadd.f32 %v13584_v36, %v13593_v35 }
0x1ae6   : > { %11226 = vpow2.f32 %v9079_v52  ;;  %v7165_v4 = vadd.f32 %v7133_v57, %v7038_v7  ;;  %v9082_v59 = vmul.f32 -1.442695, %v7166_v30  ;;  %v7148_v38 = vadd.f32 %v10497_v41, %v13576_v12 }
0x1ae7   : > { %v7142_v3 = vpop.f32.mrf.mxu0 }
0x1ae8   : > { %v9081_v26 = vmul.f32 -1.442695, %v7165_v4  ;;  %11228 = vpow2.f32 %v9082_v59  ;;  %v7143_v10 = vadd.f32 %v7142_v3, %v13587_v40 }
0x1aea   : > { %11230 = vpow2.f32 %v9081_v26 }
0x1af1   : > { %v11225_v63 = vpop.eup %11224 }
0x1af2   : > { %v7160_v44 = vadd.f32 1.0, %v11225_v63 }
0x1af3   : > { %v11227_v33 = vpop.eup %11226 }
0x1af4   : > { %11232 = vrcp.f32 %v7160_v44  ;;  %v7159_v16 = vadd.f32 1.0, %v11227_v33 }
0x1af5   : > { %v11229_v14 = vpop.eup %11228 }
0x1af6   : > { %11234 = vrcp.f32 %v7159_v16  ;;  %v7174_v61 = vadd.f32 1.0, %v11229_v14 }
0x1af7   : > { %v11231_v56 = vpop.eup %11230 }
0x1af8   : > { %v7173_v21 = vadd.f32 1.0, %v11231_v56  ;;  %11236 = vrcp.f32 %v7174_v61 }
0x1afa   : > { %11238 = vrcp.f32 %v7173_v21 }
0x1b01   : > { %v11233_v18 = vpop.eup %11232 }
0x1b02   : > { %v7180_v11 = vmul.f32 %v11233_v18, %v7148_v38  ;;  %v7270_v38 = vadd.f32 %v13600_v53, %v13550_v24 }
0x1b03   : > { %v11235_v45 = vpop.eup %11234 }
0x1b04   : > { %v7182_v8 = vadd.f32 %v7180_v11, %v7053_v28  ;;  %v7179_v17 = vmul.f32 %v11235_v45, %v7143_v10 }
0x1b05   : > { %v11237_v57 = vpop.eup %11236 }
0x1b06   : > { %11240 = vtanh.f32 %v7182_v8  ;;  %v7181_v52 = vadd.f32 %v7179_v17, %v7048_v13  ;;  %v7186_v30 = vsub.f32 1.0, %v11237_v57  ;;  %v7190_v0 = vmul.f32 %v11237_v57, %v13687_v55 }
0x1b07   : > { %v11239_v7 = vpop.eup %11238 }
0x1b08   : > { %11242 = vtanh.f32 %v7181_v52  ;;  %v7185_v26 = vsub.f32 1.0, %v11239_v7  ;;  %v7189_v36 = vmul.f32 %v11239_v7, %v13691_v2  ;;  %v7265_v2 = vadd.f32 %v13589_v58, %v13534_v54 }
0x1b13   : > { %v11241_v4 = vpop.eup %11240 }
0x1b14   : > { %v7188_v59 = vmul.f32 %v11241_v4, %v7186_v30 }
0x1b15   : > { %v11243_v63 = vpop.eup %11242 }
0x1b16   : > { %v13727_v44 = vadd.f32 %v7190_v0, %v7188_v59  ;;  %v7187_v33 = vmul.f32 %v11243_v63, %v7185_v26  ;;  %v7285_v59 = vadd.f32 %v13602_v60, %v13580_v31 }
0x1b18   : > { %10515 = vmatprep.subr.mxu0 %v13727_v44  ;;  %v13731_v16 = vadd.f32 %v7189_v36, %v7187_v33  ;;  %v7280_v33 = vadd.f32 %v13604_v22, %v13593_v35 }
0x1b19   : > { %10516 = vmatpush3.msra.mxu0 %v13727_v44 }
0x1b1a   : > { %10517 = vmatprep.subr.mxu0 %v13731_v16 }
0x1b1b   : > { %10518 = vmatpush3.msra.mxu0 %v13731_v16 }
0x1b1c   : > { %10520 = vmatmul.mubr.msk.f32.vlgmr.msra.gmra.mxu0 %vm508_vm0, %v13291_v50 }
0x1b1d   : > { %10522 = vmatprep.mubr.msk.f32.mxu0 %vm508_vm0, %v13296_v6  ;;  %v7260_v6 = vadd.f32 %v13595_v20, %v13538_v5 }
0x1b20   : > { %10523 = vmatmul.mubr.msk.f32.gmra.mxu0 %vm508_vm0, %v13305_v1 }
0x1b21   : > { %10525 = vmatprep.mubr.msk.f32.mxu0 %vm508_vm0, %v13310_v47 }
0x1b24   : > { %10526 = vmatmul.mubr.msk.f32.gmra.mxu0 %vm508_vm0, %v13319_v51 }
0x1b25   : > { %10549 = vmatprep.mubr.msk.f32.mxu0 %vm508_vm0, %v13282_v25  ;;  %v7275_v25 = vadd.f32 %v13598_v43, %v13542_v46 }
0x1bdc   : > { %v10521_v55 = vpop.f32.mrf.mxu0 }
0x1bdd   : > { %v7360_v50 = vadd.f32 %v10521_v55, %v13536_v15 }
0x1bde   : > { %v7354_v14 = vpop.f32.mrf.mxu0 }
0x1bdf   : > { %v7384_v1 = vadd.f32 %v7360_v50, %v7265_v2  ;;  %v7355_v41 = vadd.f32 %v7354_v14, %v13540_v42 }
0x1be0   : > { %v10524_v47 = vpop.f32.mrf.mxu0 }
0x1be1   : > { %v9096_v56 = vmul.f32 -1.442695, %v7384_v1  ;;  %v7383_v61 = vadd.f32 %v7355_v41, %v7260_v6  ;;  %v7370_v51 = vadd.f32 %v10524_v47, %v13544_v37 }
0x1be2   : > { %v7364_v3 = vpop.f32.mrf.mxu0 }
0x1be3   : > { %11244 = vpow2.f32 %v9096_v56  ;;  %v9095_v58 = vmul.f32 -1.442695, %v7383_v61  ;;  %v7365_v21 = vadd.f32 %v7364_v3, %v13555_v49  ;;  %v7398_v20 = vadd.f32 %v7370_v51, %v7275_v25  ;;  %v13793_v25 = vld [vmem:[%s13992_s3 + $0xa8] sm:$0xff] }
0x1be4   : > { %v10527_v17 = vpop.f32.mrf.mxu0 }
0x1be5   : > { %11246 = vpow2.f32 %v9095_v58  ;;  %v7397_v18 = vadd.f32 %v7365_v21, %v7270_v38  ;;  %v9098_v28 = vmul.f32 -1.442695, %v7398_v20  ;;  %v7380_v53 = vadd.f32 %v10527_v17, %v13576_v12  ;;  %v13800_v58 = vld [vmem:[%s13992_s3 + $0xb0] sm:$0xff]  ;;  %v13807_v21 = vld [vmem:[%s13992_s3 + $0xb8] sm:$0xff] }
0x1be6   : > { %v7374_v7 = vpop.f32.mrf.mxu0  ;;  %v13814_v38 = vld [vmem:[%s13992_s3 + $0x90] sm:$0xff] }
0x1be7   : > { %v9097_v11 = vmul.f32 -1.442695, %v7397_v18  ;;  %11248 = vpow2.f32 %v9098_v28  ;;  %v7375_v26 = vadd.f32 %v7374_v7, %v13587_v40  ;;  %v7497_v18 = vadd.f32 %v13606_v39, %v13534_v54 }
0x1be8   : > { %v7507_v7 = vadd.f32 %v13610_v9, %v13542_v46 }
0x1be9   : > { %11250 = vpow2.f32 %v9097_v11 }
0x1bf0   : > { %v11245_v10 = vpop.eup %11244 }
0x1bf1   : > { %v7392_v45 = vadd.f32 1.0, %v11245_v10  ;;  %v7492_v10 = vadd.f32 %v13608_v23, %v13538_v5 }
0x1bf2   : > { %v11247_v13 = vpop.eup %11246 }
0x1bf3   : > { %11252 = vrcp.f32 %v7392_v45  ;;  %v7391_v8 = vadd.f32 1.0, %v11247_v13 }
0x1bf4   : > { %v11249_v43 = vpop.eup %11248 }
0x1bf5   : > { %11254 = vrcp.f32 %v7391_v8  ;;  %v7406_v57 = vadd.f32 1.0, %v11249_v43 }
0x1bf6   : > { %v11251_v52 = vpop.eup %11250 }
0x1bf7   : > { %v7405_v30 = vadd.f32 1.0, %v11251_v52  ;;  %11256 = vrcp.f32 %v7406_v57 }
0x1bf9   : > { %11258 = vrcp.f32 %v7405_v30 }
0x1c00   : > { %v11253_v4 = vpop.eup %11252 }
0x1c01   : > { %v7412_v0 = vmul.f32 %v11253_v4, %v7380_v53  ;;  %v7502_v53 = vadd.f32 %v13612_v62, %v13550_v24 }
0x1c02   : > { %v11255_v63 = vpop.eup %11254 }
0x1c03   : > { %v7414_v36 = vadd.f32 %v7412_v0, %v7285_v59  ;;  %v7411_v55 = vmul.f32 %v11255_v63, %v7375_v26 }
0x1c04   : > { %v11257_v50 = vpop.eup %11256 }
0x1c05   : > { %11260 = vtanh.f32 %v7414_v36  ;;  %v7413_v2 = vadd.f32 %v7411_v55, %v7280_v33  ;;  %v7418_v6 = vsub.f32 1.0, %v11257_v50  ;;  %v7422_v60 = vmul.f32 %v11257_v50, %v13727_v44  ;;  %v13779_v44 = vld [vmem:[%s13992_s3 + $0x98] sm:$0xff] }
0x1c06   : > { %v11259_v14 = vpop.eup %11258 }
0x1c07   : > { %11262 = vtanh.f32 %v7413_v2  ;;  %v7417_v47 = vsub.f32 1.0, %v11259_v14  ;;  %v7421_v22 = vmul.f32 %v11259_v14, %v13731_v16  ;;  %v13786_v16 = vld [vmem:[%s13992_s3 + $0xa0] sm:$0xff] }
0x1c12   : > { %v11261_v1 = vpop.eup %11260 }
0x1c13   : > { %v7420_v41 = vmul.f32 %v11261_v1, %v7418_v6 }
0x1c14   : > { %v11263_v56 = vpop.eup %11262 }
0x1c15   : > { %v13767_v61 = vadd.f32 %v7422_v60, %v7420_v41  ;;  %v7419_v51 = vmul.f32 %v11263_v56, %v7417_v47  ;;  %v7517_v41 = vadd.f32 %v13614_v48, %v13580_v31 }
0x1c17   : > { %10545 = vmatprep.subr.mxu0 %v13767_v61  ;;  %v13771_v3 = vadd.f32 %v7421_v22, %v7419_v51  ;;  %v7512_v51 = vadd.f32 %v13618_v29, %v13593_v35 }
0x1c18   : > { %10546 = vmatpush3.msra.mxu0 %v13767_v61 }
0x1c19   : > { %10547 = vmatprep.subr.mxu0 %v13771_v3 }
0x1c1a   : > { %10548 = vmatpush3.msra.mxu0 %v13771_v3 }
0x1c1b   : > { %10550 = vmatmul.mubr.msk.f32.vlgmr.msra.gmra.mxu0 %vm508_vm0, %v13779_v44 }
0x1c1c   : > { %10552 = vmatprep.mubr.msk.f32.mxu0 %vm508_vm0, %v13786_v16 }
0x1c1f   : > { %10553 = vmatmul.mubr.msk.f32.gmra.mxu0 %vm508_vm0, %v13793_v25 }
0x1c20   : > { %10555 = vmatprep.mubr.msk.f32.mxu0 %vm508_vm0, %v13800_v58 }
0x1c23   : > { %10556 = vmatmul.mubr.msk.f32.gmra.mxu0 %vm508_vm0, %v13807_v21 }
0x1c24   : > { %10579 = vmatprep.mubr.msk.f32.mxu0 %vm508_vm0, %v13814_v38 }
0x1cdb   : > { %v10551_v20 = vpop.f32.mrf.mxu0 }
0x1cdc   : > { %v7592_v28 = vadd.f32 %v10551_v20, %v13536_v15 }
0x1cdd   : > { %v7586_v11 = vpop.f32.mrf.mxu0 }
0x1cde   : > { %v7616_v45 = vadd.f32 %v7592_v28, %v7497_v18  ;;  %v7587_v13 = vadd.f32 %v7586_v11, %v13540_v42 }
0x1cdf   : > { %v10554_v8 = vpop.f32.mrf.mxu0 }
0x1ce0   : > { %v9112_v43 = vmul.f32 -1.442695, %v7616_v45  ;;  %v7615_v17 = vadd.f32 %v7587_v13, %v7492_v10  ;;  %v7602_v52 = vadd.f32 %v10554_v8, %v13544_v37 }
0x1ce1   : > { %v7596_v57 = vpop.f32.mrf.mxu0 }
0x1ce2   : > { %11264 = vpow2.f32 %v9112_v43  ;;  %v9111_v39 = vmul.f32 -1.442695, %v7615_v17  ;;  %v7597_v30 = vadd.f32 %v7596_v57, %v13555_v49  ;;  %v7630_v23 = vadd.f32 %v7602_v52, %v7507_v7 }
0x1ce3   : > { %v10557_v55 = vpop.f32.mrf.mxu0 }
0x1ce4   : > { %11266 = vpow2.f32 %v9111_v39  ;;  %v7629_v4 = vadd.f32 %v7597_v30, %v7502_v53  ;;  %v9114_v59 = vmul.f32 -1.442695, %v7630_v23  ;;  %v7612_v62 = vadd.f32 %v10557_v55, %v13576_v12 }
0x1ce5   : > { %v7606_v14 = vpop.f32.mrf.mxu0  ;;  %v7724_v30 = vadd.f32 %v13630_v19, %v13538_v5 }
0x1ce6   : > { %v9113_v0 = vmul.f32 -1.442695, %v7629_v4  ;;  %11268 = vpow2.f32 %v9114_v59  ;;  %v7607_v47 = vadd.f32 %v7606_v14, %v13587_v40 }
0x1ce8   : > { %11270 = vpow2.f32 %v9113_v0 }
0x1cef   : > { %v11265_v26 = vpop.eup %11264 }
0x1cf0   : > { %v7624_v63 = vadd.f32 1.0, %v11265_v26 }
0x1cf1   : > { %v11267_v33 = vpop.eup %11266 }
0x1cf2   : > { %11272 = vrcp.f32 %v7624_v63  ;;  %v7623_v36 = vadd.f32 1.0, %v11267_v33  ;;  %v7739_v33 = vadd.f32 %v13634_v34, %v13542_v46 }
0x1cf3   : > { %v11269_v9 = vpop.eup %11268 }
0x1cf4   : > { %11274 = vrcp.f32 %v7623_v36  ;;  %v7638_v50 = vadd.f32 1.0, %v11269_v9  ;;  %v7734_v9 = vadd.f32 %v13638_v32, %v13550_v24 }
0x1cf5   : > { %v11271_v2 = vpop.eup %11270 }
0x1cf6   : > { %v7637_v6 = vadd.f32 1.0, %v11271_v2  ;;  %11276 = vrcp.f32 %v7638_v50 }
0x1cf8   : > { %11278 = vrcp.f32 %v7637_v6 }
0x1cff   : > { %v11273_v1 = vpop.eup %11272 }
0x1d00   : > { %v7644_v60 = vmul.f32 %v11273_v1, %v7612_v62 }
0x1d01   : > { %v11275_v56 = vpop.eup %11274 }
0x1d02   : > { %v7646_v22 = vadd.f32 %v7644_v60, %v7517_v41  ;;  %v7643_v20 = vmul.f32 %v11275_v56, %v7607_v47 }
0x1d03   : > { %v11277_v28 = vpop.eup %11276 }
0x1d04   : > { %11280 = vtanh.f32 %v7646_v22  ;;  %v7645_v18 = vadd.f32 %v7643_v20, %v7512_v51  ;;  %v7650_v10 = vsub.f32 1.0, %v11277_v28  ;;  %v7654_v48 = vmul.f32 %v11277_v28, %v13767_v61  ;;  %v14014_v20 = vld [vmem:[#allocation6_spill] sm:$0xff] }
0x1d05   : > { %v11279_v11 = vpop.eup %11278 }
0x1d06   : > { %11282 = vtanh.f32 %v7645_v18  ;;  %v7649_v8 = vsub.f32 1.0, %v11279_v11  ;;  %v7653_v29 = vmul.f32 %v11279_v11, %v13771_v3  ;;  %v7729_v3 = vadd.f32 %v13625_v27, %v13534_v54 }
0x1d07   : > { %v7749_v18 = vadd.f32 %v14014_v20, %v13580_v31 }
0x1d11   : > { %v11281_v45 = vpop.eup %11280 }
0x1d12   : > { %v7652_v13 = vmul.f32 %v11281_v45, %v7650_v10  ;;  %v14015_v45 = vld [vmem:[#allocation7_spill] sm:$0xff] }
0x1d13   : > { %v11283_v43 = vpop.eup %11282 }
0x1d14   : > { %v13837_v17 = vadd.f32 %v7654_v48, %v7652_v13  ;;  %v7651_v52 = vmul.f32 %v11283_v43, %v7649_v8  ;;  %v7744_v13 = vadd.f32 %v14015_v45, %v13593_v35 }
0x1d16   : > { %10575 = vmatprep.subr.mxu0 %v13837_v17  ;;  %v13841_v57 = vadd.f32 %v7653_v29, %v7651_v52 }
0x1d17   : > { %10576 = vmatpush3.msra.mxu0 %v13837_v17 }
0x1d18   : > { %10577 = vmatprep.subr.mxu0 %v13841_v57 }
0x1d19   : > { %10578 = vmatpush3.msra.mxu0 %v13841_v57 }
0x1d1a   : > { %10580 = vmatmul.mubr.msk.f32.vlgmr.msra.gmra.mxu0 %vm508_vm0, %v13779_v44 }
0x1d1b   : > { %10582 = vmatprep.mubr.msk.f32.mxu0 %vm508_vm0, %v13786_v16 }
0x1d1e   : > { %10583 = vmatmul.mubr.msk.f32.gmra.mxu0 %vm508_vm0, %v13793_v25 }
0x1d1f   : > { %10585 = vmatprep.mubr.msk.f32.mxu0 %vm508_vm0, %v13800_v58 }
0x1d22   : > { %10586 = vmatmul.mubr.msk.f32.gmra.mxu0 %vm508_vm0, %v13807_v21 }
0x1d23   : > { %10609 = vmatprep.mubr.msk.f32.mxu0 %vm508_vm0, %v13814_v38 }
0x1dda   : > { %v10581_v61 = vpop.f32.mrf.mxu0 }
0x1ddb   : > { %v7824_v7 = vadd.f32 %v10581_v61, %v13536_v15 }
0x1ddc   : > { %v7818_v39 = vpop.f32.mrf.mxu0 }
0x1ddd   : > { %v7848_v53 = vadd.f32 %v7824_v7, %v7729_v3  ;;  %v7819_v23 = vadd.f32 %v7818_v39, %v13540_v42 }
0x1dde   : > { %v10584_v4 = vpop.f32.mrf.mxu0 }
0x1ddf   : > { %v9128_v59 = vmul.f32 -1.442695, %v7848_v53  ;;  %v7847_v0 = vadd.f32 %v7819_v23, %v7724_v30  ;;  %v7834_v26 = vadd.f32 %v10584_v4, %v13544_v37 }
0x1de0   : > { %v7828_v63 = vpop.f32.mrf.mxu0 }
0x1de1   : > { %11284 = vpow2.f32 %v9128_v59  ;;  %v9127_v27 = vmul.f32 -1.442695, %v7847_v0  ;;  %v7829_v36 = vadd.f32 %v7828_v63, %v13555_v49  ;;  %v7862_v19 = vadd.f32 %v7834_v26, %v7739_v33 }
0x1de2   : > { %v10587_v41 = vpop.f32.mrf.mxu0 }
0x1de3   : > { %11286 = vpow2.f32 %v9127_v27  ;;  %v7861_v55 = vadd.f32 %v7829_v36, %v7734_v9  ;;  %v9130_v2 = vmul.f32 -1.442695, %v7862_v19  ;;  %v7844_v32 = vadd.f32 %v10587_v41, %v13576_v12  ;;  %v14017_v27 = vld [vmem:[#allocation9_spill] sm:$0xff] }
0x1de4   : > { %v7838_v56 = vpop.f32.mrf.mxu0  ;;  %v7956_v36 = vadd.f32 %v14017_v27, %v13538_v5 }
0x1de5   : > { %v9129_v50 = vmul.f32 -1.442695, %v7861_v55  ;;  %11288 = vpow2.f32 %v9130_v2  ;;  %v7839_v11 = vadd.f32 %v7838_v56, %v13587_v40 }
0x1de7   : > { %11290 = vpow2.f32 %v9129_v50 }
0x1dee   : > { %v11285_v14 = vpop.eup %11284 }
0x1def   : > { %v7856_v6 = vadd.f32 1.0, %v11285_v14 }
0x1df0   : > { %v11287_v62 = vpop.eup %11286 }
0x1df1   : > { %11292 = vrcp.f32 %v7856_v6  ;;  %v7855_v1 = vadd.f32 1.0, %v11287_v62 }
0x1df2   : > { %v11289_v34 = vpop.eup %11288 }
0x1df3   : > { %11294 = vrcp.f32 %v7855_v1  ;;  %v7870_v47 = vadd.f32 1.0, %v11289_v34  ;;  %v14019_v1 = vld [vmem:[#allocation11_spill] sm:$0xff] }
0x1df4   : > { %v11291_v60 = vpop.eup %11290  ;;  %v7966_v34 = vadd.f32 %v14019_v1, %v13550_v24 }
0x1df5   : > { %v7869_v51 = vadd.f32 1.0, %v11291_v60  ;;  %11296 = vrcp.f32 %v7870_v47 }
0x1df7   : > { %11298 = vrcp.f32 %v7869_v51 }
0x1dfe   : > { %v11293_v22 = vpop.eup %11292 }
0x1dff   : > { %v7876_v28 = vmul.f32 %v11293_v22, %v7844_v32 }
0x1e00   : > { %v11295_v10 = vpop.eup %11294 }
0x1e01   : > { %v7878_v48 = vadd.f32 %v7876_v28, %v7749_v18  ;;  %v7875_v8 = vmul.f32 %v11295_v10, %v7839_v11 }
0x1e02   : > { %v11297_v52 = vpop.eup %11296 }
0x1e03   : > { %11300 = vtanh.f32 %v7878_v48  ;;  %v7877_v43 = vadd.f32 %v7875_v8, %v7744_v13  ;;  %v7882_v61 = vsub.f32 1.0, %v11297_v52  ;;  %v7886_v39 = vmul.f32 %v11297_v52, %v13837_v17  ;;  %v14020_v48 = vld [vmem:[#allocation12_spill] sm:$0xff] }
0x1e04   : > { %v11299_v29 = vpop.eup %11298  ;;  %v7981_v8 = vadd.f32 %v14020_v48, %v13580_v31 }
0x1e05   : > { %11302 = vtanh.f32 %v7877_v43  ;;  %v7881_v30 = vsub.f32 1.0, %v11299_v29  ;;  %v7885_v59 = vmul.f32 %v11299_v29, %v13841_v57  ;;  %v14016_v57 = vld [vmem:[#allocation8_spill] sm:$0xff] }
0x1e06   : > { %v7961_v26 = vadd.f32 %v14016_v57, %v13534_v54 }
0x1e10   : > { %v11301_v3 = vpop.eup %11300 }
0x1e11   : > { %v7884_v7 = vmul.f32 %v11301_v3, %v7882_v61  ;;  %v14021_v61 = vld [vmem:[#allocation13_spill] sm:$0xff] }
0x1e12   : > { %v11303_v53 = vpop.eup %11302  ;;  %v7976_v3 = vadd.f32 %v14021_v61, %v13593_v35 }
0x1e13   : > { %v13877_v23 = vadd.f32 %v7886_v39, %v7884_v7  ;;  %v7883_v4 = vmul.f32 %v11303_v53, %v7881_v30 }
0x1e15   : > { %10605 = vmatprep.subr.mxu0 %v13877_v23  ;;  %v13881_v0 = vadd.f32 %v7885_v59, %v7883_v4 }
0x1e16   : > { %10606 = vmatpush3.msra.mxu0 %v13877_v23 }
0x1e17   : > { %10607 = vmatprep.subr.mxu0 %v13881_v0 }
0x1e18   : > { %10608 = vmatpush3.msra.mxu0 %v13881_v0 }
0x1e19   : > { %10610 = vmatmul.mubr.msk.f32.vlgmr.msra.gmra.mxu0 %vm508_vm0, %v13779_v44 }
0x1e1a   : > { %10612 = vmatprep.mubr.msk.f32.mxu0 %vm508_vm0, %v13786_v16 }
0x1e1d   : > { %10613 = vmatmul.mubr.msk.f32.gmra.mxu0 %vm508_vm0, %v13793_v25 }
0x1e1e   : > { %10615 = vmatprep.mubr.msk.f32.mxu0 %vm508_vm0, %v13800_v58 }
0x1e21   : > { %10616 = vmatmul.mubr.msk.f32.gmra.mxu0 %vm508_vm0, %v13807_v21 }
0x1e22   : > { %10639 = vmatprep.mubr.msk.f32.mxu0 %vm508_vm0, %v13814_v38  ;;  %v14018_v38 = vld [vmem:[#allocation10_spill] sm:$0xff] }
0x1e23   : > { %v7971_v62 = vadd.f32 %v14018_v38, %v13542_v46 }
0x1ed9   : > { %v10611_v17 = vpop.f32.mrf.mxu0 }
0x1eda   : > { %v8056_v63 = vadd.f32 %v10611_v17, %v13536_v15 }
0x1edb   : > { %v8050_v33 = vpop.f32.mrf.mxu0 }
0x1edc   : > { %v8080_v9 = vadd.f32 %v8056_v63, %v7961_v26  ;;  %v8051_v19 = vadd.f32 %v8050_v33, %v13540_v42 }
0x1edd   : > { %v10614_v55 = vpop.f32.mrf.mxu0 }
0x1ede   : > { %v9144_v2 = vmul.f32 -1.442695, %v8080_v9  ;;  %v8079_v50 = vadd.f32 %v8051_v19, %v7956_v36  ;;  %v8066_v14 = vadd.f32 %v10614_v55, %v13544_v37  ;;  %v14022_v9 = vmov 0.0  }
0x1edf   : > { %v8060_v6 = vpop.f32.mrf.mxu0  ;;  %10652 = vmatprep.mubr.msk.f32.mxu1 %vm11422_vm2, %v14022_v9 }
0x1ee0   : > { %11304 = vpow2.f32 %v9144_v2  ;;  %v9143_v54 = vmul.f32 -1.442695, %v8079_v50  ;;  %v8061_v15 = vadd.f32 %v8060_v6, %v13555_v49  ;;  %v8094_v41 = vadd.f32 %v8066_v14, %v7971_v62 }
0x1ee1   : > { %v10617_v20 = vpop.f32.mrf.mxu0 }
0x1ee2   : > { %11306 = vpow2.f32 %v9143_v54  ;;  %v8093_v60 = vadd.f32 %v8061_v15, %v7966_v34  ;;  %v9146_v47 = vmul.f32 -1.442695, %v8094_v41  ;;  %v8076_v45 = vadd.f32 %v10617_v20, %v13576_v12  ;;  %v8205_v34 = vpop.f32.mrf.mxu1  ;;  %v8326_v20 = vld [vmem:[%s13995_s6] sm:$0xff] }
0x1ee3   : > { %v8070_v11 = vpop.f32.mrf.mxu0 }
0x1ee4   : > { %v9145_v56 = vmul.f32 -1.442695, %v8093_v60  ;;  %11308 = vpow2.f32 %v9146_v47  ;;  %v8071_v52 = vadd.f32 %v8070_v11, %v13587_v40 }
0x1ee6   : > { %11310 = vpow2.f32 %v9145_v56 }
0x1eed   : > { %v11305_v51 = vpop.eup %11304 }
0x1eee   : > { %v8088_v37 = vadd.f32 1.0, %v11305_v51 }
0x1eef   : > { %v11307_v32 = vpop.eup %11306 }
0x1ef0   : > { %11312 = vrcp.f32 %v8088_v37  ;;  %v8087_v22 = vadd.f32 1.0, %v11307_v32 }
0x1ef1   : > { %v11309_v46 = vpop.eup %11308 }
0x1ef2   : > { %11314 = vrcp.f32 %v8087_v22  ;;  %v8102_v28 = vadd.f32 1.0, %v11309_v46 }
0x1ef3   : > { %v11311_v18 = vpop.eup %11310 }
0x1ef4   : > { %v8101_v10 = vadd.f32 1.0, %v11311_v18  ;;  %11316 = vrcp.f32 %v8102_v28 }
0x1ef6   : > { %11318 = vrcp.f32 %v8101_v10  ;;  %v8409_v10 = vld [vmem:[%s13997_s8] sm:$0xff] }
0x1efd   : > { %v11313_v13 = vpop.eup %11312 }
0x1efe   : > { %v8108_v43 = vmul.f32 %v11313_v13, %v8076_v45  ;;  %v8414_v13 = vpop.permute.xlu1 %8413 }
0x1eff   : > { %v11315_v29 = vpop.eup %11314 }
0x1f00   : > { %v8110_v7 = vadd.f32 %v8108_v43, %v7981_v8  ;;  %v8107_v39 = vmul.f32 %v11315_v29, %v8071_v52 }
0x1f01   : > { %v11317_v53 = vpop.eup %11316 }
0x1f02   : > { %11320 = vtanh.f32 %v8110_v7  ;;  %v8109_v30 = vadd.f32 %v8107_v39, %v7976_v3  ;;  %v8114_v4 = vsub.f32 1.0, %v11317_v53  ;;  %v8118_v31 = vmul.f32 %v11317_v53, %v13877_v23 }
0x1f03   : > { %v11319_v12 = vpop.eup %11318 }
0x1f04   : > { %11322 = vtanh.f32 %v8109_v30  ;;  %v8113_v57 = vsub.f32 1.0, %v11319_v12  ;;  %v8117_v27 = vmul.f32 %v11319_v12, %v13881_v0  ;;  %v14023_v0 = vld [vmem:[#allocation14_spill] sm:$0xff] }
0x1f05   : > { %v8188_v19 = vadd.f32 %v14023_v0, %v13538_v5 }
0x1f0f   : > { %v11321_v59 = vpop.eup %11320 }
0x1f10   : > { %v8116_v17 = vmul.f32 %v11321_v59, %v8114_v4 }
0x1f11   : > { %v11323_v26 = vpop.eup %11322 }
0x1f12   : > { %v8120_v63 = vadd.f32 %v8118_v31, %v8116_v17  ;;  %v8115_v33 = vmul.f32 %v11323_v26, %v8113_v57 }
0x1f14   : > { %10635 = vmatprep.subr.mxu0 %v8120_v63  ;;  %v8119_v36 = vadd.f32 %v8117_v27, %v8115_v33 }
0x1f15   : > { %10636 = vmatpush3.msra.mxu0 %v8120_v63 }
0x1f16   : > { %10637 = vmatprep.subr.mxu0 %v8119_v36 }
0x1f17   : > { %10638 = vmatpush3.msra.mxu0 %v8119_v36 }
0x1f18   : > { %10640 = vmatmul.mubr.msk.f32.vlgmr.msra.gmra.mxu0 %vm508_vm0, %v13779_v44  ;;  %10655 = vmatprep.subr.mxu0 %v14022_v9 }
0x1f19   : > { %10642 = vmatprep.mubr.msk.f32.mxu0 %vm508_vm0, %v13786_v16 }
0x1f1c   : > { %10643 = vmatmul.mubr.msk.f32.gmra.mxu0 %vm508_vm0, %v13793_v25 }
0x1f1d   : > { %10645 = vmatprep.mubr.msk.f32.mxu0 %vm508_vm0, %v13800_v58 }
0x1f20   : > { %10646 = vmatmul.mubr.msk.f32.gmra.mxu0 %vm508_vm0, %v13807_v21  ;;  %v14024_v21 = vld [vmem:[#allocation15_spill] sm:$0xff] }
0x1f21   : > { %10657 = vmatprep.mubr.msk.f32.mxu0 %vm11422_vm2, %v14022_v9  ;;  %v8197_v6 = vadd.f32 %v14024_v21, %v13550_v24 }
0x1fd8   : > { %v10641_v44 = vpop.f32.mrf.mxu0 }
0x1fda   : > { %v8279_v23 = vpop.f32.mrf.mxu0 }
0x1fdb   : > { %v8280_v16 = vadd.f32 %v8279_v23, %v13540_v42 }
0x1fdc   : > { %v10644_v55 = vpop.f32.mrf.mxu0 }
0x1fdd   : > { %v8305_v25 = vadd.f32 %v8280_v16, %v8188_v19 }
0x1fde   : > { %v8288_v2 = vpop.f32.mrf.mxu0 }
0x1fdf   : > { %v9159_v50 = vmul.f32 -1.442695, %v8305_v25  ;;  %v8289_v58 = vadd.f32 %v8288_v2, %v13555_v49  ;;  %v8206_v49 = vadd.f32 %v8205_v34, %v13593_v35 }
0x1fe0   : > { %v10647_v14 = vpop.f32.mrf.mxu0 }
0x1fe1   : > { %11324 = vpow2.f32 %v9159_v50  ;;  %v8312_v38 = vadd.f32 %v8289_v58, %v8197_v6 }
0x1fe2   : > { %v8297_v1 = vpop.f32.mrf.mxu0 }
0x1fe3   : > { %v9160_v62 = vmul.f32 -1.442695, %v8312_v38  ;;  %v8298_v41 = vadd.f32 %v8297_v1, %v13587_v40  ;;  %v8331_v40 = vpop.permute.xlu0 %8330 }
0x1fe5   : > { %11326 = vpow2.f32 %v9160_v62 }
0x1fee   : > { %v11325_v54 = vpop.eup %11324 }
0x1fef   : > { %v8309_v15 = vadd.f32 1.0, %v11325_v54 }
0x1ff1   : > { %11328 = vrcp.f32 %v8309_v15 }
0x1ff2   : > { %v11327_v5 = vpop.eup %11326 }
0x1ff3   : > { %v8316_v42 = vadd.f32 1.0, %v11327_v5 }
0x1ff5   : > { %11330 = vrcp.f32 %v8316_v42 }
0x1ffe   : > { %v11329_v60 = vpop.eup %11328 }
0x1fff   : > { %v8319_v47 = vmul.f32 %v11329_v60, %v8298_v41 }
0x2001   : > { %v8320_v56 = vadd.f32 %v8319_v47, %v8206_v49 }
0x2002   : > { %v11331_v24 = vpop.eup %11330 }
0x2003   : > { %11332 = vtanh.f32 %v8320_v56  ;;  %v8322_v51 = vsub.f32 1.0, %v11331_v24  ;;  %v8324_v22 = vmul.f32 %v11331_v24, %v8119_v36 }
0x2010   : > { %v11333_v37 = vpop.eup %11332 }
0x2011   : > { %v8323_v32 = vmul.f32 %v11333_v37, %v8322_v51 }
0x2013   : > { %v8325_v46 = vadd.f32 %v8324_v22, %v8323_v32 }
0x2015   : > { %10651 = vmatpush3.msra.mxu1 %v8325_v46 }
0x2016   : > { %10653 = vmatmul.mubr.msk.f32.vlgmr.msra.gmra.mxu1 %vm508_vm0, %v8326_v20 }
0x20d6   : > { %v8402_v35 = vpop.f32.mrf.mxu1 }
0x20d7   : > { %v8403_v18 = vadd.f32 %v8402_v35, %v8331_v40 }
0x20d8   : > { %v10654_v28 = vpop.f32.mrf.mxu1 }
0x20d9   : > { %vm8406_vm3 = vcmp.ge.f32.partialorder %v8403_v18, 0.0  ;;  %v8407_v11 = vmul.f32 0.2, %v8403_v18 }
0x20db   : > { %v8408_v45 = vsel %vm8406_vm3, %v8403_v18, %v8407_v11 }
0x20dc   : > { %10656 = vmatpush3.msra.mxu0 %v8408_v45 }
0x20dd   : > { %10658 = vmatmul.mubr.msk.f32.vlgmr.msra.gmra.mxu0 %vm8416_vm4, %v8409_v10 }
0x219d   : > { %v8486_v48 = vpop.f32.mrf.mxu0 }
0x219e   : > { %v8487_v8 = vadd.f32 %v8486_v48, %v8414_v13 }
0x219f   : > { %v10659_v43 = vpop.f32.mrf.mxu0 }
0x21a0   : > { %8490 = vst [vmem:[%s420_s27] sm:$0xff] %v8487_v8 }
0x21a1   : > { %11371 = shalt.err (!%p11368_p5)
}
0x21a2   : > { %s11372_s26 = scalar_lea.hbm %s13952_s12, 128  ;;  %s11376_s30 = scalar_lea.hbm %s13999_s10, 256 }
0x21a3   : > { %p11373_p7 = scmp.ne.s32.totalorder %s13952_s12, %s11372_s26  ;;  %p11377_p12 = scmp.lt.s32.totalorder %s13952_s12, %s13999_s10 }
0x21a4   : > { %p11378_p13 = scmp.lt.s32.totalorder %s11376_s30, %s11372_s26 }
0x21a5   : > { %p11374_p10 = pnand %p11373_p7, %p11517_p6 }
0x21a6   : > { %p11379_p0 = por %p11378_p13, %p11377_p12 }
0x21a7   : > { %p11375_p11 = pneg %p11374_p10 }
0x21a9   : > { %p11380_p1 = pnand %p11379_p0, %p11375_p11 }
0x21ab   : > { %11383 = shalt.err (!%p11380_p1)
}
0x21ac   : > { %10660 = dma.vmem_to_hbm [thread:$0]  (%p11517_p6), %s8506_s28, 128, %s13952_s12, %s8492_s18  }
0x21ad PF: > { %s8517_s20 = sand.u32 1, %s11406_s13   ;;  %p10663_p2 = pnand %p8572_p9, %p11521_p8 }
0x21ae   : > { %s8518_s25 = scalar_lea.sflag [#allocation4], %s8517_s20 }
0x21af   : > { %p10664_p3 = pneg %p10663_p2 }
0x21b1   : > { %11401 = dma.done.wait (%p10664_p3), %s8518_s25, 128  }
0x21b2   : > { %11403 = vsyncadd (%p10664_p3), %s8518_s25, 4294967168  ;;  %p20_p4 = scmp.ge.s32.totalorder %s11502_s19, 4   ;;  %s14025_s13 = smov %s11410_s14 }
0x21b3   : > { %s14026_s14 = smov %s11414_s15  ;;  %s14027_s15 = smov %s11515_s22 }
0x21b4   : > { %s14028_s16 = smov %s11502_s19  ;;  %22 = sbr.rel (!%p20_p4) target bundleno = 3 (0x3), region = 156 }
0x21b9   :  { %8523 = vsyncpa [#allocation4], 1 }
0x21ba   :  { %8525 = vsyncpa [#allocation4 + $0x1], 1 }

</bundles_post_ra>
